<compile_context>
chip_gen: v7x
topology: tpu7x:2x2x1
jax: 0.10.0
libtpu: 0.0.40
codegen_flags: <defaults>
</compile_context>

<pallas_src>
import math

import jax
import jax.numpy as jnp
from jax.experimental import pallas as pl
from jax.experimental.pallas import tpu as pltpu


# ----------------------------- small helpers -------------------------------
def _round_up(x, m):
    return ((x + m - 1) // m) * m


def _pick_time_chunk(S, target=128):
    """Largest divisor of S that is a multiple of 8 and <= target, else S."""
    if S <= target:
        return S
    for t in range(target, 7, -1):
        if S % t == 0 and t % 8 == 0:
            return t
    # TODO(synk): pad S (with masking) for prime / ragged sequence lengths.
    return S


def _fuse_pad_gates(blocks, pitch):
    """Fuse 3 gate matrices (..., H) into (..., 3*pitch) with each gate in
    its own 128-lane-aligned slab; padding lanes are zero."""
    H = blocks[0].shape[-1]
    out = jnp.zeros(blocks[0].shape[:-1] + (3 * pitch,), jnp.float32)
    for g, blk in enumerate(blocks):
        out = out.at[..., g * pitch:g * pitch + H].set(blk)
    return out


def _pad_rows(w, rows):
    pad = rows - w.shape[-2]
    if pad == 0:
        return w
    cfg = [(0, 0)] * (w.ndim - 2) + [(0, pad), (0, 0)]
    return jnp.pad(w, cfg)


# ---------------------------------------------------------------------------
# Embedding GRU: chunked over time, fori_loop recurrence, padded fused gates
# ---------------------------------------------------------------------------
def _gru_embed_kernel(x_ref, m_ref, h0_ref, wih_ref, whh_ref, bih_ref, bhh_ref,
                      out_ref, h_state, gi_scr, out_scr):
    # x_ref   : (B, T, Din)   wih_ref: (Din, 3*GP)  whh_ref: (GP, 3*GP)
    # h0_ref  : (1, GP)       biases : (1, 3*GP)    out_ref: (B, T, H)
    # h_state : VMEM (B, GP)  hidden carry across sequential grid steps
    # gi_scr  : VMEM (B, T, 3*GP)   out_scr: VMEM (B, T, GP)
    B, T, Din = x_ref.shape
    GP = h_state.shape[-1]
    H = out_ref.shape[-1]

    @pl.when(pl.program_id(0) == 0)
    def _():
        h_state[...] = jnp.broadcast_to(h0_ref[...], (B, GP))

    # Hoisted input projection: ONE matmul per chunk.
    gi2 = jnp.dot(x_ref[...].reshape(B * T, Din), wih_ref[...],
                  preferred_element_type=jnp.float32) + bih_ref[...]
    gi_scr[...] = gi2.reshape(B, T, 3 * GP)

    whh = whh_ref[...]          # hoisted out of the timestep loop
    bhh = bhh_ref[...]

    def step(tt, h_prev):
        gi_t = gi_scr[:, pl.ds(tt, 1), :].reshape(B, 3 * GP)
        gh = jnp.dot(h_prev, whh, preferred_element_type=jnp.float32) + bhh
        r = jax.nn.sigmoid(gi_t[:, :GP] + gh[:, :GP])
        z = jax.nn.sigmoid(gi_t[:, GP:2 * GP] + gh[:, GP:2 * GP])
        n = jnp.tanh(gi_t[:, 2 * GP:] + r * gh[:, 2 * GP:])
        h_new = (1.0 - z) * n + z * h_prev
        out_scr[:, pl.ds(tt, 1), :] = h_new.reshape(B, 1, GP)
        return h_new

    h_last = jax.lax.fori_loop(0, T, step, h_state[...], unroll=(T <= 32))
    h_state[...] = h_last

    # Recurrence itself is NOT masked (matches torch); output is.
    out_ref[...] = out_scr[:, :, :H] * m_ref[...]


def gru_embed_pallas(x, mask3, h0_p, wih_p, whh_p, bih_p, bhh_p, nh, t_blk):
    B, S, Din = x.shape
    GP = whh_p.shape[0]
    return pl.pallas_call(
        _gru_embed_kernel,
        out_shape=jax.ShapeDtypeStruct((B, S, nh), jnp.float32),
        grid=(S // t_blk,),
        in_specs=[
            pl.BlockSpec((B, t_blk, Din), lambda t: (0, t, 0)),
            pl.BlockSpec((B, t_blk, 1), lambda t: (0, t, 0)),
            pl.BlockSpec((1, GP), lambda t: (0, 0)),
            pl.BlockSpec((Din, 3 * GP), lambda t: (0, 0)),
            pl.BlockSpec((GP, 3 * GP), lambda t: (0, 0)),
            pl.BlockSpec((1, 3 * GP), lambda t: (0, 0)),
            pl.BlockSpec((1, 3 * GP), lambda t: (0, 0)),
        ],
        out_specs=pl.BlockSpec((B, t_blk, nh), lambda t: (0, t, 0)),
        scratch_shapes=[pltpu.VMEM((B, GP), jnp.float32),
                        pltpu.VMEM((B, t_blk, 3 * GP), jnp.float32),
                        pltpu.VMEM((B, t_blk, GP), jnp.float32)],
        # Recurrence carried in scratch -> time grid MUST stay sequential.
        compiler_params=pltpu.CompilerParams(
            dimension_semantics=("arbitrary",)),
    )(x, mask3, h0_p, wih_p, whh_p, bih_p, bhh_p)


# ---------------------------------------------------------------------------
# Fused CoupledAttention (both branches) + Prototyp update, one pallas_call
#   grid = (branch=2 "parallel", time "arbitrary")
# ---------------------------------------------------------------------------
def _att_proto_kernel(h_ref, m_ref, gu_ref, wih_ref, whh_ref, r0_ref, v_ref,
                      uT_ref, Vt_ref, r_ref, u_ref,
                      h_state, gi_scr, r_scr, m_run, l_run, n_run):
    # h_ref (B,T,nh)  gu_ref (B,2K,nh)  wih (2K,3*GPa)  whh (GPa,3*GPa)
    # r0 (1,GPa)  v (1,2K)  uT (B,nh)  Vt (nh,nh)
    # r_ref (B,T,2K)  u_ref (B,nh)  [branch axis squeezed by BlockSpec]
    t_idx = pl.program_id(1)
    B, T, nh = h_ref.shape
    GPa = h_state.shape[-1]
    K2 = r_ref.shape[-1]

    @pl.when(t_idx == 0)
    def _():
        h_state[...] = jnp.broadcast_to(r0_ref[...], (B, GPa))
        m_run[...] = jnp.full_like(m_run, -jnp.inf)
        l_run[...] = jnp.zeros_like(l_run)
        n_run[...] = jnp.zeros_like(n_run)

    h = h_ref[...]
    m3 = m_ref[...]
    gu = gu_ref[...]

    # beta[b,t,k] = tanh( sum_i h[b,t,i] * (G[k] u)[b,i] ) * mask   (MXU)
    f = jnp.einsum('btd,bkd->btk', h, gu,
                   preferred_element_type=jnp.float32)          # (B,T,2K)
    beta = jnp.tanh(f) * m3

    # Hoisted GRU input projection (bias=False): ONE matmul per chunk.
    gi2 = jnp.dot(beta.reshape(B * T, K2), wih_ref[...],
                  preferred_element_type=jnp.float32)           # (B*T,3*GPa)
    gi_scr[...] = gi2.reshape(B, T, 3 * GPa)

    whh = whh_ref[...]          # hoisted out of the timestep loop

    def step(tt, h_prev):
        gi_t = gi_scr[:, pl.ds(tt, 1), :].reshape(B, 3 * GPa)
        gh = jnp.dot(h_prev, whh, preferred_element_type=jnp.float32)
        rg = jax.nn.sigmoid(gi_t[:, :GPa] + gh[:, :GPa])
        zg = jax.nn.sigmoid(gi_t[:, GPa:2 * GPa] + gh[:, GPa:2 * GPa])
        ng = jnp.tanh(gi_t[:, 2 * GPa:] + rg * gh[:, 2 * GPa:])
        h_new = (1.0 - zg) * ng + zg * h_prev
        r_scr[:, pl.ds(tt, 1), :] = h_new.reshape(B, 1, GPa)
        return h_new

    h_last = jax.lax.fori_loop(0, T, step, h_state[...], unroll=(T <= 32))
    h_state[...] = h_last

    r_chunk = r_scr[:, :, :K2] * m3                             # (B,T,2K)
    r_ref[...] = r_chunk                                        # single store

    # --- online softmax over the sequence for the prototype update ---
    # (denominator includes padded positions, numerator masked — matches
    #  torch: softmax first, mask after)
    v = v_ref[...]                                              # (1,2K)
    e = jnp.sum(r_chunk * v[:, None, :], axis=-1)               # (B,T)
    c_max = jnp.max(e, axis=-1, keepdims=True)                  # (B,1)
    new_max = jnp.maximum(m_run[...], c_max)
    alpha = jnp.exp(m_run[...] - new_max)
    p = jnp.exp(e - new_max)                                    # (B,T)
    l_run[...] = alpha * l_run[...] + jnp.sum(p, axis=-1, keepdims=True)
    hm = h * m3                                                 # masked h
    num = jnp.einsum('bst,btd->bsd', p[:, None, :], hm,
                     preferred_element_type=jnp.float32)        # (B,1,nh) MXU
    n_run[...] = alpha * n_run[...] + num[:, 0, :]
    m_run[...] = new_max

    @pl.when(t_idx == pl.num_programs(1) - 1)
    def _():
        pooled = n_run[...] / l_run[...]
        u_ref[...] = jnp.tanh(
            jnp.dot(uT_ref[...], Vt_ref[...],
                    preferred_element_type=jnp.float32)) + pooled


def coupled_attention_proto_pallas(h, mask3, gu, att, uT, Vt, t_blk):
    B, S, nh = h.shape
    K2 = gu.shape[2]
    GPa = att['whh'].shape[1]
    return pl.pallas_call(
        _att_proto_kernel,
        out_shape=(jax.ShapeDtypeStruct((2, B, S, K2), jnp.float32),
                   jax.ShapeDtypeStruct((2, B, nh), jnp.float32)),
        grid=(2, S // t_blk),
        in_specs=[
            pl.BlockSpec((B, t_blk, nh), lambda g, t: (0, t, 0)),
            pl.BlockSpec((B, t_blk, 1), lambda g, t: (0, t, 0)),
            pl.BlockSpec((None, B, K2, nh), lambda g, t: (g, 0, 0, 0)),
            pl.BlockSpec((None, K2, 3 * GPa), lambda g, t: (g, 0, 0)),
            pl.BlockSpec((None, GPa, 3 * GPa), lambda g, t: (g, 0, 0)),
            pl.BlockSpec((None, 1, GPa), lambda g, t: (g, 0, 0)),
            pl.BlockSpec((None, 1, K2), lambda g, t: (g, 0, 0)),
            pl.BlockSpec((None, B, nh), lambda g, t: (g, 0, 0)),
            pl.BlockSpec((nh, nh), lambda g, t: (0, 0)),
        ],
        out_specs=(pl.BlockSpec((None, B, t_blk, K2),
                                lambda g, t: (g, 0, t, 0)),
                   pl.BlockSpec((None, B, nh), lambda g, t: (g, 0, 0))),
        scratch_shapes=[
            pltpu.VMEM((B, GPa), jnp.float32),            # GRU hidden carry
            pltpu.VMEM((B, t_blk, 3 * GPa), jnp.float32),  # gi chunk
            pltpu.VMEM((B, t_blk, GPa), jnp.float32),      # per-step outputs
            pltpu.VMEM((B, 1), jnp.float32),               # running max
            pltpu.VMEM((B, 1), jnp.float32),               # running denom
            pltpu.VMEM((B, nh), jnp.float32),              # running numerator
        ],
        # branch axis parallel (2 TCs on v7x); time axis carries the
        # recurrence/accumulators -> sequential.
        compiler_params=pltpu.CompilerParams(
            dimension_semantics=("parallel", "arbitrary")),
    )(h, mask3, gu, att['wih'], att['whh'], att['r0'], att['v'], uT, Vt)


# ---------------------------------------------------------------------------
# Both classifiers in one kernel
# ---------------------------------------------------------------------------
def _cls_pair_kernel(xa_ref, xo_ref, wa_ref, wo_ref, ba_ref, bo_ref,
                     oa_ref, oo_ref):
    oa_ref[...] = jnp.dot(xa_ref[...], wa_ref[...],
                          preferred_element_type=jnp.float32) + ba_ref[...]
    oo_ref[...] = jnp.dot(xo_ref[...], wo_ref[...],
                          preferred_element_type=jnp.float32) + bo_ref[...]


def classifier_pair_pallas(xa, xo, wa, wo, ba, bo):
    M = xa.shape[0]
    nc = wa.shape[-1]
    return pl.pallas_call(
        _cls_pair_kernel,
        out_shape=(jax.ShapeDtypeStruct((M, nc), jnp.float32),
                   jax.ShapeDtypeStruct((M, nc), jnp.float32)),
    )(xa, xo, wa, wo, ba, bo)


# ----------------------------- parameters ---------------------------------
def init_params(key, cfg):
    nh, nc, vs, de, cs, K = (cfg['nh'], cfg['nc'], cfg['vs'], cfg['de'],
                             cfg['cs'], cfg['K'])
    K2 = 2 * K
    Din = cs * de
    GP = _round_up(nh, 128)     # embed-GRU gate pitch (lane aligned)
    GPa = _round_up(K2, 128)    # attention-GRU gate pitch
    keys = iter(jax.random.split(key, 64))

    def unif(shape, lo, hi):
        return jax.random.uniform(next(keys), shape, jnp.float32, lo, hi)

    emb = jax.random.normal(next(keys), (vs, de), jnp.float32)
    emb = emb.at[cfg['pad_id']].set(0.0)           # padding_idx row is zero

    kh = 1.0 / math.sqrt(nh)
    embedd_gru = dict(                              # fused [r | z | n], padded
        wih=_fuse_pad_gates([unif((Din, nh), -kh, kh) for _ in range(3)], GP),
        whh=_pad_rows(
            _fuse_pad_gates([unif((nh, nh), -kh, kh) for _ in range(3)], GP),
            GP),
        bih=_fuse_pad_gates([unif((1, nh), -kh, kh) for _ in range(3)], GP),
        bhh=_fuse_pad_gates([unif((1, nh), -kh, kh) for _ in range(3)], GP),
    )

    ka = 1.0 / math.sqrt(K2)
    att = dict(                                     # stacked [aspect, opinion]
        wih=jnp.stack([_fuse_pad_gates(
            [unif((K2, K2), -ka, ka) for _ in range(3)], GPa)
            for _ in range(2)]),
        whh=jnp.stack([_pad_rows(_fuse_pad_gates(
            [unif((K2, K2), -ka, ka) for _ in range(3)], GPa), GPa)
            for _ in range(2)]),
        r0=jnp.stack([jnp.pad(unif((1, K2), -0.2, 0.2),
                              ((0, 0), (0, GPa - K2))) for _ in range(2)]),
        v=jnp.stack([unif((1, K2), -0.2, 0.2) for _ in range(2)]),
        G_a=jnp.stack([unif((K, nh, nh), -0.2, 0.2) for _ in range(2)]),
        G_o=jnp.stack([unif((K, nh, nh), -0.2, 0.2) for _ in range(2)]),
    )

    kc = 1.0 / math.sqrt(K2)
    return dict(
        embedding=emb,
        embedd_gru=embedd_gru,
        embedd_h0_p=jnp.zeros((1, GP), jnp.float32),
        att=att,
        aspect_proto_V=unif((nh, nh), -0.2, 0.2),
        opinion_proto_V=unif((nh, nh), -0.2, 0.2),   # unused by torch forward
        aspect_u0=unif((nh, 1), -0.2, 0.2),
        opinion_u0=unif((nh, 1), -0.2, 0.2),
        aspect_cls_wT=unif((K2, nc), -kc, kc),
        aspect_cls_b=unif((1, nc), -kc, kc),
        opinion_cls_wT=unif((K2, nc), -kc, kc),
        opinion_cls_b=unif((1, nc), -kc, kc),
    )


# ------------------------------- forward -----------------------------------
def cmla_forward(params, cfg, input_ids, mask=None):
    nh, nc, de, cs, K, l, pad_id = (cfg['nh'], cfg['nc'], cfg['de'], cfg['cs'],
                                    cfg['K'], cfg['l'], cfg['pad_id'])
    K2 = 2 * K
    B, S = input_ids.shape
    if mask is None:
        mask = jnp.ones((B, S), jnp.float32)
    else:
        mask = mask.astype(jnp.float32)
    mask3 = mask[..., None]                                     # (B, S, 1)
    t_blk = _pick_time_chunk(S)

    # --- context-window assembly + embedding lookup (plain-JAX glue) ---
    p = cs // 2
    pad = jnp.full((B, p), pad_id, dtype=input_ids.dtype)
    x = jnp.concatenate([pad, input_ids, pad], axis=-1)
    x = jnp.stack([jnp.roll(x, i, axis=-1) for i in range(-p, p + 1)], axis=-1)
    x = x[:, p:-p, :]                                           # (B, S, cs)
    xe = params['embedding'][x].reshape(B, S, cs * de)          # (B, S, cs*de)

    # --- embedding GRU (chunked Pallas recurrence) ---
    g = params['embedd_gru']
    h = gru_embed_pallas(xe, mask3, params['embedd_h0_p'], g['wih'], g['whh'],
                         g['bih'], g['bhh'], nh, t_blk)         # (B, S, nh)
    # TODO(synk): dropout layers are identity here (eval-mode forward).

    att = params['att']
    # NOTE: torch source uses `self.aspect_proto` (aspect V) for BOTH updates.
    Vt = jnp.transpose(params['aspect_proto_V'])
    uT = jnp.stack([
        jnp.broadcast_to(params['aspect_u0'][:, 0][None, :], (B, nh)),
        jnp.broadcast_to(params['opinion_u0'][:, 0][None, :], (B, nh)),
    ], axis=0)                                                  # (2, B, nh)
    r_sum = jnp.zeros((2, B, S, K2), jnp.float32)

    for _ in range(l):
        # gu[g, b, k, :] = G_a[g, k] @ u_a[:, b]  (k < K)  /  G_o @ u_o  (k>=K)
        gua = jnp.einsum('bj,gkij->gbki', uT[0], att['G_a'])
        guo = jnp.einsum('bj,gkij->gbki', uT[1], att['G_o'])
        gu = jnp.concatenate([gua, guo], axis=2)                # (2, B, 2K, nh)

        r_l, uT = coupled_attention_proto_pallas(h, mask3, gu, att, uT, Vt,
                                                 t_blk)
        r_sum = r_sum + r_l

    aspect_logits, opinion_logits = classifier_pair_pallas(
        r_sum[0].reshape(B * S, K2), r_sum[1].reshape(B * S, K2),
        params['aspect_cls_wT'], params['opinion_cls_wT'],
        params['aspect_cls_b'], params['opinion_cls_b'])
    return (aspect_logits.reshape(B, S, nc),
            opinion_logits.reshape(B, S, nc))


if __name__ == "__main__":
    cfg = dict(nh=32, nc=4, vs=50, de=16, cs=3, K=8, l=2,
               dropout_rate=0.5, pad_id=0)
    B, S = 2, 8

    key = jax.random.PRNGKey(0)
    pkey, dkey = jax.random.split(key)
    params = init_params(pkey, cfg)
    input_ids = jax.random.randint(dkey, (B, S), 1, cfg['vs'], dtype=jnp.int32)

    fwd = jax.jit(lambda prm, ids: cmla_forward(prm, cfg, ids))
    aspect_logits, opinion_logits = fwd(params, input_ids)
    jax.block_until_ready((aspect_logits, opinion_logits))

    assert aspect_logits.shape == (B, S, cfg['nc'])
    assert opinion_logits.shape == (B, S, cfg['nc'])
    assert bool(jnp.all(jnp.isfinite(aspect_logits)))
    assert bool(jnp.all(jnp.isfinite(opinion_logits)))
    print("KERNEL_OK")
</pallas_src>

<mosaic_0001>
module attributes {stable_mosaic.version = 11 : i64} {
  func.func @_gru_embed_kernel(%arg0: i32, %arg1: memref<2x8x48xf32, #tpu.memory_space<vmem>>, %arg2: memref<2x8x1xf32, #tpu.memory_space<vmem>>, %arg3: memref<1x128xf32, #tpu.memory_space<vmem>>, %arg4: memref<48x384xf32, #tpu.memory_space<vmem>>, %arg5: memref<128x384xf32, #tpu.memory_space<vmem>>, %arg6: memref<1x384xf32, #tpu.memory_space<vmem>>, %arg7: memref<1x384xf32, #tpu.memory_space<vmem>>, %arg8: memref<2x8x32xf32, #tpu.memory_space<vmem>>, %arg9: memref<2x128xf32, #tpu.memory_space<vmem>>, %arg10: memref<2x8x384xf32, #tpu.memory_space<vmem>>, %arg11: memref<2x8x128xf32, #tpu.memory_space<vmem>>) attributes {dimension_semantics = [#tpu.dimension_semantics<arbitrary>], iteration_bounds = array<i64: 1>, scalar_prefetch = 0 : i64, scratch_operands = 3 : i64, tpu.core_type = #tpu.core_type<tc>, window_params = [{transform_indices = @transform_0, window_bounds = array<i64: 2, 8, 48>}, {transform_indices = @transform_1, window_bounds = array<i64: 2, 8, 1>}, {pipeline_mode = #tpu.pipeline_mode<synchronous>, transform_indices = @transform_2, window_bounds = array<i64: 1, 128>}, {pipeline_mode = #tpu.pipeline_mode<synchronous>, transform_indices = @transform_3, window_bounds = array<i64: 48, 384>}, {pipeline_mode = #tpu.pipeline_mode<synchronous>, transform_indices = @transform_4, window_bounds = array<i64: 128, 384>}, {pipeline_mode = #tpu.pipeline_mode<synchronous>, transform_indices = @transform_5, window_bounds = array<i64: 1, 384>}, {pipeline_mode = #tpu.pipeline_mode<synchronous>, transform_indices = @transform_6, window_bounds = array<i64: 1, 384>}, {transform_indices = @transform_7, window_bounds = array<i64: 2, 8, 32>}]} {
    %c0_i32 = arith.constant 0 : i32
    %0 = arith.cmpi eq, %arg0, %c0_i32 : i32
    %1 = arith.extui %0 : i1 to i32
    %c0_i32_0 = arith.constant 0 : i32
    %2 = arith.cmpi ne, %1, %c0_i32_0 : i32
    scf.if %2 {
      %c0_92 = arith.constant 0 : index
      %c0_93 = arith.constant 0 : index
      %301 = vector.load %arg3[%c0_92, %c0_93] : memref<1x128xf32, #tpu.memory_space<vmem>>, vector<1x128xf32>
      %302 = vector.shape_cast %301 : vector<1x128xf32> to vector<1x128xf32>
      %303 = vector.broadcast %302 : vector<1x128xf32> to vector<2x128xf32>
      %c0_94 = arith.constant 0 : index
      %c0_95 = arith.constant 0 : index
      %304 = vector.load %arg9[%c0_94, %c0_95] : memref<2x128xf32, #tpu.memory_space<vmem>>, vector<2x128xf32>
      tpu.vector_store %arg9[%c0_94, %c0_95], %303 {strides = array<i32>} : memref<2x128xf32, #tpu.memory_space<vmem>>, vector<2x128xf32>,
    } else {
    }
    %c0 = arith.constant 0 : index
    %c0_1 = arith.constant 0 : index
    %c0_2 = arith.constant 0 : index
    %3 = vector.load %arg1[%c0, %c0_1, %c0_2] : memref<2x8x48xf32, #tpu.memory_space<vmem>>, vector<2x8x48xf32>
    %4 = vector.shape_cast %3 : vector<2x8x48xf32> to vector<16x48xf32>
    %c0_3 = arith.constant 0 : index
    %c0_4 = arith.constant 0 : index
    %5 = vector.load %arg4[%c0_3, %c0_4] : memref<48x384xf32, #tpu.memory_space<vmem>>, vector<48x384xf32>
    %cst = arith.constant dense<0.000000e+00> : vector<16x384xf32>
    %6 = tpu.matmul %4, %5, %cst {dimension_numbers = #tpu.dot_dimension_numbers<[1], [0], [0], [1], [0, 0, 1, 1], [], []>} : vector<16x48xf32>, vector<48x384xf32>, vector<16x384xf32> -> vector<16x384xf32>
    %c0_5 = arith.constant 0 : index
    %c0_6 = arith.constant 0 : index
    %7 = vector.load %arg6[%c0_5, %c0_6] : memref<1x384xf32, #tpu.memory_space<vmem>>, vector<1x384xf32>
    %8 = vector.broadcast %7 : vector<1x384xf32> to vector<16x384xf32>
    %9 = arith.addf %6, %8 : vector<16x384xf32>
    %10 = vector.shape_cast %9 : vector<16x384xf32> to vector<2x8x384xf32>
    %c0_7 = arith.constant 0 : index
    %c0_8 = arith.constant 0 : index
    %c0_9 = arith.constant 0 : index
    %11 = vector.load %arg10[%c0_7, %c0_8, %c0_9] : memref<2x8x384xf32, #tpu.memory_space<vmem>>, vector<2x8x384xf32>
    tpu.vector_store %arg10[%c0_7, %c0_8, %c0_9], %10 {strides = array<i32>} : memref<2x8x384xf32, #tpu.memory_space<vmem>>, vector<2x8x384xf32>,
    %c0_10 = arith.constant 0 : index
    %c0_11 = arith.constant 0 : index
    %12 = vector.load %arg5[%c0_10, %c0_11] : memref<128x384xf32, #tpu.memory_space<vmem>>, vector<128x384xf32>
    %c0_12 = arith.constant 0 : index
    %c0_13 = arith.constant 0 : index
    %13 = vector.load %arg7[%c0_12, %c0_13] : memref<1x384xf32, #tpu.memory_space<vmem>>, vector<1x384xf32>
    %c0_14 = arith.constant 0 : index
    %c0_15 = arith.constant 0 : index
    %14 = vector.load %arg9[%c0_14, %c0_15] : memref<2x128xf32, #tpu.memory_space<vmem>>, vector<2x128xf32>
    %c0_i32_16 = arith.constant 0 : i32
    %c0_17 = arith.constant 0 : index
    %15 = arith.index_cast %c0_i32_16 : i32 to index
    %c0_18 = arith.constant 0 : index
    %16 = vector.load %arg10[%c0_17, %15, %c0_18] : memref<2x8x384xf32, #tpu.memory_space<vmem>>, vector<2x1x384xf32>
    %17 = vector.shape_cast %16 : vector<2x1x384xf32> to vector<2x384xf32>
    %cst_19 = arith.constant dense<0.000000e+00> : vector<2x384xf32>
    %18 = tpu.matmul %14, %12, %cst_19 {dimension_numbers = #tpu.dot_dimension_numbers<[1], [0], [0], [1], [0, 0, 1, 1], [], []>} : vector<2x128xf32>, vector<128x384xf32>, vector<2x384xf32> -> vector<2x384xf32>
    %19 = vector.broadcast %13 : vector<1x384xf32> to vector<2x384xf32>
    %20 = arith.addf %18, %19 : vector<2x384xf32>
    %21 = vector.extract_strided_slice %17 {offsets = [0, 0], sizes = [2, 128], strides = [1, 1]} : vector<2x384xf32> to vector<2x128xf32>
    %22 = vector.extract_strided_slice %20 {offsets = [0, 0], sizes = [2, 128], strides = [1, 1]} : vector<2x384xf32> to vector<2x128xf32>
    %23 = arith.addf %21, %22 : vector<2x128xf32>
    %24 = arith.negf %23 : vector<2x128xf32>
    %25 = math.exp %24 : vector<2x128xf32>
    %cst_20 = arith.constant 1.000000e+00 : f32
    %26 = vector.broadcast %cst_20 : f32 to vector<2x128xf32>
    %27 = arith.addf %26, %25 : vector<2x128xf32>
    %28 = arith.divf %26, %27 : vector<2x128xf32>
    %29 = vector.extract_strided_slice %17 {offsets = [0, 128], sizes = [2, 128], strides = [1, 1]} : vector<2x384xf32> to vector<2x128xf32>
    %30 = vector.extract_strided_slice %20 {offsets = [0, 128], sizes = [2, 128], strides = [1, 1]} : vector<2x384xf32> to vector<2x128xf32>
    %31 = arith.addf %29, %30 : vector<2x128xf32>
    %32 = arith.negf %31 : vector<2x128xf32>
    %33 = math.exp %32 : vector<2x128xf32>
    %cst_21 = arith.constant 1.000000e+00 : f32
    %34 = vector.broadcast %cst_21 : f32 to vector<2x128xf32>
    %35 = arith.addf %34, %33 : vector<2x128xf32>
    %36 = arith.divf %34, %35 : vector<2x128xf32>
    %37 = vector.extract_strided_slice %17 {offsets = [0, 256], sizes = [2, 128], strides = [1, 1]} : vector<2x384xf32> to vector<2x128xf32>
    %38 = vector.extract_strided_slice %20 {offsets = [0, 256], sizes = [2, 128], strides = [1, 1]} : vector<2x384xf32> to vector<2x128xf32>
    %39 = arith.mulf %28, %38 : vector<2x128xf32>
    %40 = arith.addf %37, %39 : vector<2x128xf32>
    %41 = math.tanh %40 : vector<2x128xf32>
    %cst_22 = arith.constant 1.000000e+00 : f32
    %42 = vector.broadcast %cst_22 : f32 to vector<2x128xf32>
    %43 = arith.subf %42, %36 : vector<2x128xf32>
    %44 = arith.mulf %43, %41 : vector<2x128xf32>
    %45 = arith.mulf %36, %14 : vector<2x128xf32>
    %46 = arith.addf %44, %45 : vector<2x128xf32>
    %47 = vector.shape_cast %46 : vector<2x128xf32> to vector<2x1x128xf32>
    %c0_23 = arith.constant 0 : index
    %48 = arith.index_cast %c0_i32_16 : i32 to index
    %c0_24 = arith.constant 0 : index
    %49 = vector.load %arg11[%c0_23, %48, %c0_24] : memref<2x8x128xf32, #tpu.memory_space<vmem>>, vector<2x1x128xf32>
    tpu.vector_store %arg11[%c0_23, %48, %c0_24], %47 {strides = array<i32>} : memref<2x8x128xf32, #tpu.memory_space<vmem>>, vector<2x1x128xf32>,
    %c1_i32 = arith.constant 1 : i32
    %c0_25 = arith.constant 0 : index
    %50 = arith.index_cast %c1_i32 : i32 to index
    %c0_26 = arith.constant 0 : index
    %51 = vector.load %arg10[%c0_25, %50, %c0_26] : memref<2x8x384xf32, #tpu.memory_space<vmem>>, vector<2x1x384xf32>
    %52 = vector.shape_cast %51 : vector<2x1x384xf32> to vector<2x384xf32>
    %cst_27 = arith.constant dense<0.000000e+00> : vector<2x384xf32>
    %53 = tpu.matmul %46, %12, %cst_27 {dimension_numbers = #tpu.dot_dimension_numbers<[1], [0], [0], [1], [0, 0, 1, 1], [], []>} : vector<2x128xf32>, vector<128x384xf32>, vector<2x384xf32> -> vector<2x384xf32>
    %54 = vector.broadcast %13 : vector<1x384xf32> to vector<2x384xf32>
    %55 = arith.addf %53, %54 : vector<2x384xf32>
    %56 = vector.extract_strided_slice %52 {offsets = [0, 0], sizes = [2, 128], strides = [1, 1]} : vector<2x384xf32> to vector<2x128xf32>
    %57 = vector.extract_strided_slice %55 {offsets = [0, 0], sizes = [2, 128], strides = [1, 1]} : vector<2x384xf32> to vector<2x128xf32>
    %58 = arith.addf %56, %57 : vector<2x128xf32>
    %59 = arith.negf %58 : vector<2x128xf32>
    %60 = math.exp %59 : vector<2x128xf32>
    %cst_28 = arith.constant 1.000000e+00 : f32
    %61 = vector.broadcast %cst_28 : f32 to vector<2x128xf32>
    %62 = arith.addf %61, %60 : vector<2x128xf32>
    %63 = arith.divf %61, %62 : vector<2x128xf32>
    %64 = vector.extract_strided_slice %52 {offsets = [0, 128], sizes = [2, 128], strides = [1, 1]} : vector<2x384xf32> to vector<2x128xf32>
    %65 = vector.extract_strided_slice %55 {offsets = [0, 128], sizes = [2, 128], strides = [1, 1]} : vector<2x384xf32> to vector<2x128xf32>
    %66 = arith.addf %64, %65 : vector<2x128xf32>
    %67 = arith.negf %66 : vector<2x128xf32>
    %68 = math.exp %67 : vector<2x128xf32>
    %cst_29 = arith.constant 1.000000e+00 : f32
    %69 = vector.broadcast %cst_29 : f32 to vector<2x128xf32>
    %70 = arith.addf %69, %68 : vector<2x128xf32>
    %71 = arith.divf %69, %70 : vector<2x128xf32>
    %72 = vector.extract_strided_slice %52 {offsets = [0, 256], sizes = [2, 128], strides = [1, 1]} : vector<2x384xf32> to vector<2x128xf32>
    %73 = vector.extract_strided_slice %55 {offsets = [0, 256], sizes = [2, 128], strides = [1, 1]} : vector<2x384xf32> to vector<2x128xf32>
    %74 = arith.mulf %63, %73 : vector<2x128xf32>
    %75 = arith.addf %72, %74 : vector<2x128xf32>
    %76 = math.tanh %75 : vector<2x128xf32>
    %cst_30 = arith.constant 1.000000e+00 : f32
    %77 = vector.broadcast %cst_30 : f32 to vector<2x128xf32>
    %78 = arith.subf %77, %71 : vector<2x128xf32>
    %79 = arith.mulf %78, %76 : vector<2x128xf32>
    %80 = arith.mulf %71, %46 : vector<2x128xf32>
    %81 = arith.addf %79, %80 : vector<2x128xf32>
    %82 = vector.shape_cast %81 : vector<2x128xf32> to vector<2x1x128xf32>
    %c0_31 = arith.constant 0 : index
    %83 = arith.index_cast %c1_i32 : i32 to index
    %c0_32 = arith.constant 0 : index
    %84 = vector.load %arg11[%c0_31, %83, %c0_32] : memref<2x8x128xf32, #tpu.memory_space<vmem>>, vector<2x1x128xf32>
    tpu.vector_store %arg11[%c0_31, %83, %c0_32], %82 {strides = array<i32>} : memref<2x8x128xf32, #tpu.memory_space<vmem>>, vector<2x1x128xf32>,
    %c2_i32 = arith.constant 2 : i32
    %c0_33 = arith.constant 0 : index
    %85 = arith.index_cast %c2_i32 : i32 to index
    %c0_34 = arith.constant 0 : index
    %86 = vector.load %arg10[%c0_33, %85, %c0_34] : memref<2x8x384xf32, #tpu.memory_space<vmem>>, vector<2x1x384xf32>
    %87 = vector.shape_cast %86 : vector<2x1x384xf32> to vector<2x384xf32>
    %cst_35 = arith.constant dense<0.000000e+00> : vector<2x384xf32>
    %88 = tpu.matmul %81, %12, %cst_35 {dimension_numbers = #tpu.dot_dimension_numbers<[1], [0], [0], [1], [0, 0, 1, 1], [], []>} : vector<2x128xf32>, vector<128x384xf32>, vector<2x384xf32> -> vector<2x384xf32>
    %89 = vector.broadcast %13 : vector<1x384xf32> to vector<2x384xf32>
    %90 = arith.addf %88, %89 : vector<2x384xf32>
    %91 = vector.extract_strided_slice %87 {offsets = [0, 0], sizes = [2, 128], strides = [1, 1]} : vector<2x384xf32> to vector<2x128xf32>
    %92 = vector.extract_strided_slice %90 {offsets = [0, 0], sizes = [2, 128], strides = [1, 1]} : vector<2x384xf32> to vector<2x128xf32>
    %93 = arith.addf %91, %92 : vector<2x128xf32>
    %94 = arith.negf %93 : vector<2x128xf32>
    %95 = math.exp %94 : vector<2x128xf32>
    %cst_36 = arith.constant 1.000000e+00 : f32
    %96 = vector.broadcast %cst_36 : f32 to vector<2x128xf32>
    %97 = arith.addf %96, %95 : vector<2x128xf32>
    %98 = arith.divf %96, %97 : vector<2x128xf32>
    %99 = vector.extract_strided_slice %87 {offsets = [0, 128], sizes = [2, 128], strides = [1, 1]} : vector<2x384xf32> to vector<2x128xf32>
    %100 = vector.extract_strided_slice %90 {offsets = [0, 128], sizes = [2, 128], strides = [1, 1]} : vector<2x384xf32> to vector<2x128xf32>
    %101 = arith.addf %99, %100 : vector<2x128xf32>
    %102 = arith.negf %101 : vector<2x128xf32>
    %103 = math.exp %102 : vector<2x128xf32>
    %cst_37 = arith.constant 1.000000e+00 : f32
    %104 = vector.broadcast %cst_37 : f32 to vector<2x128xf32>
    %105 = arith.addf %104, %103 : vector<2x128xf32>
    %106 = arith.divf %104, %105 : vector<2x128xf32>
    %107 = vector.extract_strided_slice %87 {offsets = [0, 256], sizes = [2, 128], strides = [1, 1]} : vector<2x384xf32> to vector<2x128xf32>
    %108 = vector.extract_strided_slice %90 {offsets = [0, 256], sizes = [2, 128], strides = [1, 1]} : vector<2x384xf32> to vector<2x128xf32>
    %109 = arith.mulf %98, %108 : vector<2x128xf32>
    %110 = arith.addf %107, %109 : vector<2x128xf32>
    %111 = math.tanh %110 : vector<2x128xf32>
    %cst_38 = arith.constant 1.000000e+00 : f32
    %112 = vector.broadcast %cst_38 : f32 to vector<2x128xf32>
    %113 = arith.subf %112, %106 : vector<2x128xf32>
    %114 = arith.mulf %113, %111 : vector<2x128xf32>
    %115 = arith.mulf %106, %81 : vector<2x128xf32>
    %116 = arith.addf %114, %115 : vector<2x128xf32>
    %117 = vector.shape_cast %116 : vector<2x128xf32> to vector<2x1x128xf32>
    %c0_39 = arith.constant 0 : index
    %118 = arith.index_cast %c2_i32 : i32 to index
    %c0_40 = arith.constant 0 : index
    %119 = vector.load %arg11[%c0_39, %118, %c0_40] : memref<2x8x128xf32, #tpu.memory_space<vmem>>, vector<2x1x128xf32>
    tpu.vector_store %arg11[%c0_39, %118, %c0_40], %117 {strides = array<i32>} : memref<2x8x128xf32, #tpu.memory_space<vmem>>, vector<2x1x128xf32>,
    %c3_i32 = arith.constant 3 : i32
    %c0_41 = arith.constant 0 : index
    %120 = arith.index_cast %c3_i32 : i32 to index
    %c0_42 = arith.constant 0 : index
    %121 = vector.load %arg10[%c0_41, %120, %c0_42] : memref<2x8x384xf32, #tpu.memory_space<vmem>>, vector<2x1x384xf32>
    %122 = vector.shape_cast %121 : vector<2x1x384xf32> to vector<2x384xf32>
    %cst_43 = arith.constant dense<0.000000e+00> : vector<2x384xf32>
    %123 = tpu.matmul %116, %12, %cst_43 {dimension_numbers = #tpu.dot_dimension_numbers<[1], [0], [0], [1], [0, 0, 1, 1], [], []>} : vector<2x128xf32>, vector<128x384xf32>, vector<2x384xf32> -> vector<2x384xf32>
    %124 = vector.broadcast %13 : vector<1x384xf32> to vector<2x384xf32>
    %125 = arith.addf %123, %124 : vector<2x384xf32>
    %126 = vector.extract_strided_slice %122 {offsets = [0, 0], sizes = [2, 128], strides = [1, 1]} : vector<2x384xf32> to vector<2x128xf32>
    %127 = vector.extract_strided_slice %125 {offsets = [0, 0], sizes = [2, 128], strides = [1, 1]} : vector<2x384xf32> to vector<2x128xf32>
    %128 = arith.addf %126, %127 : vector<2x128xf32>
    %129 = arith.negf %128 : vector<2x128xf32>
    %130 = math.exp %129 : vector<2x128xf32>
    %cst_44 = arith.constant 1.000000e+00 : f32
    %131 = vector.broadcast %cst_44 : f32 to vector<2x128xf32>
    %132 = arith.addf %131, %130 : vector<2x128xf32>
    %133 = arith.divf %131, %132 : vector<2x128xf32>
    %134 = vector.extract_strided_slice %122 {offsets = [0, 128], sizes = [2, 128], strides = [1, 1]} : vector<2x384xf32> to vector<2x128xf32>
    %135 = vector.extract_strided_slice %125 {offsets = [0, 128], sizes = [2, 128], strides = [1, 1]} : vector<2x384xf32> to vector<2x128xf32>
    %136 = arith.addf %134, %135 : vector<2x128xf32>
    %137 = arith.negf %136 : vector<2x128xf32>
    %138 = math.exp %137 : vector<2x128xf32>
    %cst_45 = arith.constant 1.000000e+00 : f32
    %139 = vector.broadcast %cst_45 : f32 to vector<2x128xf32>
    %140 = arith.addf %139, %138 : vector<2x128xf32>
    %141 = arith.divf %139, %140 : vector<2x128xf32>
    %142 = vector.extract_strided_slice %122 {offsets = [0, 256], sizes = [2, 128], strides = [1, 1]} : vector<2x384xf32> to vector<2x128xf32>
    %143 = vector.extract_strided_slice %125 {offsets = [0, 256], sizes = [2, 128], strides = [1, 1]} : vector<2x384xf32> to vector<2x128xf32>
    %144 = arith.mulf %133, %143 : vector<2x128xf32>
    %145 = arith.addf %142, %144 : vector<2x128xf32>
    %146 = math.tanh %145 : vector<2x128xf32>
    %cst_46 = arith.constant 1.000000e+00 : f32
    %147 = vector.broadcast %cst_46 : f32 to vector<2x128xf32>
    %148 = arith.subf %147, %141 : vector<2x128xf32>
    %149 = arith.mulf %148, %146 : vector<2x128xf32>
    %150 = arith.mulf %141, %116 : vector<2x128xf32>
    %151 = arith.addf %149, %150 : vector<2x128xf32>
    %152 = vector.shape_cast %151 : vector<2x128xf32> to vector<2x1x128xf32>
    %c0_47 = arith.constant 0 : index
    %153 = arith.index_cast %c3_i32 : i32 to index
    %c0_48 = arith.constant 0 : index
    %154 = vector.load %arg11[%c0_47, %153, %c0_48] : memref<2x8x128xf32, #tpu.memory_space<vmem>>, vector<2x1x128xf32>
    tpu.vector_store %arg11[%c0_47, %153, %c0_48], %152 {strides = array<i32>} : memref<2x8x128xf32, #tpu.memory_space<vmem>>, vector<2x1x128xf32>,
    %c4_i32 = arith.constant 4 : i32
    %c0_49 = arith.constant 0 : index
    %155 = arith.index_cast %c4_i32 : i32 to index
    %c0_50 = arith.constant 0 : index
    %156 = vector.load %arg10[%c0_49, %155, %c0_50] : memref<2x8x384xf32, #tpu.memory_space<vmem>>, vector<2x1x384xf32>
    %157 = vector.shape_cast %156 : vector<2x1x384xf32> to vector<2x384xf32>
    %cst_51 = arith.constant dense<0.000000e+00> : vector<2x384xf32>
    %158 = tpu.matmul %151, %12, %cst_51 {dimension_numbers = #tpu.dot_dimension_numbers<[1], [0], [0], [1], [0, 0, 1, 1], [], []>} : vector<2x128xf32>, vector<128x384xf32>, vector<2x384xf32> -> vector<2x384xf32>
    %159 = vector.broadcast %13 : vector<1x384xf32> to vector<2x384xf32>
    %160 = arith.addf %158, %159 : vector<2x384xf32>
    %161 = vector.extract_strided_slice %157 {offsets = [0, 0], sizes = [2, 128], strides = [1, 1]} : vector<2x384xf32> to vector<2x128xf32>
    %162 = vector.extract_strided_slice %160 {offsets = [0, 0], sizes = [2, 128], strides = [1, 1]} : vector<2x384xf32> to vector<2x128xf32>
    %163 = arith.addf %161, %162 : vector<2x128xf32>
    %164 = arith.negf %163 : vector<2x128xf32>
    %165 = math.exp %164 : vector<2x128xf32>
    %cst_52 = arith.constant 1.000000e+00 : f32
    %166 = vector.broadcast %cst_52 : f32 to vector<2x128xf32>
    %167 = arith.addf %166, %165 : vector<2x128xf32>
    %168 = arith.divf %166, %167 : vector<2x128xf32>
    %169 = vector.extract_strided_slice %157 {offsets = [0, 128], sizes = [2, 128], strides = [1, 1]} : vector<2x384xf32> to vector<2x128xf32>
    %170 = vector.extract_strided_slice %160 {offsets = [0, 128], sizes = [2, 128], strides = [1, 1]} : vector<2x384xf32> to vector<2x128xf32>
    %171 = arith.addf %169, %170 : vector<2x128xf32>
    %172 = arith.negf %171 : vector<2x128xf32>
    %173 = math.exp %172 : vector<2x128xf32>
    %cst_53 = arith.constant 1.000000e+00 : f32
    %174 = vector.broadcast %cst_53 : f32 to vector<2x128xf32>
    %175 = arith.addf %174, %173 : vector<2x128xf32>
    %176 = arith.divf %174, %175 : vector<2x128xf32>
    %177 = vector.extract_strided_slice %157 {offsets = [0, 256], sizes = [2, 128], strides = [1, 1]} : vector<2x384xf32> to vector<2x128xf32>
    %178 = vector.extract_strided_slice %160 {offsets = [0, 256], sizes = [2, 128], strides = [1, 1]} : vector<2x384xf32> to vector<2x128xf32>
    %179 = arith.mulf %168, %178 : vector<2x128xf32>
    %180 = arith.addf %177, %179 : vector<2x128xf32>
    %181 = math.tanh %180 : vector<2x128xf32>
    %cst_54 = arith.constant 1.000000e+00 : f32
    %182 = vector.broadcast %cst_54 : f32 to vector<2x128xf32>
    %183 = arith.subf %182, %176 : vector<2x128xf32>
    %184 = arith.mulf %183, %181 : vector<2x128xf32>
    %185 = arith.mulf %176, %151 : vector<2x128xf32>
    %186 = arith.addf %184, %185 : vector<2x128xf32>
    %187 = vector.shape_cast %186 : vector<2x128xf32> to vector<2x1x128xf32>
    %c0_55 = arith.constant 0 : index
    %188 = arith.index_cast %c4_i32 : i32 to index
    %c0_56 = arith.constant 0 : index
    %189 = vector.load %arg11[%c0_55, %188, %c0_56] : memref<2x8x128xf32, #tpu.memory_space<vmem>>, vector<2x1x128xf32>
    tpu.vector_store %arg11[%c0_55, %188, %c0_56], %187 {strides = array<i32>} : memref<2x8x128xf32, #tpu.memory_space<vmem>>, vector<2x1x128xf32>,
    %c5_i32 = arith.constant 5 : i32
    %c0_57 = arith.constant 0 : index
    %190 = arith.index_cast %c5_i32 : i32 to index
    %c0_58 = arith.constant 0 : index
    %191 = vector.load %arg10[%c0_57, %190, %c0_58] : memref<2x8x384xf32, #tpu.memory_space<vmem>>, vector<2x1x384xf32>
    %192 = vector.shape_cast %191 : vector<2x1x384xf32> to vector<2x384xf32>
    %cst_59 = arith.constant dense<0.000000e+00> : vector<2x384xf32>
    %193 = tpu.matmul %186, %12, %cst_59 {dimension_numbers = #tpu.dot_dimension_numbers<[1], [0], [0], [1], [0, 0, 1, 1], [], []>} : vector<2x128xf32>, vector<128x384xf32>, vector<2x384xf32> -> vector<2x384xf32>
    %194 = vector.broadcast %13 : vector<1x384xf32> to vector<2x384xf32>
    %195 = arith.addf %193, %194 : vector<2x384xf32>
    %196 = vector.extract_strided_slice %192 {offsets = [0, 0], sizes = [2, 128], strides = [1, 1]} : vector<2x384xf32> to vector<2x128xf32>
    %197 = vector.extract_strided_slice %195 {offsets = [0, 0], sizes = [2, 128], strides = [1, 1]} : vector<2x384xf32> to vector<2x128xf32>
    %198 = arith.addf %196, %197 : vector<2x128xf32>
    %199 = arith.negf %198 : vector<2x128xf32>
    %200 = math.exp %199 : vector<2x128xf32>
    %cst_60 = arith.constant 1.000000e+00 : f32
    %201 = vector.broadcast %cst_60 : f32 to vector<2x128xf32>
    %202 = arith.addf %201, %200 : vector<2x128xf32>
    %203 = arith.divf %201, %202 : vector<2x128xf32>
    %204 = vector.extract_strided_slice %192 {offsets = [0, 128], sizes = [2, 128], strides = [1, 1]} : vector<2x384xf32> to vector<2x128xf32>
    %205 = vector.extract_strided_slice %195 {offsets = [0, 128], sizes = [2, 128], strides = [1, 1]} : vector<2x384xf32> to vector<2x128xf32>
    %206 = arith.addf %204, %205 : vector<2x128xf32>
    %207 = arith.negf %206 : vector<2x128xf32>
    %208 = math.exp %207 : vector<2x128xf32>
    %cst_61 = arith.constant 1.000000e+00 : f32
    %209 = vector.broadcast %cst_61 : f32 to vector<2x128xf32>
    %210 = arith.addf %209, %208 : vector<2x128xf32>
    %211 = arith.divf %209, %210 : vector<2x128xf32>
    %212 = vector.extract_strided_slice %192 {offsets = [0, 256], sizes = [2, 128], strides = [1, 1]} : vector<2x384xf32> to vector<2x128xf32>
    %213 = vector.extract_strided_slice %195 {offsets = [0, 256], sizes = [2, 128], strides = [1, 1]} : vector<2x384xf32> to vector<2x128xf32>
    %214 = arith.mulf %203, %213 : vector<2x128xf32>
    %215 = arith.addf %212, %214 : vector<2x128xf32>
    %216 = math.tanh %215 : vector<2x128xf32>
    %cst_62 = arith.constant 1.000000e+00 : f32
    %217 = vector.broadcast %cst_62 : f32 to vector<2x128xf32>
    %218 = arith.subf %217, %211 : vector<2x128xf32>
    %219 = arith.mulf %218, %216 : vector<2x128xf32>
    %220 = arith.mulf %211, %186 : vector<2x128xf32>
    %221 = arith.addf %219, %220 : vector<2x128xf32>
    %222 = vector.shape_cast %221 : vector<2x128xf32> to vector<2x1x128xf32>
    %c0_63 = arith.constant 0 : index
    %223 = arith.index_cast %c5_i32 : i32 to index
    %c0_64 = arith.constant 0 : index
    %224 = vector.load %arg11[%c0_63, %223, %c0_64] : memref<2x8x128xf32, #tpu.memory_space<vmem>>, vector<2x1x128xf32>
    tpu.vector_store %arg11[%c0_63, %223, %c0_64], %222 {strides = array<i32>} : memref<2x8x128xf32, #tpu.memory_space<vmem>>, vector<2x1x128xf32>,
    %c6_i32 = arith.constant 6 : i32
    %c0_65 = arith.constant 0 : index
    %225 = arith.index_cast %c6_i32 : i32 to index
    %c0_66 = arith.constant 0 : index
    %226 = vector.load %arg10[%c0_65, %225, %c0_66] : memref<2x8x384xf32, #tpu.memory_space<vmem>>, vector<2x1x384xf32>
    %227 = vector.shape_cast %226 : vector<2x1x384xf32> to vector<2x384xf32>
    %cst_67 = arith.constant dense<0.000000e+00> : vector<2x384xf32>
    %228 = tpu.matmul %221, %12, %cst_67 {dimension_numbers = #tpu.dot_dimension_numbers<[1], [0], [0], [1], [0, 0, 1, 1], [], []>} : vector<2x128xf32>, vector<128x384xf32>, vector<2x384xf32> -> vector<2x384xf32>
    %229 = vector.broadcast %13 : vector<1x384xf32> to vector<2x384xf32>
    %230 = arith.addf %228, %229 : vector<2x384xf32>
    %231 = vector.extract_strided_slice %227 {offsets = [0, 0], sizes = [2, 128], strides = [1, 1]} : vector<2x384xf32> to vector<2x128xf32>
    %232 = vector.extract_strided_slice %230 {offsets = [0, 0], sizes = [2, 128], strides = [1, 1]} : vector<2x384xf32> to vector<2x128xf32>
    %233 = arith.addf %231, %232 : vector<2x128xf32>
    %234 = arith.negf %233 : vector<2x128xf32>
    %235 = math.exp %234 : vector<2x128xf32>
    %cst_68 = arith.constant 1.000000e+00 : f32
    %236 = vector.broadcast %cst_68 : f32 to vector<2x128xf32>
    %237 = arith.addf %236, %235 : vector<2x128xf32>
    %238 = arith.divf %236, %237 : vector<2x128xf32>
    %239 = vector.extract_strided_slice %227 {offsets = [0, 128], sizes = [2, 128], strides = [1, 1]} : vector<2x384xf32> to vector<2x128xf32>
    %240 = vector.extract_strided_slice %230 {offsets = [0, 128], sizes = [2, 128], strides = [1, 1]} : vector<2x384xf32> to vector<2x128xf32>
    %241 = arith.addf %239, %240 : vector<2x128xf32>
    %242 = arith.negf %241 : vector<2x128xf32>
    %243 = math.exp %242 : vector<2x128xf32>
    %cst_69 = arith.constant 1.000000e+00 : f32
    %244 = vector.broadcast %cst_69 : f32 to vector<2x128xf32>
    %245 = arith.addf %244, %243 : vector<2x128xf32>
    %246 = arith.divf %244, %245 : vector<2x128xf32>
    %247 = vector.extract_strided_slice %227 {offsets = [0, 256], sizes = [2, 128], strides = [1, 1]} : vector<2x384xf32> to vector<2x128xf32>
    %248 = vector.extract_strided_slice %230 {offsets = [0, 256], sizes = [2, 128], strides = [1, 1]} : vector<2x384xf32> to vector<2x128xf32>
    %249 = arith.mulf %238, %248 : vector<2x128xf32>
    %250 = arith.addf %247, %249 : vector<2x128xf32>
    %251 = math.tanh %250 : vector<2x128xf32>
    %cst_70 = arith.constant 1.000000e+00 : f32
    %252 = vector.broadcast %cst_70 : f32 to vector<2x128xf32>
    %253 = arith.subf %252, %246 : vector<2x128xf32>
    %254 = arith.mulf %253, %251 : vector<2x128xf32>
    %255 = arith.mulf %246, %221 : vector<2x128xf32>
    %256 = arith.addf %254, %255 : vector<2x128xf32>
    %257 = vector.shape_cast %256 : vector<2x128xf32> to vector<2x1x128xf32>
    %c0_71 = arith.constant 0 : index
    %258 = arith.index_cast %c6_i32 : i32 to index
    %c0_72 = arith.constant 0 : index
    %259 = vector.load %arg11[%c0_71, %258, %c0_72] : memref<2x8x128xf32, #tpu.memory_space<vmem>>, vector<2x1x128xf32>
    tpu.vector_store %arg11[%c0_71, %258, %c0_72], %257 {strides = array<i32>} : memref<2x8x128xf32, #tpu.memory_space<vmem>>, vector<2x1x128xf32>,
    %c7_i32 = arith.constant 7 : i32
    %c0_73 = arith.constant 0 : index
    %260 = arith.index_cast %c7_i32 : i32 to index
    %c0_74 = arith.constant 0 : index
    %261 = vector.load %arg10[%c0_73, %260, %c0_74] : memref<2x8x384xf32, #tpu.memory_space<vmem>>, vector<2x1x384xf32>
    %262 = vector.shape_cast %261 : vector<2x1x384xf32> to vector<2x384xf32>
    %cst_75 = arith.constant dense<0.000000e+00> : vector<2x384xf32>
    %263 = tpu.matmul %256, %12, %cst_75 {dimension_numbers = #tpu.dot_dimension_numbers<[1], [0], [0], [1], [0, 0, 1, 1], [], []>} : vector<2x128xf32>, vector<128x384xf32>, vector<2x384xf32> -> vector<2x384xf32>
    %264 = vector.broadcast %13 : vector<1x384xf32> to vector<2x384xf32>
    %265 = arith.addf %263, %264 : vector<2x384xf32>
    %266 = vector.extract_strided_slice %262 {offsets = [0, 0], sizes = [2, 128], strides = [1, 1]} : vector<2x384xf32> to vector<2x128xf32>
    %267 = vector.extract_strided_slice %265 {offsets = [0, 0], sizes = [2, 128], strides = [1, 1]} : vector<2x384xf32> to vector<2x128xf32>
    %268 = arith.addf %266, %267 : vector<2x128xf32>
    %269 = arith.negf %268 : vector<2x128xf32>
    %270 = math.exp %269 : vector<2x128xf32>
    %cst_76 = arith.constant 1.000000e+00 : f32
    %271 = vector.broadcast %cst_76 : f32 to vector<2x128xf32>
    %272 = arith.addf %271, %270 : vector<2x128xf32>
    %273 = arith.divf %271, %272 : vector<2x128xf32>
    %274 = vector.extract_strided_slice %262 {offsets = [0, 128], sizes = [2, 128], strides = [1, 1]} : vector<2x384xf32> to vector<2x128xf32>
    %275 = vector.extract_strided_slice %265 {offsets = [0, 128], sizes = [2, 128], strides = [1, 1]} : vector<2x384xf32> to vector<2x128xf32>
    %276 = arith.addf %274, %275 : vector<2x128xf32>
    %277 = arith.negf %276 : vector<2x128xf32>
    %278 = math.exp %277 : vector<2x128xf32>
    %cst_77 = arith.constant 1.000000e+00 : f32
    %279 = vector.broadcast %cst_77 : f32 to vector<2x128xf32>
    %280 = arith.addf %279, %278 : vector<2x128xf32>
    %281 = arith.divf %279, %280 : vector<2x128xf32>
    %282 = vector.extract_strided_slice %262 {offsets = [0, 256], sizes = [2, 128], strides = [1, 1]} : vector<2x384xf32> to vector<2x128xf32>
    %283 = vector.extract_strided_slice %265 {offsets = [0, 256], sizes = [2, 128], strides = [1, 1]} : vector<2x384xf32> to vector<2x128xf32>
    %284 = arith.mulf %273, %283 : vector<2x128xf32>
    %285 = arith.addf %282, %284 : vector<2x128xf32>
    %286 = math.tanh %285 : vector<2x128xf32>
    %cst_78 = arith.constant 1.000000e+00 : f32
    %287 = vector.broadcast %cst_78 : f32 to vector<2x128xf32>
    %288 = arith.subf %287, %281 : vector<2x128xf32>
    %289 = arith.mulf %288, %286 : vector<2x128xf32>
    %290 = arith.mulf %281, %256 : vector<2x128xf32>
    %291 = arith.addf %289, %290 : vector<2x128xf32>
    %292 = vector.shape_cast %291 : vector<2x128xf32> to vector<2x1x128xf32>
    %c0_79 = arith.constant 0 : index
    %293 = arith.index_cast %c7_i32 : i32 to index
    %c0_80 = arith.constant 0 : index
    %294 = vector.load %arg11[%c0_79, %293, %c0_80] : memref<2x8x128xf32, #tpu.memory_space<vmem>>, vector<2x1x128xf32>
    tpu.vector_store %arg11[%c0_79, %293, %c0_80], %292 {strides = array<i32>} : memref<2x8x128xf32, #tpu.memory_space<vmem>>, vector<2x1x128xf32>,
    %c8_i32 = arith.constant 8 : i32
    %c0_81 = arith.constant 0 : index
    %c0_82 = arith.constant 0 : index
    %295 = vector.load %arg9[%c0_81, %c0_82] : memref<2x128xf32, #tpu.memory_space<vmem>>, vector<2x128xf32>
    tpu.vector_store %arg9[%c0_81, %c0_82], %291 {strides = array<i32>} : memref<2x128xf32, #tpu.memory_space<vmem>>, vector<2x128xf32>,
    %c0_83 = arith.constant 0 : index
    %c0_84 = arith.constant 0 : index
    %c0_85 = arith.constant 0 : index
    %296 = vector.load %arg11[%c0_83, %c0_84, %c0_85] : memref<2x8x128xf32, #tpu.memory_space<vmem>>, vector<2x8x32xf32>
    %c0_86 = arith.constant 0 : index
    %c0_87 = arith.constant 0 : index
    %c0_88 = arith.constant 0 : index
    %297 = vector.load %arg2[%c0_86, %c0_87, %c0_88] : memref<2x8x1xf32, #tpu.memory_space<vmem>>, vector<2x8x1xf32>
    %298 = vector.broadcast %297 : vector<2x8x1xf32> to vector<2x8x32xf32>
    %299 = arith.mulf %296, %298 : vector<2x8x32xf32>
    %c0_89 = arith.constant 0 : index
    %c0_90 = arith.constant 0 : index
    %c0_91 = arith.constant 0 : index
    %300 = vector.load %arg8[%c0_89, %c0_90, %c0_91] : memref<2x8x32xf32, #tpu.memory_space<vmem>>, vector<2x8x32xf32>
    tpu.vector_store %arg8[%c0_89, %c0_90, %c0_91], %299 {strides = array<i32>} : memref<2x8x32xf32, #tpu.memory_space<vmem>>, vector<2x8x32xf32>,
    return
  }
  func.func @transform_0(%arg0: i32) -> (i32, i32, i32) {
    %c0_i32 = arith.constant 0 : i32
    %c0_i32_0 = arith.constant 0 : i32
    %c0_i32_1 = arith.constant 0 : i32
    return %c0_i32, %arg0, %c0_i32_0 : i32, i32, i32
  }
  func.func @transform_1(%arg0: i32) -> (i32, i32, i32) {
    %c0_i32 = arith.constant 0 : i32
    %c0_i32_0 = arith.constant 0 : i32
    %c0_i32_1 = arith.constant 0 : i32
    return %c0_i32, %arg0, %c0_i32_0 : i32, i32, i32
  }
  func.func @transform_2(%arg0: i32) -> (i32, i32) {
    %c0_i32 = arith.constant 0 : i32
    %c0_i32_0 = arith.constant 0 : i32
    %c0_i32_1 = arith.constant 0 : i32
    return %c0_i32, %c0_i32_0 : i32, i32
  }
  func.func @transform_3(%arg0: i32) -> (i32, i32) {
    %c0_i32 = arith.constant 0 : i32
    %c0_i32_0 = arith.constant 0 : i32
    %c0_i32_1 = arith.constant 0 : i32
    return %c0_i32, %c0_i32_0 : i32, i32
  }
  func.func @transform_4(%arg0: i32) -> (i32, i32) {
    %c0_i32 = arith.constant 0 : i32
    %c0_i32_0 = arith.constant 0 : i32
    %c0_i32_1 = arith.constant 0 : i32
    return %c0_i32, %c0_i32_0 : i32, i32
  }
  func.func @transform_5(%arg0: i32) -> (i32, i32) {
    %c0_i32 = arith.constant 0 : i32
    %c0_i32_0 = arith.constant 0 : i32
    %c0_i32_1 = arith.constant 0 : i32
    return %c0_i32, %c0_i32_0 : i32, i32
  }
  func.func @transform_6(%arg0: i32) -> (i32, i32) {
    %c0_i32 = arith.constant 0 : i32
    %c0_i32_0 = arith.constant 0 : i32
    %c0_i32_1 = arith.constant 0 : i32
    return %c0_i32, %c0_i32_0 : i32, i32
  }
  func.func @transform_7(%arg0: i32) -> (i32, i32, i32) {
    %c0_i32 = arith.constant 0 : i32
    %c0_i32_0 = arith.constant 0 : i32
    %c0_i32_1 = arith.constant 0 : i32
    return %c0_i32, %arg0, %c0_i32_0 : i32, i32, i32
  }
}

module attributes {stable_mosaic.version = 11 : i64} {
  func.func @_att_proto_kernel(%arg0: i32, %arg1: i32, %arg2: memref<2x8x32xf32, #tpu.memory_space<vmem>>, %arg3: memref<2x8x1xf32, #tpu.memory_space<vmem>>, %arg4: memref<1x2x16x32xf32, #tpu.memory_space<vmem>>, %arg5: memref<1x16x384xf32, #tpu.memory_space<vmem>>, %arg6: memref<1x128x384xf32, #tpu.memory_space<vmem>>, %arg7: memref<1x1x128xf32, #tpu.memory_space<vmem>>, %arg8: memref<1x1x16xf32, #tpu.memory_space<vmem>>, %arg9: memref<1x2x32xf32, #tpu.memory_space<vmem>>, %arg10: memref<32x32xf32, #tpu.memory_space<vmem>>, %arg11: memref<1x2x8x16xf32, #tpu.memory_space<vmem>>, %arg12: memref<1x2x32xf32, #tpu.memory_space<vmem>>, %arg13: memref<2x128xf32, #tpu.memory_space<vmem>>, %arg14: memref<2x8x384xf32, #tpu.memory_space<vmem>>, %arg15: memref<2x8x128xf32, #tpu.memory_space<vmem>>, %arg16: memref<2x1xf32, #tpu.memory_space<vmem>>, %arg17: memref<2x1xf32, #tpu.memory_space<vmem>>, %arg18: memref<2x32xf32, #tpu.memory_space<vmem>>) attributes {dimension_semantics = [#tpu.dimension_semantics<parallel>, #tpu.dimension_semantics<arbitrary>], iteration_bounds = array<i64: 2, 1>, scalar_prefetch = 0 : i64, scratch_operands = 6 : i64, tpu.core_type = #tpu.core_type<tc>, window_params = [{transform_indices = @transform_0, window_bounds = array<i64: 2, 8, 32>}, {transform_indices = @transform_1, window_bounds = array<i64: 2, 8, 1>}, {transform_indices = @transform_2, window_bounds = array<i64: 1, 2, 16, 32>}, {transform_indices = @transform_3, window_bounds = array<i64: 1, 16, 384>}, {transform_indices = @transform_4, window_bounds = array<i64: 1, 128, 384>}, {transform_indices = @transform_5, window_bounds = array<i64: 1, 1, 128>}, {transform_indices = @transform_6, window_bounds = array<i64: 1, 1, 16>}, {transform_indices = @transform_7, window_bounds = array<i64: 1, 2, 32>}, {pipeline_mode = #tpu.pipeline_mode<synchronous>, transform_indices = @transform_8, window_bounds = array<i64: 32, 32>}, {transform_indices = @transform_9, window_bounds = array<i64: 1, 2, 8, 16>}, {transform_indices = @transform_10, window_bounds = array<i64: 1, 2, 32>}]} {
    %c0_i32 = arith.constant 0 : i32
    %0 = arith.cmpi eq, %arg1, %c0_i32 : i32
    %1 = arith.extui %0 : i1 to i32
    %c0_i32_0 = arith.constant 0 : i32
    %2 = arith.cmpi ne, %1, %c0_i32_0 : i32
    scf.if %2 {
      %c0_119 = arith.constant 0 : index
      %c0_120 = arith.constant 0 : index
      %c0_121 = arith.constant 0 : index
      %327 = vector.load %arg7[%c0_119, %c0_120, %c0_121] : memref<1x1x128xf32, #tpu.memory_space<vmem>>, vector<1x1x128xf32>
      %328 = vector.shape_cast %327 : vector<1x1x128xf32> to vector<1x128xf32>
      %329 = vector.shape_cast %328 : vector<1x128xf32> to vector<1x128xf32>
      %330 = vector.broadcast %329 : vector<1x128xf32> to vector<2x128xf32>
      %c0_122 = arith.constant 0 : index
      %c0_123 = arith.constant 0 : index
      %331 = vector.load %arg13[%c0_122, %c0_123] : memref<2x128xf32, #tpu.memory_space<vmem>>, vector<2x128xf32>
      tpu.vector_store %arg13[%c0_122, %c0_123], %330 {strides = array<i32>} : memref<2x128xf32, #tpu.memory_space<vmem>>, vector<2x128xf32>,
      %cst_124 = arith.constant 0xFF800000 : f32
      %332 = vector.broadcast %cst_124 : f32 to vector<2x1xf32>
      %c0_125 = arith.constant 0 : index
      %c0_126 = arith.constant 0 : index
      %333 = vector.load %arg16[%c0_125, %c0_126] : memref<2x1xf32, #tpu.memory_space<vmem>>, vector<2x1xf32>
      tpu.vector_store %arg16[%c0_125, %c0_126], %332 {strides = array<i32>} : memref<2x1xf32, #tpu.memory_space<vmem>>, vector<2x1xf32>,
      %cst_127 = arith.constant 0.000000e+00 : f32
      %334 = vector.broadcast %cst_127 : f32 to vector<2x1xf32>
      %c0_128 = arith.constant 0 : index
      %c0_129 = arith.constant 0 : index
      %335 = vector.load %arg17[%c0_128, %c0_129] : memref<2x1xf32, #tpu.memory_space<vmem>>, vector<2x1xf32>
      tpu.vector_store %arg17[%c0_128, %c0_129], %334 {strides = array<i32>} : memref<2x1xf32, #tpu.memory_space<vmem>>, vector<2x1xf32>,
      %cst_130 = arith.constant 0.000000e+00 : f32
      %336 = vector.broadcast %cst_130 : f32 to vector<2x32xf32>
      %c0_131 = arith.constant 0 : index
      %c0_132 = arith.constant 0 : index
      %337 = vector.load %arg18[%c0_131, %c0_132] : memref<2x32xf32, #tpu.memory_space<vmem>>, vector<2x32xf32>
      tpu.vector_store %arg18[%c0_131, %c0_132], %336 {strides = array<i32>} : memref<2x32xf32, #tpu.memory_space<vmem>>, vector<2x32xf32>,
    } else {
    }
    %c0 = arith.constant 0 : index
    %c0_1 = arith.constant 0 : index
    %c0_2 = arith.constant 0 : index
    %3 = vector.load %arg2[%c0, %c0_1, %c0_2] : memref<2x8x32xf32, #tpu.memory_space<vmem>>, vector<2x8x32xf32>
    %c0_3 = arith.constant 0 : index
    %c0_4 = arith.constant 0 : index
    %c0_5 = arith.constant 0 : index
    %4 = vector.load %arg3[%c0_3, %c0_4, %c0_5] : memref<2x8x1xf32, #tpu.memory_space<vmem>>, vector<2x8x1xf32>
    %c0_6 = arith.constant 0 : index
    %c0_7 = arith.constant 0 : index
    %c0_8 = arith.constant 0 : index
    %c0_9 = arith.constant 0 : index
    %5 = vector.load %arg4[%c0_6, %c0_7, %c0_8, %c0_9] : memref<1x2x16x32xf32, #tpu.memory_space<vmem>>, vector<1x2x16x32xf32>
    %6 = vector.shape_cast %5 : vector<1x2x16x32xf32> to vector<2x16x32xf32>
    "tpu.trace_start"() <{level = 10 : i32, message = "btd,bkd->btk"}> : () -> ()
    %cst = arith.constant dense<0.000000e+00> : vector<2x8x16xf32>
    %7 = tpu.matmul %3, %6, %cst {dimension_numbers = #tpu.dot_dimension_numbers<[2], [2], [1], [1], [0, 0, 0, 1, 1, 1], [0], [0]>} : vector<2x8x32xf32>, vector<2x16x32xf32>, vector<2x8x16xf32> -> vector<2x8x16xf32>
    "tpu.trace_stop"() : () -> ()
    %8 = math.tanh %7 : vector<2x8x16xf32>
    %9 = vector.broadcast %4 : vector<2x8x1xf32> to vector<2x8x16xf32>
    %10 = arith.mulf %8, %9 : vector<2x8x16xf32>
    %11 = vector.shape_cast %10 : vector<2x8x16xf32> to vector<16x16xf32>
    %c0_10 = arith.constant 0 : index
    %c0_11 = arith.constant 0 : index
    %c0_12 = arith.constant 0 : index
    %12 = vector.load %arg5[%c0_10, %c0_11, %c0_12] : memref<1x16x384xf32, #tpu.memory_space<vmem>>, vector<1x16x384xf32>
    %13 = vector.shape_cast %12 : vector<1x16x384xf32> to vector<16x384xf32>
    %cst_13 = arith.constant dense<0.000000e+00> : vector<16x384xf32>
    %14 = tpu.matmul %11, %13, %cst_13 {dimension_numbers = #tpu.dot_dimension_numbers<[1], [0], [0], [1], [0, 0, 1, 1], [], []>} : vector<16x16xf32>, vector<16x384xf32>, vector<16x384xf32> -> vector<16x384xf32>
    %15 = vector.shape_cast %14 : vector<16x384xf32> to vector<2x8x384xf32>
    %c0_14 = arith.constant 0 : index
    %c0_15 = arith.constant 0 : index
    %c0_16 = arith.constant 0 : index
    %16 = vector.load %arg14[%c0_14, %c0_15, %c0_16] : memref<2x8x384xf32, #tpu.memory_space<vmem>>, vector<2x8x384xf32>
    tpu.vector_store %arg14[%c0_14, %c0_15, %c0_16], %15 {strides = array<i32>} : memref<2x8x384xf32, #tpu.memory_space<vmem>>, vector<2x8x384xf32>,
    %c0_17 = arith.constant 0 : index
    %c0_18 = arith.constant 0 : index
    %c0_19 = arith.constant 0 : index
    %17 = vector.load %arg6[%c0_17, %c0_18, %c0_19] : memref<1x128x384xf32, #tpu.memory_space<vmem>>, vector<1x128x384xf32>
    %18 = vector.shape_cast %17 : vector<1x128x384xf32> to vector<128x384xf32>
    %c0_20 = arith.constant 0 : index
    %c0_21 = arith.constant 0 : index
    %19 = vector.load %arg13[%c0_20, %c0_21] : memref<2x128xf32, #tpu.memory_space<vmem>>, vector<2x128xf32>
    %c0_i32_22 = arith.constant 0 : i32
    %c0_23 = arith.constant 0 : index
    %20 = arith.index_cast %c0_i32_22 : i32 to index
    %c0_24 = arith.constant 0 : index
    %21 = vector.load %arg14[%c0_23, %20, %c0_24] : memref<2x8x384xf32, #tpu.memory_space<vmem>>, vector<2x1x384xf32>
    %22 = vector.shape_cast %21 : vector<2x1x384xf32> to vector<2x384xf32>
    %cst_25 = arith.constant dense<0.000000e+00> : vector<2x384xf32>
    %23 = tpu.matmul %19, %18, %cst_25 {dimension_numbers = #tpu.dot_dimension_numbers<[1], [0], [0], [1], [0, 0, 1, 1], [], []>} : vector<2x128xf32>, vector<128x384xf32>, vector<2x384xf32> -> vector<2x384xf32>
    %24 = vector.extract_strided_slice %22 {offsets = [0, 0], sizes = [2, 128], strides = [1, 1]} : vector<2x384xf32> to vector<2x128xf32>
    %25 = vector.extract_strided_slice %23 {offsets = [0, 0], sizes = [2, 128], strides = [1, 1]} : vector<2x384xf32> to vector<2x128xf32>
    %26 = arith.addf %24, %25 : vector<2x128xf32>
    %27 = arith.negf %26 : vector<2x128xf32>
    %28 = math.exp %27 : vector<2x128xf32>
    %cst_26 = arith.constant 1.000000e+00 : f32
    %29 = vector.broadcast %cst_26 : f32 to vector<2x128xf32>
    %30 = arith.addf %29, %28 : vector<2x128xf32>
    %31 = arith.divf %29, %30 : vector<2x128xf32>
    %32 = vector.extract_strided_slice %22 {offsets = [0, 128], sizes = [2, 128], strides = [1, 1]} : vector<2x384xf32> to vector<2x128xf32>
    %33 = vector.extract_strided_slice %23 {offsets = [0, 128], sizes = [2, 128], strides = [1, 1]} : vector<2x384xf32> to vector<2x128xf32>
    %34 = arith.addf %32, %33 : vector<2x128xf32>
    %35 = arith.negf %34 : vector<2x128xf32>
    %36 = math.exp %35 : vector<2x128xf32>
    %cst_27 = arith.constant 1.000000e+00 : f32
    %37 = vector.broadcast %cst_27 : f32 to vector<2x128xf32>
    %38 = arith.addf %37, %36 : vector<2x128xf32>
    %39 = arith.divf %37, %38 : vector<2x128xf32>
    %40 = vector.extract_strided_slice %22 {offsets = [0, 256], sizes = [2, 128], strides = [1, 1]} : vector<2x384xf32> to vector<2x128xf32>
    %41 = vector.extract_strided_slice %23 {offsets = [0, 256], sizes = [2, 128], strides = [1, 1]} : vector<2x384xf32> to vector<2x128xf32>
    %42 = arith.mulf %31, %41 : vector<2x128xf32>
    %43 = arith.addf %40, %42 : vector<2x128xf32>
    %44 = math.tanh %43 : vector<2x128xf32>
    %cst_28 = arith.constant 1.000000e+00 : f32
    %45 = vector.broadcast %cst_28 : f32 to vector<2x128xf32>
    %46 = arith.subf %45, %39 : vector<2x128xf32>
    %47 = arith.mulf %46, %44 : vector<2x128xf32>
    %48 = arith.mulf %39, %19 : vector<2x128xf32>
    %49 = arith.addf %47, %48 : vector<2x128xf32>
    %50 = vector.shape_cast %49 : vector<2x128xf32> to vector<2x1x128xf32>
    %c0_29 = arith.constant 0 : index
    %51 = arith.index_cast %c0_i32_22 : i32 to index
    %c0_30 = arith.constant 0 : index
    %52 = vector.load %arg15[%c0_29, %51, %c0_30] : memref<2x8x128xf32, #tpu.memory_space<vmem>>, vector<2x1x128xf32>
    tpu.vector_store %arg15[%c0_29, %51, %c0_30], %50 {strides = array<i32>} : memref<2x8x128xf32, #tpu.memory_space<vmem>>, vector<2x1x128xf32>,
    %c1_i32 = arith.constant 1 : i32
    %c0_31 = arith.constant 0 : index
    %53 = arith.index_cast %c1_i32 : i32 to index
    %c0_32 = arith.constant 0 : index
    %54 = vector.load %arg14[%c0_31, %53, %c0_32] : memref<2x8x384xf32, #tpu.memory_space<vmem>>, vector<2x1x384xf32>
    %55 = vector.shape_cast %54 : vector<2x1x384xf32> to vector<2x384xf32>
    %cst_33 = arith.constant dense<0.000000e+00> : vector<2x384xf32>
    %56 = tpu.matmul %49, %18, %cst_33 {dimension_numbers = #tpu.dot_dimension_numbers<[1], [0], [0], [1], [0, 0, 1, 1], [], []>} : vector<2x128xf32>, vector<128x384xf32>, vector<2x384xf32> -> vector<2x384xf32>
    %57 = vector.extract_strided_slice %55 {offsets = [0, 0], sizes = [2, 128], strides = [1, 1]} : vector<2x384xf32> to vector<2x128xf32>
    %58 = vector.extract_strided_slice %56 {offsets = [0, 0], sizes = [2, 128], strides = [1, 1]} : vector<2x384xf32> to vector<2x128xf32>
    %59 = arith.addf %57, %58 : vector<2x128xf32>
    %60 = arith.negf %59 : vector<2x128xf32>
    %61 = math.exp %60 : vector<2x128xf32>
    %cst_34 = arith.constant 1.000000e+00 : f32
    %62 = vector.broadcast %cst_34 : f32 to vector<2x128xf32>
    %63 = arith.addf %62, %61 : vector<2x128xf32>
    %64 = arith.divf %62, %63 : vector<2x128xf32>
    %65 = vector.extract_strided_slice %55 {offsets = [0, 128], sizes = [2, 128], strides = [1, 1]} : vector<2x384xf32> to vector<2x128xf32>
    %66 = vector.extract_strided_slice %56 {offsets = [0, 128], sizes = [2, 128], strides = [1, 1]} : vector<2x384xf32> to vector<2x128xf32>
    %67 = arith.addf %65, %66 : vector<2x128xf32>
    %68 = arith.negf %67 : vector<2x128xf32>
    %69 = math.exp %68 : vector<2x128xf32>
    %cst_35 = arith.constant 1.000000e+00 : f32
    %70 = vector.broadcast %cst_35 : f32 to vector<2x128xf32>
    %71 = arith.addf %70, %69 : vector<2x128xf32>
    %72 = arith.divf %70, %71 : vector<2x128xf32>
    %73 = vector.extract_strided_slice %55 {offsets = [0, 256], sizes = [2, 128], strides = [1, 1]} : vector<2x384xf32> to vector<2x128xf32>
    %74 = vector.extract_strided_slice %56 {offsets = [0, 256], sizes = [2, 128], strides = [1, 1]} : vector<2x384xf32> to vector<2x128xf32>
    %75 = arith.mulf %64, %74 : vector<2x128xf32>
    %76 = arith.addf %73, %75 : vector<2x128xf32>
    %77 = math.tanh %76 : vector<2x128xf32>
    %cst_36 = arith.constant 1.000000e+00 : f32
    %78 = vector.broadcast %cst_36 : f32 to vector<2x128xf32>
    %79 = arith.subf %78, %72 : vector<2x128xf32>
    %80 = arith.mulf %79, %77 : vector<2x128xf32>
    %81 = arith.mulf %72, %49 : vector<2x128xf32>
    %82 = arith.addf %80, %81 : vector<2x128xf32>
    %83 = vector.shape_cast %82 : vector<2x128xf32> to vector<2x1x128xf32>
    %c0_37 = arith.constant 0 : index
    %84 = arith.index_cast %c1_i32 : i32 to index
    %c0_38 = arith.constant 0 : index
    %85 = vector.load %arg15[%c0_37, %84, %c0_38] : memref<2x8x128xf32, #tpu.memory_space<vmem>>, vector<2x1x128xf32>
    tpu.vector_store %arg15[%c0_37, %84, %c0_38], %83 {strides = array<i32>} : memref<2x8x128xf32, #tpu.memory_space<vmem>>, vector<2x1x128xf32>,
    %c2_i32 = arith.constant 2 : i32
    %c0_39 = arith.constant 0 : index
    %86 = arith.index_cast %c2_i32 : i32 to index
    %c0_40 = arith.constant 0 : index
    %87 = vector.load %arg14[%c0_39, %86, %c0_40] : memref<2x8x384xf32, #tpu.memory_space<vmem>>, vector<2x1x384xf32>
    %88 = vector.shape_cast %87 : vector<2x1x384xf32> to vector<2x384xf32>
    %cst_41 = arith.constant dense<0.000000e+00> : vector<2x384xf32>
    %89 = tpu.matmul %82, %18, %cst_41 {dimension_numbers = #tpu.dot_dimension_numbers<[1], [0], [0], [1], [0, 0, 1, 1], [], []>} : vector<2x128xf32>, vector<128x384xf32>, vector<2x384xf32> -> vector<2x384xf32>
    %90 = vector.extract_strided_slice %88 {offsets = [0, 0], sizes = [2, 128], strides = [1, 1]} : vector<2x384xf32> to vector<2x128xf32>
    %91 = vector.extract_strided_slice %89 {offsets = [0, 0], sizes = [2, 128], strides = [1, 1]} : vector<2x384xf32> to vector<2x128xf32>
    %92 = arith.addf %90, %91 : vector<2x128xf32>
    %93 = arith.negf %92 : vector<2x128xf32>
    %94 = math.exp %93 : vector<2x128xf32>
    %cst_42 = arith.constant 1.000000e+00 : f32
    %95 = vector.broadcast %cst_42 : f32 to vector<2x128xf32>
    %96 = arith.addf %95, %94 : vector<2x128xf32>
    %97 = arith.divf %95, %96 : vector<2x128xf32>
    %98 = vector.extract_strided_slice %88 {offsets = [0, 128], sizes = [2, 128], strides = [1, 1]} : vector<2x384xf32> to vector<2x128xf32>
    %99 = vector.extract_strided_slice %89 {offsets = [0, 128], sizes = [2, 128], strides = [1, 1]} : vector<2x384xf32> to vector<2x128xf32>
    %100 = arith.addf %98, %99 : vector<2x128xf32>
    %101 = arith.negf %100 : vector<2x128xf32>
    %102 = math.exp %101 : vector<2x128xf32>
    %cst_43 = arith.constant 1.000000e+00 : f32
    %103 = vector.broadcast %cst_43 : f32 to vector<2x128xf32>
    %104 = arith.addf %103, %102 : vector<2x128xf32>
    %105 = arith.divf %103, %104 : vector<2x128xf32>
    %106 = vector.extract_strided_slice %88 {offsets = [0, 256], sizes = [2, 128], strides = [1, 1]} : vector<2x384xf32> to vector<2x128xf32>
    %107 = vector.extract_strided_slice %89 {offsets = [0, 256], sizes = [2, 128], strides = [1, 1]} : vector<2x384xf32> to vector<2x128xf32>
    %108 = arith.mulf %97, %107 : vector<2x128xf32>
    %109 = arith.addf %106, %108 : vector<2x128xf32>
    %110 = math.tanh %109 : vector<2x128xf32>
    %cst_44 = arith.constant 1.000000e+00 : f32
    %111 = vector.broadcast %cst_44 : f32 to vector<2x128xf32>
    %112 = arith.subf %111, %105 : vector<2x128xf32>
    %113 = arith.mulf %112, %110 : vector<2x128xf32>
    %114 = arith.mulf %105, %82 : vector<2x128xf32>
    %115 = arith.addf %113, %114 : vector<2x128xf32>
    %116 = vector.shape_cast %115 : vector<2x128xf32> to vector<2x1x128xf32>
    %c0_45 = arith.constant 0 : index
    %117 = arith.index_cast %c2_i32 : i32 to index
    %c0_46 = arith.constant 0 : index
    %118 = vector.load %arg15[%c0_45, %117, %c0_46] : memref<2x8x128xf32, #tpu.memory_space<vmem>>, vector<2x1x128xf32>
    tpu.vector_store %arg15[%c0_45, %117, %c0_46], %116 {strides = array<i32>} : memref<2x8x128xf32, #tpu.memory_space<vmem>>, vector<2x1x128xf32>,
    %c3_i32 = arith.constant 3 : i32
    %c0_47 = arith.constant 0 : index
    %119 = arith.index_cast %c3_i32 : i32 to index
    %c0_48 = arith.constant 0 : index
    %120 = vector.load %arg14[%c0_47, %119, %c0_48] : memref<2x8x384xf32, #tpu.memory_space<vmem>>, vector<2x1x384xf32>
    %121 = vector.shape_cast %120 : vector<2x1x384xf32> to vector<2x384xf32>
    %cst_49 = arith.constant dense<0.000000e+00> : vector<2x384xf32>
    %122 = tpu.matmul %115, %18, %cst_49 {dimension_numbers = #tpu.dot_dimension_numbers<[1], [0], [0], [1], [0, 0, 1, 1], [], []>} : vector<2x128xf32>, vector<128x384xf32>, vector<2x384xf32> -> vector<2x384xf32>
    %123 = vector.extract_strided_slice %121 {offsets = [0, 0], sizes = [2, 128], strides = [1, 1]} : vector<2x384xf32> to vector<2x128xf32>
    %124 = vector.extract_strided_slice %122 {offsets = [0, 0], sizes = [2, 128], strides = [1, 1]} : vector<2x384xf32> to vector<2x128xf32>
    %125 = arith.addf %123, %124 : vector<2x128xf32>
    %126 = arith.negf %125 : vector<2x128xf32>
    %127 = math.exp %126 : vector<2x128xf32>
    %cst_50 = arith.constant 1.000000e+00 : f32
    %128 = vector.broadcast %cst_50 : f32 to vector<2x128xf32>
    %129 = arith.addf %128, %127 : vector<2x128xf32>
    %130 = arith.divf %128, %129 : vector<2x128xf32>
    %131 = vector.extract_strided_slice %121 {offsets = [0, 128], sizes = [2, 128], strides = [1, 1]} : vector<2x384xf32> to vector<2x128xf32>
    %132 = vector.extract_strided_slice %122 {offsets = [0, 128], sizes = [2, 128], strides = [1, 1]} : vector<2x384xf32> to vector<2x128xf32>
    %133 = arith.addf %131, %132 : vector<2x128xf32>
    %134 = arith.negf %133 : vector<2x128xf32>
    %135 = math.exp %134 : vector<2x128xf32>
    %cst_51 = arith.constant 1.000000e+00 : f32
    %136 = vector.broadcast %cst_51 : f32 to vector<2x128xf32>
    %137 = arith.addf %136, %135 : vector<2x128xf32>
    %138 = arith.divf %136, %137 : vector<2x128xf32>
    %139 = vector.extract_strided_slice %121 {offsets = [0, 256], sizes = [2, 128], strides = [1, 1]} : vector<2x384xf32> to vector<2x128xf32>
    %140 = vector.extract_strided_slice %122 {offsets = [0, 256], sizes = [2, 128], strides = [1, 1]} : vector<2x384xf32> to vector<2x128xf32>
    %141 = arith.mulf %130, %140 : vector<2x128xf32>
    %142 = arith.addf %139, %141 : vector<2x128xf32>
    %143 = math.tanh %142 : vector<2x128xf32>
    %cst_52 = arith.constant 1.000000e+00 : f32
    %144 = vector.broadcast %cst_52 : f32 to vector<2x128xf32>
    %145 = arith.subf %144, %138 : vector<2x128xf32>
    %146 = arith.mulf %145, %143 : vector<2x128xf32>
    %147 = arith.mulf %138, %115 : vector<2x128xf32>
    %148 = arith.addf %146, %147 : vector<2x128xf32>
    %149 = vector.shape_cast %148 : vector<2x128xf32> to vector<2x1x128xf32>
    %c0_53 = arith.constant 0 : index
    %150 = arith.index_cast %c3_i32 : i32 to index
    %c0_54 = arith.constant 0 : index
    %151 = vector.load %arg15[%c0_53, %150, %c0_54] : memref<2x8x128xf32, #tpu.memory_space<vmem>>, vector<2x1x128xf32>
    tpu.vector_store %arg15[%c0_53, %150, %c0_54], %149 {strides = array<i32>} : memref<2x8x128xf32, #tpu.memory_space<vmem>>, vector<2x1x128xf32>,
    %c4_i32 = arith.constant 4 : i32
    %c0_55 = arith.constant 0 : index
    %152 = arith.index_cast %c4_i32 : i32 to index
    %c0_56 = arith.constant 0 : index
    %153 = vector.load %arg14[%c0_55, %152, %c0_56] : memref<2x8x384xf32, #tpu.memory_space<vmem>>, vector<2x1x384xf32>
    %154 = vector.shape_cast %153 : vector<2x1x384xf32> to vector<2x384xf32>
    %cst_57 = arith.constant dense<0.000000e+00> : vector<2x384xf32>
    %155 = tpu.matmul %148, %18, %cst_57 {dimension_numbers = #tpu.dot_dimension_numbers<[1], [0], [0], [1], [0, 0, 1, 1], [], []>} : vector<2x128xf32>, vector<128x384xf32>, vector<2x384xf32> -> vector<2x384xf32>
    %156 = vector.extract_strided_slice %154 {offsets = [0, 0], sizes = [2, 128], strides = [1, 1]} : vector<2x384xf32> to vector<2x128xf32>
    %157 = vector.extract_strided_slice %155 {offsets = [0, 0], sizes = [2, 128], strides = [1, 1]} : vector<2x384xf32> to vector<2x128xf32>
    %158 = arith.addf %156, %157 : vector<2x128xf32>
    %159 = arith.negf %158 : vector<2x128xf32>
    %160 = math.exp %159 : vector<2x128xf32>
    %cst_58 = arith.constant 1.000000e+00 : f32
    %161 = vector.broadcast %cst_58 : f32 to vector<2x128xf32>
    %162 = arith.addf %161, %160 : vector<2x128xf32>
    %163 = arith.divf %161, %162 : vector<2x128xf32>
    %164 = vector.extract_strided_slice %154 {offsets = [0, 128], sizes = [2, 128], strides = [1, 1]} : vector<2x384xf32> to vector<2x128xf32>
    %165 = vector.extract_strided_slice %155 {offsets = [0, 128], sizes = [2, 128], strides = [1, 1]} : vector<2x384xf32> to vector<2x128xf32>
    %166 = arith.addf %164, %165 : vector<2x128xf32>
    %167 = arith.negf %166 : vector<2x128xf32>
    %168 = math.exp %167 : vector<2x128xf32>
    %cst_59 = arith.constant 1.000000e+00 : f32
    %169 = vector.broadcast %cst_59 : f32 to vector<2x128xf32>
    %170 = arith.addf %169, %168 : vector<2x128xf32>
    %171 = arith.divf %169, %170 : vector<2x128xf32>
    %172 = vector.extract_strided_slice %154 {offsets = [0, 256], sizes = [2, 128], strides = [1, 1]} : vector<2x384xf32> to vector<2x128xf32>
    %173 = vector.extract_strided_slice %155 {offsets = [0, 256], sizes = [2, 128], strides = [1, 1]} : vector<2x384xf32> to vector<2x128xf32>
    %174 = arith.mulf %163, %173 : vector<2x128xf32>
    %175 = arith.addf %172, %174 : vector<2x128xf32>
    %176 = math.tanh %175 : vector<2x128xf32>
    %cst_60 = arith.constant 1.000000e+00 : f32
    %177 = vector.broadcast %cst_60 : f32 to vector<2x128xf32>
    %178 = arith.subf %177, %171 : vector<2x128xf32>
    %179 = arith.mulf %178, %176 : vector<2x128xf32>
    %180 = arith.mulf %171, %148 : vector<2x128xf32>
    %181 = arith.addf %179, %180 : vector<2x128xf32>
    %182 = vector.shape_cast %181 : vector<2x128xf32> to vector<2x1x128xf32>
    %c0_61 = arith.constant 0 : index
    %183 = arith.index_cast %c4_i32 : i32 to index
    %c0_62 = arith.constant 0 : index
    %184 = vector.load %arg15[%c0_61, %183, %c0_62] : memref<2x8x128xf32, #tpu.memory_space<vmem>>, vector<2x1x128xf32>
    tpu.vector_store %arg15[%c0_61, %183, %c0_62], %182 {strides = array<i32>} : memref<2x8x128xf32, #tpu.memory_space<vmem>>, vector<2x1x128xf32>,
    %c5_i32 = arith.constant 5 : i32
    %c0_63 = arith.constant 0 : index
    %185 = arith.index_cast %c5_i32 : i32 to index
    %c0_64 = arith.constant 0 : index
    %186 = vector.load %arg14[%c0_63, %185, %c0_64] : memref<2x8x384xf32, #tpu.memory_space<vmem>>, vector<2x1x384xf32>
    %187 = vector.shape_cast %186 : vector<2x1x384xf32> to vector<2x384xf32>
    %cst_65 = arith.constant dense<0.000000e+00> : vector<2x384xf32>
    %188 = tpu.matmul %181, %18, %cst_65 {dimension_numbers = #tpu.dot_dimension_numbers<[1], [0], [0], [1], [0, 0, 1, 1], [], []>} : vector<2x128xf32>, vector<128x384xf32>, vector<2x384xf32> -> vector<2x384xf32>
    %189 = vector.extract_strided_slice %187 {offsets = [0, 0], sizes = [2, 128], strides = [1, 1]} : vector<2x384xf32> to vector<2x128xf32>
    %190 = vector.extract_strided_slice %188 {offsets = [0, 0], sizes = [2, 128], strides = [1, 1]} : vector<2x384xf32> to vector<2x128xf32>
    %191 = arith.addf %189, %190 : vector<2x128xf32>
    %192 = arith.negf %191 : vector<2x128xf32>
    %193 = math.exp %192 : vector<2x128xf32>
    %cst_66 = arith.constant 1.000000e+00 : f32
    %194 = vector.broadcast %cst_66 : f32 to vector<2x128xf32>
    %195 = arith.addf %194, %193 : vector<2x128xf32>
    %196 = arith.divf %194, %195 : vector<2x128xf32>
    %197 = vector.extract_strided_slice %187 {offsets = [0, 128], sizes = [2, 128], strides = [1, 1]} : vector<2x384xf32> to vector<2x128xf32>
    %198 = vector.extract_strided_slice %188 {offsets = [0, 128], sizes = [2, 128], strides = [1, 1]} : vector<2x384xf32> to vector<2x128xf32>
    %199 = arith.addf %197, %198 : vector<2x128xf32>
    %200 = arith.negf %199 : vector<2x128xf32>
    %201 = math.exp %200 : vector<2x128xf32>
    %cst_67 = arith.constant 1.000000e+00 : f32
    %202 = vector.broadcast %cst_67 : f32 to vector<2x128xf32>
    %203 = arith.addf %202, %201 : vector<2x128xf32>
    %204 = arith.divf %202, %203 : vector<2x128xf32>
    %205 = vector.extract_strided_slice %187 {offsets = [0, 256], sizes = [2, 128], strides = [1, 1]} : vector<2x384xf32> to vector<2x128xf32>
    %206 = vector.extract_strided_slice %188 {offsets = [0, 256], sizes = [2, 128], strides = [1, 1]} : vector<2x384xf32> to vector<2x128xf32>
    %207 = arith.mulf %196, %206 : vector<2x128xf32>
    %208 = arith.addf %205, %207 : vector<2x128xf32>
    %209 = math.tanh %208 : vector<2x128xf32>
    %cst_68 = arith.constant 1.000000e+00 : f32
    %210 = vector.broadcast %cst_68 : f32 to vector<2x128xf32>
    %211 = arith.subf %210, %204 : vector<2x128xf32>
    %212 = arith.mulf %211, %209 : vector<2x128xf32>
    %213 = arith.mulf %204, %181 : vector<2x128xf32>
    %214 = arith.addf %212, %213 : vector<2x128xf32>
    %215 = vector.shape_cast %214 : vector<2x128xf32> to vector<2x1x128xf32>
    %c0_69 = arith.constant 0 : index
    %216 = arith.index_cast %c5_i32 : i32 to index
    %c0_70 = arith.constant 0 : index
    %217 = vector.load %arg15[%c0_69, %216, %c0_70] : memref<2x8x128xf32, #tpu.memory_space<vmem>>, vector<2x1x128xf32>
    tpu.vector_store %arg15[%c0_69, %216, %c0_70], %215 {strides = array<i32>} : memref<2x8x128xf32, #tpu.memory_space<vmem>>, vector<2x1x128xf32>,
    %c6_i32 = arith.constant 6 : i32
    %c0_71 = arith.constant 0 : index
    %218 = arith.index_cast %c6_i32 : i32 to index
    %c0_72 = arith.constant 0 : index
    %219 = vector.load %arg14[%c0_71, %218, %c0_72] : memref<2x8x384xf32, #tpu.memory_space<vmem>>, vector<2x1x384xf32>
    %220 = vector.shape_cast %219 : vector<2x1x384xf32> to vector<2x384xf32>
    %cst_73 = arith.constant dense<0.000000e+00> : vector<2x384xf32>
    %221 = tpu.matmul %214, %18, %cst_73 {dimension_numbers = #tpu.dot_dimension_numbers<[1], [0], [0], [1], [0, 0, 1, 1], [], []>} : vector<2x128xf32>, vector<128x384xf32>, vector<2x384xf32> -> vector<2x384xf32>
    %222 = vector.extract_strided_slice %220 {offsets = [0, 0], sizes = [2, 128], strides = [1, 1]} : vector<2x384xf32> to vector<2x128xf32>
    %223 = vector.extract_strided_slice %221 {offsets = [0, 0], sizes = [2, 128], strides = [1, 1]} : vector<2x384xf32> to vector<2x128xf32>
    %224 = arith.addf %222, %223 : vector<2x128xf32>
    %225 = arith.negf %224 : vector<2x128xf32>
    %226 = math.exp %225 : vector<2x128xf32>
    %cst_74 = arith.constant 1.000000e+00 : f32
    %227 = vector.broadcast %cst_74 : f32 to vector<2x128xf32>
    %228 = arith.addf %227, %226 : vector<2x128xf32>
    %229 = arith.divf %227, %228 : vector<2x128xf32>
    %230 = vector.extract_strided_slice %220 {offsets = [0, 128], sizes = [2, 128], strides = [1, 1]} : vector<2x384xf32> to vector<2x128xf32>
    %231 = vector.extract_strided_slice %221 {offsets = [0, 128], sizes = [2, 128], strides = [1, 1]} : vector<2x384xf32> to vector<2x128xf32>
    %232 = arith.addf %230, %231 : vector<2x128xf32>
    %233 = arith.negf %232 : vector<2x128xf32>
    %234 = math.exp %233 : vector<2x128xf32>
    %cst_75 = arith.constant 1.000000e+00 : f32
    %235 = vector.broadcast %cst_75 : f32 to vector<2x128xf32>
    %236 = arith.addf %235, %234 : vector<2x128xf32>
    %237 = arith.divf %235, %236 : vector<2x128xf32>
    %238 = vector.extract_strided_slice %220 {offsets = [0, 256], sizes = [2, 128], strides = [1, 1]} : vector<2x384xf32> to vector<2x128xf32>
    %239 = vector.extract_strided_slice %221 {offsets = [0, 256], sizes = [2, 128], strides = [1, 1]} : vector<2x384xf32> to vector<2x128xf32>
    %240 = arith.mulf %229, %239 : vector<2x128xf32>
    %241 = arith.addf %238, %240 : vector<2x128xf32>
    %242 = math.tanh %241 : vector<2x128xf32>
    %cst_76 = arith.constant 1.000000e+00 : f32
    %243 = vector.broadcast %cst_76 : f32 to vector<2x128xf32>
    %244 = arith.subf %243, %237 : vector<2x128xf32>
    %245 = arith.mulf %244, %242 : vector<2x128xf32>
    %246 = arith.mulf %237, %214 : vector<2x128xf32>
    %247 = arith.addf %245, %246 : vector<2x128xf32>
    %248 = vector.shape_cast %247 : vector<2x128xf32> to vector<2x1x128xf32>
    %c0_77 = arith.constant 0 : index
    %249 = arith.index_cast %c6_i32 : i32 to index
    %c0_78 = arith.constant 0 : index
    %250 = vector.load %arg15[%c0_77, %249, %c0_78] : memref<2x8x128xf32, #tpu.memory_space<vmem>>, vector<2x1x128xf32>
    tpu.vector_store %arg15[%c0_77, %249, %c0_78], %248 {strides = array<i32>} : memref<2x8x128xf32, #tpu.memory_space<vmem>>, vector<2x1x128xf32>,
    %c7_i32 = arith.constant 7 : i32
    %c0_79 = arith.constant 0 : index
    %251 = arith.index_cast %c7_i32 : i32 to index
    %c0_80 = arith.constant 0 : index
    %252 = vector.load %arg14[%c0_79, %251, %c0_80] : memref<2x8x384xf32, #tpu.memory_space<vmem>>, vector<2x1x384xf32>
    %253 = vector.shape_cast %252 : vector<2x1x384xf32> to vector<2x384xf32>
    %cst_81 = arith.constant dense<0.000000e+00> : vector<2x384xf32>
    %254 = tpu.matmul %247, %18, %cst_81 {dimension_numbers = #tpu.dot_dimension_numbers<[1], [0], [0], [1], [0, 0, 1, 1], [], []>} : vector<2x128xf32>, vector<128x384xf32>, vector<2x384xf32> -> vector<2x384xf32>
    %255 = vector.extract_strided_slice %253 {offsets = [0, 0], sizes = [2, 128], strides = [1, 1]} : vector<2x384xf32> to vector<2x128xf32>
    %256 = vector.extract_strided_slice %254 {offsets = [0, 0], sizes = [2, 128], strides = [1, 1]} : vector<2x384xf32> to vector<2x128xf32>
    %257 = arith.addf %255, %256 : vector<2x128xf32>
    %258 = arith.negf %257 : vector<2x128xf32>
    %259 = math.exp %258 : vector<2x128xf32>
    %cst_82 = arith.constant 1.000000e+00 : f32
    %260 = vector.broadcast %cst_82 : f32 to vector<2x128xf32>
    %261 = arith.addf %260, %259 : vector<2x128xf32>
    %262 = arith.divf %260, %261 : vector<2x128xf32>
    %263 = vector.extract_strided_slice %253 {offsets = [0, 128], sizes = [2, 128], strides = [1, 1]} : vector<2x384xf32> to vector<2x128xf32>
    %264 = vector.extract_strided_slice %254 {offsets = [0, 128], sizes = [2, 128], strides = [1, 1]} : vector<2x384xf32> to vector<2x128xf32>
    %265 = arith.addf %263, %264 : vector<2x128xf32>
    %266 = arith.negf %265 : vector<2x128xf32>
    %267 = math.exp %266 : vector<2x128xf32>
    %cst_83 = arith.constant 1.000000e+00 : f32
    %268 = vector.broadcast %cst_83 : f32 to vector<2x128xf32>
    %269 = arith.addf %268, %267 : vector<2x128xf32>
    %270 = arith.divf %268, %269 : vector<2x128xf32>
    %271 = vector.extract_strided_slice %253 {offsets = [0, 256], sizes = [2, 128], strides = [1, 1]} : vector<2x384xf32> to vector<2x128xf32>
    %272 = vector.extract_strided_slice %254 {offsets = [0, 256], sizes = [2, 128], strides = [1, 1]} : vector<2x384xf32> to vector<2x128xf32>
    %273 = arith.mulf %262, %272 : vector<2x128xf32>
    %274 = arith.addf %271, %273 : vector<2x128xf32>
    %275 = math.tanh %274 : vector<2x128xf32>
    %cst_84 = arith.constant 1.000000e+00 : f32
    %276 = vector.broadcast %cst_84 : f32 to vector<2x128xf32>
    %277 = arith.subf %276, %270 : vector<2x128xf32>
    %278 = arith.mulf %277, %275 : vector<2x128xf32>
    %279 = arith.mulf %270, %247 : vector<2x128xf32>
    %280 = arith.addf %278, %279 : vector<2x128xf32>
    %281 = vector.shape_cast %280 : vector<2x128xf32> to vector<2x1x128xf32>
    %c0_85 = arith.constant 0 : index
    %282 = arith.index_cast %c7_i32 : i32 to index
    %c0_86 = arith.constant 0 : index
    %283 = vector.load %arg15[%c0_85, %282, %c0_86] : memref<2x8x128xf32, #tpu.memory_space<vmem>>, vector<2x1x128xf32>
    tpu.vector_store %arg15[%c0_85, %282, %c0_86], %281 {strides = array<i32>} : memref<2x8x128xf32, #tpu.memory_space<vmem>>, vector<2x1x128xf32>,
    %c8_i32 = arith.constant 8 : i32
    %c0_87 = arith.constant 0 : index
    %c0_88 = arith.constant 0 : index
    %284 = vector.load %arg13[%c0_87, %c0_88] : memref<2x128xf32, #tpu.memory_space<vmem>>, vector<2x128xf32>
    tpu.vector_store %arg13[%c0_87, %c0_88], %280 {strides = array<i32>} : memref<2x128xf32, #tpu.memory_space<vmem>>, vector<2x128xf32>,
    %c0_89 = arith.constant 0 : index
    %c0_90 = arith.constant 0 : index
    %c0_91 = arith.constant 0 : index
    %285 = vector.load %arg15[%c0_89, %c0_90, %c0_91] : memref<2x8x128xf32, #tpu.memory_space<vmem>>, vector<2x8x16xf32>
    %286 = vector.broadcast %4 : vector<2x8x1xf32> to vector<2x8x16xf32>
    %287 = arith.mulf %285, %286 : vector<2x8x16xf32>
    %c0_92 = arith.constant 0 : index
    %c0_93 = arith.constant 0 : index
    %c0_94 = arith.constant 0 : index
    %c0_95 = arith.constant 0 : index
    %288 = vector.load %arg11[%c0_92, %c0_93, %c0_94, %c0_95] : memref<1x2x8x16xf32, #tpu.memory_space<vmem>>, vector<1x2x8x16xf32>
    %289 = vector.shape_cast %288 : vector<1x2x8x16xf32> to vector<2x8x16xf32>
    %290 = vector.shape_cast %287 : vector<2x8x16xf32> to vector<1x2x8x16xf32>
    tpu.vector_store %arg11[%c0_92, %c0_93, %c0_94, %c0_95], %290 {strides = array<i32>} : memref<1x2x8x16xf32, #tpu.memory_space<vmem>>, vector<1x2x8x16xf32>,
    %c0_96 = arith.constant 0 : index
    %c0_97 = arith.constant 0 : index
    %c0_98 = arith.constant 0 : index
    %291 = vector.load %arg8[%c0_96, %c0_97, %c0_98] : memref<1x1x16xf32, #tpu.memory_space<vmem>>, vector<1x1x16xf32>
    %292 = vector.shape_cast %291 : vector<1x1x16xf32> to vector<1x16xf32>
    %293 = vector.shape_cast %292 : vector<1x16xf32> to vector<1x1x16xf32>
    %294 = vector.broadcast %293 : vector<1x1x16xf32> to vector<2x8x16xf32>
    %295 = arith.mulf %287, %294 : vector<2x8x16xf32>
    %cst_99 = arith.constant dense<0.000000e+00> : vector<2x8xf32>
    %296 = vector.multi_reduction <add>, %295, %cst_99 [2] : vector<2x8x16xf32> to vector<2x8xf32>
    %cst_100 = arith.constant dense<0xFF800000> : vector<2xf32>
    %297 = vector.multi_reduction <maximumf>, %296, %cst_100 [1] : vector<2x8xf32> to vector<2xf32>
    %298 = vector.shape_cast %297 : vector<2xf32> to vector<2x1xf32>
    %c0_101 = arith.constant 0 : index
    %c0_102 = arith.constant 0 : index
    %299 = vector.load %arg16[%c0_101, %c0_102] : memref<2x1xf32, #tpu.memory_space<vmem>>, vector<2x1xf32>
    %300 = arith.maximumf %299, %298 : vector<2x1xf32>
    %c0_103 = arith.constant 0 : index
    %c0_104 = arith.constant 0 : index
    %301 = vector.load %arg16[%c0_103, %c0_104] : memref<2x1xf32, #tpu.memory_space<vmem>>, vector<2x1xf32>
    %302 = arith.subf %301, %300 : vector<2x1xf32>
    %303 = math.exp %302 : vector<2x1xf32>
    %304 = vector.broadcast %300 : vector<2x1xf32> to vector<2x8xf32>
    %305 = arith.subf %296, %304 : vector<2x8xf32>
    %306 = math.exp %305 : vector<2x8xf32>
    %c0_105 = arith.constant 0 : index
    %c0_106 = arith.constant 0 : index
    %307 = vector.load %arg17[%c0_105, %c0_106] : memref<2x1xf32, #tpu.memory_space<vmem>>, vector<2x1xf32>
    %308 = arith.mulf %303, %307 : vector<2x1xf32>
    %cst_107 = arith.constant dense<0.000000e+00> : vector<2xf32>
    %309 = vector.multi_reduction <add>, %306, %cst_107 [1] : vector<2x8xf32> to vector<2xf32>
    %310 = vector.shape_cast %309 : vector<2xf32> to vector<2x1xf32>
    %311 = arith.addf %308, %310 : vector<2x1xf32>
    %c0_108 = arith.constant 0 : index
    %c0_109 = arith.constant 0 : index
    %312 = vector.load %arg17[%c0_108, %c0_109] : memref<2x1xf32, #tpu.memory_space<vmem>>, vector<2x1xf32>
    tpu.vector_store %arg17[%c0_108, %c0_109], %311 {strides = array<i32>} : memref<2x1xf32, #tpu.memory_space<vmem>>, vector<2x1xf32>,
    %313 = vector.broadcast %4 : vector<2x8x1xf32> to vector<2x8x32xf32>
    %314 = arith.mulf %3, %313 : vector<2x8x32xf32>
    %315 = vector.shape_cast %306 : vector<2x8xf32> to vector<2x1x8xf32>
    "tpu.trace_start"() <{level = 10 : i32, message = "bst,btd->bsd"}> : () -> ()
    %cst_110 = arith.constant dense<0.000000e+00> : vector<2x1x32xf32>
    %316 = tpu.matmul %315, %314, %cst_110 {dimension_numbers = #tpu.dot_dimension_numbers<[2], [1], [1], [2], [0, 0, 0, 1, 1, 2], [0], [0]>} : vector<2x1x8xf32>, vector<2x8x32xf32>, vector<2x1x32xf32> -> vector<2x1x32xf32>
    "tpu.trace_stop"() : () -> ()
    %c0_111 = arith.constant 0 : index
    %c0_112 = arith.constant 0 : index
    %317 = vector.load %arg18[%c0_111, %c0_112] : memref<2x32xf32, #tpu.memory_space<vmem>>, vector<2x32xf32>
    %318 = vector.broadcast %303 : vector<2x1xf32> to vector<2x32xf32>
    %319 = arith.mulf %318, %317 : vector<2x32xf32>
    %320 = vector.shape_cast %316 : vector<2x1x32xf32> to vector<2x32xf32>
    %321 = arith.addf %319, %320 : vector<2x32xf32>
    %c0_113 = arith.constant 0 : index
    %c0_114 = arith.constant 0 : index
    %322 = vector.load %arg18[%c0_113, %c0_114] : memref<2x32xf32, #tpu.memory_space<vmem>>, vector<2x32xf32>
    tpu.vector_store %arg18[%c0_113, %c0_114], %321 {strides = array<i32>} : memref<2x32xf32, #tpu.memory_space<vmem>>, vector<2x32xf32>,
    %c0_115 = arith.constant 0 : index
    %c0_116 = arith.constant 0 : index
    %323 = vector.load %arg16[%c0_115, %c0_116] : memref<2x1xf32, #tpu.memory_space<vmem>>, vector<2x1xf32>
    tpu.vector_store %arg16[%c0_115, %c0_116], %300 {strides = array<i32>} : memref<2x1xf32, #tpu.memory_space<vmem>>, vector<2x1xf32>,
    %c0_i32_117 = arith.constant 0 : i32
    %324 = arith.cmpi eq, %arg1, %c0_i32_117 : i32
    %325 = arith.extui %324 : i1 to i32
    %c0_i32_118 = arith.constant 0 : i32
    %326 = arith.cmpi ne, %325, %c0_i32_118 : i32
    scf.if %326 {
      %c0_119 = arith.constant 0 : index
      %c0_120 = arith.constant 0 : index
      %327 = vector.load %arg18[%c0_119, %c0_120] : memref<2x32xf32, #tpu.memory_space<vmem>>, vector<2x32xf32>
      %c0_121 = arith.constant 0 : index
      %c0_122 = arith.constant 0 : index
      %328 = vector.load %arg17[%c0_121, %c0_122] : memref<2x1xf32, #tpu.memory_space<vmem>>, vector<2x1xf32>
      %329 = vector.broadcast %328 : vector<2x1xf32> to vector<2x32xf32>
      %330 = arith.divf %327, %329 : vector<2x32xf32>
      %c0_123 = arith.constant 0 : index
      %c0_124 = arith.constant 0 : index
      %c0_125 = arith.constant 0 : index
      %331 = vector.load %arg9[%c0_123, %c0_124, %c0_125] : memref<1x2x32xf32, #tpu.memory_space<vmem>>, vector<1x2x32xf32>
      %332 = vector.shape_cast %331 : vector<1x2x32xf32> to vector<2x32xf32>
      %c0_126 = arith.constant 0 : index
      %c0_127 = arith.constant 0 : index
      %333 = vector.load %arg10[%c0_126, %c0_127] : memref<32x32xf32, #tpu.memory_space<vmem>>, vector<32x32xf32>
      %cst_128 = arith.constant dense<0.000000e+00> : vector<2x32xf32>
      %334 = tpu.matmul %332, %333, %cst_128 {dimension_numbers = #tpu.dot_dimension_numbers<[1], [0], [0], [1], [0, 0, 1, 1], [], []>} : vector<2x32xf32>, vector<32x32xf32>, vector<2x32xf32> -> vector<2x32xf32>
      %335 = math.tanh %334 : vector<2x32xf32>
      %336 = arith.addf %335, %330 : vector<2x32xf32>
      %c0_129 = arith.constant 0 : index
      %c0_130 = arith.constant 0 : index
      %c0_131 = arith.constant 0 : index
      %337 = vector.load %arg12[%c0_129, %c0_130, %c0_131] : memref<1x2x32xf32, #tpu.memory_space<vmem>>, vector<1x2x32xf32>
      %338 = vector.shape_cast %337 : vector<1x2x32xf32> to vector<2x32xf32>
      %339 = vector.shape_cast %336 : vector<2x32xf32> to vector<1x2x32xf32>
      tpu.vector_store %arg12[%c0_129, %c0_130, %c0_131], %339 {strides = array<i32>} : memref<1x2x32xf32, #tpu.memory_space<vmem>>, vector<1x2x32xf32>,
    } else {
    }
    return
  }
  func.func @transform_0(%arg0: i32, %arg1: i32) -> (i32, i32, i32) {
    %c0_i32 = arith.constant 0 : i32
    %c0_i32_0 = arith.constant 0 : i32
    %c0_i32_1 = arith.constant 0 : i32
    return %c0_i32, %arg1, %c0_i32_0 : i32, i32, i32
  }
  func.func @transform_1(%arg0: i32, %arg1: i32) -> (i32, i32, i32) {
    %c0_i32 = arith.constant 0 : i32
    %c0_i32_0 = arith.constant 0 : i32
    %c0_i32_1 = arith.constant 0 : i32
    return %c0_i32, %arg1, %c0_i32_0 : i32, i32, i32
  }
  func.func @transform_2(%arg0: i32, %arg1: i32) -> (i32, i32, i32, i32) {
    %c0_i32 = arith.constant 0 : i32
    %c0_i32_0 = arith.constant 0 : i32
    %c0_i32_1 = arith.constant 0 : i32
    %c0_i32_2 = arith.constant 0 : i32
    return %arg0, %c0_i32, %c0_i32_0, %c0_i32_1 : i32, i32, i32, i32
  }
  func.func @transform_3(%arg0: i32, %arg1: i32) -> (i32, i32, i32) {
    %c0_i32 = arith.constant 0 : i32
    %c0_i32_0 = arith.constant 0 : i32
    %c0_i32_1 = arith.constant 0 : i32
    return %arg0, %c0_i32, %c0_i32_0 : i32, i32, i32
  }
  func.func @transform_4(%arg0: i32, %arg1: i32) -> (i32, i32, i32) {
    %c0_i32 = arith.constant 0 : i32
    %c0_i32_0 = arith.constant 0 : i32
    %c0_i32_1 = arith.constant 0 : i32
    return %arg0, %c0_i32, %c0_i32_0 : i32, i32, i32
  }
  func.func @transform_5(%arg0: i32, %arg1: i32) -> (i32, i32, i32) {
    %c0_i32 = arith.constant 0 : i32
    %c0_i32_0 = arith.constant 0 : i32
    %c0_i32_1 = arith.constant 0 : i32
    return %arg0, %c0_i32, %c0_i32_0 : i32, i32, i32
  }
  func.func @transform_6(%arg0: i32, %arg1: i32) -> (i32, i32, i32) {
    %c0_i32 = arith.constant 0 : i32
    %c0_i32_0 = arith.constant 0 : i32
    %c0_i32_1 = arith.constant 0 : i32
    return %arg0, %c0_i32, %c0_i32_0 : i32, i32, i32
  }
  func.func @transform_7(%arg0: i32, %arg1: i32) -> (i32, i32, i32) {
    %c0_i32 = arith.constant 0 : i32
    %c0_i32_0 = arith.constant 0 : i32
    %c0_i32_1 = arith.constant 0 : i32
    return %arg0, %c0_i32, %c0_i32_0 : i32, i32, i32
  }
  func.func @transform_8(%arg0: i32, %arg1: i32) -> (i32, i32) {
    %c0_i32 = arith.constant 0 : i32
    %c0_i32_0 = arith.constant 0 : i32
    %c0_i32_1 = arith.constant 0 : i32
    return %c0_i32, %c0_i32_0 : i32, i32
  }
  func.func @transform_9(%arg0: i32, %arg1: i32) -> (i32, i32, i32, i32) {
    %c0_i32 = arith.constant 0 : i32
    %c0_i32_0 = arith.constant 0 : i32
    %c0_i32_1 = arith.constant 0 : i32
    return %arg0, %c0_i32, %arg1, %c0_i32_0 : i32, i32, i32, i32
  }
  func.func @transform_10(%arg0: i32, %arg1: i32) -> (i32, i32, i32) {
    %c0_i32 = arith.constant 0 : i32
    %c0_i32_0 = arith.constant 0 : i32
    %c0_i32_1 = arith.constant 0 : i32
    return %arg0, %c0_i32, %c0_i32_0 : i32, i32, i32
  }
}

module attributes {stable_mosaic.version = 11 : i64} {
  func.func @_att_proto_kernel(%arg0: i32, %arg1: i32, %arg2: memref<2x8x32xf32, #tpu.memory_space<vmem>>, %arg3: memref<2x8x1xf32, #tpu.memory_space<vmem>>, %arg4: memref<1x2x16x32xf32, #tpu.memory_space<vmem>>, %arg5: memref<1x16x384xf32, #tpu.memory_space<vmem>>, %arg6: memref<1x128x384xf32, #tpu.memory_space<vmem>>, %arg7: memref<1x1x128xf32, #tpu.memory_space<vmem>>, %arg8: memref<1x1x16xf32, #tpu.memory_space<vmem>>, %arg9: memref<1x2x32xf32, #tpu.memory_space<vmem>>, %arg10: memref<32x32xf32, #tpu.memory_space<vmem>>, %arg11: memref<1x2x8x16xf32, #tpu.memory_space<vmem>>, %arg12: memref<1x2x32xf32, #tpu.memory_space<vmem>>, %arg13: memref<2x128xf32, #tpu.memory_space<vmem>>, %arg14: memref<2x8x384xf32, #tpu.memory_space<vmem>>, %arg15: memref<2x8x128xf32, #tpu.memory_space<vmem>>, %arg16: memref<2x1xf32, #tpu.memory_space<vmem>>, %arg17: memref<2x1xf32, #tpu.memory_space<vmem>>, %arg18: memref<2x32xf32, #tpu.memory_space<vmem>>) attributes {dimension_semantics = [#tpu.dimension_semantics<parallel>, #tpu.dimension_semantics<arbitrary>], iteration_bounds = array<i64: 2, 1>, scalar_prefetch = 0 : i64, scratch_operands = 6 : i64, tpu.core_type = #tpu.core_type<tc>, window_params = [{transform_indices = @transform_0, window_bounds = array<i64: 2, 8, 32>}, {transform_indices = @transform_1, window_bounds = array<i64: 2, 8, 1>}, {transform_indices = @transform_2, window_bounds = array<i64: 1, 2, 16, 32>}, {transform_indices = @transform_3, window_bounds = array<i64: 1, 16, 384>}, {transform_indices = @transform_4, window_bounds = array<i64: 1, 128, 384>}, {transform_indices = @transform_5, window_bounds = array<i64: 1, 1, 128>}, {transform_indices = @transform_6, window_bounds = array<i64: 1, 1, 16>}, {transform_indices = @transform_7, window_bounds = array<i64: 1, 2, 32>}, {pipeline_mode = #tpu.pipeline_mode<synchronous>, transform_indices = @transform_8, window_bounds = array<i64: 32, 32>}, {transform_indices = @transform_9, window_bounds = array<i64: 1, 2, 8, 16>}, {transform_indices = @transform_10, window_bounds = array<i64: 1, 2, 32>}]} {
    %c0_i32 = arith.constant 0 : i32
    %0 = arith.cmpi eq, %arg1, %c0_i32 : i32
    %1 = arith.extui %0 : i1 to i32
    %c0_i32_0 = arith.constant 0 : i32
    %2 = arith.cmpi ne, %1, %c0_i32_0 : i32
    scf.if %2 {
      %c0_119 = arith.constant 0 : index
      %c0_120 = arith.constant 0 : index
      %c0_121 = arith.constant 0 : index
      %327 = vector.load %arg7[%c0_119, %c0_120, %c0_121] : memref<1x1x128xf32, #tpu.memory_space<vmem>>, vector<1x1x128xf32>
      %328 = vector.shape_cast %327 : vector<1x1x128xf32> to vector<1x128xf32>
      %329 = vector.shape_cast %328 : vector<1x128xf32> to vector<1x128xf32>
      %330 = vector.broadcast %329 : vector<1x128xf32> to vector<2x128xf32>
      %c0_122 = arith.constant 0 : index
      %c0_123 = arith.constant 0 : index
      %331 = vector.load %arg13[%c0_122, %c0_123] : memref<2x128xf32, #tpu.memory_space<vmem>>, vector<2x128xf32>
      tpu.vector_store %arg13[%c0_122, %c0_123], %330 {strides = array<i32>} : memref<2x128xf32, #tpu.memory_space<vmem>>, vector<2x128xf32>,
      %cst_124 = arith.constant 0xFF800000 : f32
      %332 = vector.broadcast %cst_124 : f32 to vector<2x1xf32>
      %c0_125 = arith.constant 0 : index
      %c0_126 = arith.constant 0 : index
      %333 = vector.load %arg16[%c0_125, %c0_126] : memref<2x1xf32, #tpu.memory_space<vmem>>, vector<2x1xf32>
      tpu.vector_store %arg16[%c0_125, %c0_126], %332 {strides = array<i32>} : memref<2x1xf32, #tpu.memory_space<vmem>>, vector<2x1xf32>,
      %cst_127 = arith.constant 0.000000e+00 : f32
      %334 = vector.broadcast %cst_127 : f32 to vector<2x1xf32>
      %c0_128 = arith.constant 0 : index
      %c0_129 = arith.constant 0 : index
      %335 = vector.load %arg17[%c0_128, %c0_129] : memref<2x1xf32, #tpu.memory_space<vmem>>, vector<2x1xf32>
      tpu.vector_store %arg17[%c0_128, %c0_129], %334 {strides = array<i32>} : memref<2x1xf32, #tpu.memory_space<vmem>>, vector<2x1xf32>,
      %cst_130 = arith.constant 0.000000e+00 : f32
      %336 = vector.broadcast %cst_130 : f32 to vector<2x32xf32>
      %c0_131 = arith.constant 0 : index
      %c0_132 = arith.constant 0 : index
      %337 = vector.load %arg18[%c0_131, %c0_132] : memref<2x32xf32, #tpu.memory_space<vmem>>, vector<2x32xf32>
      tpu.vector_store %arg18[%c0_131, %c0_132], %336 {strides = array<i32>} : memref<2x32xf32, #tpu.memory_space<vmem>>, vector<2x32xf32>,
    } else {
    }
    %c0 = arith.constant 0 : index
    %c0_1 = arith.constant 0 : index
    %c0_2 = arith.constant 0 : index
    %3 = vector.load %arg2[%c0, %c0_1, %c0_2] : memref<2x8x32xf32, #tpu.memory_space<vmem>>, vector<2x8x32xf32>
    %c0_3 = arith.constant 0 : index
    %c0_4 = arith.constant 0 : index
    %c0_5 = arith.constant 0 : index
    %4 = vector.load %arg3[%c0_3, %c0_4, %c0_5] : memref<2x8x1xf32, #tpu.memory_space<vmem>>, vector<2x8x1xf32>
    %c0_6 = arith.constant 0 : index
    %c0_7 = arith.constant 0 : index
    %c0_8 = arith.constant 0 : index
    %c0_9 = arith.constant 0 : index
    %5 = vector.load %arg4[%c0_6, %c0_7, %c0_8, %c0_9] : memref<1x2x16x32xf32, #tpu.memory_space<vmem>>, vector<1x2x16x32xf32>
    %6 = vector.shape_cast %5 : vector<1x2x16x32xf32> to vector<2x16x32xf32>
    "tpu.trace_start"() <{level = 10 : i32, message = "btd,bkd->btk"}> : () -> ()
    %cst = arith.constant dense<0.000000e+00> : vector<2x8x16xf32>
    %7 = tpu.matmul %3, %6, %cst {dimension_numbers = #tpu.dot_dimension_numbers<[2], [2], [1], [1], [0, 0, 0, 1, 1, 1], [0], [0]>} : vector<2x8x32xf32>, vector<2x16x32xf32>, vector<2x8x16xf32> -> vector<2x8x16xf32>
    "tpu.trace_stop"() : () -> ()
    %8 = math.tanh %7 : vector<2x8x16xf32>
    %9 = vector.broadcast %4 : vector<2x8x1xf32> to vector<2x8x16xf32>
    %10 = arith.mulf %8, %9 : vector<2x8x16xf32>
    %11 = vector.shape_cast %10 : vector<2x8x16xf32> to vector<16x16xf32>
    %c0_10 = arith.constant 0 : index
    %c0_11 = arith.constant 0 : index
    %c0_12 = arith.constant 0 : index
    %12 = vector.load %arg5[%c0_10, %c0_11, %c0_12] : memref<1x16x384xf32, #tpu.memory_space<vmem>>, vector<1x16x384xf32>
    %13 = vector.shape_cast %12 : vector<1x16x384xf32> to vector<16x384xf32>
    %cst_13 = arith.constant dense<0.000000e+00> : vector<16x384xf32>
    %14 = tpu.matmul %11, %13, %cst_13 {dimension_numbers = #tpu.dot_dimension_numbers<[1], [0], [0], [1], [0, 0, 1, 1], [], []>} : vector<16x16xf32>, vector<16x384xf32>, vector<16x384xf32> -> vector<16x384xf32>
    %15 = vector.shape_cast %14 : vector<16x384xf32> to vector<2x8x384xf32>
    %c0_14 = arith.constant 0 : index
    %c0_15 = arith.constant 0 : index
    %c0_16 = arith.constant 0 : index
    %16 = vector.load %arg14[%c0_14, %c0_15, %c0_16] : memref<2x8x384xf32, #tpu.memory_space<vmem>>, vector<2x8x384xf32>
    tpu.vector_store %arg14[%c0_14, %c0_15, %c0_16], %15 {strides = array<i32>} : memref<2x8x384xf32, #tpu.memory_space<vmem>>, vector<2x8x384xf32>,
    %c0_17 = arith.constant 0 : index
    %c0_18 = arith.constant 0 : index
    %c0_19 = arith.constant 0 : index
    %17 = vector.load %arg6[%c0_17, %c0_18, %c0_19] : memref<1x128x384xf32, #tpu.memory_space<vmem>>, vector<1x128x384xf32>
    %18 = vector.shape_cast %17 : vector<1x128x384xf32> to vector<128x384xf32>
    %c0_20 = arith.constant 0 : index
    %c0_21 = arith.constant 0 : index
    %19 = vector.load %arg13[%c0_20, %c0_21] : memref<2x128xf32, #tpu.memory_space<vmem>>, vector<2x128xf32>
    %c0_i32_22 = arith.constant 0 : i32
    %c0_23 = arith.constant 0 : index
    %20 = arith.index_cast %c0_i32_22 : i32 to index
    %c0_24 = arith.constant 0 : index
    %21 = vector.load %arg14[%c0_23, %20, %c0_24] : memref<2x8x384xf32, #tpu.memory_space<vmem>>, vector<2x1x384xf32>
    %22 = vector.shape_cast %21 : vector<2x1x384xf32> to vector<2x384xf32>
    %cst_25 = arith.constant dense<0.000000e+00> : vector<2x384xf32>
    %23 = tpu.matmul %19, %18, %cst_25 {dimension_numbers = #tpu.dot_dimension_numbers<[1], [0], [0], [1], [0, 0, 1, 1], [], []>} : vector<2x128xf32>, vector<128x384xf32>, vector<2x384xf32> -> vector<2x384xf32>
    %24 = vector.extract_strided_slice %22 {offsets = [0, 0], sizes = [2, 128], strides = [1, 1]} : vector<2x384xf32> to vector<2x128xf32>
    %25 = vector.extract_strided_slice %23 {offsets = [0, 0], sizes = [2, 128], strides = [1, 1]} : vector<2x384xf32> to vector<2x128xf32>
    %26 = arith.addf %24, %25 : vector<2x128xf32>
    %27 = arith.negf %26 : vector<2x128xf32>
    %28 = math.exp %27 : vector<2x128xf32>
    %cst_26 = arith.constant 1.000000e+00 : f32
    %29 = vector.broadcast %cst_26 : f32 to vector<2x128xf32>
    %30 = arith.addf %29, %28 : vector<2x128xf32>
    %31 = arith.divf %29, %30 : vector<2x128xf32>
    %32 = vector.extract_strided_slice %22 {offsets = [0, 128], sizes = [2, 128], strides = [1, 1]} : vector<2x384xf32> to vector<2x128xf32>
    %33 = vector.extract_strided_slice %23 {offsets = [0, 128], sizes = [2, 128], strides = [1, 1]} : vector<2x384xf32> to vector<2x128xf32>
    %34 = arith.addf %32, %33 : vector<2x128xf32>
    %35 = arith.negf %34 : vector<2x128xf32>
    %36 = math.exp %35 : vector<2x128xf32>
    %cst_27 = arith.constant 1.000000e+00 : f32
    %37 = vector.broadcast %cst_27 : f32 to vector<2x128xf32>
    %38 = arith.addf %37, %36 : vector<2x128xf32>
    %39 = arith.divf %37, %38 : vector<2x128xf32>
    %40 = vector.extract_strided_slice %22 {offsets = [0, 256], sizes = [2, 128], strides = [1, 1]} : vector<2x384xf32> to vector<2x128xf32>
    %41 = vector.extract_strided_slice %23 {offsets = [0, 256], sizes = [2, 128], strides = [1, 1]} : vector<2x384xf32> to vector<2x128xf32>
    %42 = arith.mulf %31, %41 : vector<2x128xf32>
    %43 = arith.addf %40, %42 : vector<2x128xf32>
    %44 = math.tanh %43 : vector<2x128xf32>
    %cst_28 = arith.constant 1.000000e+00 : f32
    %45 = vector.broadcast %cst_28 : f32 to vector<2x128xf32>
    %46 = arith.subf %45, %39 : vector<2x128xf32>
    %47 = arith.mulf %46, %44 : vector<2x128xf32>
    %48 = arith.mulf %39, %19 : vector<2x128xf32>
    %49 = arith.addf %47, %48 : vector<2x128xf32>
    %50 = vector.shape_cast %49 : vector<2x128xf32> to vector<2x1x128xf32>
    %c0_29 = arith.constant 0 : index
    %51 = arith.index_cast %c0_i32_22 : i32 to index
    %c0_30 = arith.constant 0 : index
    %52 = vector.load %arg15[%c0_29, %51, %c0_30] : memref<2x8x128xf32, #tpu.memory_space<vmem>>, vector<2x1x128xf32>
    tpu.vector_store %arg15[%c0_29, %51, %c0_30], %50 {strides = array<i32>} : memref<2x8x128xf32, #tpu.memory_space<vmem>>, vector<2x1x128xf32>,
    %c1_i32 = arith.constant 1 : i32
    %c0_31 = arith.constant 0 : index
    %53 = arith.index_cast %c1_i32 : i32 to index
    %c0_32 = arith.constant 0 : index
    %54 = vector.load %arg14[%c0_31, %53, %c0_32] : memref<2x8x384xf32, #tpu.memory_space<vmem>>, vector<2x1x384xf32>
    %55 = vector.shape_cast %54 : vector<2x1x384xf32> to vector<2x384xf32>
    %cst_33 = arith.constant dense<0.000000e+00> : vector<2x384xf32>
    %56 = tpu.matmul %49, %18, %cst_33 {dimension_numbers = #tpu.dot_dimension_numbers<[1], [0], [0], [1], [0, 0, 1, 1], [], []>} : vector<2x128xf32>, vector<128x384xf32>, vector<2x384xf32> -> vector<2x384xf32>
    %57 = vector.extract_strided_slice %55 {offsets = [0, 0], sizes = [2, 128], strides = [1, 1]} : vector<2x384xf32> to vector<2x128xf32>
    %58 = vector.extract_strided_slice %56 {offsets = [0, 0], sizes = [2, 128], strides = [1, 1]} : vector<2x384xf32> to vector<2x128xf32>
    %59 = arith.addf %57, %58 : vector<2x128xf32>
    %60 = arith.negf %59 : vector<2x128xf32>
    %61 = math.exp %60 : vector<2x128xf32>
    %cst_34 = arith.constant 1.000000e+00 : f32
    %62 = vector.broadcast %cst_34 : f32 to vector<2x128xf32>
    %63 = arith.addf %62, %61 : vector<2x128xf32>
    %64 = arith.divf %62, %63 : vector<2x128xf32>
    %65 = vector.extract_strided_slice %55 {offsets = [0, 128], sizes = [2, 128], strides = [1, 1]} : vector<2x384xf32> to vector<2x128xf32>
    %66 = vector.extract_strided_slice %56 {offsets = [0, 128], sizes = [2, 128], strides = [1, 1]} : vector<2x384xf32> to vector<2x128xf32>
    %67 = arith.addf %65, %66 : vector<2x128xf32>
    %68 = arith.negf %67 : vector<2x128xf32>
    %69 = math.exp %68 : vector<2x128xf32>
    %cst_35 = arith.constant 1.000000e+00 : f32
    %70 = vector.broadcast %cst_35 : f32 to vector<2x128xf32>
    %71 = arith.addf %70, %69 : vector<2x128xf32>
    %72 = arith.divf %70, %71 : vector<2x128xf32>
    %73 = vector.extract_strided_slice %55 {offsets = [0, 256], sizes = [2, 128], strides = [1, 1]} : vector<2x384xf32> to vector<2x128xf32>
    %74 = vector.extract_strided_slice %56 {offsets = [0, 256], sizes = [2, 128], strides = [1, 1]} : vector<2x384xf32> to vector<2x128xf32>
    %75 = arith.mulf %64, %74 : vector<2x128xf32>
    %76 = arith.addf %73, %75 : vector<2x128xf32>
    %77 = math.tanh %76 : vector<2x128xf32>
    %cst_36 = arith.constant 1.000000e+00 : f32
    %78 = vector.broadcast %cst_36 : f32 to vector<2x128xf32>
    %79 = arith.subf %78, %72 : vector<2x128xf32>
    %80 = arith.mulf %79, %77 : vector<2x128xf32>
    %81 = arith.mulf %72, %49 : vector<2x128xf32>
    %82 = arith.addf %80, %81 : vector<2x128xf32>
    %83 = vector.shape_cast %82 : vector<2x128xf32> to vector<2x1x128xf32>
    %c0_37 = arith.constant 0 : index
    %84 = arith.index_cast %c1_i32 : i32 to index
    %c0_38 = arith.constant 0 : index
    %85 = vector.load %arg15[%c0_37, %84, %c0_38] : memref<2x8x128xf32, #tpu.memory_space<vmem>>, vector<2x1x128xf32>
    tpu.vector_store %arg15[%c0_37, %84, %c0_38], %83 {strides = array<i32>} : memref<2x8x128xf32, #tpu.memory_space<vmem>>, vector<2x1x128xf32>,
    %c2_i32 = arith.constant 2 : i32
    %c0_39 = arith.constant 0 : index
    %86 = arith.index_cast %c2_i32 : i32 to index
    %c0_40 = arith.constant 0 : index
    %87 = vector.load %arg14[%c0_39, %86, %c0_40] : memref<2x8x384xf32, #tpu.memory_space<vmem>>, vector<2x1x384xf32>
    %88 = vector.shape_cast %87 : vector<2x1x384xf32> to vector<2x384xf32>
    %cst_41 = arith.constant dense<0.000000e+00> : vector<2x384xf32>
    %89 = tpu.matmul %82, %18, %cst_41 {dimension_numbers = #tpu.dot_dimension_numbers<[1], [0], [0], [1], [0, 0, 1, 1], [], []>} : vector<2x128xf32>, vector<128x384xf32>, vector<2x384xf32> -> vector<2x384xf32>
    %90 = vector.extract_strided_slice %88 {offsets = [0, 0], sizes = [2, 128], strides = [1, 1]} : vector<2x384xf32> to vector<2x128xf32>
    %91 = vector.extract_strided_slice %89 {offsets = [0, 0], sizes = [2, 128], strides = [1, 1]} : vector<2x384xf32> to vector<2x128xf32>
    %92 = arith.addf %90, %91 : vector<2x128xf32>
    %93 = arith.negf %92 : vector<2x128xf32>
    %94 = math.exp %93 : vector<2x128xf32>
    %cst_42 = arith.constant 1.000000e+00 : f32
    %95 = vector.broadcast %cst_42 : f32 to vector<2x128xf32>
    %96 = arith.addf %95, %94 : vector<2x128xf32>
    %97 = arith.divf %95, %96 : vector<2x128xf32>
    %98 = vector.extract_strided_slice %88 {offsets = [0, 128], sizes = [2, 128], strides = [1, 1]} : vector<2x384xf32> to vector<2x128xf32>
    %99 = vector.extract_strided_slice %89 {offsets = [0, 128], sizes = [2, 128], strides = [1, 1]} : vector<2x384xf32> to vector<2x128xf32>
    %100 = arith.addf %98, %99 : vector<2x128xf32>
    %101 = arith.negf %100 : vector<2x128xf32>
    %102 = math.exp %101 : vector<2x128xf32>
    %cst_43 = arith.constant 1.000000e+00 : f32
    %103 = vector.broadcast %cst_43 : f32 to vector<2x128xf32>
    %104 = arith.addf %103, %102 : vector<2x128xf32>
    %105 = arith.divf %103, %104 : vector<2x128xf32>
    %106 = vector.extract_strided_slice %88 {offsets = [0, 256], sizes = [2, 128], strides = [1, 1]} : vector<2x384xf32> to vector<2x128xf32>
    %107 = vector.extract_strided_slice %89 {offsets = [0, 256], sizes = [2, 128], strides = [1, 1]} : vector<2x384xf32> to vector<2x128xf32>
    %108 = arith.mulf %97, %107 : vector<2x128xf32>
    %109 = arith.addf %106, %108 : vector<2x128xf32>
    %110 = math.tanh %109 : vector<2x128xf32>
    %cst_44 = arith.constant 1.000000e+00 : f32
    %111 = vector.broadcast %cst_44 : f32 to vector<2x128xf32>
    %112 = arith.subf %111, %105 : vector<2x128xf32>
    %113 = arith.mulf %112, %110 : vector<2x128xf32>
    %114 = arith.mulf %105, %82 : vector<2x128xf32>
    %115 = arith.addf %113, %114 : vector<2x128xf32>
    %116 = vector.shape_cast %115 : vector<2x128xf32> to vector<2x1x128xf32>
    %c0_45 = arith.constant 0 : index
    %117 = arith.index_cast %c2_i32 : i32 to index
    %c0_46 = arith.constant 0 : index
    %118 = vector.load %arg15[%c0_45, %117, %c0_46] : memref<2x8x128xf32, #tpu.memory_space<vmem>>, vector<2x1x128xf32>
    tpu.vector_store %arg15[%c0_45, %117, %c0_46], %116 {strides = array<i32>} : memref<2x8x128xf32, #tpu.memory_space<vmem>>, vector<2x1x128xf32>,
    %c3_i32 = arith.constant 3 : i32
    %c0_47 = arith.constant 0 : index
    %119 = arith.index_cast %c3_i32 : i32 to index
    %c0_48 = arith.constant 0 : index
    %120 = vector.load %arg14[%c0_47, %119, %c0_48] : memref<2x8x384xf32, #tpu.memory_space<vmem>>, vector<2x1x384xf32>
    %121 = vector.shape_cast %120 : vector<2x1x384xf32> to vector<2x384xf32>
    %cst_49 = arith.constant dense<0.000000e+00> : vector<2x384xf32>
    %122 = tpu.matmul %115, %18, %cst_49 {dimension_numbers = #tpu.dot_dimension_numbers<[1], [0], [0], [1], [0, 0, 1, 1], [], []>} : vector<2x128xf32>, vector<128x384xf32>, vector<2x384xf32> -> vector<2x384xf32>
    %123 = vector.extract_strided_slice %121 {offsets = [0, 0], sizes = [2, 128], strides = [1, 1]} : vector<2x384xf32> to vector<2x128xf32>
    %124 = vector.extract_strided_slice %122 {offsets = [0, 0], sizes = [2, 128], strides = [1, 1]} : vector<2x384xf32> to vector<2x128xf32>
    %125 = arith.addf %123, %124 : vector<2x128xf32>
    %126 = arith.negf %125 : vector<2x128xf32>
    %127 = math.exp %126 : vector<2x128xf32>
    %cst_50 = arith.constant 1.000000e+00 : f32
    %128 = vector.broadcast %cst_50 : f32 to vector<2x128xf32>
    %129 = arith.addf %128, %127 : vector<2x128xf32>
    %130 = arith.divf %128, %129 : vector<2x128xf32>
    %131 = vector.extract_strided_slice %121 {offsets = [0, 128], sizes = [2, 128], strides = [1, 1]} : vector<2x384xf32> to vector<2x128xf32>
    %132 = vector.extract_strided_slice %122 {offsets = [0, 128], sizes = [2, 128], strides = [1, 1]} : vector<2x384xf32> to vector<2x128xf32>
    %133 = arith.addf %131, %132 : vector<2x128xf32>
    %134 = arith.negf %133 : vector<2x128xf32>
    %135 = math.exp %134 : vector<2x128xf32>
    %cst_51 = arith.constant 1.000000e+00 : f32
    %136 = vector.broadcast %cst_51 : f32 to vector<2x128xf32>
    %137 = arith.addf %136, %135 : vector<2x128xf32>
    %138 = arith.divf %136, %137 : vector<2x128xf32>
    %139 = vector.extract_strided_slice %121 {offsets = [0, 256], sizes = [2, 128], strides = [1, 1]} : vector<2x384xf32> to vector<2x128xf32>
    %140 = vector.extract_strided_slice %122 {offsets = [0, 256], sizes = [2, 128], strides = [1, 1]} : vector<2x384xf32> to vector<2x128xf32>
    %141 = arith.mulf %130, %140 : vector<2x128xf32>
    %142 = arith.addf %139, %141 : vector<2x128xf32>
    %143 = math.tanh %142 : vector<2x128xf32>
    %cst_52 = arith.constant 1.000000e+00 : f32
    %144 = vector.broadcast %cst_52 : f32 to vector<2x128xf32>
    %145 = arith.subf %144, %138 : vector<2x128xf32>
    %146 = arith.mulf %145, %143 : vector<2x128xf32>
    %147 = arith.mulf %138, %115 : vector<2x128xf32>
    %148 = arith.addf %146, %147 : vector<2x128xf32>
    %149 = vector.shape_cast %148 : vector<2x128xf32> to vector<2x1x128xf32>
    %c0_53 = arith.constant 0 : index
    %150 = arith.index_cast %c3_i32 : i32 to index
    %c0_54 = arith.constant 0 : index
    %151 = vector.load %arg15[%c0_53, %150, %c0_54] : memref<2x8x128xf32, #tpu.memory_space<vmem>>, vector<2x1x128xf32>
    tpu.vector_store %arg15[%c0_53, %150, %c0_54], %149 {strides = array<i32>} : memref<2x8x128xf32, #tpu.memory_space<vmem>>, vector<2x1x128xf32>,
    %c4_i32 = arith.constant 4 : i32
    %c0_55 = arith.constant 0 : index
    %152 = arith.index_cast %c4_i32 : i32 to index
    %c0_56 = arith.constant 0 : index
    %153 = vector.load %arg14[%c0_55, %152, %c0_56] : memref<2x8x384xf32, #tpu.memory_space<vmem>>, vector<2x1x384xf32>
    %154 = vector.shape_cast %153 : vector<2x1x384xf32> to vector<2x384xf32>
    %cst_57 = arith.constant dense<0.000000e+00> : vector<2x384xf32>
    %155 = tpu.matmul %148, %18, %cst_57 {dimension_numbers = #tpu.dot_dimension_numbers<[1], [0], [0], [1], [0, 0, 1, 1], [], []>} : vector<2x128xf32>, vector<128x384xf32>, vector<2x384xf32> -> vector<2x384xf32>
    %156 = vector.extract_strided_slice %154 {offsets = [0, 0], sizes = [2, 128], strides = [1, 1]} : vector<2x384xf32> to vector<2x128xf32>
    %157 = vector.extract_strided_slice %155 {offsets = [0, 0], sizes = [2, 128], strides = [1, 1]} : vector<2x384xf32> to vector<2x128xf32>
    %158 = arith.addf %156, %157 : vector<2x128xf32>
    %159 = arith.negf %158 : vector<2x128xf32>
    %160 = math.exp %159 : vector<2x128xf32>
    %cst_58 = arith.constant 1.000000e+00 : f32
    %161 = vector.broadcast %cst_58 : f32 to vector<2x128xf32>
    %162 = arith.addf %161, %160 : vector<2x128xf32>
    %163 = arith.divf %161, %162 : vector<2x128xf32>
    %164 = vector.extract_strided_slice %154 {offsets = [0, 128], sizes = [2, 128], strides = [1, 1]} : vector<2x384xf32> to vector<2x128xf32>
    %165 = vector.extract_strided_slice %155 {offsets = [0, 128], sizes = [2, 128], strides = [1, 1]} : vector<2x384xf32> to vector<2x128xf32>
    %166 = arith.addf %164, %165 : vector<2x128xf32>
    %167 = arith.negf %166 : vector<2x128xf32>
    %168 = math.exp %167 : vector<2x128xf32>
    %cst_59 = arith.constant 1.000000e+00 : f32
    %169 = vector.broadcast %cst_59 : f32 to vector<2x128xf32>
    %170 = arith.addf %169, %168 : vector<2x128xf32>
    %171 = arith.divf %169, %170 : vector<2x128xf32>
    %172 = vector.extract_strided_slice %154 {offsets = [0, 256], sizes = [2, 128], strides = [1, 1]} : vector<2x384xf32> to vector<2x128xf32>
    %173 = vector.extract_strided_slice %155 {offsets = [0, 256], sizes = [2, 128], strides = [1, 1]} : vector<2x384xf32> to vector<2x128xf32>
    %174 = arith.mulf %163, %173 : vector<2x128xf32>
    %175 = arith.addf %172, %174 : vector<2x128xf32>
    %176 = math.tanh %175 : vector<2x128xf32>
    %cst_60 = arith.constant 1.000000e+00 : f32
    %177 = vector.broadcast %cst_60 : f32 to vector<2x128xf32>
    %178 = arith.subf %177, %171 : vector<2x128xf32>
    %179 = arith.mulf %178, %176 : vector<2x128xf32>
    %180 = arith.mulf %171, %148 : vector<2x128xf32>
    %181 = arith.addf %179, %180 : vector<2x128xf32>
    %182 = vector.shape_cast %181 : vector<2x128xf32> to vector<2x1x128xf32>
    %c0_61 = arith.constant 0 : index
    %183 = arith.index_cast %c4_i32 : i32 to index
    %c0_62 = arith.constant 0 : index
    %184 = vector.load %arg15[%c0_61, %183, %c0_62] : memref<2x8x128xf32, #tpu.memory_space<vmem>>, vector<2x1x128xf32>
    tpu.vector_store %arg15[%c0_61, %183, %c0_62], %182 {strides = array<i32>} : memref<2x8x128xf32, #tpu.memory_space<vmem>>, vector<2x1x128xf32>,
    %c5_i32 = arith.constant 5 : i32
    %c0_63 = arith.constant 0 : index
    %185 = arith.index_cast %c5_i32 : i32 to index
    %c0_64 = arith.constant 0 : index
    %186 = vector.load %arg14[%c0_63, %185, %c0_64] : memref<2x8x384xf32, #tpu.memory_space<vmem>>, vector<2x1x384xf32>
    %187 = vector.shape_cast %186 : vector<2x1x384xf32> to vector<2x384xf32>
    %cst_65 = arith.constant dense<0.000000e+00> : vector<2x384xf32>
    %188 = tpu.matmul %181, %18, %cst_65 {dimension_numbers = #tpu.dot_dimension_numbers<[1], [0], [0], [1], [0, 0, 1, 1], [], []>} : vector<2x128xf32>, vector<128x384xf32>, vector<2x384xf32> -> vector<2x384xf32>
    %189 = vector.extract_strided_slice %187 {offsets = [0, 0], sizes = [2, 128], strides = [1, 1]} : vector<2x384xf32> to vector<2x128xf32>
    %190 = vector.extract_strided_slice %188 {offsets = [0, 0], sizes = [2, 128], strides = [1, 1]} : vector<2x384xf32> to vector<2x128xf32>
    %191 = arith.addf %189, %190 : vector<2x128xf32>
    %192 = arith.negf %191 : vector<2x128xf32>
    %193 = math.exp %192 : vector<2x128xf32>
    %cst_66 = arith.constant 1.000000e+00 : f32
    %194 = vector.broadcast %cst_66 : f32 to vector<2x128xf32>
    %195 = arith.addf %194, %193 : vector<2x128xf32>
    %196 = arith.divf %194, %195 : vector<2x128xf32>
    %197 = vector.extract_strided_slice %187 {offsets = [0, 128], sizes = [2, 128], strides = [1, 1]} : vector<2x384xf32> to vector<2x128xf32>
    %198 = vector.extract_strided_slice %188 {offsets = [0, 128], sizes = [2, 128], strides = [1, 1]} : vector<2x384xf32> to vector<2x128xf32>
    %199 = arith.addf %197, %198 : vector<2x128xf32>
    %200 = arith.negf %199 : vector<2x128xf32>
    %201 = math.exp %200 : vector<2x128xf32>
    %cst_67 = arith.constant 1.000000e+00 : f32
    %202 = vector.broadcast %cst_67 : f32 to vector<2x128xf32>
    %203 = arith.addf %202, %201 : vector<2x128xf32>
    %204 = arith.divf %202, %203 : vector<2x128xf32>
    %205 = vector.extract_strided_slice %187 {offsets = [0, 256], sizes = [2, 128], strides = [1, 1]} : vector<2x384xf32> to vector<2x128xf32>
    %206 = vector.extract_strided_slice %188 {offsets = [0, 256], sizes = [2, 128], strides = [1, 1]} : vector<2x384xf32> to vector<2x128xf32>
    %207 = arith.mulf %196, %206 : vector<2x128xf32>
    %208 = arith.addf %205, %207 : vector<2x128xf32>
    %209 = math.tanh %208 : vector<2x128xf32>
    %cst_68 = arith.constant 1.000000e+00 : f32
    %210 = vector.broadcast %cst_68 : f32 to vector<2x128xf32>
    %211 = arith.subf %210, %204 : vector<2x128xf32>
    %212 = arith.mulf %211, %209 : vector<2x128xf32>
    %213 = arith.mulf %204, %181 : vector<2x128xf32>
    %214 = arith.addf %212, %213 : vector<2x128xf32>
    %215 = vector.shape_cast %214 : vector<2x128xf32> to vector<2x1x128xf32>
    %c0_69 = arith.constant 0 : index
    %216 = arith.index_cast %c5_i32 : i32 to index
    %c0_70 = arith.constant 0 : index
    %217 = vector.load %arg15[%c0_69, %216, %c0_70] : memref<2x8x128xf32, #tpu.memory_space<vmem>>, vector<2x1x128xf32>
    tpu.vector_store %arg15[%c0_69, %216, %c0_70], %215 {strides = array<i32>} : memref<2x8x128xf32, #tpu.memory_space<vmem>>, vector<2x1x128xf32>,
    %c6_i32 = arith.constant 6 : i32
    %c0_71 = arith.constant 0 : index
    %218 = arith.index_cast %c6_i32 : i32 to index
    %c0_72 = arith.constant 0 : index
    %219 = vector.load %arg14[%c0_71, %218, %c0_72] : memref<2x8x384xf32, #tpu.memory_space<vmem>>, vector<2x1x384xf32>
    %220 = vector.shape_cast %219 : vector<2x1x384xf32> to vector<2x384xf32>
    %cst_73 = arith.constant dense<0.000000e+00> : vector<2x384xf32>
    %221 = tpu.matmul %214, %18, %cst_73 {dimension_numbers = #tpu.dot_dimension_numbers<[1], [0], [0], [1], [0, 0, 1, 1], [], []>} : vector<2x128xf32>, vector<128x384xf32>, vector<2x384xf32> -> vector<2x384xf32>
    %222 = vector.extract_strided_slice %220 {offsets = [0, 0], sizes = [2, 128], strides = [1, 1]} : vector<2x384xf32> to vector<2x128xf32>
    %223 = vector.extract_strided_slice %221 {offsets = [0, 0], sizes = [2, 128], strides = [1, 1]} : vector<2x384xf32> to vector<2x128xf32>
    %224 = arith.addf %222, %223 : vector<2x128xf32>
    %225 = arith.negf %224 : vector<2x128xf32>
    %226 = math.exp %225 : vector<2x128xf32>
    %cst_74 = arith.constant 1.000000e+00 : f32
    %227 = vector.broadcast %cst_74 : f32 to vector<2x128xf32>
    %228 = arith.addf %227, %226 : vector<2x128xf32>
    %229 = arith.divf %227, %228 : vector<2x128xf32>
    %230 = vector.extract_strided_slice %220 {offsets = [0, 128], sizes = [2, 128], strides = [1, 1]} : vector<2x384xf32> to vector<2x128xf32>
    %231 = vector.extract_strided_slice %221 {offsets = [0, 128], sizes = [2, 128], strides = [1, 1]} : vector<2x384xf32> to vector<2x128xf32>
    %232 = arith.addf %230, %231 : vector<2x128xf32>
    %233 = arith.negf %232 : vector<2x128xf32>
    %234 = math.exp %233 : vector<2x128xf32>
    %cst_75 = arith.constant 1.000000e+00 : f32
    %235 = vector.broadcast %cst_75 : f32 to vector<2x128xf32>
    %236 = arith.addf %235, %234 : vector<2x128xf32>
    %237 = arith.divf %235, %236 : vector<2x128xf32>
    %238 = vector.extract_strided_slice %220 {offsets = [0, 256], sizes = [2, 128], strides = [1, 1]} : vector<2x384xf32> to vector<2x128xf32>
    %239 = vector.extract_strided_slice %221 {offsets = [0, 256], sizes = [2, 128], strides = [1, 1]} : vector<2x384xf32> to vector<2x128xf32>
    %240 = arith.mulf %229, %239 : vector<2x128xf32>
    %241 = arith.addf %238, %240 : vector<2x128xf32>
    %242 = math.tanh %241 : vector<2x128xf32>
    %cst_76 = arith.constant 1.000000e+00 : f32
    %243 = vector.broadcast %cst_76 : f32 to vector<2x128xf32>
    %244 = arith.subf %243, %237 : vector<2x128xf32>
    %245 = arith.mulf %244, %242 : vector<2x128xf32>
    %246 = arith.mulf %237, %214 : vector<2x128xf32>
    %247 = arith.addf %245, %246 : vector<2x128xf32>
    %248 = vector.shape_cast %247 : vector<2x128xf32> to vector<2x1x128xf32>
    %c0_77 = arith.constant 0 : index
    %249 = arith.index_cast %c6_i32 : i32 to index
    %c0_78 = arith.constant 0 : index
    %250 = vector.load %arg15[%c0_77, %249, %c0_78] : memref<2x8x128xf32, #tpu.memory_space<vmem>>, vector<2x1x128xf32>
    tpu.vector_store %arg15[%c0_77, %249, %c0_78], %248 {strides = array<i32>} : memref<2x8x128xf32, #tpu.memory_space<vmem>>, vector<2x1x128xf32>,
    %c7_i32 = arith.constant 7 : i32
    %c0_79 = arith.constant 0 : index
    %251 = arith.index_cast %c7_i32 : i32 to index
    %c0_80 = arith.constant 0 : index
    %252 = vector.load %arg14[%c0_79, %251, %c0_80] : memref<2x8x384xf32, #tpu.memory_space<vmem>>, vector<2x1x384xf32>
    %253 = vector.shape_cast %252 : vector<2x1x384xf32> to vector<2x384xf32>
    %cst_81 = arith.constant dense<0.000000e+00> : vector<2x384xf32>
    %254 = tpu.matmul %247, %18, %cst_81 {dimension_numbers = #tpu.dot_dimension_numbers<[1], [0], [0], [1], [0, 0, 1, 1], [], []>} : vector<2x128xf32>, vector<128x384xf32>, vector<2x384xf32> -> vector<2x384xf32>
    %255 = vector.extract_strided_slice %253 {offsets = [0, 0], sizes = [2, 128], strides = [1, 1]} : vector<2x384xf32> to vector<2x128xf32>
    %256 = vector.extract_strided_slice %254 {offsets = [0, 0], sizes = [2, 128], strides = [1, 1]} : vector<2x384xf32> to vector<2x128xf32>
    %257 = arith.addf %255, %256 : vector<2x128xf32>
    %258 = arith.negf %257 : vector<2x128xf32>
    %259 = math.exp %258 : vector<2x128xf32>
    %cst_82 = arith.constant 1.000000e+00 : f32
    %260 = vector.broadcast %cst_82 : f32 to vector<2x128xf32>
    %261 = arith.addf %260, %259 : vector<2x128xf32>
    %262 = arith.divf %260, %261 : vector<2x128xf32>
    %263 = vector.extract_strided_slice %253 {offsets = [0, 128], sizes = [2, 128], strides = [1, 1]} : vector<2x384xf32> to vector<2x128xf32>
    %264 = vector.extract_strided_slice %254 {offsets = [0, 128], sizes = [2, 128], strides = [1, 1]} : vector<2x384xf32> to vector<2x128xf32>
    %265 = arith.addf %263, %264 : vector<2x128xf32>
    %266 = arith.negf %265 : vector<2x128xf32>
    %267 = math.exp %266 : vector<2x128xf32>
    %cst_83 = arith.constant 1.000000e+00 : f32
    %268 = vector.broadcast %cst_83 : f32 to vector<2x128xf32>
    %269 = arith.addf %268, %267 : vector<2x128xf32>
    %270 = arith.divf %268, %269 : vector<2x128xf32>
    %271 = vector.extract_strided_slice %253 {offsets = [0, 256], sizes = [2, 128], strides = [1, 1]} : vector<2x384xf32> to vector<2x128xf32>
    %272 = vector.extract_strided_slice %254 {offsets = [0, 256], sizes = [2, 128], strides = [1, 1]} : vector<2x384xf32> to vector<2x128xf32>
    %273 = arith.mulf %262, %272 : vector<2x128xf32>
    %274 = arith.addf %271, %273 : vector<2x128xf32>
    %275 = math.tanh %274 : vector<2x128xf32>
    %cst_84 = arith.constant 1.000000e+00 : f32
    %276 = vector.broadcast %cst_84 : f32 to vector<2x128xf32>
    %277 = arith.subf %276, %270 : vector<2x128xf32>
    %278 = arith.mulf %277, %275 : vector<2x128xf32>
    %279 = arith.mulf %270, %247 : vector<2x128xf32>
    %280 = arith.addf %278, %279 : vector<2x128xf32>
    %281 = vector.shape_cast %280 : vector<2x128xf32> to vector<2x1x128xf32>
    %c0_85 = arith.constant 0 : index
    %282 = arith.index_cast %c7_i32 : i32 to index
    %c0_86 = arith.constant 0 : index
    %283 = vector.load %arg15[%c0_85, %282, %c0_86] : memref<2x8x128xf32, #tpu.memory_space<vmem>>, vector<2x1x128xf32>
    tpu.vector_store %arg15[%c0_85, %282, %c0_86], %281 {strides = array<i32>} : memref<2x8x128xf32, #tpu.memory_space<vmem>>, vector<2x1x128xf32>,
    %c8_i32 = arith.constant 8 : i32
    %c0_87 = arith.constant 0 : index
    %c0_88 = arith.constant 0 : index
    %284 = vector.load %arg13[%c0_87, %c0_88] : memref<2x128xf32, #tpu.memory_space<vmem>>, vector<2x128xf32>
    tpu.vector_store %arg13[%c0_87, %c0_88], %280 {strides = array<i32>} : memref<2x128xf32, #tpu.memory_space<vmem>>, vector<2x128xf32>,
    %c0_89 = arith.constant 0 : index
    %c0_90 = arith.constant 0 : index
    %c0_91 = arith.constant 0 : index
    %285 = vector.load %arg15[%c0_89, %c0_90, %c0_91] : memref<2x8x128xf32, #tpu.memory_space<vmem>>, vector<2x8x16xf32>
    %286 = vector.broadcast %4 : vector<2x8x1xf32> to vector<2x8x16xf32>
    %287 = arith.mulf %285, %286 : vector<2x8x16xf32>
    %c0_92 = arith.constant 0 : index
    %c0_93 = arith.constant 0 : index
    %c0_94 = arith.constant 0 : index
    %c0_95 = arith.constant 0 : index
    %288 = vector.load %arg11[%c0_92, %c0_93, %c0_94, %c0_95] : memref<1x2x8x16xf32, #tpu.memory_space<vmem>>, vector<1x2x8x16xf32>
    %289 = vector.shape_cast %288 : vector<1x2x8x16xf32> to vector<2x8x16xf32>
    %290 = vector.shape_cast %287 : vector<2x8x16xf32> to vector<1x2x8x16xf32>
    tpu.vector_store %arg11[%c0_92, %c0_93, %c0_94, %c0_95], %290 {strides = array<i32>} : memref<1x2x8x16xf32, #tpu.memory_space<vmem>>, vector<1x2x8x16xf32>,
    %c0_96 = arith.constant 0 : index
    %c0_97 = arith.constant 0 : index
    %c0_98 = arith.constant 0 : index
    %291 = vector.load %arg8[%c0_96, %c0_97, %c0_98] : memref<1x1x16xf32, #tpu.memory_space<vmem>>, vector<1x1x16xf32>
    %292 = vector.shape_cast %291 : vector<1x1x16xf32> to vector<1x16xf32>
    %293 = vector.shape_cast %292 : vector<1x16xf32> to vector<1x1x16xf32>
    %294 = vector.broadcast %293 : vector<1x1x16xf32> to vector<2x8x16xf32>
    %295 = arith.mulf %287, %294 : vector<2x8x16xf32>
    %cst_99 = arith.constant dense<0.000000e+00> : vector<2x8xf32>
    %296 = vector.multi_reduction <add>, %295, %cst_99 [2] : vector<2x8x16xf32> to vector<2x8xf32>
    %cst_100 = arith.constant dense<0xFF800000> : vector<2xf32>
    %297 = vector.multi_reduction <maximumf>, %296, %cst_100 [1] : vector<2x8xf32> to vector<2xf32>
    %298 = vector.shape_cast %297 : vector<2xf32> to vector<2x1xf32>
    %c0_101 = arith.constant 0 : index
    %c0_102 = arith.constant 0 : index
    %299 = vector.load %arg16[%c0_101, %c0_102] : memref<2x1xf32, #tpu.memory_space<vmem>>, vector<2x1xf32>
    %300 = arith.maximumf %299, %298 : vector<2x1xf32>
    %c0_103 = arith.constant 0 : index
    %c0_104 = arith.constant 0 : index
    %301 = vector.load %arg16[%c0_103, %c0_104] : memref<2x1xf32, #tpu.memory_space<vmem>>, vector<2x1xf32>
    %302 = arith.subf %301, %300 : vector<2x1xf32>
    %303 = math.exp %302 : vector<2x1xf32>
    %304 = vector.broadcast %300 : vector<2x1xf32> to vector<2x8xf32>
    %305 = arith.subf %296, %304 : vector<2x8xf32>
    %306 = math.exp %305 : vector<2x8xf32>
    %c0_105 = arith.constant 0 : index
    %c0_106 = arith.constant 0 : index
    %307 = vector.load %arg17[%c0_105, %c0_106] : memref<2x1xf32, #tpu.memory_space<vmem>>, vector<2x1xf32>
    %308 = arith.mulf %303, %307 : vector<2x1xf32>
    %cst_107 = arith.constant dense<0.000000e+00> : vector<2xf32>
    %309 = vector.multi_reduction <add>, %306, %cst_107 [1] : vector<2x8xf32> to vector<2xf32>
    %310 = vector.shape_cast %309 : vector<2xf32> to vector<2x1xf32>
    %311 = arith.addf %308, %310 : vector<2x1xf32>
    %c0_108 = arith.constant 0 : index
    %c0_109 = arith.constant 0 : index
    %312 = vector.load %arg17[%c0_108, %c0_109] : memref<2x1xf32, #tpu.memory_space<vmem>>, vector<2x1xf32>
    tpu.vector_store %arg17[%c0_108, %c0_109], %311 {strides = array<i32>} : memref<2x1xf32, #tpu.memory_space<vmem>>, vector<2x1xf32>,
    %313 = vector.broadcast %4 : vector<2x8x1xf32> to vector<2x8x32xf32>
    %314 = arith.mulf %3, %313 : vector<2x8x32xf32>
    %315 = vector.shape_cast %306 : vector<2x8xf32> to vector<2x1x8xf32>
    "tpu.trace_start"() <{level = 10 : i32, message = "bst,btd->bsd"}> : () -> ()
    %cst_110 = arith.constant dense<0.000000e+00> : vector<2x1x32xf32>
    %316 = tpu.matmul %315, %314, %cst_110 {dimension_numbers = #tpu.dot_dimension_numbers<[2], [1], [1], [2], [0, 0, 0, 1, 1, 2], [0], [0]>} : vector<2x1x8xf32>, vector<2x8x32xf32>, vector<2x1x32xf32> -> vector<2x1x32xf32>
    "tpu.trace_stop"() : () -> ()
    %c0_111 = arith.constant 0 : index
    %c0_112 = arith.constant 0 : index
    %317 = vector.load %arg18[%c0_111, %c0_112] : memref<2x32xf32, #tpu.memory_space<vmem>>, vector<2x32xf32>
    %318 = vector.broadcast %303 : vector<2x1xf32> to vector<2x32xf32>
    %319 = arith.mulf %318, %317 : vector<2x32xf32>
    %320 = vector.shape_cast %316 : vector<2x1x32xf32> to vector<2x32xf32>
    %321 = arith.addf %319, %320 : vector<2x32xf32>
    %c0_113 = arith.constant 0 : index
    %c0_114 = arith.constant 0 : index
    %322 = vector.load %arg18[%c0_113, %c0_114] : memref<2x32xf32, #tpu.memory_space<vmem>>, vector<2x32xf32>
    tpu.vector_store %arg18[%c0_113, %c0_114], %321 {strides = array<i32>} : memref<2x32xf32, #tpu.memory_space<vmem>>, vector<2x32xf32>,
    %c0_115 = arith.constant 0 : index
    %c0_116 = arith.constant 0 : index
    %323 = vector.load %arg16[%c0_115, %c0_116] : memref<2x1xf32, #tpu.memory_space<vmem>>, vector<2x1xf32>
    tpu.vector_store %arg16[%c0_115, %c0_116], %300 {strides = array<i32>} : memref<2x1xf32, #tpu.memory_space<vmem>>, vector<2x1xf32>,
    %c0_i32_117 = arith.constant 0 : i32
    %324 = arith.cmpi eq, %arg1, %c0_i32_117 : i32
    %325 = arith.extui %324 : i1 to i32
    %c0_i32_118 = arith.constant 0 : i32
    %326 = arith.cmpi ne, %325, %c0_i32_118 : i32
    scf.if %326 {
      %c0_119 = arith.constant 0 : index
      %c0_120 = arith.constant 0 : index
      %327 = vector.load %arg18[%c0_119, %c0_120] : memref<2x32xf32, #tpu.memory_space<vmem>>, vector<2x32xf32>
      %c0_121 = arith.constant 0 : index
      %c0_122 = arith.constant 0 : index
      %328 = vector.load %arg17[%c0_121, %c0_122] : memref<2x1xf32, #tpu.memory_space<vmem>>, vector<2x1xf32>
      %329 = vector.broadcast %328 : vector<2x1xf32> to vector<2x32xf32>
      %330 = arith.divf %327, %329 : vector<2x32xf32>
      %c0_123 = arith.constant 0 : index
      %c0_124 = arith.constant 0 : index
      %c0_125 = arith.constant 0 : index
      %331 = vector.load %arg9[%c0_123, %c0_124, %c0_125] : memref<1x2x32xf32, #tpu.memory_space<vmem>>, vector<1x2x32xf32>
      %332 = vector.shape_cast %331 : vector<1x2x32xf32> to vector<2x32xf32>
      %c0_126 = arith.constant 0 : index
      %c0_127 = arith.constant 0 : index
      %333 = vector.load %arg10[%c0_126, %c0_127] : memref<32x32xf32, #tpu.memory_space<vmem>>, vector<32x32xf32>
      %cst_128 = arith.constant dense<0.000000e+00> : vector<2x32xf32>
      %334 = tpu.matmul %332, %333, %cst_128 {dimension_numbers = #tpu.dot_dimension_numbers<[1], [0], [0], [1], [0, 0, 1, 1], [], []>} : vector<2x32xf32>, vector<32x32xf32>, vector<2x32xf32> -> vector<2x32xf32>
      %335 = math.tanh %334 : vector<2x32xf32>
      %336 = arith.addf %335, %330 : vector<2x32xf32>
      %c0_129 = arith.constant 0 : index
      %c0_130 = arith.constant 0 : index
      %c0_131 = arith.constant 0 : index
      %337 = vector.load %arg12[%c0_129, %c0_130, %c0_131] : memref<1x2x32xf32, #tpu.memory_space<vmem>>, vector<1x2x32xf32>
      %338 = vector.shape_cast %337 : vector<1x2x32xf32> to vector<2x32xf32>
      %339 = vector.shape_cast %336 : vector<2x32xf32> to vector<1x2x32xf32>
      tpu.vector_store %arg12[%c0_129, %c0_130, %c0_131], %339 {strides = array<i32>} : memref<1x2x32xf32, #tpu.memory_space<vmem>>, vector<1x2x32xf32>,
    } else {
    }
    return
  }
  func.func @transform_0(%arg0: i32, %arg1: i32) -> (i32, i32, i32) {
    %c0_i32 = arith.constant 0 : i32
    %c0_i32_0 = arith.constant 0 : i32
    %c0_i32_1 = arith.constant 0 : i32
    return %c0_i32, %arg1, %c0_i32_0 : i32, i32, i32
  }
  func.func @transform_1(%arg0: i32, %arg1: i32) -> (i32, i32, i32) {
    %c0_i32 = arith.constant 0 : i32
    %c0_i32_0 = arith.constant 0 : i32
    %c0_i32_1 = arith.constant 0 : i32
    return %c0_i32, %arg1, %c0_i32_0 : i32, i32, i32
  }
  func.func @transform_2(%arg0: i32, %arg1: i32) -> (i32, i32, i32, i32) {
    %c0_i32 = arith.constant 0 : i32
    %c0_i32_0 = arith.constant 0 : i32
    %c0_i32_1 = arith.constant 0 : i32
    %c0_i32_2 = arith.constant 0 : i32
    return %arg0, %c0_i32, %c0_i32_0, %c0_i32_1 : i32, i32, i32, i32
  }
  func.func @transform_3(%arg0: i32, %arg1: i32) -> (i32, i32, i32) {
    %c0_i32 = arith.constant 0 : i32
    %c0_i32_0 = arith.constant 0 : i32
    %c0_i32_1 = arith.constant 0 : i32
    return %arg0, %c0_i32, %c0_i32_0 : i32, i32, i32
  }
  func.func @transform_4(%arg0: i32, %arg1: i32) -> (i32, i32, i32) {
    %c0_i32 = arith.constant 0 : i32
    %c0_i32_0 = arith.constant 0 : i32
    %c0_i32_1 = arith.constant 0 : i32
    return %arg0, %c0_i32, %c0_i32_0 : i32, i32, i32
  }
  func.func @transform_5(%arg0: i32, %arg1: i32) -> (i32, i32, i32) {
    %c0_i32 = arith.constant 0 : i32
    %c0_i32_0 = arith.constant 0 : i32
    %c0_i32_1 = arith.constant 0 : i32
    return %arg0, %c0_i32, %c0_i32_0 : i32, i32, i32
  }
  func.func @transform_6(%arg0: i32, %arg1: i32) -> (i32, i32, i32) {
    %c0_i32 = arith.constant 0 : i32
    %c0_i32_0 = arith.constant 0 : i32
    %c0_i32_1 = arith.constant 0 : i32
    return %arg0, %c0_i32, %c0_i32_0 : i32, i32, i32
  }
  func.func @transform_7(%arg0: i32, %arg1: i32) -> (i32, i32, i32) {
    %c0_i32 = arith.constant 0 : i32
    %c0_i32_0 = arith.constant 0 : i32
    %c0_i32_1 = arith.constant 0 : i32
    return %arg0, %c0_i32, %c0_i32_0 : i32, i32, i32
  }
  func.func @transform_8(%arg0: i32, %arg1: i32) -> (i32, i32) {
    %c0_i32 = arith.constant 0 : i32
    %c0_i32_0 = arith.constant 0 : i32
    %c0_i32_1 = arith.constant 0 : i32
    return %c0_i32, %c0_i32_0 : i32, i32
  }
  func.func @transform_9(%arg0: i32, %arg1: i32) -> (i32, i32, i32, i32) {
    %c0_i32 = arith.constant 0 : i32
    %c0_i32_0 = arith.constant 0 : i32
    %c0_i32_1 = arith.constant 0 : i32
    return %arg0, %c0_i32, %arg1, %c0_i32_0 : i32, i32, i32, i32
  }
  func.func @transform_10(%arg0: i32, %arg1: i32) -> (i32, i32, i32) {
    %c0_i32 = arith.constant 0 : i32
    %c0_i32_0 = arith.constant 0 : i32
    %c0_i32_1 = arith.constant 0 : i32
    return %arg0, %c0_i32, %c0_i32_0 : i32, i32, i32
  }
}

module attributes {stable_mosaic.version = 11 : i64} {
  func.func @_cls_pair_kernel(%arg0: memref<16x16xf32, #tpu.memory_space<vmem>>, %arg1: memref<16x16xf32, #tpu.memory_space<vmem>>, %arg2: memref<16x4xf32, #tpu.memory_space<vmem>>, %arg3: memref<16x4xf32, #tpu.memory_space<vmem>>, %arg4: memref<1x4xf32, #tpu.memory_space<vmem>>, %arg5: memref<1x4xf32, #tpu.memory_space<vmem>>, %arg6: memref<16x4xf32, #tpu.memory_space<vmem>>, %arg7: memref<16x4xf32, #tpu.memory_space<vmem>>) attributes {dimension_semantics = [], scalar_prefetch = 0 : i64, scratch_operands = 0 : i64, tpu.core_type = #tpu.core_type<tc>} {
    %c0 = arith.constant 0 : index
    %c0_0 = arith.constant 0 : index
    %0 = vector.load %arg0[%c0, %c0_0] : memref<16x16xf32, #tpu.memory_space<vmem>>, vector<16x16xf32>
    %c0_1 = arith.constant 0 : index
    %c0_2 = arith.constant 0 : index
    %1 = vector.load %arg2[%c0_1, %c0_2] : memref<16x4xf32, #tpu.memory_space<vmem>>, vector<16x4xf32>
    %cst = arith.constant dense<0.000000e+00> : vector<16x4xf32>
    %2 = tpu.matmul %0, %1, %cst {dimension_numbers = #tpu.dot_dimension_numbers<[1], [0], [0], [1], [0, 0, 1, 1], [], []>} : vector<16x16xf32>, vector<16x4xf32>, vector<16x4xf32> -> vector<16x4xf32>
    %c0_3 = arith.constant 0 : index
    %c0_4 = arith.constant 0 : index
    %3 = vector.load %arg4[%c0_3, %c0_4] : memref<1x4xf32, #tpu.memory_space<vmem>>, vector<1x4xf32>
    %4 = vector.broadcast %3 : vector<1x4xf32> to vector<16x4xf32>
    %5 = arith.addf %2, %4 : vector<16x4xf32>
    %c0_5 = arith.constant 0 : index
    %c0_6 = arith.constant 0 : index
    %6 = vector.load %arg6[%c0_5, %c0_6] : memref<16x4xf32, #tpu.memory_space<vmem>>, vector<16x4xf32>
    tpu.vector_store %arg6[%c0_5, %c0_6], %5 {strides = array<i32>} : memref<16x4xf32, #tpu.memory_space<vmem>>, vector<16x4xf32>,
    %c0_7 = arith.constant 0 : index
    %c0_8 = arith.constant 0 : index
    %7 = vector.load %arg1[%c0_7, %c0_8] : memref<16x16xf32, #tpu.memory_space<vmem>>, vector<16x16xf32>
    %c0_9 = arith.constant 0 : index
    %c0_10 = arith.constant 0 : index
    %8 = vector.load %arg3[%c0_9, %c0_10] : memref<16x4xf32, #tpu.memory_space<vmem>>, vector<16x4xf32>
    %cst_11 = arith.constant dense<0.000000e+00> : vector<16x4xf32>
    %9 = tpu.matmul %7, %8, %cst_11 {dimension_numbers = #tpu.dot_dimension_numbers<[1], [0], [0], [1], [0, 0, 1, 1], [], []>} : vector<16x16xf32>, vector<16x4xf32>, vector<16x4xf32> -> vector<16x4xf32>
    %c0_12 = arith.constant 0 : index
    %c0_13 = arith.constant 0 : index
    %10 = vector.load %arg5[%c0_12, %c0_13] : memref<1x4xf32, #tpu.memory_space<vmem>>, vector<1x4xf32>
    %11 = vector.broadcast %10 : vector<1x4xf32> to vector<16x4xf32>
    %12 = arith.addf %9, %11 : vector<16x4xf32>
    %c0_14 = arith.constant 0 : index
    %c0_15 = arith.constant 0 : index
    %13 = vector.load %arg7[%c0_14, %c0_15] : memref<16x4xf32, #tpu.memory_space<vmem>>, vector<16x4xf32>
    tpu.vector_store %arg7[%c0_14, %c0_15], %12 {strides = array<i32>} : memref<16x4xf32, #tpu.memory_space<vmem>>, vector<16x4xf32>,
    return
  }
}

</mosaic_0001>

<bundles_post_ra>
// kernel: _lambda_.7
= control target key start
LH: loop header
LB: loop body
LE: loop exit
PB: predicated region body
PF: predicated region fallthrough
CT: control target
= control target key end

     0   :  { %vm36_vm0 = vcmask 130048   ;;  %vm118_vm1 = vcmask 31744   ;;  %s345_s2 = inlined_call_operand.vmem [shape: f32[16,4], index: 2, kind: input, shape index: {}]   ;;  %s346_s3 = inlined_call_operand.vmem [shape: f32[16,4], index: 3, kind: input, shape index: {}]   ;;  %s347_s0 = inlined_call_operand.vmem [shape: f32[16,16], index: 0, kind: input, shape index: {}]   ;;  %s348_s1 = inlined_call_operand.vmem [shape: f32[16,16], index: 1, kind: input, shape index: {}]   ;;  %s349_s4 = inlined_call_operand.vmem [shape: f32[1,4], index: 4, kind: input, shape index: {}]   ;;  %s350_s5 = inlined_call_operand.vmem [shape: f32[1,4], index: 5, kind: input, shape index: {}]   ;;  %s351_s6 = inlined_call_operand.vmem [shape: f32[16,4], index: 6, kind: output, shape index: {0}]   ;;  %s352_s7 = inlined_call_operand.vmem [shape: f32[16,4], index: 7, kind: output, shape index: {1}]  }
   0x1   :  { %v27_v0 = vld [vmem:[%s345_s2] sm:$0xff]  ;;  %v28_v1 = vld [vmem:[%s345_s2 + $0x8] sm:$0xff] }
   0x2   :  { %v123_v2 = vld [vmem:[%s346_s3] sm:$0xff]  ;;  %v251_v3 = vpack.c.bf16 %v28_v1, %v27_v0  ;;  %v124_v4 = vld [vmem:[%s346_s3 + $0x8] sm:$0xff] }
   0x3   :  { %v25_v5 = vld [vmem:[%s347_s0] sm:$0xff]  ;;  %v255_v6 = vpack.c.bf16 %v124_v4, %v123_v2  ;;  %v26_v8 = vld [vmem:[%s347_s0 + $0x8] sm:$0xff] }
   0x4   :  { %241 = vmatprep.mubr.msk.f32.mxu0 %vm36_vm0, %v25_v5  ;;  %v121_v7 = vld [vmem:[%s348_s1] sm:$0xff]  ;;  %252 = vmatprep.subr.bf16.mxu0 %v251_v3  ;;  %v122_v9 = vld [vmem:[%s348_s1 + $0x8] sm:$0xff] }
   0x5   :  { %248 = vmatprep.mubr.msk.f32.mxu1 %vm36_vm0, %v121_v7  ;;  %256 = vmatprep.subr.bf16.mxu1 %v255_v6  ;;  %v223_v10 = vld [vmem:[%s349_s4] ss:$0 sm:$0xff] }
   0x6   :  { %254 = vmatpush3.bf16.msra.mxu0 %v251_v3  ;;  %258 = vmatpush3.bf16.msra.mxu1 %v255_v6  ;;  %v226_v11 = vld [vmem:[%s350_s5] ss:$0 sm:$0xff] }
   0x9   :  { %242 = vmatmul.mubr.msk.f32.vlgmr.msra.gmra.mrb[0].mxu0 %vm36_vm0, %v26_v8  ;;  %249 = vmatmul.mubr.msk.f32.vlgmr.msra.gmra.mrb[0].mxu1 %vm36_vm0, %v122_v9 }
  0xdc   :  { %v243_v12 = vpop.f32.mrb[0].mxu0  ;;  %v250_v14 = vpop.f32.mrb[0].mxu1 }
  0xdd   :  { %v115_v13 = vadd.f32 %v243_v12, %v223_v10  ;;  %v109_v15 = vpop.f32.mrb[1].mxu0  ;;  %v210_v16 = vadd.f32 %v250_v14, %v226_v11  ;;  %v204_v18 = vpop.f32.mrb[1].mxu1 }
  0xde   :  { %v110_v17 = vadd.f32 %v223_v10, %v109_v15  ;;  %v205_v19 = vadd.f32 %v226_v11, %v204_v18 }
  0xdf   :  { %120 = vst.msk [vmem:[%s351_s6 + $0x8] sm:$0xff] %vm118_vm1, %v115_v13  ;;  %214 = vst.msk [vmem:[%s352_s7 + $0x8] sm:$0xff] %vm118_vm1, %v210_v16 }
  0xe0   :  { %119 = vst.msk [vmem:[%s351_s6] sm:$0xff] %vm118_vm1, %v110_v17  ;;  %213 = vst.msk [vmem:[%s352_s7] sm:$0xff] %vm118_vm1, %v205_v19 }

// kernel: _lambda_.4
= control target key start
LH: loop header
LB: loop body
LE: loop exit
PB: predicated region body
PF: predicated region fallthrough
CT: control target
= control target key end

     0   :  { %v3805_v3 = vmov 0.0   ;;  %vm75_vm0 = vcmask 392192   ;;  %v3806_v43 = vmov 0.0|0.0   ;;  %vm3807_vm1 = vmmov 0   ;;  %s4612_s3 = inlined_call_operand.vmem [shape: f32[48,384], index: 3, kind: input, shape index: {}]   ;;  %s4613_s0 = inlined_call_operand.vmem [shape: f32[2,8,48], index: 0, kind: input, shape index: {}]   ;;  %s4614_s4 = inlined_call_operand.vmem [shape: f32[128,384], index: 4, kind: input, shape index: {}]   ;;  %s4615_s2 = inlined_call_operand.vmem [shape: f32[1,128], index: 2, kind: input, shape index: {}]   ;;  %s4616_s5 = inlined_call_operand.vmem [shape: f32[1,384], index: 5, kind: input, shape index: {}]   ;;  %s4617_s6 = inlined_call_operand.vmem [shape: f32[1,384], index: 6, kind: input, shape index: {}]   ;;  %s4618_s1 = inlined_call_operand.vmem [shape: f32[2,8,1], index: 1, kind: input, shape index: {}]   ;;  %s4619_s7 = inlined_call_operand.vmem [shape: f32[2,8,32], index: 7, kind: output, shape index: {}]  }
   0x1   :  { %v41_v0 = vld [vmem:[%s4612_s3 + $0x8] sm:$0xff]  ;;  %v44_v1 = vld [vmem:[%s4612_s3 + $0x20] sm:$0xff]  ;;  %v42_v2 = vld [vmem:[%s4612_s3 + $0x10] sm:$0xff]  ;;  %146 = vmatprep.mubr.f32.mxu0 %v3805_v3  ;;  %vm2683_vm2 = vcmask 261120  }
   0x2   :  { %v3167_v4 = vpack.c.bf16 %v44_v1, %v41_v0  ;;  %v45_v5 = vld [vmem:[%s4612_s3 + $0x28] sm:$0xff]  ;;  %v40_v6 = vld [vmem:[%s4612_s3] sm:$0xff]  ;;  %v43_v7 = vld [vmem:[%s4612_s3 + $0x18] sm:$0xff] }
   0x3   :  { %v3179_v8 = vpack.c.bf16 %v45_v5, %v42_v2  ;;  %v3169_v9 = vpack.c.bf16 %v43_v7, %v40_v6  ;;  %v47_v10 = vld [vmem:[%s4612_s3 + $0x38] sm:$0xff]  ;;  %v50_v11 = vld [vmem:[%s4612_s3 + $0x50] sm:$0xff]  ;;  %v48_v12 = vld [vmem:[%s4612_s3 + $0x40] sm:$0xff] }
   0x4   :  { %3168 = vmatprep.subr.bf16.mxu0 %v3167_v4  ;;  %v3171_v13 = vpack.c.bf16 %v50_v11, %v47_v10  ;;  %v51_v14 = vld [vmem:[%s4612_s3 + $0x58] sm:$0xff]  ;;  %v46_v15 = vld [vmem:[%s4612_s3 + $0x30] sm:$0xff]  ;;  %v49_v16 = vld [vmem:[%s4612_s3 + $0x48] sm:$0xff] }
   0x5   :  { %3180 = vmatprep.subr.bf16.mxu1 %v3179_v8  ;;  %3170 = vmatpush1.bf16.msra.mxu0 %v3169_v9  ;;  %v3183_v17 = vpack.c.bf16 %v51_v14, %v48_v12  ;;  %v3173_v18 = vpack.c.bf16 %v49_v16, %v46_v15  ;;  %v53_v19 = vld [vmem:[%s4612_s3 + $0x68] sm:$0xff]  ;;  %v56_v20 = vld [vmem:[%s4612_s3 + $0x80] sm:$0xff]  ;;  %v54_v21 = vld [vmem:[%s4612_s3 + $0x70] sm:$0xff] }
   0x6   :  { %3182 = vmatpush3.bf16.msra.mxu1 %v3179_v8  ;;  %3172 = vmatprep.subr.bf16.mxu0 %v3171_v13  ;;  %v3175_v22 = vpack.c.bf16 %v56_v20, %v53_v19  ;;  %v57_v23 = vld [vmem:[%s4612_s3 + $0x88] sm:$0xff]  ;;  %v52_v24 = vld [vmem:[%s4612_s3 + $0x60] sm:$0xff]  ;;  %v55_v25 = vld [vmem:[%s4612_s3 + $0x78] sm:$0xff] }
   0x7   :  { %3184 = vmatprep.subr.bf16.mxu1 %v3183_v17  ;;  %v3187_v26 = vpack.c.bf16 %v57_v23, %v54_v21  ;;  %v38_v27 = vld [vmem:[%s4613_s0] sm:$0xff]  ;;  %v241_v28 = vld [vmem:[%s4614_s4 + $0x8] sm:$0xff]  ;;  %v3177_v30 = vpack.c.bf16 %v55_v25, %v52_v24  ;;  %v243_v33 = vld [vmem:[%s4614_s4 + $0x18] sm:$0xff] }
   0x8   :  { %2884 = vmatprep.mubr.msk.f32.mxu1 %vm75_vm0, %v38_v27  ;;  %v244_v29 = vld [vmem:[%s4614_s4 + $0x20] sm:$0xff]  ;;  %v247_v34 = vld [vmem:[%s4614_s4 + $0x38] sm:$0xff]  ;;  %v250_v35 = vld [vmem:[%s4614_s4 + $0x50] sm:$0xff] }
   0x9   :  { %3174 = vmatpush1.bf16.msra.mxu0 %v3173_v18  ;;  %v3915_v31 = vpack.c.bf16 %v244_v29, %v241_v28  ;;  %v240_v32 = vld [vmem:[%s4614_s4] sm:$0xff]  ;;  %v39_v37 = vld [vmem:[%s4613_s0 + $0x8] sm:$0xff]  ;;  %v3935_v38 = vpack.c.bf16 %v250_v35, %v247_v34  ;;  %v246_v39 = vld [vmem:[%s4614_s4 + $0x30] sm:$0xff] }
   0xa   :  { %3186 = vmatpush3.bf16.msra.mxu1 %v3183_v17  ;;  %3176 = vmatprep.subr.bf16.mxu0 %v3175_v22  ;;  %v3929_v36 = vpack.c.bf16 %v243_v33, %v240_v32  ;;  %v249_v40 = vld [vmem:[%s4614_s4 + $0x48] sm:$0xff]  ;;  %v256_v42 = vld [vmem:[%s4614_s4 + $0x80] sm:$0xff]  ;;  %v255_v46 = vld [vmem:[%s4614_s4 + $0x78] sm:$0xff] }
   0xb   :  { %3188 = vmatprep.subr.bf16.mxu1 %v3187_v26  ;;  %v253_v41 = vld [vmem:[%s4614_s4 + $0x68] sm:$0xff]  ;;  %v3953_v44 = vpack.c.bf16 %v249_v40, %v246_v39  ;;  %v252_v45 = vld [vmem:[%s4614_s4 + $0x60] sm:$0xff]  ;;  %v242_v47 = vld [vmem:[%s4614_s4 + $0x10] sm:$0xff] }
   0xc   :  { %v3965_v48 = vpack.c.bf16 %v256_v42, %v253_v41  ;;  %v259_v49 = vld [vmem:[%s4614_s4 + $0x98] sm:$0xff]  ;;  %v262_v50 = vld [vmem:[%s4614_s4 + $0xb0] sm:$0xff]  ;;  %v245_v51 = vld [vmem:[%s4614_s4 + $0x28] sm:$0xff]  ;;  %v3992_v56 = vpack.c.bf16 %v255_v46, %v252_v45 }
   0xd   :  { %3178 = vmatpush1.bf16.msra.mxu0 %v3177_v30  ;;  %v3977_v52 = vpack.c.bf16 %v245_v51, %v242_v47  ;;  %v2690_v53 = vld [vmem:[%s4615_s2] ss:$0 sm:$0xff]  ;;  %v251_v55 = vld [vmem:[%s4614_s4 + $0x58] sm:$0xff]  ;;  %v258_v57 = vld [vmem:[%s4614_s4 + $0x90] sm:$0xff]  ;;  %v4001_v59 = vpack.c.bf16 %v262_v50, %v259_v49  ;;  %v60_v47 = vlaneseq }
   0xe   :  { %3190 = vmatpush3.bf16.msra.mxu1 %v3187_v26  ;;  %3192 = vmatprep.subr.bf16.mxu0 %v3915_v31  ;;  %v248_v54 = vld [vmem:[%s4614_s4 + $0x40] sm:$0xff]  ;;  %37 = vst [vmem:[#allocation2] sm:$0x3] %v2690_v53  ;;  %v261_v60 = vld [vmem:[%s4614_s4 + $0xa8] sm:$0xff]  ;;  %v254_v61 = vld [vmem:[%s4614_s4 + $0x70] sm:$0xff] }
   0xf   :  { %3223 = vmatprep.subr.bf16.mxu1 %v3806_v43  ;;  %v3998_v58 = vpack.c.bf16 %v251_v55, %v248_v54  ;;  %v257_v62 = vld [vmem:[%s4614_s4 + $0x88] sm:$0xff]  ;;  %v268_v0 = vld [vmem:[%s4614_s4 + $0xe0] sm:$0xff]  ;;  %v4021_v1 = vpack.c.bf16 %v261_v60, %v258_v57  ;;  %v267_v6 = vld [vmem:[%s4614_s4 + $0xd8] sm:$0xff]  ;;  %v4187_v49 = vshrl.u32 %v60_v47, 7 }
  0x10   :  { %2691 = vmatmul.mubr.msk.f32.vlgmr.msra.gmra.mrb[0].mxu0 %vm75_vm0, %v38_v27  ;;  %v265_v63 = vld [vmem:[%s4614_s4 + $0xc8] sm:$0xff]  ;;  %v264_v2 = vld [vmem:[%s4614_s4 + $0xc0] sm:$0xff]  ;;  %v4027_v4 = vpack.c.bf16 %v257_v62, %v254_v61  ;;  %v263_v8 = vld [vmem:[%s4614_s4 + $0xb8] sm:$0xff] }
  0x11   :  { %2885 = vmatmul.mubr.msk.f32.vlgmr.msra.gmra.mrb[0].mxu1 %vm75_vm0, %v39_v37  ;;  %3194 = vmatpush1.bf16.msra.mxu0 %v3929_v36  ;;  %v4030_v5 = vpack.c.bf16 %v268_v0, %v265_v63  ;;  %v260_v7 = vld [vmem:[%s4614_s4 + $0xa0] sm:$0xff]  ;;  %v271_v9 = vld [vmem:[%s4614_s4 + $0xf8] sm:$0xff]  ;;  %v274_v10 = vld [vmem:[%s4614_s4 + $0x110] sm:$0xff]  ;;  %v4049_v11 = vpack.c.bf16 %v267_v6, %v264_v2  ;;  %v62_v50 = vsub.s32 0, %v4187_v49  ;;  %v66_v53 = vsub.s32 1, %v4187_v49 }
  0x12   :  { %3196 = vmatprep.subr.bf16.mxu0 %v3935_v38  ;;  %152 = vmatprep.mubr.f32.mxu0 %v3805_v3  ;;  %v270_v12 = vld [vmem:[%s4614_s4 + $0xf0] sm:$0xff]  ;;  %v4055_v13 = vpack.c.bf16 %v263_v8, %v260_v7  ;;  %v4058_v14 = vpack.c.bf16 %v274_v10, %v271_v9  ;;  %v273_v15 = vld [vmem:[%s4614_s4 + $0x108] sm:$0xff]  ;;  %v280_v19 = vld [vmem:[%s4614_s4 + $0x140] sm:$0xff]  ;;  %v70_v54 = vsub.s32 2, %v4187_v49 }
  0x13   :  { %2919 = vmatprep.mubr.msk.f32.mxu1 %vm3807_vm1, %v3805_v3  ;;  %3225 = vmatpush3.bf16.msra.mxu1 %v3977_v52  ;;  %v266_v16 = vld [vmem:[%s4614_s4 + $0xd0] sm:$0xff]  ;;  %v269_v17 = vld [vmem:[%s4614_s4 + $0xe8] sm:$0xff]  ;;  %v4077_v20 = vpack.c.bf16 %v273_v15, %v270_v12  ;;  %v276_v21 = vld [vmem:[%s4614_s4 + $0x120] sm:$0xff] }
  0x14   :  { %2692 = vmatmul.mubr.msk.f32.gmra.mrb[2].mxu0 %vm75_vm0, %v39_v37  ;;  %3226 = vmatprep.subr.bf16.mxu1 %v3806_v43  ;;  %v277_v18 = vld [vmem:[%s4614_s4 + $0x128] sm:$0xff]  ;;  %v4083_v22 = vpack.c.bf16 %v269_v17, %v266_v16  ;;  %v279_v24 = vld [vmem:[%s4614_s4 + $0x138] sm:$0xff]  ;;  %v272_v25 = vld [vmem:[%s4614_s4 + $0x100] sm:$0xff]  ;;  %v3808_v16 = vmov 1966171168  }
  0x15   :  { %3198 = vmatpush1.bf16.msra.mxu0 %v3953_v44  ;;  %373 = vmatprep.mubr.f32.mxu0 %v3805_v3  ;;  %v4086_v23 = vpack.c.bf16 %v280_v19, %v277_v18  ;;  %v275_v26 = vld [vmem:[%s4614_s4 + $0x118] sm:$0xff]  ;;  %v286_v28 = vld [vmem:[%s4614_s4 + $0x170] sm:$0xff]  ;;  %v4105_v29 = vpack.c.bf16 %v279_v24, %v276_v21  ;;  %v285_v34 = vld [vmem:[%s4614_s4 + $0x168] sm:$0xff]  ;;  %v452_v17 = vunpack.c.l.s4 %v3808_v16 }
  0x16   :  { %3200 = vmatprep.subr.bf16.mxu0 %v3965_v48  ;;  %v283_v27 = vld [vmem:[%s4614_s4 + $0x158] sm:$0xff]  ;;  %v282_v30 = vld [vmem:[%s4614_s4 + $0x150] sm:$0xff]  ;;  %v4111_v32 = vpack.c.bf16 %v275_v26, %v272_v25  ;;  %v281_v37 = vld [vmem:[%s4614_s4 + $0x148] sm:$0xff] }
  0x17   :  { %3228 = vmatpush3.bf16.msra.mxu1 %v3998_v58  ;;  %v4114_v33 = vpack.c.bf16 %v286_v28, %v283_v27  ;;  %v278_v35 = vld [vmem:[%s4614_s4 + $0x130] sm:$0xff]  ;;  %v4127_v39 = vpack.c.bf16 %v285_v34, %v282_v30  ;;  %v284_v41 = vld [vmem:[%s4614_s4 + $0x160] sm:$0xff]  ;;  %v287_v42 = vld [vmem:[%s4614_s4 + $0x178] sm:$0xff]  ;;  %v453_v19 = vunpack.c.0.s8 %v452_v17 }
  0x18   :  { %3229 = vmatprep.subr.bf16.mxu1 %v3806_v43  ;;  %v4130_v40 = vpack.c.bf16 %v281_v37, %v278_v35  ;;  %v4141_v45 = vld [vmem:[#allocation2] sm:$0x3]  ;;  %v4144_v46 = vpack.c.bf16 %v287_v42, %v284_v41 }
  0x19   :  { %3202 = vmatpush1.bf16.msra.mxu0 %v3992_v56  ;;  %v58_v51 = vld [vmem:[%s4616_s5] sm:$0x7]  ;;  %v4203_v25 = vsub.s32 %v453_v19, %v4187_v49 }
  0x1a   :  { %3204 = vmatprep.subr.bf16.mxu0 %v4001_v59  ;;  %v63_v55 = vrot.slane %v58_v51, %v62_v50  ;;  %v67_v57 = vrot.slane %v58_v51, %v66_v53  ;;  %v71_v60 = vrot.slane %v58_v51, %v70_v54  ;;  %v288_v18 = vld [vmem:[%s4617_s6] sm:$0x7] }
  0x1b   :  { %3231 = vmatpush3.bf16.msra.mxu1 %v4027_v4  ;;  %v4198_v21 = vrot.slane %v288_v18, %v62_v50  ;;  %v4200_v24 = vrot.slane %v288_v18, %v66_v53 }
  0x1c   :  { %3232 = vmatprep.subr.bf16.mxu1 %v3806_v43 }
  0x1d   :  { %3206 = vmatpush1.bf16.msra.mxu0 %v4021_v1 }
  0x1e   :  { %3208 = vmatprep.subr.bf16.mxu0 %v4030_v5 }
  0x1f   :  { %3234 = vmatpush3.bf16.msra.mxu1 %v4055_v13 }
  0x20   :  { %3235 = vmatprep.subr.bf16.mxu1 %v3806_v43 }
  0x21   :  { %3210 = vmatpush1.bf16.msra.mxu0 %v4049_v11 }
  0x22   :  { %3212 = vmatprep.subr.bf16.mxu0 %v4058_v14 }
  0x23   :  { %3237 = vmatpush3.bf16.msra.mxu1 %v4083_v22 }
  0x24   :  { %3238 = vmatprep.subr.bf16.mxu1 %v3806_v43 }
  0x25   :  { %3214 = vmatpush1.bf16.msra.mxu0 %v4077_v20 }
  0x26   :  { %3216 = vmatprep.subr.bf16.mxu0 %v4086_v23 }
  0x27   :  { %3240 = vmatpush3.bf16.msra.mxu1 %v4111_v32 }
  0x28   :  { %3241 = vmatprep.subr.bf16.mxu1 %v3806_v43 }
  0x29   :  { %3218 = vmatpush1.bf16.msra.mxu0 %v4105_v29 }
  0x2a   :  { %3220 = vmatprep.subr.bf16.mxu0 %v4114_v33 }
  0x2b   :  { %3243 = vmatpush3.bf16.msra.mxu1 %v4130_v40 }
  0x2c   :  { %3244 = vmatprep.subr.bf16.mxu1 %v3806_v43 }
  0x2d   :  { %3222 = vmatpush1.bf16.msra.mxu0 %v4127_v39 }
  0x2e   :  { %3248 = vmatprep.subr.bf16.mxu0 %v3915_v31 }
  0x2f   :  { %3246 = vmatpush3.bf16.msra.mxu1 %v4144_v46 }
  0x30   :  { %374 = vmatmul.mubr.f32.vlgmr.msra.gmra.mrb[4].mxu0 %v4141_v45  ;;  %3279 = vmatprep.subr.bf16.mxu1 %v3806_v43 }
  0x31   :  { %3250 = vmatpush1.bf16.msra.mxu0 %v3929_v36  ;;  %690 = vmatprep.mubr.f32.mxu0 %v3805_v3 }
  0x32   :  { %3252 = vmatprep.subr.bf16.mxu0 %v3935_v38  ;;  %2920 = vmatmul.mubr.f32.vlgmr.msra.gmra.mrb[2].mxu1 %v4141_v45 }
  0x33   :  { %3281 = vmatpush3.bf16.msra.mxu1 %v3977_v52  ;;  %2954 = vmatprep.mubr.msk.f32.mxu1 %vm3807_vm1, %v3805_v3 }
  0x34   :  { %3282 = vmatprep.subr.bf16.mxu1 %v3806_v43 }
  0x35   :  { %3254 = vmatpush1.bf16.msra.mxu0 %v3953_v44 }
  0x36   :  { %3256 = vmatprep.subr.bf16.mxu0 %v3965_v48 }
  0x37   :  { %3284 = vmatpush3.bf16.msra.mxu1 %v3998_v58 }
  0x38   :  { %3285 = vmatprep.subr.bf16.mxu1 %v3806_v43 }
  0x39   :  { %3258 = vmatpush1.bf16.msra.mxu0 %v3992_v56 }
  0x3a   :  { %3260 = vmatprep.subr.bf16.mxu0 %v4001_v59 }
  0x3b   :  { %3287 = vmatpush3.bf16.msra.mxu1 %v4027_v4 }
  0x3c   :  { %3288 = vmatprep.subr.bf16.mxu1 %v3806_v43 }
  0x3d   :  { %3262 = vmatpush1.bf16.msra.mxu0 %v4021_v1 }
  0x3e   :  { %3264 = vmatprep.subr.bf16.mxu0 %v4030_v5 }
  0x3f   :  { %3290 = vmatpush3.bf16.msra.mxu1 %v4055_v13 }
  0x40   :  { %3291 = vmatprep.subr.bf16.mxu1 %v3806_v43 }
  0x41   :  { %3266 = vmatpush1.bf16.msra.mxu0 %v4049_v11 }
  0x42   :  { %3268 = vmatprep.subr.bf16.mxu0 %v4058_v14 }
  0x43   :  { %3293 = vmatpush3.bf16.msra.mxu1 %v4083_v22 }
  0x44   :  { %3294 = vmatprep.subr.bf16.mxu1 %v3806_v43 }
  0x45   :  { %3270 = vmatpush1.bf16.msra.mxu0 %v4077_v20 }
  0x46   :  { %3272 = vmatprep.subr.bf16.mxu0 %v4086_v23 }
  0x47   :  { %3296 = vmatpush3.bf16.msra.mxu1 %v4111_v32 }
  0x48   :  { %3297 = vmatprep.subr.bf16.mxu1 %v3806_v43 }
  0x49   :  { %3274 = vmatpush1.bf16.msra.mxu0 %v4105_v29 }
  0x4a   :  { %3276 = vmatprep.subr.bf16.mxu0 %v4114_v33 }
  0x4b   :  { %3299 = vmatpush3.bf16.msra.mxu1 %v4130_v40 }
  0x4c   :  { %3300 = vmatprep.subr.bf16.mxu1 %v3806_v43 }
  0x4d   :  { %3278 = vmatpush1.bf16.msra.mxu0 %v4127_v39 }
  0x4e   :  { %3304 = vmatprep.subr.bf16.mxu0 %v3915_v31 }
  0x4f   :  { %3302 = vmatpush3.bf16.msra.mxu1 %v4144_v46 }
  0x50   :  { %3335 = vmatprep.subr.bf16.mxu1 %v3806_v43 }
  0xe3   :  { %v148_v61 = vpop.f32.mrb[0].mxu0 }
  0xe4   :  { %v149_v62 = vadd.f32 %v148_v61, %v63_v55  ;;  %v2886_v63 = vpop.f32.mrb[0].mxu1  ;;  %v150_v0 = vpop.f32.mrb[1].mxu0 }
  0xe5   :  { %v231_v2 = vadd.f32 %v2886_v63, %v71_v60  ;;  %v151_v6 = vadd.f32 %v150_v0, %v67_v57  ;;  %v225_v7 = vpop.f32.mrb[1].mxu1 }
  0xe6   :  { %234 = vst [vmem:[#allocation3] sm:$0xff] %v149_v62  ;;  %v226_v8 = vadd.f32 %v225_v7, %v71_v60 }
  0xe7   :  { %239 = vst [vmem:[#allocation3 + $0x28] sm:$0xff] %v231_v2  ;;  %235 = vst [vmem:[#allocation3 + $0x8] sm:$0xff] %v151_v6  ;;  %v154_v9 = vpop.f32.mrb[2].mxu0 }
  0xe8   :  { %236 = vst [vmem:[#allocation3 + $0x10] sm:$0xff] %v226_v8  ;;  %v155_v10 = vadd.f32 %v154_v9, %v63_v55  ;;  %v156_v12 = vpop.f32.mrb[3].mxu0 }
  0xe9   :  { %v157_v15 = vadd.f32 %v156_v12, %v67_v57 }
  0xea   :  { %237 = vst [vmem:[#allocation3 + $0x18] sm:$0xff] %v155_v10  ;;  %v4213_v10 = vrot.slane %v288_v18, %v70_v54 }
  0xeb   :  { %238 = vst [vmem:[#allocation3 + $0x20] sm:$0xff] %v157_v15 }
  0xef   :  { %v290_v35 = vld [vmem:[#allocation3] ss:$8 sm:$0x7] }
  0xf0   :  { %v491_v60 = vrot.slane %v290_v35, 1 }
  0xf2   :  { %v292_v42 = vld [vmem:[#allocation3 + $0x18] ss:$8 sm:$0x7] }
  0xf3   :  { %v492_v61 = vrot.slane %v292_v42, 1 }
 0x103   :  { %v375_v26 = vpop.f32.mrb[4].mxu0 }
 0x104   :  { %v376_v27 = vadd.f32 %v375_v26, %v4198_v21  ;;  %v377_v28 = vpop.f32.mrb[5].mxu0 }
 0x105   :  { %v378_v30 = vadd.f32 %v377_v28, %v4200_v24  ;;  %v446_v41 = vpop.f32.mrb[2].mxu1 }
 0x106   :  { %v457_v34 = vrot.slane %v376_v27, %v4203_v25  ;;  %v2921_v51 = vpop.f32.mrb[3].mxu1  ;;  %v447_v15 = vadd.f32 %v446_v41, %v4213_v10  ;;  %v561_v41 = vrot.slane %v290_v35, 2 }
 0x107   :  { %v502_v37 = vrot.slane %v378_v30, %v4203_v25 }
 0x108   :  { %v458_v47 = vcombine.high %v457_v34, %v457_v34  ;;  %v465_v50 = vrot.slane %v457_v34, %v4203_v25  ;;  %v541_v26 = vrot.slane %v447_v15, %v4203_v25 }
 0x109   :  { %v503_v53 = vcombine.high %v502_v37, %v502_v37  ;;  %v510_v49 = vrot.slane %v502_v37, %v4203_v25 }
 0x10a   :  { %v472_v55 = vrot.slane %v458_v47, %v4203_v25  ;;  %v475_v57 = vadd.f32 %v465_v50, %v290_v35  ;;  %v542_v28 = vcombine.high %v541_v26, %v541_v26  ;;  %v549_v37 = vrot.slane %v541_v26, %v4203_v25 }
 0x10b   :  { %v517_v62 = vrot.slane %v503_v53, %v4203_v25  ;;  %v520_v2 = vadd.f32 %v510_v49, %v491_v60  ;;  %v562_v49 = vrot.slane %v292_v42, 2  ;;  %v580_v60 = vrot.slane %v4141_v45, %v4203_v25 }
 0x10c   :  { %v476_v63 = vadd.f32 %v472_v55, %v292_v42  ;;  %v2695_v0 = vmul.f32 -1.442695, %v475_v57  ;;  %v556_v18 = vrot.slane %v542_v28, %v4203_v25 }
 0x10d   :  { %v521_v7 = vadd.f32 %v517_v62, %v492_v61  ;;  %v2697_v8 = vmul.f32 -1.442695, %v520_v2  ;;  %v581_v61 = vcombine.high %v580_v60, %v580_v60 }
 0x10e   :  { %3645 = vpow2.f32 %v2695_v0  ;;  %v2696_v6 = vmul.f32 -1.442695, %v476_v63  ;;  %v588_v63 = vrot.slane %v580_v60, %v4203_v25 }
 0x10f   :  { %v2698_v9 = vmul.f32 -1.442695, %v521_v7  ;;  %v595_v2 = vrot.slane %v581_v61, %v4203_v25 }
 0x110   :  { %3647 = vpow2.f32 %v2696_v6 }
 0x111   :  { %3649 = vpow2.f32 %v2697_v8 }
 0x112   :  { %3651 = vpow2.f32 %v2698_v9 }
 0x118   :  { %v3646_v12 = vpop.eup %3645 }
 0x119   :  { %v483_v16 = vadd.f32 1.0, %v3646_v12 }
 0x11a   :  { %v3648_v17 = vpop.eup %3647 }
 0x11b   :  { %v484_v19 = vadd.f32 1.0, %v3648_v17  ;;  %3653 = vrcp.f32 %v483_v16  ;;  %v3650_v27 = vpop.eup %3649 }
 0x11c   :  { %v3652_v30 = vpop.eup %3651  ;;  %v528_v34 = vadd.f32 1.0, %v3650_v27 }
 0x11d   :  { %3655 = vrcp.f32 %v484_v19  ;;  %v529_v54 = vadd.f32 1.0, %v3652_v30 }
 0x11e   :  { %3657 = vrcp.f32 %v528_v34 }
 0x11f   :  { %3659 = vrcp.f32 %v529_v54 }
 0x125   :  { %v3654_v47 = vpop.eup %3653 }
 0x126   :  { %v559_v50 = vmul.f32 %v3654_v47, %v549_v37 }
 0x127   :  { %v3656_v51 = vpop.eup %3655 }
 0x128   :  { %v560_v53 = vmul.f32 %v3656_v51, %v556_v18  ;;  %v565_v55 = vadd.f32 %v561_v41, %v559_v50  ;;  %v3658_v62 = vpop.eup %3657  ;;  %v605_v50 = vld [vmem:[#allocation3 + $0x1] ss:$8 sm:$0x7] }
 0x129   :  { %v3660_v0 = vpop.eup %3659  ;;  %v569_v6 = vsub.f32 1.0, %v3658_v62  ;;  %v598_v9 = vmul.f32 %v3658_v62, %v588_v63  ;;  %v808_v61 = vrot.slane %v605_v50, 1 }
 0x12a   :  { %v566_v57 = vadd.f32 %v562_v49, %v560_v53  ;;  %3661 = vtanh.f32 %v565_v55  ;;  %v570_v7 = vsub.f32 1.0, %v3660_v0  ;;  %v599_v15 = vmul.f32 %v3660_v0, %v595_v2  ;;  %v607_v55 = vld [vmem:[#allocation3 + $0x19] ss:$8 sm:$0x7] }
 0x12b   :  { %v809_v2 = vrot.slane %v607_v55, 1 }
 0x12c   :  { %3663 = vtanh.f32 %v566_v57 }
 0x134   :  { %v3662_v35 = vpop.eup %3661 }
 0x135   :  { %v571_v8 = vmul.f32 %v3662_v35, %v569_v6 }
 0x136   :  { %v3664_v42 = vpop.eup %3663 }
 0x137   :  { %v572_v12 = vmul.f32 %v3664_v42, %v570_v7  ;;  %v4223_v16 = vadd.f32 %v598_v9, %v571_v8 }
 0x139   :  { %v4225_v17 = vadd.f32 %v599_v15, %v572_v12  ;;  %602 = vst [vmem:[#allocation4] sm:$0x1] %v4223_v16 }
 0x13b   :  { %603 = vst [vmem:[#allocation4 + $0x8] sm:$0x1] %v4225_v17  ;;  %v610_v45 = vcombine.low %v4223_v16, %v4225_v17 }
 0x13d   :  { %v617_v19 = vrot.slane %v610_v45, %v4203_v25 }
 0x13f   :  { %v624_v26 = vrot.slane %v617_v19, %v4203_v25 }
 0x141   :  { %691 = vmatmul.mubr.f32.vlgmr.msra.gmra.mrb[6].mxu0 %v624_v26  ;;  %2955 = vmatmul.mubr.f32.vlgmr.msra.gmra.mrb[4].mxu1 %v624_v26 }
 0x142   :  { %3306 = vmatpush1.bf16.msra.mxu0 %v3929_v36  ;;  %3337 = vmatpush3.bf16.msra.mxu1 %v3977_v52 }
 0x143   :  { %3308 = vmatprep.subr.bf16.mxu0 %v3935_v38  ;;  %3338 = vmatprep.subr.bf16.mxu1 %v3806_v43 }
 0x144   :  { %982 = vmatprep.mubr.f32.mxu0 %v3805_v3  ;;  %2989 = vmatprep.mubr.msk.f32.mxu1 %vm3807_vm1, %v3805_v3 }
 0x146   :  { %3310 = vmatpush1.bf16.msra.mxu0 %v3953_v44  ;;  %3340 = vmatpush3.bf16.msra.mxu1 %v3998_v58 }
 0x147   :  { %3312 = vmatprep.subr.bf16.mxu0 %v3965_v48  ;;  %3341 = vmatprep.subr.bf16.mxu1 %v3806_v43 }
 0x14a   :  { %3314 = vmatpush1.bf16.msra.mxu0 %v3992_v56  ;;  %3343 = vmatpush3.bf16.msra.mxu1 %v4027_v4 }
 0x14b   :  { %3316 = vmatprep.subr.bf16.mxu0 %v4001_v59  ;;  %3344 = vmatprep.subr.bf16.mxu1 %v3806_v43 }
 0x14e   :  { %3318 = vmatpush1.bf16.msra.mxu0 %v4021_v1  ;;  %3346 = vmatpush3.bf16.msra.mxu1 %v4055_v13 }
 0x14f   :  { %3320 = vmatprep.subr.bf16.mxu0 %v4030_v5  ;;  %3347 = vmatprep.subr.bf16.mxu1 %v3806_v43 }
 0x152   :  { %3322 = vmatpush1.bf16.msra.mxu0 %v4049_v11  ;;  %3349 = vmatpush3.bf16.msra.mxu1 %v4083_v22 }
 0x153   :  { %3324 = vmatprep.subr.bf16.mxu0 %v4058_v14  ;;  %3350 = vmatprep.subr.bf16.mxu1 %v3806_v43 }
 0x156   :  { %3326 = vmatpush1.bf16.msra.mxu0 %v4077_v20  ;;  %3352 = vmatpush3.bf16.msra.mxu1 %v4111_v32 }
 0x157   :  { %3328 = vmatprep.subr.bf16.mxu0 %v4086_v23  ;;  %3353 = vmatprep.subr.bf16.mxu1 %v3806_v43 }
 0x15a   :  { %3330 = vmatpush1.bf16.msra.mxu0 %v4105_v29  ;;  %3355 = vmatpush3.bf16.msra.mxu1 %v4130_v40 }
 0x15b   :  { %3332 = vmatprep.subr.bf16.mxu0 %v4114_v33  ;;  %3356 = vmatprep.subr.bf16.mxu1 %v3806_v43 }
 0x15e   :  { %3334 = vmatpush1.bf16.msra.mxu0 %v4127_v39  ;;  %3358 = vmatpush3.bf16.msra.mxu1 %v4144_v46 }
 0x15f   :  { %3360 = vmatprep.subr.bf16.mxu0 %v3915_v31  ;;  %3391 = vmatprep.subr.bf16.mxu1 %v3806_v43 }
 0x214   :  { %v692_v27 = vpop.f32.mrb[6].mxu0  ;;  %v763_v28 = vpop.f32.mrb[4].mxu1 }
 0x215   :  { %v693_v30 = vadd.f32 %v692_v27, %v4198_v21  ;;  %v694_v34 = vpop.f32.mrb[7].mxu0  ;;  %v2956_v37 = vpop.f32.mrb[5].mxu1  ;;  %v764_v45 = vadd.f32 %v763_v28, %v4213_v10 }
 0x216   :  { %v695_v54 = vadd.f32 %v694_v34, %v4200_v24 }
 0x217   :  { %v774_v18 = vrot.slane %v693_v30, %v4203_v25  ;;  %v858_v26 = vrot.slane %v764_v45, %v4203_v25 }
 0x218   :  { %v819_v47 = vrot.slane %v695_v54, %v4203_v25 }
 0x219   :  { %v775_v41 = vcombine.high %v774_v18, %v774_v18  ;;  %v782_v51 = vrot.slane %v774_v18, %v4203_v25  ;;  %v859_v34 = vcombine.high %v858_v26, %v858_v26  ;;  %v866_v54 = vrot.slane %v858_v26, %v4203_v25 }
 0x21a   :  { %v820_v53 = vcombine.high %v819_v47, %v819_v47  ;;  %v827_v49 = vrot.slane %v819_v47, %v4203_v25 }
 0x21b   :  { %v789_v57 = vrot.slane %v775_v41, %v4203_v25  ;;  %v792_v60 = vadd.f32 %v782_v51, %v605_v50  ;;  %v873_v41 = vrot.slane %v859_v34, %v4203_v25 }
 0x21c   :  { %v834_v62 = vrot.slane %v820_v53, %v4203_v25  ;;  %v837_v6 = vadd.f32 %v827_v49, %v808_v61  ;;  %v878_v53 = vrot.slane %v605_v50, 2 }
 0x21d   :  { %v793_v63 = vadd.f32 %v789_v57, %v607_v55  ;;  %v2699_v0 = vmul.f32 -1.442695, %v792_v60  ;;  %v879_v57 = vrot.slane %v607_v55, 2 }
 0x21e   :  { %v838_v7 = vadd.f32 %v834_v62, %v809_v2  ;;  %v2701_v8 = vmul.f32 -1.442695, %v837_v6 }
 0x21f   :  { %3665 = vpow2.f32 %v2699_v0  ;;  %v2700_v35 = vmul.f32 -1.442695, %v793_v63 }
 0x220   :  { %v2702_v9 = vmul.f32 -1.442695, %v838_v7 }
 0x221   :  { %3667 = vpow2.f32 %v2700_v35 }
 0x222   :  { %3669 = vpow2.f32 %v2701_v8 }
 0x223   :  { %3671 = vpow2.f32 %v2702_v9 }
 0x229   :  { %v3666_v42 = vpop.eup %3665 }
 0x22a   :  { %v800_v12 = vadd.f32 1.0, %v3666_v42 }
 0x22b   :  { %v3668_v15 = vpop.eup %3667 }
 0x22c   :  { %v801_v19 = vadd.f32 1.0, %v3668_v15  ;;  %3673 = vrcp.f32 %v800_v12  ;;  %v3670_v27 = vpop.eup %3669 }
 0x22d   :  { %v3672_v30 = vpop.eup %3671  ;;  %v845_v37 = vadd.f32 1.0, %v3670_v27 }
 0x22e   :  { %3675 = vrcp.f32 %v801_v19  ;;  %v846_v18 = vadd.f32 1.0, %v3672_v30 }
 0x22f   :  { %3677 = vrcp.f32 %v845_v37 }
 0x230   :  { %3679 = vrcp.f32 %v846_v18 }
 0x236   :  { %v3674_v47 = vpop.eup %3673 }
 0x237   :  { %v876_v51 = vmul.f32 %v3674_v47, %v866_v54  ;;  %v897_v54 = vld [vmem:[#allocation3 + $0x2] ss:$8 sm:$0x7] }
 0x238   :  { %v3676_v49 = vpop.eup %3675 }
 0x239   :  { %v877_v28 = vmul.f32 %v3676_v49, %v873_v41  ;;  %v882_v60 = vadd.f32 %v878_v53, %v876_v51  ;;  %v3678_v62 = vpop.eup %3677  ;;  %v899_v53 = vld [vmem:[#allocation3 + $0x1a] ss:$8 sm:$0x7] }
 0x23a   :  { %v3680_v63 = vpop.eup %3679  ;;  %v886_v0 = vsub.f32 1.0, %v3678_v62  ;;  %v890_v7 = vmul.f32 %v3678_v62, %v4223_v16 }
 0x23b   :  { %v883_v61 = vadd.f32 %v879_v57, %v877_v28  ;;  %3681 = vtanh.f32 %v882_v60  ;;  %v887_v6 = vsub.f32 1.0, %v3680_v63  ;;  %v891_v50 = vmul.f32 %v3680_v63, %v4225_v17 }
 0x23c   :  { %v1100_v57 = vrot.slane %v897_v54, 1  ;;  %v1101_v63 = vrot.slane %v899_v53, 1 }
 0x23d   :  { %3683 = vtanh.f32 %v883_v61 }
 0x245   :  { %v3682_v2 = vpop.eup %3681 }
 0x246   :  { %v888_v35 = vmul.f32 %v3682_v2, %v886_v0 }
 0x247   :  { %v3684_v8 = vpop.eup %3683 }
 0x248   :  { %v889_v9 = vmul.f32 %v3684_v8, %v887_v6  ;;  %v4282_v42 = vadd.f32 %v890_v7, %v888_v35 }
 0x24a   :  { %v4284_v55 = vadd.f32 %v891_v50, %v889_v9  ;;  %894 = vst [vmem:[#allocation4 + $0x1] sm:$0x1] %v4282_v42 }
 0x24c   :  { %895 = vst [vmem:[#allocation4 + $0x9] sm:$0x1] %v4284_v55  ;;  %v902_v12 = vcombine.low %v4282_v42, %v4284_v55 }
 0x24e   :  { %v909_v15 = vrot.slane %v902_v12, %v4203_v25 }
 0x250   :  { %v916_v45 = vrot.slane %v909_v15, %v4203_v25 }
 0x252   :  { %983 = vmatmul.mubr.f32.vlgmr.msra.gmra.mrb[8].mxu0 %v916_v45  ;;  %2990 = vmatmul.mubr.f32.vlgmr.msra.gmra.mrb[6].mxu1 %v916_v45 }
 0x253   :  { %3362 = vmatpush1.bf16.msra.mxu0 %v3929_v36  ;;  %3393 = vmatpush3.bf16.msra.mxu1 %v3977_v52 }
 0x254   :  { %3364 = vmatprep.subr.bf16.mxu0 %v3935_v38  ;;  %3394 = vmatprep.subr.bf16.mxu1 %v3806_v43 }
 0x255   :  { %1274 = vmatprep.mubr.f32.mxu0 %v3805_v3  ;;  %3024 = vmatprep.mubr.msk.f32.mxu1 %vm3807_vm1, %v3805_v3 }
 0x257   :  { %3366 = vmatpush1.bf16.msra.mxu0 %v3953_v44  ;;  %3396 = vmatpush3.bf16.msra.mxu1 %v3998_v58 }
 0x258   :  { %3368 = vmatprep.subr.bf16.mxu0 %v3965_v48  ;;  %3397 = vmatprep.subr.bf16.mxu1 %v3806_v43 }
 0x25b   :  { %3370 = vmatpush1.bf16.msra.mxu0 %v3992_v56  ;;  %3399 = vmatpush3.bf16.msra.mxu1 %v4027_v4 }
 0x25c   :  { %3372 = vmatprep.subr.bf16.mxu0 %v4001_v59  ;;  %3400 = vmatprep.subr.bf16.mxu1 %v3806_v43 }
 0x25f   :  { %3374 = vmatpush1.bf16.msra.mxu0 %v4021_v1  ;;  %3402 = vmatpush3.bf16.msra.mxu1 %v4055_v13 }
 0x260   :  { %3376 = vmatprep.subr.bf16.mxu0 %v4030_v5  ;;  %3403 = vmatprep.subr.bf16.mxu1 %v3806_v43 }
 0x263   :  { %3378 = vmatpush1.bf16.msra.mxu0 %v4049_v11  ;;  %3405 = vmatpush3.bf16.msra.mxu1 %v4083_v22 }
 0x264   :  { %3380 = vmatprep.subr.bf16.mxu0 %v4058_v14  ;;  %3406 = vmatprep.subr.bf16.mxu1 %v3806_v43 }
 0x267   :  { %3382 = vmatpush1.bf16.msra.mxu0 %v4077_v20  ;;  %3408 = vmatpush3.bf16.msra.mxu1 %v4111_v32 }
 0x268   :  { %3384 = vmatprep.subr.bf16.mxu0 %v4086_v23  ;;  %3409 = vmatprep.subr.bf16.mxu1 %v3806_v43 }
 0x26b   :  { %3386 = vmatpush1.bf16.msra.mxu0 %v4105_v29  ;;  %3411 = vmatpush3.bf16.msra.mxu1 %v4130_v40 }
 0x26c   :  { %3388 = vmatprep.subr.bf16.mxu0 %v4114_v33  ;;  %3412 = vmatprep.subr.bf16.mxu1 %v3806_v43 }
 0x26f   :  { %3390 = vmatpush1.bf16.msra.mxu0 %v4127_v39  ;;  %3414 = vmatpush3.bf16.msra.mxu1 %v4144_v46 }
 0x270   :  { %3416 = vmatprep.subr.bf16.mxu0 %v3915_v31  ;;  %3447 = vmatprep.subr.bf16.mxu1 %v3806_v43 }
 0x325   :  { %v984_v16 = vpop.f32.mrb[8].mxu0  ;;  %v1055_v17 = vpop.f32.mrb[6].mxu1 }
 0x326   :  { %v985_v19 = vadd.f32 %v984_v16, %v4198_v21  ;;  %v986_v26 = vpop.f32.mrb[9].mxu0  ;;  %v2991_v27 = vpop.f32.mrb[7].mxu1  ;;  %v1056_v12 = vadd.f32 %v1055_v17, %v4213_v10 }
 0x327   :  { %v987_v30 = vadd.f32 %v986_v26, %v4200_v24 }
 0x328   :  { %v1066_v34 = vrot.slane %v985_v19, %v4203_v25  ;;  %v1150_v45 = vrot.slane %v1056_v12, %v4203_v25 }
 0x329   :  { %v1111_v37 = vrot.slane %v987_v30, %v4203_v25 }
 0x32a   :  { %v1067_v18 = vcombine.high %v1066_v34, %v1066_v34  ;;  %v1074_v47 = vrot.slane %v1066_v34, %v4203_v25  ;;  %v1151_v26 = vcombine.high %v1150_v45, %v1150_v45  ;;  %v1158_v30 = vrot.slane %v1150_v45, %v4203_v25 }
 0x32b   :  { %v1112_v41 = vcombine.high %v1111_v37, %v1111_v37  ;;  %v1119_v51 = vrot.slane %v1111_v37, %v4203_v25 }
 0x32c   :  { %v1081_v49 = vrot.slane %v1067_v18, %v4203_v25  ;;  %v1084_v28 = vadd.f32 %v1074_v47, %v897_v54  ;;  %v1165_v18 = vrot.slane %v1151_v26, %v4203_v25 }
 0x32d   :  { %v1126_v60 = vrot.slane %v1112_v41, %v4203_v25  ;;  %v1129_v0 = vadd.f32 %v1119_v51, %v1100_v57  ;;  %v1170_v41 = vrot.slane %v897_v54, 2 }
 0x32e   :  { %v1085_v61 = vadd.f32 %v1081_v49, %v899_v53  ;;  %v2703_v62 = vmul.f32 -1.442695, %v1084_v28  ;;  %v1171_v49 = vrot.slane %v899_v53, 2 }
 0x32f   :  { %v1130_v6 = vadd.f32 %v1126_v60, %v1101_v63  ;;  %v2705_v35 = vmul.f32 -1.442695, %v1129_v0 }
 0x330   :  { %3685 = vpow2.f32 %v2703_v62  ;;  %v2704_v2 = vmul.f32 -1.442695, %v1085_v61 }
 0x331   :  { %v2706_v7 = vmul.f32 -1.442695, %v1130_v6 }
 0x332   :  { %3687 = vpow2.f32 %v2704_v2 }
 0x333   :  { %3689 = vpow2.f32 %v2705_v35 }
 0x334   :  { %3691 = vpow2.f32 %v2706_v7 }
 0x33a   :  { %v3686_v8 = vpop.eup %3685 }
 0x33b   :  { %v1092_v9 = vadd.f32 1.0, %v3686_v8 }
 0x33c   :  { %v3688_v50 = vpop.eup %3687 }
 0x33d   :  { %v1093_v15 = vadd.f32 1.0, %v3688_v50  ;;  %3693 = vrcp.f32 %v1092_v9  ;;  %v3690_v16 = vpop.eup %3689 }
 0x33e   :  { %v3692_v19 = vpop.eup %3691  ;;  %v1137_v27 = vadd.f32 1.0, %v3690_v16 }
 0x33f   :  { %3695 = vrcp.f32 %v1093_v15  ;;  %v1138_v34 = vadd.f32 1.0, %v3692_v19 }
 0x340   :  { %3697 = vrcp.f32 %v1137_v27 }
 0x341   :  { %3699 = vrcp.f32 %v1138_v34 }
 0x347   :  { %v3694_v37 = vpop.eup %3693 }
 0x348   :  { %v1168_v47 = vmul.f32 %v3694_v37, %v1158_v30  ;;  %v1189_v30 = vld [vmem:[#allocation3 + $0x3] ss:$8 sm:$0x7] }
 0x349   :  { %v3696_v51 = vpop.eup %3695 }
 0x34a   :  { %v1169_v17 = vmul.f32 %v3696_v51, %v1165_v18  ;;  %v1174_v28 = vadd.f32 %v1170_v41, %v1168_v47  ;;  %v3698_v60 = vpop.eup %3697  ;;  %v1191_v41 = vld [vmem:[#allocation3 + $0x1b] ss:$8 sm:$0x7] }
 0x34b   :  { %v3700_v61 = vpop.eup %3699  ;;  %v1178_v62 = vsub.f32 1.0, %v3698_v60  ;;  %v1182_v6 = vmul.f32 %v3698_v60, %v4282_v42 }
 0x34c   :  { %v1175_v57 = vadd.f32 %v1171_v49, %v1169_v17  ;;  %3701 = vtanh.f32 %v1174_v28  ;;  %v1179_v0 = vsub.f32 1.0, %v3700_v61  ;;  %v1183_v54 = vmul.f32 %v3700_v61, %v4284_v55 }
 0x34d   :  { %v1392_v49 = vrot.slane %v1189_v30, 1  ;;  %v1393_v61 = vrot.slane %v1191_v41, 1 }
 0x34e   :  { %3703 = vtanh.f32 %v1175_v57 }
 0x356   :  { %v3702_v63 = vpop.eup %3701 }
 0x357   :  { %v1180_v2 = vmul.f32 %v3702_v63, %v1178_v62 }
 0x358   :  { %v3704_v35 = vpop.eup %3703 }
 0x359   :  { %v1181_v7 = vmul.f32 %v3704_v35, %v1179_v0  ;;  %v4341_v8 = vadd.f32 %v1182_v6, %v1180_v2 }
 0x35b   :  { %v4343_v53 = vadd.f32 %v1183_v54, %v1181_v7  ;;  %1186 = vst [vmem:[#allocation4 + $0x2] sm:$0x1] %v4341_v8 }
 0x35d   :  { %1187 = vst [vmem:[#allocation4 + $0xa] sm:$0x1] %v4343_v53  ;;  %v1194_v9 = vcombine.low %v4341_v8, %v4343_v53 }
 0x35f   :  { %v1201_v50 = vrot.slane %v1194_v9, %v4203_v25 }
 0x361   :  { %v1208_v12 = vrot.slane %v1201_v50, %v4203_v25 }
 0x363   :  { %1275 = vmatmul.mubr.f32.vlgmr.msra.gmra.mrb[10].mxu0 %v1208_v12  ;;  %3025 = vmatmul.mubr.f32.vlgmr.msra.gmra.mrb[8].mxu1 %v1208_v12 }
 0x364   :  { %3418 = vmatpush1.bf16.msra.mxu0 %v3929_v36  ;;  %3449 = vmatpush3.bf16.msra.mxu1 %v3977_v52 }
 0x365   :  { %3420 = vmatprep.subr.bf16.mxu0 %v3935_v38  ;;  %3450 = vmatprep.subr.bf16.mxu1 %v3806_v43 }
 0x366   :  { %1566 = vmatprep.mubr.f32.mxu0 %v3805_v3  ;;  %3059 = vmatprep.mubr.msk.f32.mxu1 %vm3807_vm1, %v3805_v3 }
 0x368   :  { %3422 = vmatpush1.bf16.msra.mxu0 %v3953_v44  ;;  %3452 = vmatpush3.bf16.msra.mxu1 %v3998_v58 }
 0x369   :  { %3424 = vmatprep.subr.bf16.mxu0 %v3965_v48  ;;  %3453 = vmatprep.subr.bf16.mxu1 %v3806_v43 }
 0x36c   :  { %3426 = vmatpush1.bf16.msra.mxu0 %v3992_v56  ;;  %3455 = vmatpush3.bf16.msra.mxu1 %v4027_v4 }
 0x36d   :  { %3428 = vmatprep.subr.bf16.mxu0 %v4001_v59  ;;  %3456 = vmatprep.subr.bf16.mxu1 %v3806_v43 }
 0x370   :  { %3430 = vmatpush1.bf16.msra.mxu0 %v4021_v1  ;;  %3458 = vmatpush3.bf16.msra.mxu1 %v4055_v13 }
 0x371   :  { %3432 = vmatprep.subr.bf16.mxu0 %v4030_v5  ;;  %3459 = vmatprep.subr.bf16.mxu1 %v3806_v43 }
 0x374   :  { %3434 = vmatpush1.bf16.msra.mxu0 %v4049_v11  ;;  %3461 = vmatpush3.bf16.msra.mxu1 %v4083_v22 }
 0x375   :  { %3436 = vmatprep.subr.bf16.mxu0 %v4058_v14  ;;  %3462 = vmatprep.subr.bf16.mxu1 %v3806_v43 }
 0x378   :  { %3438 = vmatpush1.bf16.msra.mxu0 %v4077_v20  ;;  %3464 = vmatpush3.bf16.msra.mxu1 %v4111_v32 }
 0x379   :  { %3440 = vmatprep.subr.bf16.mxu0 %v4086_v23  ;;  %3465 = vmatprep.subr.bf16.mxu1 %v3806_v43 }
 0x37c   :  { %3442 = vmatpush1.bf16.msra.mxu0 %v4105_v29  ;;  %3467 = vmatpush3.bf16.msra.mxu1 %v4130_v40 }
 0x37d   :  { %3444 = vmatprep.subr.bf16.mxu0 %v4114_v33  ;;  %3468 = vmatprep.subr.bf16.mxu1 %v3806_v43 }
 0x380   :  { %3446 = vmatpush1.bf16.msra.mxu0 %v4127_v39  ;;  %3470 = vmatpush3.bf16.msra.mxu1 %v4144_v46 }
 0x381   :  { %3472 = vmatprep.subr.bf16.mxu0 %v3915_v31  ;;  %3503 = vmatprep.subr.bf16.mxu1 %v3806_v43 }
 0x436   :  { %v1276_v42 = vpop.f32.mrb[10].mxu0  ;;  %v1347_v55 = vpop.f32.mrb[8].mxu1 }
 0x437   :  { %v1277_v15 = vadd.f32 %v1276_v42, %v4198_v21  ;;  %v1278_v45 = vpop.f32.mrb[11].mxu0  ;;  %v3026_v16 = vpop.f32.mrb[9].mxu1  ;;  %v1348_v9 = vadd.f32 %v1347_v55, %v4213_v10 }
 0x438   :  { %v1279_v19 = vadd.f32 %v1278_v45, %v4200_v24 }
 0x439   :  { %v1358_v26 = vrot.slane %v1277_v15, %v4203_v25  ;;  %v1442_v12 = vrot.slane %v1348_v9, %v4203_v25 }
 0x43a   :  { %v1403_v27 = vrot.slane %v1279_v19, %v4203_v25 }
 0x43b   :  { %v1359_v34 = vcombine.high %v1358_v26, %v1358_v26  ;;  %v1366_v37 = vrot.slane %v1358_v26, %v4203_v25  ;;  %v1443_v45 = vcombine.high %v1442_v12, %v1442_v12  ;;  %v1450_v19 = vrot.slane %v1442_v12, %v4203_v25 }
 0x43c   :  { %v1404_v18 = vcombine.high %v1403_v27, %v1403_v27  ;;  %v1411_v47 = vrot.slane %v1403_v27, %v4203_v25 }
 0x43d   :  { %v1373_v51 = vrot.slane %v1359_v34, %v4203_v25  ;;  %v1376_v17 = vadd.f32 %v1366_v37, %v1189_v30  ;;  %v1457_v34 = vrot.slane %v1443_v45, %v4203_v25 }
 0x43e   :  { %v1418_v28 = vrot.slane %v1404_v18, %v4203_v25  ;;  %v1421_v62 = vadd.f32 %v1411_v47, %v1392_v49  ;;  %v1462_v18 = vrot.slane %v1189_v30, 2 }
 0x43f   :  { %v1377_v57 = vadd.f32 %v1373_v51, %v1191_v41  ;;  %v2707_v60 = vmul.f32 -1.442695, %v1376_v17  ;;  %v1463_v51 = vrot.slane %v1191_v41, 2 }
 0x440   :  { %v1422_v0 = vadd.f32 %v1418_v28, %v1393_v61  ;;  %v2709_v2 = vmul.f32 -1.442695, %v1421_v62 }
 0x441   :  { %3705 = vpow2.f32 %v2707_v60  ;;  %v2708_v63 = vmul.f32 -1.442695, %v1377_v57 }
 0x442   :  { %v2710_v6 = vmul.f32 -1.442695, %v1422_v0 }
 0x443   :  { %3707 = vpow2.f32 %v2708_v63 }
 0x444   :  { %3709 = vpow2.f32 %v2709_v2 }
 0x445   :  { %3711 = vpow2.f32 %v2710_v6 }
 0x44b   :  { %v3706_v35 = vpop.eup %3705 }
 0x44c   :  { %v1384_v7 = vadd.f32 1.0, %v3706_v35 }
 0x44d   :  { %v3708_v54 = vpop.eup %3707 }
 0x44e   :  { %v1385_v50 = vadd.f32 1.0, %v3708_v54  ;;  %3713 = vrcp.f32 %v1384_v7  ;;  %v3710_v42 = vpop.eup %3709 }
 0x44f   :  { %v3712_v15 = vpop.eup %3711  ;;  %v1429_v16 = vadd.f32 1.0, %v3710_v42 }
 0x450   :  { %3715 = vrcp.f32 %v1385_v50  ;;  %v1430_v26 = vadd.f32 1.0, %v3712_v15 }
 0x451   :  { %3717 = vrcp.f32 %v1429_v16 }
 0x452   :  { %3719 = vrcp.f32 %v1430_v26 }
 0x458   :  { %v3714_v27 = vpop.eup %3713 }
 0x459   :  { %v1460_v37 = vmul.f32 %v3714_v27, %v1450_v19  ;;  %v1481_v19 = vld [vmem:[#allocation3 + $0x4] ss:$8 sm:$0x7] }
 0x45a   :  { %v3716_v47 = vpop.eup %3715 }
 0x45b   :  { %v1461_v55 = vmul.f32 %v3716_v47, %v1457_v34  ;;  %v1466_v17 = vadd.f32 %v1462_v18, %v1460_v37  ;;  %v3718_v28 = vpop.eup %3717  ;;  %v1483_v18 = vld [vmem:[#allocation3 + $0x1c] ss:$8 sm:$0x7] }
 0x45c   :  { %v3720_v57 = vpop.eup %3719  ;;  %v1470_v60 = vsub.f32 1.0, %v3718_v28  ;;  %v1474_v0 = vmul.f32 %v3718_v28, %v4341_v8 }
 0x45d   :  { %v1467_v49 = vadd.f32 %v1463_v51, %v1461_v55  ;;  %3721 = vtanh.f32 %v1466_v17  ;;  %v1471_v62 = vsub.f32 1.0, %v3720_v57  ;;  %v1475_v30 = vmul.f32 %v3720_v57, %v4343_v53 }
 0x45e   :  { %v1684_v51 = vrot.slane %v1481_v19, 1  ;;  %v1685_v57 = vrot.slane %v1483_v18, 1 }
 0x45f   :  { %3723 = vtanh.f32 %v1467_v49 }
 0x467   :  { %v3722_v61 = vpop.eup %3721 }
 0x468   :  { %v1472_v63 = vmul.f32 %v3722_v61, %v1470_v60 }
 0x469   :  { %v3724_v2 = vpop.eup %3723 }
 0x46a   :  { %v1473_v6 = vmul.f32 %v3724_v2, %v1471_v62  ;;  %v4400_v35 = vadd.f32 %v1474_v0, %v1472_v63 }
 0x46c   :  { %v4402_v41 = vadd.f32 %v1475_v30, %v1473_v6  ;;  %1478 = vst [vmem:[#allocation4 + $0x3] sm:$0x1] %v4400_v35 }
 0x46e   :  { %1479 = vst [vmem:[#allocation4 + $0xb] sm:$0x1] %v4402_v41  ;;  %v1486_v7 = vcombine.low %v4400_v35, %v4402_v41 }
 0x470   :  { %v1493_v54 = vrot.slane %v1486_v7, %v4203_v25 }
 0x472   :  { %v1500_v9 = vrot.slane %v1493_v54, %v4203_v25 }
 0x474   :  { %1567 = vmatmul.mubr.f32.vlgmr.msra.gmra.mrb[12].mxu0 %v1500_v9  ;;  %3060 = vmatmul.mubr.f32.vlgmr.msra.gmra.mrb[10].mxu1 %v1500_v9 }
 0x475   :  { %3474 = vmatpush1.bf16.msra.mxu0 %v3929_v36  ;;  %3505 = vmatpush3.bf16.msra.mxu1 %v3977_v52 }
 0x476   :  { %3476 = vmatprep.subr.bf16.mxu0 %v3935_v38  ;;  %3506 = vmatprep.subr.bf16.mxu1 %v3806_v43 }
 0x477   :  { %1858 = vmatprep.mubr.f32.mxu0 %v3805_v3  ;;  %3094 = vmatprep.mubr.msk.f32.mxu1 %vm3807_vm1, %v3805_v3 }
 0x479   :  { %3478 = vmatpush1.bf16.msra.mxu0 %v3953_v44  ;;  %3508 = vmatpush3.bf16.msra.mxu1 %v3998_v58 }
 0x47a   :  { %3480 = vmatprep.subr.bf16.mxu0 %v3965_v48  ;;  %3509 = vmatprep.subr.bf16.mxu1 %v3806_v43 }
 0x47d   :  { %3482 = vmatpush1.bf16.msra.mxu0 %v3992_v56  ;;  %3511 = vmatpush3.bf16.msra.mxu1 %v4027_v4 }
 0x47e   :  { %3484 = vmatprep.subr.bf16.mxu0 %v4001_v59  ;;  %3512 = vmatprep.subr.bf16.mxu1 %v3806_v43 }
 0x481   :  { %3486 = vmatpush1.bf16.msra.mxu0 %v4021_v1  ;;  %3514 = vmatpush3.bf16.msra.mxu1 %v4055_v13 }
 0x482   :  { %3488 = vmatprep.subr.bf16.mxu0 %v4030_v5  ;;  %3515 = vmatprep.subr.bf16.mxu1 %v3806_v43 }
 0x485   :  { %3490 = vmatpush1.bf16.msra.mxu0 %v4049_v11  ;;  %3517 = vmatpush3.bf16.msra.mxu1 %v4083_v22 }
 0x486   :  { %3492 = vmatprep.subr.bf16.mxu0 %v4058_v14  ;;  %3518 = vmatprep.subr.bf16.mxu1 %v3806_v43 }
 0x489   :  { %3494 = vmatpush1.bf16.msra.mxu0 %v4077_v20  ;;  %3520 = vmatpush3.bf16.msra.mxu1 %v4111_v32 }
 0x48a   :  { %3496 = vmatprep.subr.bf16.mxu0 %v4086_v23  ;;  %3521 = vmatprep.subr.bf16.mxu1 %v3806_v43 }
 0x48d   :  { %3498 = vmatpush1.bf16.msra.mxu0 %v4105_v29  ;;  %3523 = vmatpush3.bf16.msra.mxu1 %v4130_v40 }
 0x48e   :  { %3500 = vmatprep.subr.bf16.mxu0 %v4114_v33  ;;  %3524 = vmatprep.subr.bf16.mxu1 %v3806_v43 }
 0x491   :  { %3502 = vmatpush1.bf16.msra.mxu0 %v4127_v39  ;;  %3526 = vmatpush3.bf16.msra.mxu1 %v4144_v46 }
 0x492   :  { %3528 = vmatprep.subr.bf16.mxu0 %v3915_v31  ;;  %3559 = vmatprep.subr.bf16.mxu1 %v3806_v43 }
 0x547   :  { %v1568_v8 = vpop.f32.mrb[12].mxu0  ;;  %v1639_v53 = vpop.f32.mrb[10].mxu1 }
 0x548   :  { %v1569_v50 = vadd.f32 %v1568_v8, %v4198_v21  ;;  %v1570_v12 = vpop.f32.mrb[13].mxu0  ;;  %v3061_v42 = vpop.f32.mrb[11].mxu1  ;;  %v1640_v7 = vadd.f32 %v1639_v53, %v4213_v10 }
 0x549   :  { %v1571_v15 = vadd.f32 %v1570_v12, %v4200_v24 }
 0x54a   :  { %v1650_v45 = vrot.slane %v1569_v50, %v4203_v25  ;;  %v1734_v9 = vrot.slane %v1640_v7, %v4203_v25 }
 0x54b   :  { %v1695_v16 = vrot.slane %v1571_v15, %v4203_v25 }
 0x54c   :  { %v1651_v26 = vcombine.high %v1650_v45, %v1650_v45  ;;  %v1658_v27 = vrot.slane %v1650_v45, %v4203_v25  ;;  %v1735_v12 = vcombine.high %v1734_v9, %v1734_v9  ;;  %v1742_v15 = vrot.slane %v1734_v9, %v4203_v25 }
 0x54d   :  { %v1696_v34 = vcombine.high %v1695_v16, %v1695_v16  ;;  %v1703_v37 = vrot.slane %v1695_v16, %v4203_v25 }
 0x54e   :  { %v1665_v47 = vrot.slane %v1651_v26, %v4203_v25  ;;  %v1668_v55 = vadd.f32 %v1658_v27, %v1481_v19  ;;  %v1749_v26 = vrot.slane %v1735_v12, %v4203_v25 }
 0x54f   :  { %v1710_v17 = vrot.slane %v1696_v34, %v4203_v25  ;;  %v1713_v60 = vadd.f32 %v1703_v37, %v1684_v51  ;;  %v1754_v34 = vrot.slane %v1481_v19, 2 }
 0x550   :  { %v1669_v49 = vadd.f32 %v1665_v47, %v1483_v18  ;;  %v2711_v28 = vmul.f32 -1.442695, %v1668_v55  ;;  %v1755_v47 = vrot.slane %v1483_v18, 2 }
 0x551   :  { %v1714_v62 = vadd.f32 %v1710_v17, %v1685_v57  ;;  %v2713_v63 = vmul.f32 -1.442695, %v1713_v60 }
 0x552   :  { %3725 = vpow2.f32 %v2711_v28  ;;  %v2712_v61 = vmul.f32 -1.442695, %v1669_v49 }
 0x553   :  { %v2714_v0 = vmul.f32 -1.442695, %v1714_v62 }
 0x554   :  { %3727 = vpow2.f32 %v2712_v61 }
 0x555   :  { %3729 = vpow2.f32 %v2713_v63 }
 0x556   :  { %3731 = vpow2.f32 %v2714_v0 }
 0x55c   :  { %v3726_v2 = vpop.eup %3725 }
 0x55d   :  { %v1676_v6 = vadd.f32 1.0, %v3726_v2 }
 0x55e   :  { %v3728_v30 = vpop.eup %3727 }
 0x55f   :  { %v1677_v54 = vadd.f32 1.0, %v3728_v30  ;;  %3733 = vrcp.f32 %v1676_v6  ;;  %v3730_v8 = vpop.eup %3729 }
 0x560   :  { %v3732_v50 = vpop.eup %3731  ;;  %v1721_v42 = vadd.f32 1.0, %v3730_v8 }
 0x561   :  { %3735 = vrcp.f32 %v1677_v54  ;;  %v1722_v45 = vadd.f32 1.0, %v3732_v50 }
 0x562   :  { %3737 = vrcp.f32 %v1721_v42 }
 0x563   :  { %3739 = vrcp.f32 %v1722_v45 }
 0x569   :  { %v3734_v16 = vpop.eup %3733 }
 0x56a   :  { %v1752_v27 = vmul.f32 %v3734_v16, %v1742_v15  ;;  %v1773_v15 = vld [vmem:[#allocation3 + $0x5] ss:$8 sm:$0x7] }
 0x56b   :  { %v3736_v37 = vpop.eup %3735 }
 0x56c   :  { %v1753_v53 = vmul.f32 %v3736_v37, %v1749_v26  ;;  %v1758_v55 = vadd.f32 %v1754_v34, %v1752_v27  ;;  %v3738_v17 = vpop.eup %3737  ;;  %v1775_v27 = vld [vmem:[#allocation3 + $0x1d] ss:$8 sm:$0x7] }
 0x56d   :  { %v3740_v49 = vpop.eup %3739  ;;  %v1762_v28 = vsub.f32 1.0, %v3738_v17  ;;  %v1766_v62 = vmul.f32 %v3738_v17, %v4400_v35  ;;  %v1977_v17 = vrot.slane %v1775_v27, 1 }
 0x56e   :  { %v1759_v51 = vadd.f32 %v1755_v47, %v1753_v53  ;;  %3741 = vtanh.f32 %v1758_v55  ;;  %v1763_v60 = vsub.f32 1.0, %v3740_v49  ;;  %v1767_v19 = vmul.f32 %v3740_v49, %v4402_v41 }
 0x56f   :  { %v1976_v53 = vrot.slane %v1773_v15, 1 }
 0x570   :  { %3743 = vtanh.f32 %v1759_v51 }
 0x578   :  { %v3742_v57 = vpop.eup %3741 }
 0x579   :  { %v1764_v61 = vmul.f32 %v3742_v57, %v1762_v28 }
 0x57a   :  { %v3744_v63 = vpop.eup %3743 }
 0x57b   :  { %v1765_v0 = vmul.f32 %v3744_v63, %v1763_v60  ;;  %v4459_v2 = vadd.f32 %v1766_v62, %v1764_v61 }
 0x57d   :  { %v4461_v18 = vadd.f32 %v1767_v19, %v1765_v0  ;;  %1770 = vst [vmem:[#allocation4 + $0x4] sm:$0x1] %v4459_v2 }
 0x57f   :  { %1771 = vst [vmem:[#allocation4 + $0xc] sm:$0x1] %v4461_v18  ;;  %v1778_v6 = vcombine.low %v4459_v2, %v4461_v18 }
 0x581   :  { %v1785_v30 = vrot.slane %v1778_v6, %v4203_v25 }
 0x583   :  { %v1792_v7 = vrot.slane %v1785_v30, %v4203_v25 }
 0x585   :  { %1859 = vmatmul.mubr.f32.vlgmr.msra.gmra.mrb[14].mxu0 %v1792_v7  ;;  %3095 = vmatmul.mubr.f32.vlgmr.msra.gmra.mrb[12].mxu1 %v1792_v7 }
 0x586   :  { %3530 = vmatpush1.bf16.msra.mxu0 %v3929_v36  ;;  %3561 = vmatpush3.bf16.msra.mxu1 %v3977_v52 }
 0x587   :  { %3532 = vmatprep.subr.bf16.mxu0 %v3935_v38  ;;  %3562 = vmatprep.subr.bf16.mxu1 %v3806_v43 }
 0x588   :  { %2150 = vmatprep.mubr.f32.mxu0 %v3805_v3  ;;  %3129 = vmatprep.mubr.msk.f32.mxu1 %vm3807_vm1, %v3805_v3 }
 0x58a   :  { %3534 = vmatpush1.bf16.msra.mxu0 %v3953_v44  ;;  %3564 = vmatpush3.bf16.msra.mxu1 %v3998_v58 }
 0x58b   :  { %3536 = vmatprep.subr.bf16.mxu0 %v3965_v48  ;;  %3565 = vmatprep.subr.bf16.mxu1 %v3806_v43 }
 0x58e   :  { %3538 = vmatpush1.bf16.msra.mxu0 %v3992_v56  ;;  %3567 = vmatpush3.bf16.msra.mxu1 %v4027_v4 }
 0x58f   :  { %3540 = vmatprep.subr.bf16.mxu0 %v4001_v59  ;;  %3568 = vmatprep.subr.bf16.mxu1 %v3806_v43 }
 0x592   :  { %3542 = vmatpush1.bf16.msra.mxu0 %v4021_v1  ;;  %3570 = vmatpush3.bf16.msra.mxu1 %v4055_v13 }
 0x593   :  { %3544 = vmatprep.subr.bf16.mxu0 %v4030_v5  ;;  %3571 = vmatprep.subr.bf16.mxu1 %v3806_v43 }
 0x596   :  { %3546 = vmatpush1.bf16.msra.mxu0 %v4049_v11  ;;  %3573 = vmatpush3.bf16.msra.mxu1 %v4083_v22 }
 0x597   :  { %3548 = vmatprep.subr.bf16.mxu0 %v4058_v14  ;;  %3574 = vmatprep.subr.bf16.mxu1 %v3806_v43 }
 0x59a   :  { %3550 = vmatpush1.bf16.msra.mxu0 %v4077_v20  ;;  %3576 = vmatpush3.bf16.msra.mxu1 %v4111_v32 }
 0x59b   :  { %3552 = vmatprep.subr.bf16.mxu0 %v4086_v23  ;;  %3577 = vmatprep.subr.bf16.mxu1 %v3806_v43 }
 0x59e   :  { %3554 = vmatpush1.bf16.msra.mxu0 %v4105_v29  ;;  %3579 = vmatpush3.bf16.msra.mxu1 %v4130_v40 }
 0x59f   :  { %3556 = vmatprep.subr.bf16.mxu0 %v4114_v33  ;;  %3580 = vmatprep.subr.bf16.mxu1 %v3806_v43 }
 0x5a2   :  { %3558 = vmatpush1.bf16.msra.mxu0 %v4127_v39  ;;  %3582 = vmatpush3.bf16.msra.mxu1 %v4144_v46 }
 0x5a3   :  { %3584 = vmatprep.subr.bf16.mxu0 %v3915_v31  ;;  %3615 = vmatprep.subr.bf16.mxu1 %v3806_v43 }
 0x658   :  { %v1860_v35 = vpop.f32.mrb[14].mxu0  ;;  %v1931_v41 = vpop.f32.mrb[12].mxu1 }
 0x659   :  { %v1861_v54 = vadd.f32 %v1860_v35, %v4198_v21  ;;  %v1862_v9 = vpop.f32.mrb[15].mxu0  ;;  %v3096_v8 = vpop.f32.mrb[13].mxu1  ;;  %v1932_v19 = vadd.f32 %v1931_v41, %v4213_v10 }
 0x65a   :  { %v1863_v50 = vadd.f32 %v1862_v9, %v4200_v24 }
 0x65b   :  { %v1942_v12 = vrot.slane %v1861_v54, %v4203_v25  ;;  %v2026_v30 = vrot.slane %v1932_v19, %v4203_v25 }
 0x65c   :  { %v1987_v42 = vrot.slane %v1863_v50, %v4203_v25 }
 0x65d   :  { %v1943_v45 = vcombine.high %v1942_v12, %v1942_v12  ;;  %v1950_v16 = vrot.slane %v1942_v12, %v4203_v25  ;;  %v2027_v54 = vcombine.high %v2026_v30, %v2026_v30  ;;  %v2034_v8 = vrot.slane %v2026_v30, %v4203_v25 }
 0x65e   :  { %v1988_v26 = vcombine.high %v1987_v42, %v1987_v42  ;;  %v1995_v31 = vrot.slane %v1987_v42, %v4203_v25 }
 0x65f   :  { %v1957_v34 = vrot.slane %v1943_v45, %v4203_v25  ;;  %v1960_v37 = vadd.f32 %v1950_v16, %v1773_v15  ;;  %v2041_v42 = vrot.slane %v2027_v54, %v4203_v25  ;;  %v2046_v16 = vrot.slane %v1773_v15, 2 }
 0x660   :  { %v2002_v47 = vrot.slane %v1988_v26, %v4203_v25  ;;  %v2005_v49 = vadd.f32 %v1995_v31, %v1976_v53  ;;  %v2047_v31 = vrot.slane %v1775_v27, 2 }
 0x661   :  { %v1961_v55 = vadd.f32 %v1957_v34, %v1775_v27  ;;  %v2715_v51 = vmul.f32 -1.442695, %v1960_v37 }
 0x662   :  { %v2006_v57 = vadd.f32 %v2002_v47, %v1977_v17  ;;  %v2717_v60 = vmul.f32 -1.442695, %v2005_v49 }
 0x663   :  { %3745 = vpow2.f32 %v2715_v51  ;;  %v2716_v28 = vmul.f32 -1.442695, %v1961_v55 }
 0x664   :  { %v2718_v61 = vmul.f32 -1.442695, %v2006_v57 }
 0x665   :  { %3747 = vpow2.f32 %v2716_v28 }
 0x666   :  { %3749 = vpow2.f32 %v2717_v60 }
 0x667   :  { %3751 = vpow2.f32 %v2718_v61 }
 0x66d   :  { %v3746_v62 = vpop.eup %3745 }
 0x66e   :  { %v1968_v63 = vadd.f32 1.0, %v3746_v62 }
 0x66f   :  { %v3748_v0 = vpop.eup %3747 }
 0x670   :  { %v1969_v6 = vadd.f32 1.0, %v3748_v0  ;;  %3753 = vrcp.f32 %v1968_v63  ;;  %v3750_v7 = vpop.eup %3749 }
 0x671   :  { %v3752_v35 = vpop.eup %3751  ;;  %v2013_v9 = vadd.f32 1.0, %v3750_v7 }
 0x672   :  { %3755 = vrcp.f32 %v1969_v6  ;;  %v2014_v50 = vadd.f32 1.0, %v3752_v35 }
 0x673   :  { %3757 = vrcp.f32 %v2013_v9 }
 0x674   :  { %3759 = vrcp.f32 %v2014_v50 }
 0x67a   :  { %v3754_v12 = vpop.eup %3753 }
 0x67b   :  { %v2044_v45 = vmul.f32 %v3754_v12, %v2034_v8 }
 0x67c   :  { %v3756_v26 = vpop.eup %3755 }
 0x67d   :  { %v2045_v41 = vmul.f32 %v3756_v26, %v2041_v42  ;;  %v2050_v34 = vadd.f32 %v2046_v16, %v2044_v45  ;;  %v3758_v53 = vpop.eup %3757 }
 0x67e   :  { %v3760_v47 = vpop.eup %3759  ;;  %v2054_v55 = vsub.f32 1.0, %v3758_v53  ;;  %v2058_v28 = vmul.f32 %v3758_v53, %v4459_v2 }
 0x67f   :  { %v2051_v37 = vadd.f32 %v2047_v31, %v2045_v41  ;;  %3761 = vtanh.f32 %v2050_v34  ;;  %v2055_v17 = vsub.f32 1.0, %v3760_v47  ;;  %v2059_v15 = vmul.f32 %v3760_v47, %v4461_v18 }
 0x681   :  { %3763 = vtanh.f32 %v2051_v37 }
 0x689   :  { %v3762_v51 = vpop.eup %3761 }
 0x68a   :  { %v2056_v49 = vmul.f32 %v3762_v51, %v2054_v55 }
 0x68b   :  { %v3764_v57 = vpop.eup %3763 }
 0x68c   :  { %v2057_v60 = vmul.f32 %v3764_v57, %v2055_v17  ;;  %v4518_v61 = vadd.f32 %v2058_v28, %v2056_v49 }
 0x68e   :  { %v4520_v27 = vadd.f32 %v2059_v15, %v2057_v60  ;;  %2062 = vst [vmem:[#allocation4 + $0x5] sm:$0x1] %v4518_v61 }
 0x690   :  { %2063 = vst [vmem:[#allocation4 + $0xd] sm:$0x1] %v4520_v27  ;;  %v2070_v62 = vcombine.low %v4518_v61, %v4520_v27 }
 0x692   :  { %v2077_v63 = vrot.slane %v2070_v62, %v4203_v25 }
 0x694   :  { %v2084_v0 = vrot.slane %v2077_v63, %v4203_v25 }
 0x696   :  { %2151 = vmatmul.mubr.f32.vlgmr.msra.gmra.mrb[16].mxu0 %v2084_v0  ;;  %3130 = vmatmul.mubr.f32.vlgmr.msra.gmra.mrb[14].mxu1 %v2084_v0 }
 0x697   :  { %3586 = vmatpush1.bf16.msra.mxu0 %v3929_v36  ;;  %3617 = vmatpush3.bf16.msra.mxu1 %v3977_v52  ;;  %v2669_v36 = vld [vmem:[%s4618_s1] sm:$0xff] }
 0x698   :  { %3588 = vmatprep.subr.bf16.mxu0 %v3935_v38  ;;  %3618 = vmatprep.subr.bf16.mxu1 %v3806_v43  ;;  %v2670_v38 = vld [vmem:[%s4618_s1 + $0x8] sm:$0xff] }
 0x699   :  { %2442 = vmatprep.mubr.f32.mxu0 %v3805_v3  ;;  %3164 = vmatprep.mubr.msk.f32.mxu1 %vm3807_vm1, %v3805_v3  ;;  %v3809_v3 = vmov 0  }
 0x69a   :  { %3644 = vset.pattern.permute.xlu0 %v3809_v3 }
 0x69b   :  { %3590 = vmatpush1.bf16.msra.mxu0 %v3953_v44  ;;  %3620 = vmatpush3.bf16.msra.mxu1 %v3998_v58 }
 0x69c   :  { %3592 = vmatprep.subr.bf16.mxu0 %v3965_v48  ;;  %3621 = vmatprep.subr.bf16.mxu1 %v3806_v43 }
 0x69d   :  { %2673 = vperm.xlu0 %3644, %v2669_v36  }
 0x69f   :  { %3594 = vmatpush1.bf16.msra.mxu0 %v3992_v56  ;;  %3623 = vmatpush3.bf16.msra.mxu1 %v4027_v4  ;;  %v2065_v4 = vld [vmem:[#allocation3 + $0x6] ss:$8 sm:$0x7] }
 0x6a0   :  { %3596 = vmatprep.subr.bf16.mxu0 %v4001_v59  ;;  %3624 = vmatprep.subr.bf16.mxu1 %v3806_v43  ;;  %v2338_v37 = vrot.slane %v2065_v4, 2 }
 0x6a1   :  { %2678 = vperm.xlu0 %3644, %v2670_v38  }
 0x6a3   :  { %3598 = vmatpush1.bf16.msra.mxu0 %v4021_v1  ;;  %3626 = vmatpush3.bf16.msra.mxu1 %v4055_v13 }
 0x6a4   :  { %3600 = vmatprep.subr.bf16.mxu0 %v4030_v5  ;;  %3627 = vmatprep.subr.bf16.mxu1 %v3806_v43 }
 0x6a7   :  { %3602 = vmatpush1.bf16.msra.mxu0 %v4049_v11  ;;  %3629 = vmatpush3.bf16.msra.mxu1 %v4083_v22 }
 0x6a8   :  { %3604 = vmatprep.subr.bf16.mxu0 %v4058_v14  ;;  %3630 = vmatprep.subr.bf16.mxu1 %v3806_v43 }
 0x6ab   :  { %3606 = vmatpush1.bf16.msra.mxu0 %v4077_v20  ;;  %3632 = vmatpush3.bf16.msra.mxu1 %v4111_v32  ;;  %v2067_v20 = vld [vmem:[#allocation3 + $0x1e] ss:$8 sm:$0x7] }
 0x6ac   :  { %3608 = vmatprep.subr.bf16.mxu0 %v4086_v23  ;;  %3633 = vmatprep.subr.bf16.mxu1 %v3806_v43  ;;  %v2339_v55 = vrot.slane %v2067_v20, 2 }
 0x6af   :  { %3610 = vmatpush1.bf16.msra.mxu0 %v4105_v29  ;;  %3635 = vmatpush3.bf16.msra.mxu1 %v4130_v40  ;;  %v2268_v29 = vrot.slane %v2065_v4, 1  ;;  %v2269_v40 = vrot.slane %v2067_v20, 1 }
 0x6b0   :  { %3612 = vmatprep.subr.bf16.mxu0 %v4114_v33  ;;  %3636 = vmatprep.subr.bf16.mxu1 %v3806_v43 }
 0x6b3   :  { %3614 = vmatpush1.bf16.msra.mxu0 %v4127_v39  ;;  %3638 = vmatpush3.bf16.msra.mxu1 %v4144_v46 }
 0x769   :  { %v2152_v44 = vpop.f32.mrb[16].mxu0  ;;  %v2223_v48 = vpop.f32.mrb[14].mxu1 }
 0x76a   :  { %v2153_v43 = vadd.f32 %v2152_v44, %v4198_v21  ;;  %v2154_v52 = vpop.f32.mrb[17].mxu0  ;;  %v3131_v56 = vpop.f32.mrb[15].mxu1  ;;  %v2224_v54 = vadd.f32 %v2223_v48, %v4213_v10 }
 0x76b   :  { %v2155_v58 = vadd.f32 %v2154_v52, %v4200_v24 }
 0x76c   :  { %v2234_v59 = vrot.slane %v2153_v43, %v4203_v25  ;;  %v2318_v8 = vrot.slane %v2224_v54, %v4203_v25 }
 0x76d   :  { %v2279_v1 = vrot.slane %v2155_v58, %v4203_v25 }
 0x76e   :  { %v2235_v5 = vcombine.high %v2234_v59, %v2234_v59  ;;  %v2242_v11 = vrot.slane %v2234_v59, %v4203_v25  ;;  %v2319_v42 = vcombine.high %v2318_v8, %v2318_v8  ;;  %v2326_v16 = vrot.slane %v2318_v8, %v4203_v25 }
 0x76f   :  { %v2280_v13 = vcombine.high %v2279_v1, %v2279_v1  ;;  %v2287_v14 = vrot.slane %v2279_v1, %v4203_v25 }
 0x770   :  { %v2249_v22 = vrot.slane %v2235_v5, %v4203_v25  ;;  %v2252_v23 = vadd.f32 %v2242_v11, %v2065_v4  ;;  %v2333_v31 = vrot.slane %v2319_v42, %v4203_v25  ;;  %v2357_v11 = vld [vmem:[#allocation3 + $0x7] ss:$8 sm:$0x7] }
 0x771   :  { %v2294_v32 = vrot.slane %v2280_v13, %v4203_v25  ;;  %v2297_v46 = vadd.f32 %v2287_v14, %v2268_v29 }
 0x772   :  { %v2253_v33 = vadd.f32 %v2249_v22, %v2067_v20  ;;  %v2719_v39 = vmul.f32 -1.442695, %v2252_v23  ;;  %v2359_v23 = vld [vmem:[#allocation3 + $0x1f] ss:$8 sm:$0x7] }
 0x773   :  { %v2298_v18 = vadd.f32 %v2294_v32, %v2269_v40  ;;  %v2721_v19 = vmul.f32 -1.442695, %v2297_v46  ;;  %v2561_v40 = vrot.slane %v2359_v23, 1 }
 0x774   :  { %3765 = vpow2.f32 %v2719_v39  ;;  %v2720_v2 = vmul.f32 -1.442695, %v2253_v33 }
 0x775   :  { %v2722_v6 = vmul.f32 -1.442695, %v2298_v18 }
 0x776   :  { %3767 = vpow2.f32 %v2720_v2 }
 0x777   :  { %3769 = vpow2.f32 %v2721_v19 }
 0x778   :  { %3771 = vpow2.f32 %v2722_v6 }
 0x77e   :  { %v3766_v30 = vpop.eup %3765 }
 0x77f   :  { %v2260_v7 = vadd.f32 1.0, %v3766_v30 }
 0x780   :  { %v3768_v35 = vpop.eup %3767 }
 0x781   :  { %v2261_v9 = vadd.f32 1.0, %v3768_v35  ;;  %3773 = vrcp.f32 %v2260_v7  ;;  %v3770_v50 = vpop.eup %3769 }
 0x782   :  { %v3772_v12 = vpop.eup %3771  ;;  %v2305_v45 = vadd.f32 1.0, %v3770_v50 }
 0x783   :  { %3775 = vrcp.f32 %v2261_v9  ;;  %v2306_v26 = vadd.f32 1.0, %v3772_v12 }
 0x784   :  { %3777 = vrcp.f32 %v2305_v45 }
 0x785   :  { %3779 = vrcp.f32 %v2306_v26 }
 0x78b   :  { %v3774_v41 = vpop.eup %3773 }
 0x78c   :  { %v2336_v34 = vmul.f32 %v3774_v41, %v2326_v16 }
 0x78d   :  { %v3776_v53 = vpop.eup %3775 }
 0x78e   :  { %v2337_v47 = vmul.f32 %v3776_v53, %v2333_v31  ;;  %v2342_v51 = vadd.f32 %v2338_v37, %v2336_v34  ;;  %v3778_v49 = vpop.eup %3777  ;;  %v2630_v37 = vrot.slane %v2357_v11, 2 }
 0x78f   :  { %v3780_v28 = vpop.eup %3779  ;;  %v2346_v57 = vsub.f32 1.0, %v3778_v49  ;;  %v2350_v63 = vmul.f32 %v3778_v49, %v4518_v61 }
 0x790   :  { %v2343_v17 = vadd.f32 %v2339_v55, %v2337_v47  ;;  %3781 = vtanh.f32 %v2342_v51  ;;  %v2347_v15 = vsub.f32 1.0, %v3780_v28  ;;  %v2351_v36 = vmul.f32 %v3780_v28, %v4520_v27 }
 0x791   :  { %v2631_v47 = vrot.slane %v2359_v23, 2 }
 0x792   :  { %3783 = vtanh.f32 %v2343_v17 }
 0x79a   :  { %v3782_v60 = vpop.eup %3781 }
 0x79b   :  { %v2348_v62 = vmul.f32 %v3782_v60, %v2346_v57 }
 0x79c   :  { %v3784_v0 = vpop.eup %3783 }
 0x79d   :  { %v2349_v3 = vmul.f32 %v3784_v0, %v2347_v15  ;;  %v4581_v38 = vadd.f32 %v2350_v63, %v2348_v62 }
 0x79f   :  { %v4583_v44 = vadd.f32 %v2351_v36, %v2349_v3  ;;  %2354 = vst [vmem:[#allocation4 + $0x6] sm:$0x1] %v4581_v38 }
 0x7a1   :  { %2355 = vst [vmem:[#allocation4 + $0xe] sm:$0x1] %v4583_v44  ;;  %v2362_v48 = vcombine.low %v4581_v38, %v4583_v44 }
 0x7a3   :  { %v2369_v43 = vrot.slane %v2362_v48, %v4203_v25 }
 0x7a5   :  { %v2376_v52 = vrot.slane %v2369_v43, %v4203_v25 }
 0x7a7   :  { %2443 = vmatmul.mubr.f32.vlgmr.msra.gmra.mrb[18].mxu0 %v2376_v52  ;;  %3165 = vmatmul.mubr.f32.vlgmr.msra.gmra.mrb[16].mxu1 %v2376_v52  ;;  %v2674_v52 = vpop.permute.xlu0 %2673 }
 0x87a   :  { %v2444_v61 = vpop.f32.mrb[18].mxu0  ;;  %v2515_v56 = vpop.f32.mrb[16].mxu1 }
 0x87b   :  { %v2445_v27 = vadd.f32 %v2444_v61, %v4198_v21  ;;  %v2446_v58 = vpop.f32.mrb[19].mxu0  ;;  %v3166_v59 = vpop.f32.mrb[17].mxu1  ;;  %v2560_v21 = vrot.slane %v2357_v11, 1  ;;  %v2516_v54 = vadd.f32 %v2515_v56, %v4213_v10 }
 0x87c   :  { %v2447_v1 = vadd.f32 %v2446_v58, %v4200_v24  ;;  %v2679_v58 = vpop.permute.xlu0 %2678 }
 0x87d   :  { %v2526_v4 = vrot.slane %v2445_v27, %v4203_v25  ;;  %v2610_v8 = vrot.slane %v2516_v54, %v4203_v25 }
 0x87e   :  { %v2571_v5 = vrot.slane %v2447_v1, %v4203_v25 }
 0x87f   :  { %v2527_v13 = vcombine.high %v2526_v4, %v2526_v4  ;;  %v2534_v14 = vrot.slane %v2526_v4, %v4203_v25  ;;  %v2611_v42 = vcombine.high %v2610_v8, %v2610_v8  ;;  %v2618_v16 = vrot.slane %v2610_v8, %v4203_v25 }
 0x880   :  { %v2572_v20 = vcombine.high %v2571_v5, %v2571_v5  ;;  %v2579_v22 = vrot.slane %v2571_v5, %v4203_v25 }
 0x881   :  { %v2541_v29 = vrot.slane %v2527_v13, %v4203_v25  ;;  %v2544_v32 = vadd.f32 %v2534_v14, %v2357_v11  ;;  %v2625_v31 = vrot.slane %v2611_v42, %v4203_v25 }
 0x882   :  { %v2586_v33 = vrot.slane %v2572_v20, %v4203_v25  ;;  %v2589_v46 = vadd.f32 %v2579_v22, %v2560_v21 }
 0x883   :  { %v2545_v39 = vadd.f32 %v2541_v29, %v2359_v23  ;;  %v2723_v24 = vmul.f32 -1.442695, %v2544_v32 }
 0x884   :  { %v2590_v18 = vadd.f32 %v2586_v33, %v2561_v40  ;;  %v2725_v19 = vmul.f32 -1.442695, %v2589_v46 }
 0x885   :  { %3785 = vpow2.f32 %v2723_v24  ;;  %v2724_v2 = vmul.f32 -1.442695, %v2545_v39 }
 0x886   :  { %v2726_v6 = vmul.f32 -1.442695, %v2590_v18 }
 0x887   :  { %3787 = vpow2.f32 %v2724_v2 }
 0x888   :  { %3789 = vpow2.f32 %v2725_v19 }
 0x889   :  { %3791 = vpow2.f32 %v2726_v6 }
 0x88f   :  { %v3786_v30 = vpop.eup %3785 }
 0x890   :  { %v2552_v7 = vadd.f32 1.0, %v3786_v30 }
 0x891   :  { %v3788_v35 = vpop.eup %3787 }
 0x892   :  { %v2553_v9 = vadd.f32 1.0, %v3788_v35  ;;  %3793 = vrcp.f32 %v2552_v7  ;;  %v3790_v50 = vpop.eup %3789 }
 0x893   :  { %v3792_v12 = vpop.eup %3791  ;;  %v2597_v45 = vadd.f32 1.0, %v3790_v50 }
 0x894   :  { %3795 = vrcp.f32 %v2553_v9  ;;  %v2598_v26 = vadd.f32 1.0, %v3792_v12 }
 0x895   :  { %3797 = vrcp.f32 %v2597_v45 }
 0x896   :  { %3799 = vrcp.f32 %v2598_v26 }
 0x89c   :  { %v3794_v41 = vpop.eup %3793 }
 0x89d   :  { %v2628_v34 = vmul.f32 %v3794_v41, %v2618_v16 }
 0x89e   :  { %v3796_v53 = vpop.eup %3795 }
 0x89f   :  { %v2629_v10 = vmul.f32 %v3796_v53, %v2625_v31  ;;  %v2634_v55 = vadd.f32 %v2630_v37, %v2628_v34  ;;  %v3798_v17 = vpop.eup %3797 }
 0x8a0   :  { %v3800_v49 = vpop.eup %3799  ;;  %v2638_v28 = vsub.f32 1.0, %v3798_v17  ;;  %v2642_v62 = vmul.f32 %v3798_v17, %v4581_v38 }
 0x8a1   :  { %v2635_v51 = vadd.f32 %v2631_v47, %v2629_v10  ;;  %3801 = vtanh.f32 %v2634_v55  ;;  %v2639_v60 = vsub.f32 1.0, %v3800_v49  ;;  %v2643_v3 = vmul.f32 %v3800_v49, %v4583_v44 }
 0x8a3   :  { %3803 = vtanh.f32 %v2635_v51 }
 0x8ab   :  { %v3802_v57 = vpop.eup %3801 }
 0x8ac   :  { %v2640_v15 = vmul.f32 %v3802_v57, %v2638_v28 }
 0x8ad   :  { %v3804_v63 = vpop.eup %3803 }
 0x8ae   :  { %v2641_v0 = vmul.f32 %v3804_v63, %v2639_v60  ;;  %v2644_v36 = vadd.f32 %v2642_v62, %v2640_v15 }
 0x8b0   :  { %v2645_v48 = vadd.f32 %v2643_v3, %v2641_v0  ;;  %2646 = vst [vmem:[#allocation4 + $0x7] sm:$0x1] %v2644_v36 }
 0x8b2   :  { %2647 = vst [vmem:[#allocation4 + $0xf] sm:$0x1] %v2645_v48  ;;  %v2650_v43 = vcombine.low %v2644_v36, %v2645_v48 }
 0x8b4   :  { %v2657_v61 = vrot.slane %v2650_v43, %v4203_v25 }
 0x8b6   :  { %2727 = vst.sshfl [vmem:[#allocation2] sm:$0x5 pattern:$0x73625140] %v2657_v61 }
 0x8b7   :  { %v2667_v56 = vld [vmem:[#allocation4] sm:$0xff] }
 0x8b8   :  { %v2681_v27 = vmul.f32 %v2674_v52, %v2667_v56 }
 0x8b9   :  { %v2668_v59 = vld [vmem:[#allocation4 + $0x8] sm:$0xff] }
 0x8ba   :  { %2684 = vst.msk [vmem:[%s4619_s7] sm:$0xff] %vm2683_vm2, %v2681_v27  ;;  %v2682_v38 = vmul.f32 %v2679_v58, %v2668_v59 }
 0x8bc   :  { %2685 = vst.msk [vmem:[%s4619_s7 + $0x8] sm:$0xff] %vm2683_vm2, %v2682_v38 }

// kernel: _lambda_.5
= control target key start
LH: loop header
LB: loop body
LE: loop exit
PB: predicated region body
PF: predicated region fallthrough
CT: control target
= control target key end

     0   :  { %s5138_s13 = smov 0   ;;  %s5140_s14 = smov 0   ;;  %s5840_s0 = inlined_call_operand.vmem [shape: f32[2,8,32], index: 0, kind: input, shape index: {}]   ;;  %s5841_s1 = inlined_call_operand.vmem [shape: f32[2,8,1], index: 1, kind: input, shape index: {}]   ;;  %s5842_s2 = inlined_call_operand.vmem [shape: f32[2,2,16,32], index: 2, kind: input, shape index: {}]   ;;  %s5843_s3 = inlined_call_operand.vmem [shape: f32[2,16,384], index: 3, kind: input, shape index: {}]   ;;  %s5844_s4 = inlined_call_operand.vmem [shape: f32[2,128,384], index: 4, kind: input, shape index: {}]   ;;  %s5845_s5 = inlined_call_operand.vmem [shape: f32[2,1,128], index: 5, kind: input, shape index: {}]   ;;  %s5846_s6 = inlined_call_operand.vmem [shape: f32[2,1,16], index: 6, kind: input, shape index: {}]   ;;  %s5847_s7 = inlined_call_operand.vmem [shape: f32[2,2,32], index: 7, kind: input, shape index: {}]   ;;  %s5848_s8 = inlined_call_operand.vmem [shape: f32[32,32], index: 8, kind: input, shape index: {}]   ;;  %s5849_s9 = inlined_call_operand.vmem [shape: f32[2,2,8,16], index: 9, kind: output, shape index: {0}]   ;;  %s5850_s10 = inlined_call_operand.vmem [shape: f32[2,2,32], index: 10, kind: output, shape index: {1}]  }
   0x1   :  { %s5142_s15 = smov 0  }
   0x2 LB: > { %s33_s16 = sadd.s32 1, %s5071_s14  ;;  %p3835_p0 = scmp.ge.s32.totalorder %s5075_s15, 1  ;;  %s5075_s15 = sphi %s5142_s15, %s21_s15   ;;  %s5071_s14 = sphi %s5140_s14, %s5852_s14   ;;  %s5067_s13 = sphi %s5138_s13, %s5851_s13  }
   0x3   : > { %p35_p1 = scmp.ge.s32.totalorder %s33_s16, 2  ;;  %p392_p2 = scmp.lt.s32.totalorder %s5075_s15, 3 }
   0x5   : > { %s5854_s16 = smov (%p35_p1, %s33_s16), 0  ;;  %p393_p3 = pnand %p3835_p0, %p392_p2 }
   0x6   : > { %p473_p4 = scmp.lt.s32.totalorder (!%p393_p3), %s5067_s13, 1  ;;  %v5077_v0 = vmov (!%p393_p3), 0.0|0.0   ;;  %v529_v1 = vld [vmem:[%s5841_s1] sm:$0xff] (!%p393_p3)  ;;  %vm535_vm0 = vcmask (!%p393_p3), 261120   ;;  %vm5078_vm1 = vmmov (!%p393_p3), 0   ;;  %v5079_v2 = vmov (!%p393_p3), 0.0  }
   0x7   : > { %396 = sbr.rel (%p393_p3) target bundleno = 3328 (0xd00), region = 56  ;;  %4373 = vmatprep.subr.bf16.mxu0 (!%p393_p3), %v5077_v0  ;;  %4377 = vmatprep.subr.bf16.mxu1 (!%p393_p3), %v5077_v0  ;;  %v5080_v3 = vmov (!%p393_p3), 0   ;;  %vm4375_vm2 = vmpackc.low (!%p393_p3), %vm535_vm0, %vm535_vm0  ;;  %v530_v4 = vld [vmem:[%s5841_s1 + $0x8] sm:$0xff] (!%p393_p3)  ;;  %v527_v11 = vld [vmem:[%s5840_s0] sm:$0xff] (!%p393_p3)  ;;  %vm714_vm3 = vcmask (!%p393_p3), 130048   ;;  %vm522_vm4 = vcmask (!%p393_p3), 1024  }
   0x8   : > { %4055 = vmatprep.mubr.msk.f32.mxu0 (!%p393_p3), %vm5078_vm1, %v5079_v2  ;;  %4062 = vmatprep.mubr.msk.f32.mxu1 (!%p393_p3), %vm5078_vm1, %v5079_v2  ;;  %v528_v12 = vld [vmem:[%s5840_s0 + $0x8] sm:$0xff] (!%p393_p3)  ;;  %524 = vst.msk [vmem:[#allocation6] sm:$0x3] (!%p393_p3), %vm522_vm4, %v5079_v2  ;;  %vm3322_vm5 = vcmask (!%p393_p3), 1041409   ;;  %vm3325_vm6 = vcmask (!%p393_p3), 58368   ;;  %vm525_vm7 = vcmask (!%p393_p3), 254976  }
   0x9   : > { %4875 = vset.pattern.permute.xlu0 (!%p393_p3), %v5080_v3  ;;  %4876 = vset.pattern.permute.xlu1 (!%p393_p3), %v5080_v3  ;;  %526 = vst.msk [vmem:[#allocation7] sm:$0x3] (!%p393_p3), %vm525_vm7, %v5079_v2  ;;  %vm3382_vm8 = vcmask (!%p393_p3), 64512  }
   0xa   : > { %698 = vperm.xlu0 (!%p393_p3), %4875, %v529_v1  }
   0xe   : > { %s5856_s13 = smov (!%p473_p4, %s5067_s13), 1  ;;  %703 = vperm.xlu0 %4875, %v530_v4  }
   0xf   : > { %s3894_s19 = sshll.u32 %s5856_s13, 5  ;;  %s4844_s29 = smul.u32 384, %s5856_s13 }
  0x10   : > { %s477_s22 = scalar_lea.vmem %s5842_s2, %s3894_s19  ;;  %s4843_s30 = smul.u32 48, %s5856_s13 }
  0x11   : > { %v531_v5 = vld [vmem:[%s477_s22] sm:$0xff]  ;;  %v532_v6 = vld [vmem:[%s477_s22 + $0x8] sm:$0xff]  ;;  %v533_v7 = vld [vmem:[%s477_s22 + $0x10] sm:$0xff]  ;;  %s5193_s20 = scalar_lea.vmem %s5844_s4, %s4844_s29  ;;  %s490_s23 = scalar_lea.vmem %s5845_s5, %s5856_s13 }
  0x12   : > { %v4374_v8 = vpack.c.bf16 %v532_v6, %v531_v5  ;;  %v534_v9 = vld [vmem:[%s477_s22 + $0x18] sm:$0xff]  ;;  %s482_s17 = scalar_lea.vmem %s5843_s3, %s4843_s30  ;;  %v880_v22 = vld [vmem:[%s5193_s20 + $0x8] sm:$0xff]  ;;  %v883_v23 = vld [vmem:[%s5193_s20 + $0x20] sm:$0xff]  ;;  %s493_s28 = scalar_lea.vmem %s5846_s6, %s5856_s13 }
  0x13   : > { %v4378_v10 = vpack.c.bf16 %v534_v9, %v533_v7  ;;  %v709_v13 = vld [vmem:[%s482_s17 + $0x8] sm:$0xff]  ;;  %v712_v14 = vld [vmem:[%s482_s17 + $0x20] sm:$0xff]  ;;  %v711_v17 = vld [vmem:[%s482_s17 + $0x18] sm:$0xff]  ;;  %v5197_v24 = vpack.c.bf16 %v883_v23, %v880_v22  ;;  %s3895_s29 = sshll.u32 %s5856_s13, 4  ;;  %s3840_s25 = sshll.u32 %s5856_s13, 1 }
  0x14   : > { %4376 = vmatpush3.bf16.xpose.msk.msra.mxu0 %vm4375_vm2, %v4374_v8  ;;  %v4381_v15 = vpack.c.bf16 %v712_v14, %v709_v13  ;;  %v708_v16 = vld [vmem:[%s482_s17] sm:$0xff]  ;;  %v710_v19 = vld [vmem:[%s482_s17 + $0x10] sm:$0xff]  ;;  %v713_v20 = vld [vmem:[%s482_s17 + $0x28] sm:$0xff]  ;;  %s505_s12 = scalar_lea.vmem %s5849_s9, %s3895_s29  ;;  %s509_s17 = scalar_lea.vmem %s5850_s10, %s3840_s25 }
  0x15   : > { %4380 = vmatpush3.bf16.xpose.msk.msra.mxu1 %vm4375_vm2, %v4378_v10  ;;  %v4383_v18 = vpack.c.bf16 %v711_v17, %v708_v16  ;;  %v4385_v21 = vpack.c.bf16 %v713_v20, %v710_v19  ;;  %v3844_v25 = vld [vmem:[%s490_s23] ss:$0 sm:$0xff]  ;;  %v882_v32 = vld [vmem:[%s5193_s20 + $0x18] sm:$0xff]  ;;  %v889_v34 = vld [vmem:[%s5193_s20 + $0x50] sm:$0xff] }
  0x16   : > { %4382 = vmatprep.subr.bf16.mxu0 %v4381_v15  ;;  %521 = vst [vmem:[#allocation2] sm:$0x3] %v3844_v25  ;;  %v879_v31 = vld [vmem:[%s5193_s20] sm:$0xff]  ;;  %v886_v33 = vld [vmem:[%s5193_s20 + $0x38] sm:$0xff]  ;;  %v881_v36 = vld [vmem:[%s5193_s20 + $0x10] sm:$0xff] }
  0x17   : > { %4386 = vmatprep.subr.bf16.mxu1 %v4385_v21  ;;  %v884_v37 = vld [vmem:[%s5193_s20 + $0x28] sm:$0xff]  ;;  %v5215_v39 = vpack.c.bf16 %v882_v32, %v879_v31  ;;  %v5218_v42 = vpack.c.bf16 %v889_v34, %v886_v33  ;;  %v885_v43 = vld [vmem:[%s5193_s20 + $0x30] sm:$0xff]  ;;  %v895_v47 = vld [vmem:[%s5193_s20 + $0x80] sm:$0xff] }
  0x18   : > { %v888_v44 = vld [vmem:[%s5193_s20 + $0x48] sm:$0xff]  ;;  %v5225_v48 = vpack.c.bf16 %v884_v37, %v881_v36  ;;  %v887_v49 = vld [vmem:[%s5193_s20 + $0x40] sm:$0xff]  ;;  %v890_v50 = vld [vmem:[%s5193_s20 + $0x58] sm:$0xff] }
  0x19   : > { %v892_v46 = vld [vmem:[%s5193_s20 + $0x68] sm:$0xff]  ;;  %v5233_v51 = vpack.c.bf16 %v888_v44, %v885_v43  ;;  %v891_v53 = vld [vmem:[%s5193_s20 + $0x60] sm:$0xff]  ;;  %v894_v54 = vld [vmem:[%s5193_s20 + $0x78] sm:$0xff]  ;;  %v5244_v57 = vpack.c.bf16 %v890_v50, %v887_v49 }
  0x1a   : > { %v5237_v52 = vpack.c.bf16 %v895_v47, %v892_v46  ;;  %v898_v55 = vld [vmem:[%s5193_s20 + $0x98] sm:$0xff]  ;;  %v901_v56 = vld [vmem:[%s5193_s20 + $0xb0] sm:$0xff]  ;;  %v896_v59 = vld [vmem:[%s5193_s20 + $0x88] sm:$0xff]  ;;  %v5253_v60 = vpack.c.bf16 %v894_v54, %v891_v53 }
  0x1b   : > { %4056 = vmatmul.mubr.msk.f32.vlgmr.msra.gmra.mrb[0].mxu0 %vm535_vm0, %v527_v11  ;;  %v893_v58 = vld [vmem:[%s5193_s20 + $0x70] sm:$0xff]  ;;  %v5257_v61 = vpack.c.bf16 %v901_v56, %v898_v55  ;;  %v900_v63 = vld [vmem:[%s5193_s20 + $0xa8] sm:$0xff]  ;;  %v907_v3 = vld [vmem:[%s5193_s20 + $0xe0] sm:$0xff] }
  0x1c   : > { %4063 = vmatmul.mubr.msk.f32.vlgmr.msra.gmra.mrb[0].mxu1 %vm535_vm0, %v528_v12  ;;  %785 = vmatprep.mubr.f32.mxu0 %v5079_v2  ;;  %v897_v62 = vld [vmem:[%s5193_s20 + $0x90] sm:$0xff]  ;;  %v904_v1 = vld [vmem:[%s5193_s20 + $0xc8] sm:$0xff]  ;;  %v5264_v4 = vpack.c.bf16 %v896_v59, %v893_v58  ;;  %v899_v5 = vld [vmem:[%s5193_s20 + $0xa0] sm:$0xff]  ;;  %v5081_v59 = vmov 1966171168  }
  0x1d   : > { %4384 = vmatpush1.bf16.msra.mxu0 %v4383_v18  ;;  %4388 = vmatpush3.bf16.msra.mxu1 %v4385_v21  ;;  %v902_v6 = vld [vmem:[%s5193_s20 + $0xb8] sm:$0xff]  ;;  %v5270_v7 = vpack.c.bf16 %v900_v63, %v897_v62  ;;  %v5273_v8 = vpack.c.bf16 %v907_v3, %v904_v1  ;;  %v903_v9 = vld [vmem:[%s5193_s20 + $0xc0] sm:$0xff]  ;;  %v913_v12 = vld [vmem:[%s5193_s20 + $0x110] sm:$0xff]  ;;  %v1074_v62 = vunpack.c.l.s4 %v5081_v59  ;;  %v1076_v63 = vlaneseq }
  0x1e   : > { %4390 = vmatprep.subr.bf16.mxu0 %v5197_v24  ;;  %4421 = vmatprep.subr.bf16.mxu1 %v5077_v0  ;;  %v906_v10 = vld [vmem:[%s5193_s20 + $0xd8] sm:$0xff]  ;;  %v5280_v13 = vpack.c.bf16 %v902_v6, %v899_v5  ;;  %v905_v14 = vld [vmem:[%s5193_s20 + $0xd0] sm:$0xff]  ;;  %v908_v15 = vld [vmem:[%s5193_s20 + $0xe8] sm:$0xff] }
  0x1f   : > { %v910_v11 = vld [vmem:[%s5193_s20 + $0xf8] sm:$0xff]  ;;  %v5286_v16 = vpack.c.bf16 %v906_v10, %v903_v9  ;;  %v909_v18 = vld [vmem:[%s5193_s20 + $0xf0] sm:$0xff]  ;;  %v912_v19 = vld [vmem:[%s5193_s20 + $0x108] sm:$0xff]  ;;  %v5296_v22 = vpack.c.bf16 %v908_v15, %v905_v14  ;;  %v1075_v1 = vunpack.c.0.s8 %v1074_v62  ;;  %v5383_v3 = vshrl.u32 %v1076_v63, 7 }
  0x20   : > { %v5289_v17 = vpack.c.bf16 %v913_v12, %v910_v11  ;;  %v916_v20 = vld [vmem:[%s5193_s20 + $0x128] sm:$0xff]  ;;  %v919_v21 = vld [vmem:[%s5193_s20 + $0x140] sm:$0xff]  ;;  %v914_v25 = vld [vmem:[%s5193_s20 + $0x118] sm:$0xff] }
  0x21   : > { %v911_v23 = vld [vmem:[%s5193_s20 + $0x100] sm:$0xff]  ;;  %v922_v31 = vld [vmem:[%s5193_s20 + $0x158] sm:$0xff]  ;;  %v925_v32 = vld [vmem:[%s5193_s20 + $0x170] sm:$0xff]  ;;  %v5386_v5 = vsub.s32 %v1075_v1, %v5383_v3 }
  0x22   : > { %v5312_v33 = vpack.c.bf16 %v914_v25, %v911_v23  ;;  %v917_v34 = vld [vmem:[%s5193_s20 + $0x130] sm:$0xff]  ;;  %v920_v36 = vld [vmem:[%s5193_s20 + $0x148] sm:$0xff]  ;;  %v923_v44 = vld [vmem:[%s5193_s20 + $0x160] sm:$0xff] }
  0x23   : > { %v5326_v43 = vpack.c.bf16 %v920_v36, %v917_v34  ;;  %v5340_v49 = vld [vmem:[#allocation2] sm:$0x3] }
  0x89   : > { %v5205_v30 = vpop.permute.xlu0 %698 }
  0x8d   : > { %v5211_v35 = vpop.permute.xlu0 %703 }
  0xee   : > { %v611_v26 = vpop.f32.mrb[0].mxu0 }
  0xef   : > { %4877 = vtanh.f32 %v611_v26  ;;  %v690_v27 = vpop.f32.mrb[0].mxu1  ;;  %v4057_v28 = vpop.f32.mrb[1].mxu0  ;;  %v5302_v26 = vpack.c.bf16 %v912_v19, %v909_v18 }
  0xf0   : > { %4879 = vtanh.f32 %v690_v27  ;;  %v4064_v29 = vpop.f32.mrb[1].mxu1  ;;  %v5305_v27 = vpack.c.bf16 %v919_v21, %v916_v20  ;;  %v915_v28 = vld [vmem:[%s5193_s20 + $0x120] sm:$0xff] }
  0xf1   : > { %v918_v29 = vld [vmem:[%s5193_s20 + $0x138] sm:$0xff] }
  0xf2   : > { %v5318_v37 = vpack.c.bf16 %v918_v29, %v915_v28 }
  0xf9   : > { %v4878_v38 = vpop.eup %4877 }
  0xfa   : > { %v4880_v40 = vpop.eup %4879  ;;  %v706_v41 = vmul.f32 %v4878_v38, %v5205_v30  ;;  %v5321_v38 = vpack.c.bf16 %v925_v32, %v922_v31 }
  0xfb   : > { %v707_v45 = vmul.f32 %v4880_v40, %v5211_v35  ;;  %v921_v40 = vld [vmem:[%s5193_s20 + $0x150] sm:$0xff] }
  0xfc   : > { %3851 = vmatmul.mubr.msk.f32.vlgmr.msra.gmra.mrb[2].mxu0 %vm714_vm3, %v706_v41  ;;  %4069 = vmatprep.mubr.msk.f32.mxu1 %vm714_vm3, %v706_v41  ;;  %v924_v41 = vld [vmem:[%s5193_s20 + $0x168] sm:$0xff] }
  0xfd   : > { %4392 = vmatpush1.bf16.msra.mxu0 %v5215_v39  ;;  %4070 = vmatmul.mubr.msk.f32.vlgmr.msra.gmra.mrb[2].mxu1 %vm714_vm3, %v707_v45  ;;  %v5332_v46 = vpack.c.bf16 %v924_v41, %v921_v40 }
  0xfe   : > { %791 = vmatprep.mubr.f32.mxu0 %v5079_v2  ;;  %4394 = vmatprep.subr.bf16.mxu0 %v5218_v42 }
  0xff   : > { %4423 = vmatpush3.bf16.msra.mxu1 %v5225_v48  ;;  %4104 = vmatprep.mubr.msk.f32.mxu1 %vm5078_vm1, %v5079_v2 }
 0x100   : > { %3852 = vmatmul.mubr.msk.f32.gmra.mrb[4].mxu0 %vm714_vm3, %v707_v45  ;;  %4424 = vmatprep.subr.bf16.mxu1 %v5077_v0  ;;  %v926_v45 = vld [vmem:[%s5193_s20 + $0x178] sm:$0xff] }
 0x101   : > { %4396 = vmatpush1.bf16.msra.mxu0 %v5233_v51  ;;  %995 = vmatprep.mubr.f32.mxu0 %v5079_v2  ;;  %v5336_v47 = vpack.c.bf16 %v926_v45, %v923_v44 }
 0x102   : > { %4398 = vmatprep.subr.bf16.mxu0 %v5237_v52 }
 0x103   : > { %4426 = vmatpush3.bf16.msra.mxu1 %v5244_v57 }
 0x104   : > { %4427 = vmatprep.subr.bf16.mxu1 %v5077_v0 }
 0x105   : > { %4400 = vmatpush1.bf16.msra.mxu0 %v5253_v60 }
 0x106   : > { %4402 = vmatprep.subr.bf16.mxu0 %v5257_v61 }
 0x107   : > { %4429 = vmatpush3.bf16.msra.mxu1 %v5264_v4 }
 0x108   : > { %4430 = vmatprep.subr.bf16.mxu1 %v5077_v0 }
 0x109   : > { %4404 = vmatpush1.bf16.msra.mxu0 %v5270_v7 }
 0x10a   : > { %4406 = vmatprep.subr.bf16.mxu0 %v5273_v8 }
 0x10b   : > { %4432 = vmatpush3.bf16.msra.mxu1 %v5280_v13 }
 0x10c   : > { %4433 = vmatprep.subr.bf16.mxu1 %v5077_v0 }
 0x10d   : > { %4408 = vmatpush1.bf16.msra.mxu0 %v5286_v16 }
 0x10e   : > { %4410 = vmatprep.subr.bf16.mxu0 %v5289_v17 }
 0x10f   : > { %4435 = vmatpush3.bf16.msra.mxu1 %v5296_v22 }
 0x110   : > { %4436 = vmatprep.subr.bf16.mxu1 %v5077_v0 }
 0x111   : > { %4412 = vmatpush1.bf16.msra.mxu0 %v5302_v26 }
 0x112   : > { %4414 = vmatprep.subr.bf16.mxu0 %v5305_v27 }
 0x113   : > { %4438 = vmatpush3.bf16.msra.mxu1 %v5312_v33 }
 0x114   : > { %4439 = vmatprep.subr.bf16.mxu1 %v5077_v0 }
 0x115   : > { %4416 = vmatpush1.bf16.msra.mxu0 %v5318_v37 }
 0x116   : > { %4418 = vmatprep.subr.bf16.mxu0 %v5321_v38 }
 0x117   : > { %4441 = vmatpush3.bf16.msra.mxu1 %v5326_v43 }
 0x118   : > { %4442 = vmatprep.subr.bf16.mxu1 %v5077_v0 }
 0x119   : > { %4420 = vmatpush1.bf16.msra.mxu0 %v5332_v46 }
 0x11a   : > { %4446 = vmatprep.subr.bf16.mxu0 %v5197_v24 }
 0x11b   : > { %4444 = vmatpush3.bf16.msra.mxu1 %v5336_v47 }
 0x11c   : > { %996 = vmatmul.mubr.f32.vlgmr.msra.gmra.mrb[6].mxu0 %v5340_v49  ;;  %4477 = vmatprep.subr.bf16.mxu1 %v5077_v0 }
 0x11d   : > { %4448 = vmatpush1.bf16.msra.mxu0 %v5215_v39  ;;  %1312 = vmatprep.mubr.f32.mxu0 %v5079_v2 }
 0x11e   : > { %4105 = vmatmul.mubr.f32.vlgmr.msra.gmra.mrb[4].mxu1 %v5340_v49  ;;  %4450 = vmatprep.subr.bf16.mxu0 %v5218_v42 }
 0x11f   : > { %4479 = vmatpush3.bf16.msra.mxu1 %v5225_v48  ;;  %4139 = vmatprep.mubr.msk.f32.mxu1 %vm5078_vm1, %v5079_v2 }
 0x120   : > { %4480 = vmatprep.subr.bf16.mxu1 %v5077_v0 }
 0x121   : > { %4452 = vmatpush1.bf16.msra.mxu0 %v5233_v51 }
 0x122   : > { %4454 = vmatprep.subr.bf16.mxu0 %v5237_v52 }
 0x123   : > { %4482 = vmatpush3.bf16.msra.mxu1 %v5244_v57 }
 0x124   : > { %4483 = vmatprep.subr.bf16.mxu1 %v5077_v0 }
 0x125   : > { %4456 = vmatpush1.bf16.msra.mxu0 %v5253_v60 }
 0x126   : > { %4458 = vmatprep.subr.bf16.mxu0 %v5257_v61 }
 0x127   : > { %4485 = vmatpush3.bf16.msra.mxu1 %v5264_v4 }
 0x128   : > { %4486 = vmatprep.subr.bf16.mxu1 %v5077_v0 }
 0x129   : > { %4460 = vmatpush1.bf16.msra.mxu0 %v5270_v7 }
 0x12a   : > { %4462 = vmatprep.subr.bf16.mxu0 %v5273_v8 }
 0x12b   : > { %4488 = vmatpush3.bf16.msra.mxu1 %v5280_v13 }
 0x12c   : > { %4489 = vmatprep.subr.bf16.mxu1 %v5077_v0 }
 0x12d   : > { %4464 = vmatpush1.bf16.msra.mxu0 %v5286_v16 }
 0x12e   : > { %4466 = vmatprep.subr.bf16.mxu0 %v5289_v17 }
 0x12f   : > { %4491 = vmatpush3.bf16.msra.mxu1 %v5296_v22 }
 0x130   : > { %4492 = vmatprep.subr.bf16.mxu1 %v5077_v0 }
 0x131   : > { %4468 = vmatpush1.bf16.msra.mxu0 %v5302_v26 }
 0x132   : > { %4470 = vmatprep.subr.bf16.mxu0 %v5305_v27 }
 0x133   : > { %4494 = vmatpush3.bf16.msra.mxu1 %v5312_v33 }
 0x134   : > { %4495 = vmatprep.subr.bf16.mxu1 %v5077_v0 }
 0x135   : > { %4472 = vmatpush1.bf16.msra.mxu0 %v5318_v37 }
 0x136   : > { %4474 = vmatprep.subr.bf16.mxu0 %v5321_v38 }
 0x137   : > { %4497 = vmatpush3.bf16.msra.mxu1 %v5326_v43 }
 0x138   : > { %4498 = vmatprep.subr.bf16.mxu1 %v5077_v0 }
 0x139   : > { %4476 = vmatpush1.bf16.msra.mxu0 %v5332_v46 }
 0x13a   : > { %4502 = vmatprep.subr.bf16.mxu0 %v5197_v24 }
 0x13b   : > { %4500 = vmatpush3.bf16.msra.mxu1 %v5336_v47 }
 0x13c   : > { %4533 = vmatprep.subr.bf16.mxu1 %v5077_v0 }
 0x1cf   : > { %v787_v50 = vpop.f32.mrb[2].mxu0 }
 0x1d0   : > { %873 = vst [vmem:[#allocation3] sm:$0xff] %v787_v50  ;;  %v789_v53 = vpop.f32.mrb[3].mxu0  ;;  %v4071_v54 = vpop.f32.mrb[2].mxu1 }
 0x1d1   : > { %874 = vst [vmem:[#allocation3 + $0x8] sm:$0xff] %v789_v53  ;;  %878 = vst [vmem:[#allocation3 + $0x28] sm:$0xff] %v4071_v54  ;;  %v864_v55 = vpop.f32.mrb[3].mxu1 }
 0x1d2   : > { %875 = vst [vmem:[#allocation3 + $0x10] sm:$0xff] %v864_v55 }
 0x1d3   : > { %v793_v56 = vpop.f32.mrb[4].mxu0 }
 0x1d4   : > { %876 = vst [vmem:[#allocation3 + $0x18] sm:$0xff] %v793_v56  ;;  %v795_v58 = vpop.f32.mrb[5].mxu0 }
 0x1d5   : > { %877 = vst [vmem:[#allocation3 + $0x20] sm:$0xff] %v795_v58 }
 0x1d9   : > { %v928_v14 = vld [vmem:[#allocation3] ss:$8 sm:$0x7] }
 0x1da   : > { %v1113_v29 = vrot.slane %v928_v14, 1 }
 0x1dc   : > { %v930_v23 = vld [vmem:[#allocation3 + $0x18] ss:$8 sm:$0x7] }
 0x1dd   : > { %v1114_v36 = vrot.slane %v930_v23, 1 }
 0x1ef   : > { %v997_v6 = vpop.f32.mrb[6].mxu0 }
 0x1f0   : > { %v1079_v9 = vrot.slane %v997_v6, %v5386_v5  ;;  %v999_v10 = vpop.f32.mrb[7].mxu0 }
 0x1f1   : > { %v1124_v11 = vrot.slane %v999_v10, %v5386_v5  ;;  %v1068_v12 = vpop.f32.mrb[4].mxu1 }
 0x1f2   : > { %v1080_v15 = vcombine.high %v1079_v9, %v1079_v9  ;;  %v1087_v18 = vrot.slane %v1079_v9, %v5386_v5  ;;  %v4106_v19 = vpop.f32.mrb[5].mxu1  ;;  %v1163_v58 = vrot.slane %v1068_v12, %v5386_v5 }
 0x1f3   : > { %v1125_v20 = vcombine.high %v1124_v11, %v1124_v11  ;;  %v1132_v21 = vrot.slane %v1124_v11, %v5386_v5  ;;  %v1183_v19 = vrot.slane %v928_v14, 2 }
 0x1f4   : > { %v1094_v25 = vrot.slane %v1080_v15, %v5386_v5  ;;  %v1097_v28 = vadd.f32 %v1087_v18, %v928_v14  ;;  %v1164_v62 = vcombine.high %v1163_v58, %v1163_v58  ;;  %v1171_v9 = vrot.slane %v1163_v58, %v5386_v5 }
 0x1f5   : > { %v1139_v31 = vrot.slane %v1125_v20, %v5386_v5  ;;  %v1142_v40 = vadd.f32 %v1132_v21, %v1113_v29  ;;  %v1202_v29 = vrot.slane %v5340_v49, %v5386_v5 }
 0x1f6   : > { %v1098_v32 = vadd.f32 %v1094_v25, %v930_v23  ;;  %v3855_v34 = vmul.f32 -1.442695, %v1097_v28  ;;  %v1178_v11 = vrot.slane %v1164_v62, %v5386_v5  ;;  %v1184_v25 = vrot.slane %v930_v23, 2 }
 0x1f7   : > { %v1143_v44 = vadd.f32 %v1139_v31, %v1114_v36  ;;  %v3857_v45 = vmul.f32 -1.442695, %v1142_v40  ;;  %v1203_v31 = vcombine.high %v1202_v29, %v1202_v29 }
 0x1f8   : > { %4881 = vpow2.f32 %v3855_v34  ;;  %v3856_v41 = vmul.f32 -1.442695, %v1098_v32  ;;  %v1210_v34 = vrot.slane %v1202_v29, %v5386_v5 }
 0x1f9   : > { %v3858_v50 = vmul.f32 -1.442695, %v1143_v44  ;;  %v1217_v40 = vrot.slane %v1203_v31, %v5386_v5 }
 0x1fa   : > { %4883 = vpow2.f32 %v3856_v41 }
 0x1fb   : > { %4885 = vpow2.f32 %v3857_v45 }
 0x1fc   : > { %4887 = vpow2.f32 %v3858_v50 }
 0x202   : > { %v4882_v53 = vpop.eup %4881 }
 0x203   : > { %v1105_v54 = vadd.f32 1.0, %v4882_v53 }
 0x204   : > { %v4884_v55 = vpop.eup %4883 }
 0x205   : > { %v1106_v56 = vadd.f32 1.0, %v4884_v55  ;;  %4889 = vrcp.f32 %v1105_v54  ;;  %v4886_v59 = vpop.eup %4885 }
 0x206   : > { %v4888_v1 = vpop.eup %4887  ;;  %v1150_v6 = vadd.f32 1.0, %v4886_v59 }
 0x207   : > { %4891 = vrcp.f32 %v1106_v56  ;;  %v1151_v10 = vadd.f32 1.0, %v4888_v1 }
 0x208   : > { %4893 = vrcp.f32 %v1150_v6 }
 0x209   : > { %4895 = vrcp.f32 %v1151_v10 }
 0x20f   : > { %v4890_v15 = vpop.eup %4889 }
 0x210   : > { %v1181_v18 = vmul.f32 %v4890_v15, %v1171_v9  ;;  %v1227_v15 = vld [vmem:[#allocation3 + $0x1] ss:$8 sm:$0x7] }
 0x211   : > { %v4892_v20 = vpop.eup %4891  ;;  %v1430_v29 = vrot.slane %v1227_v15, 1 }
 0x212   : > { %v1182_v21 = vmul.f32 %v4892_v20, %v1178_v11  ;;  %v1187_v28 = vadd.f32 %v1183_v19, %v1181_v18  ;;  %v4894_v32 = vpop.eup %4893 }
 0x213   : > { %v4896_v36 = vpop.eup %4895  ;;  %v1191_v41 = vsub.f32 1.0, %v4894_v32  ;;  %v1220_v50 = vmul.f32 %v4894_v32, %v1210_v34 }
 0x214   : > { %v1188_v12 = vadd.f32 %v1184_v25, %v1182_v21  ;;  %4897 = vtanh.f32 %v1187_v28  ;;  %v1192_v44 = vsub.f32 1.0, %v4896_v36  ;;  %v1221_v54 = vmul.f32 %v4896_v36, %v1217_v40  ;;  %v1229_v25 = vld [vmem:[#allocation3 + $0x19] ss:$8 sm:$0x7] }
 0x215   : > { %v1431_v36 = vrot.slane %v1229_v25, 1 }
 0x216   : > { %4899 = vtanh.f32 %v1188_v12 }
 0x21e   : > { %v4898_v14 = vpop.eup %4897 }
 0x21f   : > { %v1193_v45 = vmul.f32 %v4898_v14, %v1191_v41 }
 0x220   : > { %v4900_v23 = vpop.eup %4899 }
 0x221   : > { %v1194_v53 = vmul.f32 %v4900_v23, %v1192_v44  ;;  %v5401_v55 = vadd.f32 %v1220_v50, %v1193_v45 }
 0x223   : > { %v5403_v56 = vadd.f32 %v1221_v54, %v1194_v53  ;;  %1224 = vst [vmem:[#allocation4] sm:$0x1] %v5401_v55 }
 0x225   : > { %1225 = vst [vmem:[#allocation4 + $0x8] sm:$0x1] %v5403_v56  ;;  %v1232_v49 = vcombine.low %v5401_v55, %v5403_v56 }
 0x227   : > { %v1239_v58 = vrot.slane %v1232_v49, %v5386_v5 }
 0x229   : > { %v1246_v59 = vrot.slane %v1239_v58, %v5386_v5 }
 0x22b   : > { %1313 = vmatmul.mubr.f32.vlgmr.msra.gmra.mrb[8].mxu0 %v1246_v59  ;;  %4140 = vmatmul.mubr.f32.vlgmr.msra.gmra.mrb[6].mxu1 %v1246_v59 }
 0x22c   : > { %4504 = vmatpush1.bf16.msra.mxu0 %v5215_v39  ;;  %4535 = vmatpush3.bf16.msra.mxu1 %v5225_v48 }
 0x22d   : > { %4506 = vmatprep.subr.bf16.mxu0 %v5218_v42  ;;  %4536 = vmatprep.subr.bf16.mxu1 %v5077_v0 }
 0x22e   : > { %1604 = vmatprep.mubr.f32.mxu0 %v5079_v2  ;;  %4174 = vmatprep.mubr.msk.f32.mxu1 %vm5078_vm1, %v5079_v2 }
 0x230   : > { %4508 = vmatpush1.bf16.msra.mxu0 %v5233_v51  ;;  %4538 = vmatpush3.bf16.msra.mxu1 %v5244_v57 }
 0x231   : > { %4510 = vmatprep.subr.bf16.mxu0 %v5237_v52  ;;  %4539 = vmatprep.subr.bf16.mxu1 %v5077_v0 }
 0x234   : > { %4512 = vmatpush1.bf16.msra.mxu0 %v5253_v60  ;;  %4541 = vmatpush3.bf16.msra.mxu1 %v5264_v4 }
 0x235   : > { %4514 = vmatprep.subr.bf16.mxu0 %v5257_v61  ;;  %4542 = vmatprep.subr.bf16.mxu1 %v5077_v0 }
 0x238   : > { %4516 = vmatpush1.bf16.msra.mxu0 %v5270_v7  ;;  %4544 = vmatpush3.bf16.msra.mxu1 %v5280_v13 }
 0x239   : > { %4518 = vmatprep.subr.bf16.mxu0 %v5273_v8  ;;  %4545 = vmatprep.subr.bf16.mxu1 %v5077_v0 }
 0x23c   : > { %4520 = vmatpush1.bf16.msra.mxu0 %v5286_v16  ;;  %4547 = vmatpush3.bf16.msra.mxu1 %v5296_v22 }
 0x23d   : > { %4522 = vmatprep.subr.bf16.mxu0 %v5289_v17  ;;  %4548 = vmatprep.subr.bf16.mxu1 %v5077_v0 }
 0x240   : > { %4524 = vmatpush1.bf16.msra.mxu0 %v5302_v26  ;;  %4550 = vmatpush3.bf16.msra.mxu1 %v5312_v33 }
 0x241   : > { %4526 = vmatprep.subr.bf16.mxu0 %v5305_v27  ;;  %4551 = vmatprep.subr.bf16.mxu1 %v5077_v0 }
 0x244   : > { %4528 = vmatpush1.bf16.msra.mxu0 %v5318_v37  ;;  %4553 = vmatpush3.bf16.msra.mxu1 %v5326_v43 }
 0x245   : > { %4530 = vmatprep.subr.bf16.mxu0 %v5321_v38  ;;  %4554 = vmatprep.subr.bf16.mxu1 %v5077_v0 }
 0x248   : > { %4532 = vmatpush1.bf16.msra.mxu0 %v5332_v46  ;;  %4556 = vmatpush3.bf16.msra.mxu1 %v5336_v47 }
 0x249   : > { %4558 = vmatprep.subr.bf16.mxu0 %v5197_v24  ;;  %4589 = vmatprep.subr.bf16.mxu1 %v5077_v0 }
 0x2fe   : > { %v1314_v62 = vpop.f32.mrb[8].mxu0  ;;  %v1385_v1 = vpop.f32.mrb[6].mxu1 }
 0x2ff   : > { %v1396_v6 = vrot.slane %v1314_v62, %v5386_v5  ;;  %v1316_v9 = vpop.f32.mrb[9].mxu0  ;;  %v4141_v10 = vpop.f32.mrb[7].mxu1  ;;  %v1480_v49 = vrot.slane %v1385_v1, %v5386_v5 }
 0x300   : > { %v1441_v11 = vrot.slane %v1316_v9, %v5386_v5 }
 0x301   : > { %v1397_v18 = vcombine.high %v1396_v6, %v1396_v6  ;;  %v1404_v19 = vrot.slane %v1396_v6, %v5386_v5  ;;  %v1481_v62 = vcombine.high %v1480_v49, %v1480_v49  ;;  %v1488_v9 = vrot.slane %v1480_v49, %v5386_v5 }
 0x302   : > { %v1442_v20 = vcombine.high %v1441_v11, %v1441_v11  ;;  %v1449_v21 = vrot.slane %v1441_v11, %v5386_v5 }
 0x303   : > { %v1411_v28 = vrot.slane %v1397_v18, %v5386_v5  ;;  %v1414_v12 = vadd.f32 %v1404_v19, %v1227_v15  ;;  %v1495_v18 = vrot.slane %v1481_v62, %v5386_v5 }
 0x304   : > { %v1456_v31 = vrot.slane %v1442_v20, %v5386_v5  ;;  %v1459_v40 = vadd.f32 %v1449_v21, %v1430_v29  ;;  %v1500_v20 = vrot.slane %v1227_v15, 2 }
 0x305   : > { %v1415_v32 = vadd.f32 %v1411_v28, %v1229_v25  ;;  %v3859_v34 = vmul.f32 -1.442695, %v1414_v12  ;;  %v1501_v12 = vrot.slane %v1229_v25, 2 }
 0x306   : > { %v1460_v14 = vadd.f32 %v1456_v31, %v1431_v36  ;;  %v3861_v44 = vmul.f32 -1.442695, %v1459_v40 }
 0x307   : > { %4901 = vpow2.f32 %v3859_v34  ;;  %v3860_v41 = vmul.f32 -1.442695, %v1415_v32 }
 0x308   : > { %v3862_v45 = vmul.f32 -1.442695, %v1460_v14 }
 0x309   : > { %4903 = vpow2.f32 %v3860_v41 }
 0x30a   : > { %4905 = vpow2.f32 %v3861_v44 }
 0x30b   : > { %4907 = vpow2.f32 %v3862_v45 }
 0x311   : > { %v4902_v50 = vpop.eup %4901 }
 0x312   : > { %v1422_v23 = vadd.f32 1.0, %v4902_v50 }
 0x313   : > { %v4904_v53 = vpop.eup %4903 }
 0x314   : > { %v1423_v54 = vadd.f32 1.0, %v4904_v53  ;;  %4909 = vrcp.f32 %v1422_v23  ;;  %v4906_v58 = vpop.eup %4905 }
 0x315   : > { %v4908_v59 = vpop.eup %4907  ;;  %v1467_v6 = vadd.f32 1.0, %v4906_v58 }
 0x316   : > { %4911 = vrcp.f32 %v1423_v54  ;;  %v1468_v10 = vadd.f32 1.0, %v4908_v59 }
 0x317   : > { %4913 = vrcp.f32 %v1467_v6  ;;  %v1519_v6 = vld [vmem:[#allocation3 + $0x2] ss:$8 sm:$0x7] }
 0x318   : > { %4915 = vrcp.f32 %v1468_v10 }
 0x31e   : > { %v4910_v11 = vpop.eup %4909 }
 0x31f   : > { %v1498_v19 = vmul.f32 %v4910_v11, %v1488_v9 }
 0x320   : > { %v4912_v21 = vpop.eup %4911 }
 0x321   : > { %v1499_v28 = vmul.f32 %v4912_v21, %v1495_v18  ;;  %v1504_v29 = vadd.f32 %v1500_v20, %v1498_v19  ;;  %v4914_v1 = vpop.eup %4913  ;;  %v1521_v19 = vld [vmem:[#allocation3 + $0x1a] ss:$8 sm:$0x7] }
 0x322   : > { %v4916_v32 = vpop.eup %4915  ;;  %v1508_v34 = vsub.f32 1.0, %v4914_v1  ;;  %v1512_v14 = vmul.f32 %v4914_v1, %v5401_v55  ;;  %v1723_v1 = vrot.slane %v1521_v19, 1 }
 0x323   : > { %v1505_v31 = vadd.f32 %v1501_v12, %v1499_v28  ;;  %4917 = vtanh.f32 %v1504_v29  ;;  %v1509_v40 = vsub.f32 1.0, %v4916_v32  ;;  %v1513_v15 = vmul.f32 %v4916_v32, %v5403_v56 }
 0x324   : > { %v1722_v28 = vrot.slane %v1519_v6, 1 }
 0x325   : > { %4919 = vtanh.f32 %v1505_v31 }
 0x32d   : > { %v4918_v36 = vpop.eup %4917 }
 0x32e   : > { %v1510_v41 = vmul.f32 %v4918_v36, %v1508_v34 }
 0x32f   : > { %v4920_v44 = vpop.eup %4919 }
 0x330   : > { %v1511_v45 = vmul.f32 %v4920_v44, %v1509_v40  ;;  %v5457_v50 = vadd.f32 %v1512_v14, %v1510_v41 }
 0x332   : > { %v5459_v25 = vadd.f32 %v1513_v15, %v1511_v45  ;;  %1516 = vst [vmem:[#allocation4 + $0x1] sm:$0x1] %v5457_v50 }
 0x334   : > { %1517 = vst [vmem:[#allocation4 + $0x9] sm:$0x1] %v5459_v25  ;;  %v1524_v23 = vcombine.low %v5457_v50, %v5459_v25 }
 0x336   : > { %v1531_v53 = vrot.slane %v1524_v23, %v5386_v5 }
 0x338   : > { %v1538_v54 = vrot.slane %v1531_v53, %v5386_v5 }
 0x33a   : > { %1605 = vmatmul.mubr.f32.vlgmr.msra.gmra.mrb[10].mxu0 %v1538_v54  ;;  %4175 = vmatmul.mubr.f32.vlgmr.msra.gmra.mrb[8].mxu1 %v1538_v54 }
 0x33b   : > { %4560 = vmatpush1.bf16.msra.mxu0 %v5215_v39  ;;  %4591 = vmatpush3.bf16.msra.mxu1 %v5225_v48 }
 0x33c   : > { %4562 = vmatprep.subr.bf16.mxu0 %v5218_v42  ;;  %4592 = vmatprep.subr.bf16.mxu1 %v5077_v0 }
 0x33d   : > { %1896 = vmatprep.mubr.f32.mxu0 %v5079_v2  ;;  %4209 = vmatprep.mubr.msk.f32.mxu1 %vm5078_vm1, %v5079_v2 }
 0x33f   : > { %4564 = vmatpush1.bf16.msra.mxu0 %v5233_v51  ;;  %4594 = vmatpush3.bf16.msra.mxu1 %v5244_v57 }
 0x340   : > { %4566 = vmatprep.subr.bf16.mxu0 %v5237_v52  ;;  %4595 = vmatprep.subr.bf16.mxu1 %v5077_v0 }
 0x343   : > { %4568 = vmatpush1.bf16.msra.mxu0 %v5253_v60  ;;  %4597 = vmatpush3.bf16.msra.mxu1 %v5264_v4 }
 0x344   : > { %4570 = vmatprep.subr.bf16.mxu0 %v5257_v61  ;;  %4598 = vmatprep.subr.bf16.mxu1 %v5077_v0 }
 0x347   : > { %4572 = vmatpush1.bf16.msra.mxu0 %v5270_v7  ;;  %4600 = vmatpush3.bf16.msra.mxu1 %v5280_v13 }
 0x348   : > { %4574 = vmatprep.subr.bf16.mxu0 %v5273_v8  ;;  %4601 = vmatprep.subr.bf16.mxu1 %v5077_v0 }
 0x34b   : > { %4576 = vmatpush1.bf16.msra.mxu0 %v5286_v16  ;;  %4603 = vmatpush3.bf16.msra.mxu1 %v5296_v22 }
 0x34c   : > { %4578 = vmatprep.subr.bf16.mxu0 %v5289_v17  ;;  %4604 = vmatprep.subr.bf16.mxu1 %v5077_v0 }
 0x34f   : > { %4580 = vmatpush1.bf16.msra.mxu0 %v5302_v26  ;;  %4606 = vmatpush3.bf16.msra.mxu1 %v5312_v33 }
 0x350   : > { %4582 = vmatprep.subr.bf16.mxu0 %v5305_v27  ;;  %4607 = vmatprep.subr.bf16.mxu1 %v5077_v0 }
 0x353   : > { %4584 = vmatpush1.bf16.msra.mxu0 %v5318_v37  ;;  %4609 = vmatpush3.bf16.msra.mxu1 %v5326_v43 }
 0x354   : > { %4586 = vmatprep.subr.bf16.mxu0 %v5321_v38  ;;  %4610 = vmatprep.subr.bf16.mxu1 %v5077_v0 }
 0x357   : > { %4588 = vmatpush1.bf16.msra.mxu0 %v5332_v46  ;;  %4612 = vmatpush3.bf16.msra.mxu1 %v5336_v47 }
 0x358   : > { %4614 = vmatprep.subr.bf16.mxu0 %v5197_v24  ;;  %4645 = vmatprep.subr.bf16.mxu1 %v5077_v0 }
 0x40d   : > { %v1606_v55 = vpop.f32.mrb[10].mxu0  ;;  %v1677_v56 = vpop.f32.mrb[8].mxu1 }
 0x40e   : > { %v1688_v49 = vrot.slane %v1606_v55, %v5386_v5  ;;  %v1608_v58 = vpop.f32.mrb[11].mxu0  ;;  %v4176_v59 = vpop.f32.mrb[9].mxu1  ;;  %v1772_v23 = vrot.slane %v1677_v56, %v5386_v5 }
 0x40f   : > { %v1733_v62 = vrot.slane %v1608_v58, %v5386_v5 }
 0x410   : > { %v1689_v9 = vcombine.high %v1688_v49, %v1688_v49  ;;  %v1696_v10 = vrot.slane %v1688_v49, %v5386_v5  ;;  %v1773_v55 = vcombine.high %v1772_v23, %v1772_v23  ;;  %v1780_v58 = vrot.slane %v1772_v23, %v5386_v5 }
 0x411   : > { %v1734_v11 = vcombine.high %v1733_v62, %v1733_v62  ;;  %v1741_v18 = vrot.slane %v1733_v62, %v5386_v5 }
 0x412   : > { %v1703_v20 = vrot.slane %v1689_v9, %v5386_v5  ;;  %v1706_v21 = vadd.f32 %v1696_v10, %v1519_v6  ;;  %v1787_v9 = vrot.slane %v1773_v55, %v5386_v5 }
 0x413   : > { %v1748_v12 = vrot.slane %v1734_v11, %v5386_v5  ;;  %v1751_v32 = vadd.f32 %v1741_v18, %v1722_v28  ;;  %v1792_v11 = vrot.slane %v1519_v6, 2 }
 0x414   : > { %v1707_v29 = vadd.f32 %v1703_v20, %v1521_v19  ;;  %v3863_v31 = vmul.f32 -1.442695, %v1706_v21  ;;  %v1793_v21 = vrot.slane %v1521_v19, 2 }
 0x415   : > { %v1752_v36 = vadd.f32 %v1748_v12, %v1723_v1  ;;  %v3865_v40 = vmul.f32 -1.442695, %v1751_v32 }
 0x416   : > { %4921 = vpow2.f32 %v3863_v31  ;;  %v3864_v34 = vmul.f32 -1.442695, %v1707_v29 }
 0x417   : > { %v3866_v41 = vmul.f32 -1.442695, %v1752_v36 }
 0x418   : > { %4923 = vpow2.f32 %v3864_v34 }
 0x419   : > { %4925 = vpow2.f32 %v3865_v40 }
 0x41a   : > { %4927 = vpow2.f32 %v3866_v41 }
 0x420   : > { %v4922_v14 = vpop.eup %4921 }
 0x421   : > { %v1714_v44 = vadd.f32 1.0, %v4922_v14 }
 0x422   : > { %v4924_v45 = vpop.eup %4923 }
 0x423   : > { %v1715_v15 = vadd.f32 1.0, %v4924_v45  ;;  %4929 = vrcp.f32 %v1714_v44  ;;  %v4926_v53 = vpop.eup %4925 }
 0x424   : > { %v4928_v54 = vpop.eup %4927  ;;  %v1759_v49 = vadd.f32 1.0, %v4926_v53 }
 0x425   : > { %4931 = vrcp.f32 %v1715_v15  ;;  %v1760_v59 = vadd.f32 1.0, %v4928_v54 }
 0x426   : > { %4933 = vrcp.f32 %v1759_v49  ;;  %v1811_v49 = vld [vmem:[#allocation3 + $0x3] ss:$8 sm:$0x7] }
 0x427   : > { %4935 = vrcp.f32 %v1760_v59 }
 0x42d   : > { %v4930_v62 = vpop.eup %4929 }
 0x42e   : > { %v1790_v10 = vmul.f32 %v4930_v62, %v1780_v58 }
 0x42f   : > { %v4932_v18 = vpop.eup %4931 }
 0x430   : > { %v1791_v20 = vmul.f32 %v4932_v18, %v1787_v9  ;;  %v1796_v28 = vadd.f32 %v1792_v11, %v1790_v10  ;;  %v4934_v56 = vpop.eup %4933  ;;  %v1813_v10 = vld [vmem:[#allocation3 + $0x1b] ss:$8 sm:$0x7] }
 0x431   : > { %v4936_v29 = vpop.eup %4935  ;;  %v1800_v31 = vsub.f32 1.0, %v4934_v56  ;;  %v1804_v36 = vmul.f32 %v4934_v56, %v5457_v50  ;;  %v2015_v56 = vrot.slane %v1813_v10, 1 }
 0x432   : > { %v1797_v12 = vadd.f32 %v1793_v21, %v1791_v20  ;;  %4937 = vtanh.f32 %v1796_v28  ;;  %v1801_v32 = vsub.f32 1.0, %v4936_v29  ;;  %v1805_v6 = vmul.f32 %v4936_v29, %v5459_v25 }
 0x433   : > { %v2014_v20 = vrot.slane %v1811_v49, 1 }
 0x434   : > { %4939 = vtanh.f32 %v1797_v12 }
 0x43c   : > { %v4938_v1 = vpop.eup %4937 }
 0x43d   : > { %v1802_v34 = vmul.f32 %v4938_v1, %v1800_v31 }
 0x43e   : > { %v4940_v40 = vpop.eup %4939 }
 0x43f   : > { %v1803_v41 = vmul.f32 %v4940_v40, %v1801_v32  ;;  %v5513_v14 = vadd.f32 %v1804_v36, %v1802_v34 }
 0x441   : > { %v5515_v19 = vadd.f32 %v1805_v6, %v1803_v41  ;;  %1808 = vst [vmem:[#allocation4 + $0x2] sm:$0x1] %v5513_v14 }
 0x443   : > { %1809 = vst [vmem:[#allocation4 + $0xa] sm:$0x1] %v5515_v19  ;;  %v1816_v44 = vcombine.low %v5513_v14, %v5515_v19 }
 0x445   : > { %v1823_v45 = vrot.slane %v1816_v44, %v5386_v5 }
 0x447   : > { %v1830_v15 = vrot.slane %v1823_v45, %v5386_v5 }
 0x449   : > { %1897 = vmatmul.mubr.f32.vlgmr.msra.gmra.mrb[12].mxu0 %v1830_v15  ;;  %4210 = vmatmul.mubr.f32.vlgmr.msra.gmra.mrb[10].mxu1 %v1830_v15 }
 0x44a   : > { %4616 = vmatpush1.bf16.msra.mxu0 %v5215_v39  ;;  %4647 = vmatpush3.bf16.msra.mxu1 %v5225_v48 }
 0x44b   : > { %4618 = vmatprep.subr.bf16.mxu0 %v5218_v42  ;;  %4648 = vmatprep.subr.bf16.mxu1 %v5077_v0 }
 0x44c   : > { %2188 = vmatprep.mubr.f32.mxu0 %v5079_v2  ;;  %4244 = vmatprep.mubr.msk.f32.mxu1 %vm5078_vm1, %v5079_v2 }
 0x44e   : > { %4620 = vmatpush1.bf16.msra.mxu0 %v5233_v51  ;;  %4650 = vmatpush3.bf16.msra.mxu1 %v5244_v57 }
 0x44f   : > { %4622 = vmatprep.subr.bf16.mxu0 %v5237_v52  ;;  %4651 = vmatprep.subr.bf16.mxu1 %v5077_v0 }
 0x452   : > { %4624 = vmatpush1.bf16.msra.mxu0 %v5253_v60  ;;  %4653 = vmatpush3.bf16.msra.mxu1 %v5264_v4 }
 0x453   : > { %4626 = vmatprep.subr.bf16.mxu0 %v5257_v61  ;;  %4654 = vmatprep.subr.bf16.mxu1 %v5077_v0 }
 0x456   : > { %4628 = vmatpush1.bf16.msra.mxu0 %v5270_v7  ;;  %4656 = vmatpush3.bf16.msra.mxu1 %v5280_v13 }
 0x457   : > { %4630 = vmatprep.subr.bf16.mxu0 %v5273_v8  ;;  %4657 = vmatprep.subr.bf16.mxu1 %v5077_v0 }
 0x45a   : > { %4632 = vmatpush1.bf16.msra.mxu0 %v5286_v16  ;;  %4659 = vmatpush3.bf16.msra.mxu1 %v5296_v22 }
 0x45b   : > { %4634 = vmatprep.subr.bf16.mxu0 %v5289_v17  ;;  %4660 = vmatprep.subr.bf16.mxu1 %v5077_v0 }
 0x45e   : > { %4636 = vmatpush1.bf16.msra.mxu0 %v5302_v26  ;;  %4662 = vmatpush3.bf16.msra.mxu1 %v5312_v33 }
 0x45f   : > { %4638 = vmatprep.subr.bf16.mxu0 %v5305_v27  ;;  %4663 = vmatprep.subr.bf16.mxu1 %v5077_v0 }
 0x462   : > { %4640 = vmatpush1.bf16.msra.mxu0 %v5318_v37  ;;  %4665 = vmatpush3.bf16.msra.mxu1 %v5326_v43 }
 0x463   : > { %4642 = vmatprep.subr.bf16.mxu0 %v5321_v38  ;;  %4666 = vmatprep.subr.bf16.mxu1 %v5077_v0 }
 0x466   : > { %4644 = vmatpush1.bf16.msra.mxu0 %v5332_v46  ;;  %4668 = vmatpush3.bf16.msra.mxu1 %v5336_v47 }
 0x467   : > { %4670 = vmatprep.subr.bf16.mxu0 %v5197_v24  ;;  %4701 = vmatprep.subr.bf16.mxu1 %v5077_v0 }
 0x51c   : > { %v1898_v50 = vpop.f32.mrb[12].mxu0  ;;  %v1969_v25 = vpop.f32.mrb[10].mxu1 }
 0x51d   : > { %v1980_v23 = vrot.slane %v1898_v50, %v5386_v5  ;;  %v1900_v53 = vpop.f32.mrb[13].mxu0  ;;  %v4211_v54 = vpop.f32.mrb[11].mxu1  ;;  %v2064_v44 = vrot.slane %v1969_v25, %v5386_v5 }
 0x51e   : > { %v2025_v55 = vrot.slane %v1900_v53, %v5386_v5 }
 0x51f   : > { %v1981_v58 = vcombine.high %v1980_v23, %v1980_v23  ;;  %v1988_v59 = vrot.slane %v1980_v23, %v5386_v5  ;;  %v2065_v50 = vcombine.high %v2064_v44, %v2064_v44  ;;  %v2072_v53 = vrot.slane %v2064_v44, %v5386_v5 }
 0x520   : > { %v2026_v62 = vcombine.high %v2025_v55, %v2025_v55  ;;  %v2033_v9 = vrot.slane %v2025_v55, %v5386_v5 }
 0x521   : > { %v1995_v11 = vrot.slane %v1981_v58, %v5386_v5  ;;  %v1998_v18 = vadd.f32 %v1988_v59, %v1811_v49  ;;  %v2079_v58 = vrot.slane %v2065_v50, %v5386_v5 }
 0x522   : > { %v2040_v21 = vrot.slane %v2026_v62, %v5386_v5  ;;  %v2043_v29 = vadd.f32 %v2033_v9, %v2014_v20  ;;  %v2084_v62 = vrot.slane %v1811_v49, 2 }
 0x523   : > { %v1999_v28 = vadd.f32 %v1995_v11, %v1813_v10  ;;  %v3867_v12 = vmul.f32 -1.442695, %v1998_v18  ;;  %v2085_v18 = vrot.slane %v1813_v10, 2 }
 0x524   : > { %v2044_v1 = vadd.f32 %v2040_v21, %v2015_v56  ;;  %v3869_v32 = vmul.f32 -1.442695, %v2043_v29 }
 0x525   : > { %4941 = vpow2.f32 %v3867_v12  ;;  %v3868_v31 = vmul.f32 -1.442695, %v1999_v28 }
 0x526   : > { %v3870_v34 = vmul.f32 -1.442695, %v2044_v1 }
 0x527   : > { %4943 = vpow2.f32 %v3868_v31 }
 0x528   : > { %4945 = vpow2.f32 %v3869_v32 }
 0x529   : > { %4947 = vpow2.f32 %v3870_v34 }
 0x52f   : > { %v4942_v36 = vpop.eup %4941 }
 0x530   : > { %v2006_v40 = vadd.f32 1.0, %v4942_v36 }
 0x531   : > { %v4944_v41 = vpop.eup %4943 }
 0x532   : > { %v2007_v6 = vadd.f32 1.0, %v4944_v41  ;;  %4949 = vrcp.f32 %v2006_v40  ;;  %v4946_v45 = vpop.eup %4945 }
 0x533   : > { %v4948_v15 = vpop.eup %4947  ;;  %v2051_v23 = vadd.f32 1.0, %v4946_v45 }
 0x534   : > { %4951 = vrcp.f32 %v2007_v6  ;;  %v2052_v54 = vadd.f32 1.0, %v4948_v15 }
 0x535   : > { %4953 = vrcp.f32 %v2051_v23  ;;  %v2103_v23 = vld [vmem:[#allocation3 + $0x4] ss:$8 sm:$0x7] }
 0x536   : > { %4955 = vrcp.f32 %v2052_v54 }
 0x53c   : > { %v4950_v55 = vpop.eup %4949 }
 0x53d   : > { %v2082_v59 = vmul.f32 %v4950_v55, %v2072_v53 }
 0x53e   : > { %v4952_v9 = vpop.eup %4951 }
 0x53f   : > { %v2083_v11 = vmul.f32 %v4952_v9, %v2079_v58  ;;  %v2088_v20 = vadd.f32 %v2084_v62, %v2082_v59  ;;  %v4954_v25 = vpop.eup %4953  ;;  %v2105_v59 = vld [vmem:[#allocation3 + $0x1c] ss:$8 sm:$0x7] }
 0x540   : > { %v4956_v28 = vpop.eup %4955  ;;  %v2092_v12 = vsub.f32 1.0, %v4954_v25  ;;  %v2096_v1 = vmul.f32 %v4954_v25, %v5513_v14  ;;  %v2307_v25 = vrot.slane %v2105_v59, 1 }
 0x541   : > { %v2089_v21 = vadd.f32 %v2085_v18, %v2083_v11  ;;  %4957 = vtanh.f32 %v2088_v20  ;;  %v2093_v29 = vsub.f32 1.0, %v4956_v28  ;;  %v2097_v49 = vmul.f32 %v4956_v28, %v5515_v19 }
 0x542   : > { %v2306_v11 = vrot.slane %v2103_v23, 1 }
 0x543   : > { %4959 = vtanh.f32 %v2089_v21 }
 0x54b   : > { %v4958_v56 = vpop.eup %4957 }
 0x54c   : > { %v2094_v31 = vmul.f32 %v4958_v56, %v2092_v12 }
 0x54d   : > { %v4960_v32 = vpop.eup %4959 }
 0x54e   : > { %v2095_v34 = vmul.f32 %v4960_v32, %v2093_v29  ;;  %v5569_v36 = vadd.f32 %v2096_v1, %v2094_v31 }
 0x550   : > { %v5571_v10 = vadd.f32 %v2097_v49, %v2095_v34  ;;  %2100 = vst [vmem:[#allocation4 + $0x3] sm:$0x1] %v5569_v36 }
 0x552   : > { %2101 = vst [vmem:[#allocation4 + $0xb] sm:$0x1] %v5571_v10  ;;  %v2108_v40 = vcombine.low %v5569_v36, %v5571_v10 }
 0x554   : > { %v2115_v41 = vrot.slane %v2108_v40, %v5386_v5 }
 0x556   : > { %v2122_v6 = vrot.slane %v2115_v41, %v5386_v5 }
 0x558   : > { %2189 = vmatmul.mubr.f32.vlgmr.msra.gmra.mrb[14].mxu0 %v2122_v6  ;;  %4245 = vmatmul.mubr.f32.vlgmr.msra.gmra.mrb[12].mxu1 %v2122_v6 }
 0x559   : > { %4672 = vmatpush1.bf16.msra.mxu0 %v5215_v39  ;;  %4703 = vmatpush3.bf16.msra.mxu1 %v5225_v48 }
 0x55a   : > { %4674 = vmatprep.subr.bf16.mxu0 %v5218_v42  ;;  %4704 = vmatprep.subr.bf16.mxu1 %v5077_v0 }
 0x55b   : > { %2480 = vmatprep.mubr.f32.mxu0 %v5079_v2  ;;  %4279 = vmatprep.mubr.msk.f32.mxu1 %vm5078_vm1, %v5079_v2 }
 0x55d   : > { %4676 = vmatpush1.bf16.msra.mxu0 %v5233_v51  ;;  %4706 = vmatpush3.bf16.msra.mxu1 %v5244_v57 }
 0x55e   : > { %4678 = vmatprep.subr.bf16.mxu0 %v5237_v52  ;;  %4707 = vmatprep.subr.bf16.mxu1 %v5077_v0 }
 0x561   : > { %4680 = vmatpush1.bf16.msra.mxu0 %v5253_v60  ;;  %4709 = vmatpush3.bf16.msra.mxu1 %v5264_v4 }
 0x562   : > { %4682 = vmatprep.subr.bf16.mxu0 %v5257_v61  ;;  %4710 = vmatprep.subr.bf16.mxu1 %v5077_v0 }
 0x565   : > { %4684 = vmatpush1.bf16.msra.mxu0 %v5270_v7  ;;  %4712 = vmatpush3.bf16.msra.mxu1 %v5280_v13 }
 0x566   : > { %4686 = vmatprep.subr.bf16.mxu0 %v5273_v8  ;;  %4713 = vmatprep.subr.bf16.mxu1 %v5077_v0 }
 0x569   : > { %4688 = vmatpush1.bf16.msra.mxu0 %v5286_v16  ;;  %4715 = vmatpush3.bf16.msra.mxu1 %v5296_v22 }
 0x56a   : > { %4690 = vmatprep.subr.bf16.mxu0 %v5289_v17  ;;  %4716 = vmatprep.subr.bf16.mxu1 %v5077_v0 }
 0x56d   : > { %4692 = vmatpush1.bf16.msra.mxu0 %v5302_v26  ;;  %4718 = vmatpush3.bf16.msra.mxu1 %v5312_v33 }
 0x56e   : > { %4694 = vmatprep.subr.bf16.mxu0 %v5305_v27  ;;  %4719 = vmatprep.subr.bf16.mxu1 %v5077_v0 }
 0x571   : > { %4696 = vmatpush1.bf16.msra.mxu0 %v5318_v37  ;;  %4721 = vmatpush3.bf16.msra.mxu1 %v5326_v43 }
 0x572   : > { %4698 = vmatprep.subr.bf16.mxu0 %v5321_v38  ;;  %4722 = vmatprep.subr.bf16.mxu1 %v5077_v0 }
 0x575   : > { %4700 = vmatpush1.bf16.msra.mxu0 %v5332_v46  ;;  %4724 = vmatpush3.bf16.msra.mxu1 %v5336_v47 }
 0x576   : > { %4726 = vmatprep.subr.bf16.mxu0 %v5197_v24  ;;  %4757 = vmatprep.subr.bf16.mxu1 %v5077_v0 }
 0x62b   : > { %v2190_v14 = vpop.f32.mrb[14].mxu0  ;;  %v2261_v19 = vpop.f32.mrb[12].mxu1 }
 0x62c   : > { %v2272_v44 = vrot.slane %v2190_v14, %v5386_v5  ;;  %v2192_v45 = vpop.f32.mrb[15].mxu0  ;;  %v4246_v15 = vpop.f32.mrb[13].mxu1  ;;  %v2356_v40 = vrot.slane %v2261_v19, %v5386_v5 }
 0x62d   : > { %v2317_v50 = vrot.slane %v2192_v45, %v5386_v5 }
 0x62e   : > { %v2273_v53 = vcombine.high %v2272_v44, %v2272_v44  ;;  %v2280_v54 = vrot.slane %v2272_v44, %v5386_v5  ;;  %v2357_v14 = vcombine.high %v2356_v40, %v2356_v40  ;;  %v2364_v45 = vrot.slane %v2356_v40, %v5386_v5 }
 0x62f   : > { %v2318_v55 = vcombine.high %v2317_v50, %v2317_v50  ;;  %v2325_v58 = vrot.slane %v2317_v50, %v5386_v5 }
 0x630   : > { %v2287_v62 = vrot.slane %v2273_v53, %v5386_v5  ;;  %v2290_v9 = vadd.f32 %v2280_v54, %v2103_v23  ;;  %v2371_v53 = vrot.slane %v2357_v14, %v5386_v5 }
 0x631   : > { %v2332_v18 = vrot.slane %v2318_v55, %v5386_v5  ;;  %v2335_v28 = vadd.f32 %v2325_v58, %v2306_v11  ;;  %v2376_v55 = vrot.slane %v2103_v23, 2 }
 0x632   : > { %v2291_v20 = vadd.f32 %v2287_v62, %v2105_v59  ;;  %v3871_v21 = vmul.f32 -1.442695, %v2290_v9  ;;  %v2377_v9 = vrot.slane %v2105_v59, 2 }
 0x633   : > { %v2336_v56 = vadd.f32 %v2332_v18, %v2307_v25  ;;  %v3873_v29 = vmul.f32 -1.442695, %v2335_v28 }
 0x634   : > { %4961 = vpow2.f32 %v3871_v21  ;;  %v3872_v12 = vmul.f32 -1.442695, %v2291_v20 }
 0x635   : > { %v3874_v31 = vmul.f32 -1.442695, %v2336_v56 }
 0x636   : > { %4963 = vpow2.f32 %v3872_v12 }
 0x637   : > { %4965 = vpow2.f32 %v3873_v29 }
 0x638   : > { %4967 = vpow2.f32 %v3874_v31 }
 0x63e   : > { %v4962_v1 = vpop.eup %4961 }
 0x63f   : > { %v2298_v32 = vadd.f32 1.0, %v4962_v1 }
 0x640   : > { %v4964_v34 = vpop.eup %4963 }
 0x641   : > { %v2299_v49 = vadd.f32 1.0, %v4964_v34  ;;  %4969 = vrcp.f32 %v2298_v32  ;;  %v4966_v41 = vpop.eup %4965 }
 0x642   : > { %v4968_v6 = vpop.eup %4967  ;;  %v2343_v44 = vadd.f32 1.0, %v4966_v41 }
 0x643   : > { %4971 = vrcp.f32 %v2299_v49  ;;  %v2344_v15 = vadd.f32 1.0, %v4968_v6 }
 0x644   : > { %4973 = vrcp.f32 %v2343_v44  ;;  %v2395_v44 = vld [vmem:[#allocation3 + $0x5] ss:$8 sm:$0x7] }
 0x645   : > { %4975 = vrcp.f32 %v2344_v15 }
 0x64b   : > { %v4970_v50 = vpop.eup %4969 }
 0x64c   : > { %v2374_v54 = vmul.f32 %v4970_v50, %v2364_v45 }
 0x64d   : > { %v4972_v58 = vpop.eup %4971 }
 0x64e   : > { %v2375_v62 = vmul.f32 %v4972_v58, %v2371_v53  ;;  %v2380_v11 = vadd.f32 %v2376_v55, %v2374_v54  ;;  %v4974_v19 = vpop.eup %4973  ;;  %v2397_v54 = vld [vmem:[#allocation3 + $0x1d] ss:$8 sm:$0x7] }
 0x64f   : > { %v4976_v20 = vpop.eup %4975  ;;  %v2384_v21 = vsub.f32 1.0, %v4974_v19  ;;  %v2388_v56 = vmul.f32 %v4974_v19, %v5569_v36 }
 0x650   : > { %v2381_v18 = vadd.f32 %v2377_v9, %v2375_v62  ;;  %4977 = vtanh.f32 %v2380_v11  ;;  %v2385_v28 = vsub.f32 1.0, %v4976_v20  ;;  %v2389_v23 = vmul.f32 %v4976_v20, %v5571_v10 }
 0x652   : > { %4979 = vtanh.f32 %v2381_v18  ;;  %v2599_v18 = vrot.slane %v2397_v54, 1 }
 0x65a   : > { %v4978_v25 = vpop.eup %4977 }
 0x65b   : > { %v2386_v12 = vmul.f32 %v4978_v25, %v2384_v21 }
 0x65c   : > { %v4980_v29 = vpop.eup %4979 }
 0x65d   : > { %v2387_v31 = vmul.f32 %v4980_v29, %v2385_v28  ;;  %v5625_v1 = vadd.f32 %v2388_v56, %v2386_v12 }
 0x65f   : > { %v5627_v59 = vadd.f32 %v2389_v23, %v2387_v31  ;;  %2392 = vst [vmem:[#allocation4 + $0x4] sm:$0x1] %v5625_v1 }
 0x661   : > { %2393 = vst [vmem:[#allocation4 + $0xc] sm:$0x1] %v5627_v59  ;;  %v2400_v32 = vcombine.low %v5625_v1, %v5627_v59 }
 0x663   : > { %v2407_v34 = vrot.slane %v2400_v32, %v5386_v5 }
 0x665   : > { %v2414_v49 = vrot.slane %v2407_v34, %v5386_v5 }
 0x667   : > { %2481 = vmatmul.mubr.f32.vlgmr.msra.gmra.mrb[16].mxu0 %v2414_v49  ;;  %4280 = vmatmul.mubr.f32.vlgmr.msra.gmra.mrb[14].mxu1 %v2414_v49 }
 0x668   : > { %4728 = vmatpush1.bf16.msra.mxu0 %v5215_v39  ;;  %4759 = vmatpush3.bf16.msra.mxu1 %v5225_v48 }
 0x669   : > { %4730 = vmatprep.subr.bf16.mxu0 %v5218_v42  ;;  %4760 = vmatprep.subr.bf16.mxu1 %v5077_v0 }
 0x66a   : > { %2772 = vmatprep.mubr.f32.mxu0 %v5079_v2  ;;  %4314 = vmatprep.mubr.msk.f32.mxu1 %vm5078_vm1, %v5079_v2 }
 0x66c   : > { %4732 = vmatpush1.bf16.msra.mxu0 %v5233_v51  ;;  %4762 = vmatpush3.bf16.msra.mxu1 %v5244_v57 }
 0x66d   : > { %4734 = vmatprep.subr.bf16.mxu0 %v5237_v52  ;;  %4763 = vmatprep.subr.bf16.mxu1 %v5077_v0 }
 0x670   : > { %4736 = vmatpush1.bf16.msra.mxu0 %v5253_v60  ;;  %4765 = vmatpush3.bf16.msra.mxu1 %v5264_v4 }
 0x671   : > { %4738 = vmatprep.subr.bf16.mxu0 %v5257_v61  ;;  %4766 = vmatprep.subr.bf16.mxu1 %v5077_v0 }
 0x674   : > { %4740 = vmatpush1.bf16.msra.mxu0 %v5270_v7  ;;  %4768 = vmatpush3.bf16.msra.mxu1 %v5280_v13 }
 0x675   : > { %4742 = vmatprep.subr.bf16.mxu0 %v5273_v8  ;;  %4769 = vmatprep.subr.bf16.mxu1 %v5077_v0 }
 0x678   : > { %4744 = vmatpush1.bf16.msra.mxu0 %v5286_v16  ;;  %4771 = vmatpush3.bf16.msra.mxu1 %v5296_v22 }
 0x679   : > { %4746 = vmatprep.subr.bf16.mxu0 %v5289_v17  ;;  %4772 = vmatprep.subr.bf16.mxu1 %v5077_v0 }
 0x67c   : > { %4748 = vmatpush1.bf16.msra.mxu0 %v5302_v26  ;;  %4774 = vmatpush3.bf16.msra.mxu1 %v5312_v33 }
 0x67d   : > { %4750 = vmatprep.subr.bf16.mxu0 %v5305_v27  ;;  %4775 = vmatprep.subr.bf16.mxu1 %v5077_v0 }
 0x680   : > { %4752 = vmatpush1.bf16.msra.mxu0 %v5318_v37  ;;  %4777 = vmatpush3.bf16.msra.mxu1 %v5326_v43 }
 0x681   : > { %4754 = vmatprep.subr.bf16.mxu0 %v5321_v38  ;;  %4778 = vmatprep.subr.bf16.mxu1 %v5077_v0 }
 0x684   : > { %4756 = vmatpush1.bf16.msra.mxu0 %v5332_v46  ;;  %4780 = vmatpush3.bf16.msra.mxu1 %v5336_v47 }
 0x685   : > { %4813 = vmatprep.subr.bf16.mxu1 %v5077_v0  ;;  %4782 = vmatprep.subr.bf16.mxu0 %v5197_v24  ;;  %v2598_v24 = vrot.slane %v2395_v44, 1 }
 0x73a   : > { %v2482_v36 = vpop.f32.mrb[16].mxu0  ;;  %v2553_v10 = vpop.f32.mrb[14].mxu1 }
 0x73b   : > { %v2564_v40 = vrot.slane %v2482_v36, %v5386_v5  ;;  %v2484_v41 = vpop.f32.mrb[17].mxu0  ;;  %v4281_v6 = vpop.f32.mrb[15].mxu1  ;;  %v2648_v23 = vrot.slane %v2553_v10, %v5386_v5 }
 0x73c   : > { %v2609_v14 = vrot.slane %v2484_v41, %v5386_v5 }
 0x73d   : > { %v2565_v45 = vcombine.high %v2564_v40, %v2564_v40  ;;  %v2572_v15 = vrot.slane %v2564_v40, %v5386_v5  ;;  %v2649_v49 = vcombine.high %v2648_v23, %v2648_v23  ;;  %v2656_v40 = vrot.slane %v2648_v23, %v5386_v5 }
 0x73e   : > { %v2610_v50 = vcombine.high %v2609_v14, %v2609_v14  ;;  %v2617_v53 = vrot.slane %v2609_v14, %v5386_v5 }
 0x73f   : > { %v2579_v55 = vrot.slane %v2565_v45, %v5386_v5  ;;  %v2582_v58 = vadd.f32 %v2572_v15, %v2395_v44  ;;  %v2663_v14 = vrot.slane %v2649_v49, %v5386_v5  ;;  %v2668_v15 = vrot.slane %v2395_v44, 2 }
 0x740   : > { %v2624_v62 = vrot.slane %v2610_v50, %v5386_v5  ;;  %v2627_v19 = vadd.f32 %v2617_v53, %v2598_v24 }
 0x741   : > { %v2583_v9 = vadd.f32 %v2579_v55, %v2397_v54  ;;  %v3875_v11 = vmul.f32 -1.442695, %v2582_v58  ;;  %v2669_v55 = vrot.slane %v2397_v54, 2 }
 0x742   : > { %v2628_v21 = vadd.f32 %v2624_v62, %v2599_v18  ;;  %v3877_v25 = vmul.f32 -1.442695, %v2627_v19 }
 0x743   : > { %4981 = vpow2.f32 %v3875_v11  ;;  %v3876_v20 = vmul.f32 -1.442695, %v2583_v9 }
 0x744   : > { %v3878_v28 = vmul.f32 -1.442695, %v2628_v21 }
 0x745   : > { %4983 = vpow2.f32 %v3876_v20 }
 0x746   : > { %4985 = vpow2.f32 %v3877_v25 }
 0x747   : > { %4987 = vpow2.f32 %v3878_v28 }
 0x74d   : > { %v4982_v12 = vpop.eup %4981 }
 0x74e   : > { %v2590_v56 = vadd.f32 1.0, %v4982_v12 }
 0x74f   : > { %v4984_v29 = vpop.eup %4983 }
 0x750   : > { %v2591_v31 = vadd.f32 1.0, %v4984_v29  ;;  %4989 = vrcp.f32 %v2590_v56  ;;  %v4986_v32 = vpop.eup %4985 }
 0x751   : > { %v4988_v34 = vpop.eup %4987  ;;  %v2635_v36 = vadd.f32 1.0, %v4986_v32 }
 0x752   : > { %4991 = vrcp.f32 %v2591_v31  ;;  %v2636_v41 = vadd.f32 1.0, %v4988_v34 }
 0x753   : > { %4993 = vrcp.f32 %v2635_v36 }
 0x754   : > { %4995 = vrcp.f32 %v2636_v41 }
 0x75a   : > { %v4990_v6 = vpop.eup %4989 }
 0x75b   : > { %v2666_v45 = vmul.f32 %v4990_v6, %v2656_v40 }
 0x75c   : > { %v4992_v50 = vpop.eup %4991 }
 0x75d   : > { %v2667_v53 = vmul.f32 %v4992_v50, %v2663_v14  ;;  %v2672_v58 = vadd.f32 %v2668_v15, %v2666_v45  ;;  %v4994_v10 = vpop.eup %4993 }
 0x75e   : > { %v4996_v62 = vpop.eup %4995  ;;  %v2676_v9 = vsub.f32 1.0, %v4994_v10  ;;  %v2680_v20 = vmul.f32 %v4994_v10, %v5625_v1 }
 0x75f   : > { %v2673_v24 = vadd.f32 %v2669_v55, %v2667_v53  ;;  %4997 = vtanh.f32 %v2672_v58  ;;  %v2677_v18 = vsub.f32 1.0, %v4996_v62  ;;  %v2681_v44 = vmul.f32 %v4996_v62, %v5627_v59 }
 0x761   : > { %4999 = vtanh.f32 %v2673_v24 }
 0x769   : > { %v4998_v11 = vpop.eup %4997 }
 0x76a   : > { %v2678_v19 = vmul.f32 %v4998_v11, %v2676_v9 }
 0x76b   : > { %v5000_v21 = vpop.eup %4999 }
 0x76c   : > { %v2679_v25 = vmul.f32 %v5000_v21, %v2677_v18  ;;  %v5681_v28 = vadd.f32 %v2680_v20, %v2678_v19 }
 0x76e   : > { %v5683_v54 = vadd.f32 %v2681_v44, %v2679_v25  ;;  %2684 = vst [vmem:[#allocation4 + $0x5] sm:$0x1] %v5681_v28 }
 0x770   : > { %2685 = vst [vmem:[#allocation4 + $0xd] sm:$0x1] %v5683_v54  ;;  %v2692_v12 = vcombine.low %v5681_v28, %v5683_v54 }
 0x772   : > { %v2699_v56 = vrot.slane %v2692_v12, %v5386_v5 }
 0x774   : > { %v2706_v29 = vrot.slane %v2699_v56, %v5386_v5 }
 0x776   : > { %2773 = vmatmul.mubr.f32.vlgmr.msra.gmra.mrb[18].mxu0 %v2706_v29  ;;  %4315 = vmatmul.mubr.f32.vlgmr.msra.gmra.mrb[16].mxu1 %v2706_v29 }
 0x777   : > { %4815 = vmatpush3.bf16.msra.mxu1 %v5225_v48  ;;  %4784 = vmatpush1.bf16.msra.mxu0 %v5215_v39 }
 0x778   : > { %4816 = vmatprep.subr.bf16.mxu1 %v5077_v0  ;;  %4786 = vmatprep.subr.bf16.mxu0 %v5218_v42 }
 0x779   : > { %3064 = vmatprep.mubr.f32.mxu0 %v5079_v2  ;;  %4349 = vmatprep.mubr.msk.f32.mxu1 %vm5078_vm1, %v5079_v2 }
 0x77b   : > { %4818 = vmatpush3.bf16.msra.mxu1 %v5244_v57  ;;  %4788 = vmatpush1.bf16.msra.mxu0 %v5233_v51 }
 0x77c   : > { %4819 = vmatprep.subr.bf16.mxu1 %v5077_v0  ;;  %4790 = vmatprep.subr.bf16.mxu0 %v5237_v52 }
 0x77f   : > { %4821 = vmatpush3.bf16.msra.mxu1 %v5264_v4  ;;  %4792 = vmatpush1.bf16.msra.mxu0 %v5253_v60  ;;  %v2687_v60 = vld [vmem:[#allocation3 + $0x6] ss:$8 sm:$0x7] }
 0x780   : > { %4822 = vmatprep.subr.bf16.mxu1 %v5077_v0  ;;  %4794 = vmatprep.subr.bf16.mxu0 %v5257_v61  ;;  %v2960_v53 = vrot.slane %v2687_v60, 2 }
 0x783   : > { %4824 = vmatpush3.bf16.msra.mxu1 %v5280_v13  ;;  %4796 = vmatpush1.bf16.msra.mxu0 %v5270_v7  ;;  %v2689_v13 = vld [vmem:[#allocation3 + $0x1e] ss:$8 sm:$0x7] }
 0x784   : > { %4825 = vmatprep.subr.bf16.mxu1 %v5077_v0  ;;  %4798 = vmatprep.subr.bf16.mxu0 %v5273_v8  ;;  %v2961_v24 = vrot.slane %v2689_v13, 2 }
 0x787   : > { %4827 = vmatpush3.bf16.msra.mxu1 %v5296_v22  ;;  %4800 = vmatpush1.bf16.msra.mxu0 %v5286_v16  ;;  %v2890_v22 = vrot.slane %v2687_v60, 1 }
 0x788   : > { %4828 = vmatprep.subr.bf16.mxu1 %v5077_v0  ;;  %4802 = vmatprep.subr.bf16.mxu0 %v5289_v17 }
 0x78b   : > { %4830 = vmatpush3.bf16.msra.mxu1 %v5312_v33  ;;  %4804 = vmatpush1.bf16.msra.mxu0 %v5302_v26 }
 0x78c   : > { %4831 = vmatprep.subr.bf16.mxu1 %v5077_v0  ;;  %4806 = vmatprep.subr.bf16.mxu0 %v5305_v27 }
 0x78f   : > { %4833 = vmatpush3.bf16.msra.mxu1 %v5326_v43  ;;  %4808 = vmatpush1.bf16.msra.mxu0 %v5318_v37  ;;  %v2891_v37 = vrot.slane %v2689_v13, 1 }
 0x790   : > { %4834 = vmatprep.subr.bf16.mxu1 %v5077_v0  ;;  %4810 = vmatprep.subr.bf16.mxu0 %v5321_v38 }
 0x793   : > { %4836 = vmatpush3.bf16.msra.mxu1 %v5336_v47  ;;  %4812 = vmatpush1.bf16.msra.mxu0 %v5332_v46 }
 0x794   : > { %4352 = vmatprep.subr.mxu1 %v5079_v2  ;;  %4837 = vmatprep.subr.bf16.mxu0 %v5077_v0 }
 0x849   : > { %v2774_v39 = vpop.f32.mrb[18].mxu0  ;;  %v2845_v42 = vpop.f32.mrb[16].mxu1 }
 0x84a   : > { %v2856_v48 = vrot.slane %v2774_v39, %v5386_v5  ;;  %v2776_v51 = vpop.f32.mrb[19].mxu0  ;;  %v4316_v52 = vpop.f32.mrb[17].mxu1  ;;  %v2940_v34 = vrot.slane %v2845_v42, %v5386_v5 }
 0x84b   : > { %v2901_v57 = vrot.slane %v2776_v51, %v5386_v5 }
 0x84c   : > { %v2857_v61 = vcombine.high %v2856_v48, %v2856_v48  ;;  %v2864_v4 = vrot.slane %v2856_v48, %v5386_v5  ;;  %v2941_v40 = vcombine.high %v2940_v34, %v2940_v34  ;;  %v2948_v6 = vrot.slane %v2940_v34, %v5386_v5 }
 0x84d   : > { %v2902_v7 = vcombine.high %v2901_v57, %v2901_v57  ;;  %v2909_v8 = vrot.slane %v2901_v57, %v5386_v5 }
 0x84e   : > { %v2871_v16 = vrot.slane %v2857_v61, %v5386_v5  ;;  %v2874_v17 = vadd.f32 %v2864_v4, %v2687_v60  ;;  %v2955_v15 = vrot.slane %v2941_v40, %v5386_v5 }
 0x84f   : > { %v2916_v26 = vrot.slane %v2902_v7, %v5386_v5  ;;  %v2919_v38 = vadd.f32 %v2909_v8, %v2890_v22  ;;  %v2979_v8 = vld [vmem:[#allocation3 + $0x7] ss:$8 sm:$0x7] }
 0x850   : > { %v2875_v27 = vadd.f32 %v2871_v16, %v2689_v13  ;;  %v3879_v33 = vmul.f32 -1.442695, %v2874_v17 }
 0x851   : > { %v2920_v46 = vadd.f32 %v2916_v26, %v2891_v37  ;;  %v3881_v47 = vmul.f32 -1.442695, %v2919_v38  ;;  %v2981_v26 = vld [vmem:[#allocation3 + $0x1f] ss:$8 sm:$0x7]  ;;  %v3182_v37 = vrot.slane %v2979_v8, 1 }
 0x852   : > { %5001 = vpow2.f32 %v3879_v33  ;;  %v3880_v43 = vmul.f32 -1.442695, %v2875_v27 }
 0x853   : > { %v3882_v1 = vmul.f32 -1.442695, %v2920_v46 }
 0x854   : > { %5003 = vpow2.f32 %v3880_v43 }
 0x855   : > { %5005 = vpow2.f32 %v3881_v47  ;;  %v3183_v47 = vrot.slane %v2981_v26, 1 }
 0x856   : > { %5007 = vpow2.f32 %v3882_v1 }
 0x85c   : > { %v5002_v59 = vpop.eup %5001 }
 0x85d   : > { %v2882_v31 = vadd.f32 1.0, %v5002_v59 }
 0x85e   : > { %v5004_v23 = vpop.eup %5003 }
 0x85f   : > { %v2883_v32 = vadd.f32 1.0, %v5004_v23  ;;  %5009 = vrcp.f32 %v2882_v31  ;;  %v5006_v49 = vpop.eup %5005 }
 0x860   : > { %v5008_v36 = vpop.eup %5007  ;;  %v2927_v41 = vadd.f32 1.0, %v5006_v49 }
 0x861   : > { %5011 = vrcp.f32 %v2883_v32  ;;  %v2928_v14 = vadd.f32 1.0, %v5008_v36 }
 0x862   : > { %5013 = vrcp.f32 %v2927_v41 }
 0x863   : > { %5015 = vrcp.f32 %v2928_v14 }
 0x869   : > { %v5010_v45 = vpop.eup %5009 }
 0x86a   : > { %v2958_v50 = vmul.f32 %v5010_v45, %v2948_v6 }
 0x86b   : > { %v5012_v55 = vpop.eup %5011 }
 0x86c   : > { %v2959_v58 = vmul.f32 %v5012_v55, %v2955_v15  ;;  %v2964_v10 = vadd.f32 %v2960_v53, %v2958_v50  ;;  %v5014_v9 = vpop.eup %5013 }
 0x86d   : > { %v5016_v11 = vpop.eup %5015  ;;  %v2968_v18 = vsub.f32 1.0, %v5014_v9  ;;  %v2972_v25 = vmul.f32 %v5014_v9, %v5681_v28  ;;  %v5051_v28 = vld [vmem:[%s5840_s0] sm:$0xff] }
 0x86e   : > { %v2965_v62 = vadd.f32 %v2961_v24, %v2959_v58  ;;  %5017 = vtanh.f32 %v2964_v10  ;;  %v2969_v20 = vsub.f32 1.0, %v5016_v11  ;;  %v2973_v56 = vmul.f32 %v5016_v11, %v5683_v54 }
 0x86f   : > { %v3380_v54 = vmul.f32 %v5051_v28, %v5205_v30  ;;  %v3252_v10 = vrot.slane %v2979_v8, 2  ;;  %v3253_v11 = vrot.slane %v2981_v26, 2 }
 0x870   : > { %5019 = vtanh.f32 %v2965_v62 }
 0x878   : > { %v5018_v19 = vpop.eup %5017 }
 0x879   : > { %v2970_v21 = vmul.f32 %v5018_v19, %v2968_v18 }
 0x87a   : > { %v5020_v44 = vpop.eup %5019 }
 0x87b   : > { %v2971_v12 = vmul.f32 %v5020_v44, %v2969_v20  ;;  %v5737_v29 = vadd.f32 %v2972_v25, %v2970_v21 }
 0x87d   : > { %v5739_v39 = vadd.f32 %v2973_v56, %v2971_v12  ;;  %2976 = vst [vmem:[#allocation4 + $0x6] sm:$0x1] %v5737_v29 }
 0x87f   : > { %2977 = vst [vmem:[#allocation4 + $0xe] sm:$0x1] %v5739_v39  ;;  %v2984_v42 = vcombine.low %v5737_v29, %v5739_v39 }
 0x881   : > { %v2991_v48 = vrot.slane %v2984_v42, %v5386_v5 }
 0x883   : > { %v2998_v51 = vrot.slane %v2991_v48, %v5386_v5 }
 0x885   : > { %3065 = vmatmul.mubr.f32.vlgmr.msra.gmra.mrb[20].mxu0 %v2998_v51  ;;  %4350 = vmatmul.mubr.f32.vlgmr.msra.gmra.mrb[18].mxu1 %v2998_v51 }
 0x886   : > { %4353 = vmatpush3.msra.mxu1 %v3380_v54  ;;  %4354 = vmatprep.mubr.msk.f32.mxu1 %vm5078_vm1, %v5079_v2 }
 0x887   : > { %4357 = vmatprep.subr.mxu1 %v5079_v2  ;;  %4370 = vmatprep.mubr.msk.f32.mxu0 %vm5078_vm1, %v5079_v2 }
 0x958   : > { %v3066_v52 = vpop.f32.mrb[20].mxu0  ;;  %v3137_v57 = vpop.f32.mrb[18].mxu1 }
 0x959   : > { %v3148_v60 = vrot.slane %v3066_v52, %v5386_v5  ;;  %v3068_v61 = vpop.f32.mrb[21].mxu0  ;;  %v4351_v4 = vpop.f32.mrb[19].mxu1  ;;  %v3232_v41 = vrot.slane %v3137_v57, %v5386_v5 }
 0x95a   : > { %v3193_v7 = vrot.slane %v3068_v61, %v5386_v5  ;;  %v3888_v61 = vld [vmem:[%s493_s28] ss:$0 sm:$0xff]  ;;  %s497_s28 = scalar_lea.vmem %s5847_s7, %s3840_s25 }
 0x95b   : > { %v3149_v13 = vcombine.high %v3148_v60, %v3148_v60  ;;  %v3156_v16 = vrot.slane %v3148_v60, %v5386_v5  ;;  %v3233_v45 = vcombine.high %v3232_v41, %v3232_v41  ;;  %v3240_v50 = vrot.slane %v3232_v41, %v5386_v5 }
 0x95c   : > { %v3194_v17 = vcombine.high %v3193_v7, %v3193_v7  ;;  %v3201_v22 = vrot.slane %v3193_v7, %v5386_v5 }
 0x95d   : > { %v3163_v27 = vrot.slane %v3149_v13, %v5386_v5  ;;  %v3166_v33 = vadd.f32 %v3156_v16, %v2979_v8  ;;  %v3247_v58 = vrot.slane %v3233_v45, %v5386_v5 }
 0x95e   : > { %v3208_v38 = vrot.slane %v3194_v17, %v5386_v5  ;;  %v3211_v1 = vadd.f32 %v3201_v22, %v3182_v37  ;;  %v5082_v17 = vmov -inf  }
 0x95f   : > { %v3167_v43 = vadd.f32 %v3163_v27, %v2981_v26  ;;  %v3883_v46 = vmul.f32 -1.442695, %v3166_v33  ;;  %523 = vst.msk [vmem:[#allocation5] sm:$0x3] %vm522_vm4, %v5082_v17 }
 0x960   : > { %v3212_v31 = vadd.f32 %v3208_v38, %v3183_v47  ;;  %v3885_v23 = vmul.f32 -1.442695, %v3211_v1 }
 0x961   : > { %5021 = vpow2.f32 %v3883_v46  ;;  %v3884_v59 = vmul.f32 -1.442695, %v3167_v43 }
 0x962   : > { %v3886_v32 = vmul.f32 -1.442695, %v3212_v31 }
 0x963   : > { %5023 = vpow2.f32 %v3884_v59 }
 0x964   : > { %5025 = vpow2.f32 %v3885_v23  ;;  %v3340_v23 = vsub.s32 0, %v5383_v3 }
 0x965   : > { %5027 = vpow2.f32 %v3886_v32  ;;  %v3344_v32 = vsub.s32 1, %v5383_v3 }
 0x966   : > { %v3329_v46 = vld [vmem:[#allocation5] sm:$0x3] }
 0x96b   : > { %v5022_v34 = vpop.eup %5021 }
 0x96c   : > { %v3174_v49 = vadd.f32 1.0, %v5022_v34 }
 0x96d   : > { %v5024_v36 = vpop.eup %5023 }
 0x96e   : > { %v3175_v40 = vadd.f32 1.0, %v5024_v36  ;;  %5029 = vrcp.f32 %v3174_v49  ;;  %v5026_v6 = vpop.eup %5025 }
 0x96f   : > { %v5028_v14 = vpop.eup %5027  ;;  %v3219_v15 = vadd.f32 1.0, %v5026_v6 }
 0x970   : > { %5031 = vrcp.f32 %v3175_v40  ;;  %v3220_v53 = vadd.f32 1.0, %v5028_v14 }
 0x971   : > { %5033 = vrcp.f32 %v3219_v15 }
 0x972   : > { %5035 = vrcp.f32 %v3220_v53  ;;  %v3558_v53 = vld [vmem:[%s5848_s8 + $0x10] sm:$0xff] }
 0x978   : > { %v5030_v55 = vpop.eup %5029 }
 0x979   : > { %v3250_v24 = vmul.f32 %v5030_v55, %v3240_v50  ;;  %v3556_v50 = vld [vmem:[%s5848_s8] sm:$0xff] }
 0x97a   : > { %v5032_v62 = vpop.eup %5031 }
 0x97b   : > { %v3251_v9 = vmul.f32 %v5032_v62, %v3247_v58  ;;  %v3256_v18 = vadd.f32 %v3252_v10, %v3250_v24  ;;  %v5034_v20 = vpop.eup %5033  ;;  %v3559_v58 = vld [vmem:[%s5848_s8 + $0x18] sm:$0xff]  ;;  %v3555_v10 = vld [vmem:[%s497_s28] sm:$0x3] }
 0x97c   : > { %v5036_v21 = vpop.eup %5035  ;;  %v3260_v25 = vsub.f32 1.0, %v5034_v20  ;;  %v3264_v42 = vmul.f32 %v5034_v20, %v5737_v29  ;;  %v4841_v24 = vpack.c.bf16 %v3559_v58, %v3558_v53 }
 0x97d   : > { %v3257_v19 = vadd.f32 %v3253_v11, %v3251_v9  ;;  %5037 = vtanh.f32 %v3256_v18  ;;  %v3261_v12 = vsub.f32 1.0, %v5036_v21  ;;  %v3265_v28 = vmul.f32 %v5036_v21, %v5739_v39  ;;  %v5052_v11 = vld [vmem:[%s5840_s0 + $0x8] sm:$0xff] }
 0x97e   : > { %v3381_v18 = vmul.f32 %v5052_v11, %v5211_v35 }
 0x97f   : > { %5039 = vtanh.f32 %v3257_v19 }
 0x987   : > { %v5038_v44 = vpop.eup %5037 }
 0x988   : > { %v3262_v56 = vmul.f32 %v5038_v44, %v3260_v25  ;;  %v3354_v25 = vld [vmem:[#allocation6] sm:$0x3] }
 0x989   : > { %v5040_v48 = vpop.eup %5039 }
 0x98a   : > { %v3263_v51 = vmul.f32 %v5040_v48, %v3261_v12  ;;  %v3266_v54 = vadd.f32 %v3264_v42, %v3262_v56 }
 0x98c   : > { %v3267_v52 = vadd.f32 %v3265_v28, %v3263_v51  ;;  %3268 = vst [vmem:[#allocation4 + $0x7] sm:$0x1] %v3266_v54 }
 0x98e   : > { %3269 = vst [vmem:[#allocation4 + $0xf] sm:$0x1] %v3267_v52  ;;  %v3272_v57 = vcombine.low %v3266_v54, %v3267_v52 }
 0x990   : > { %v3279_v60 = vrot.slane %v3272_v57, %v5386_v5 }
 0x992   : > { %3887 = vst.sshfl [vmem:[#allocation2] sm:$0x5 pattern:$0x73625140] %v3279_v60 }
 0x993   : > { %v3289_v29 = vld [vmem:[#allocation4] sm:$0xff] }
 0x994   : > { %v3291_v39 = vmul.f32 %v3289_v29, %v5205_v30  ;;  %v3313_v30 = vand.u32 127, %v1076_v63 }
 0x995   : > { %v3290_v4 = vld [vmem:[#allocation4 + $0x8] sm:$0xff] }
 0x996   : > { %v3302_v7 = vmul.f32 %v3888_v61, %v3291_v39  ;;  %3293 = vst.msk [vmem:[%s505_s12] sm:$0xff] %vm714_vm3, %v3291_v39  ;;  %v3292_v5 = vmul.f32 %v3290_v4, %v5211_v35  ;;  %v3316_v26 = vsub.s32 %v3313_v30, %v5383_v3  ;;  %v3557_v3 = vld [vmem:[%s5848_s8 + $0x8] sm:$0xff] }
 0x997   : > { %v4838_v55 = vpack.c.bf16 %v3557_v3, %v3556_v50 }
 0x998   : > { %v3304_v8 = vsel %vm714_vm3, %v3302_v7, 0.0  ;;  %v3303_v13 = vmul.f32 %v3888_v61, %v3292_v5  ;;  %3294 = vst.msk [vmem:[%s505_s12 + $0x8] sm:$0xff] %vm714_vm3, %v3292_v5 }
 0x999   : > { %3305 = vadd.xlane.f32.xlu1 %v3304_v8  ;;  %4839 = vmatpush3.bf16.msra.mxu0 %v4838_v55 }
 0x99a   : > { %v3307_v16 = vsel %vm714_vm3, %v3303_v13, 0.0  ;;  %4840 = vmatprep.subr.bf16.mxu0 %v5077_v0 }
 0x99d   : > { %3308 = vadd.xlane.f32.xlu1 %v3307_v16  ;;  %4842 = vmatpush3.bf16.msra.mxu0 %v4841_v24 }
 0x9a0   : > { %4371 = vmatmul.mubr.msk.f32.vlgmr.msra.gmra.mrb[22].mxu0 %vm535_vm0, %v3555_v10 }
 0xa26   : > { %v3306_v22 = vpop.xlane.xlu1 %3305 }
 0xa27   : > { %v3317_v33 = vrot.slane %v3306_v22, %v3316_v26 }
 0xa2a   : > { %v3309_v27 = vpop.xlane.xlu1 %3308 }
 0xa2b   : > { %v3321_v37 = vrot.slane %v3309_v27, %v3316_v26 }
 0xa2d   : > { %v3323_v38 = vsel %vm3322_vm5, %v3321_v37, %v3317_v33 }
 0xa2e   : > { %v3326_v43 = vsel %vm3325_vm6, %v3323_v38, -inf }
 0xa2f   : > { %3327 = vmax.xlane.f32.xlu0 %v3326_v43 }
 0xa73   : > { %v3629_v42 = vpop.f32.mrb[22].mxu0 }
 0xa74   : > { %v4372_v48 = vpop.f32.mrb[23].mxu0 }
 0xabc   : > { %v3328_v47 = vpop.xlane.xlu0 %3327 }
 0xabd   : > { %v3330_v1 = vmax.f32 %v3329_v46, %v3328_v47 }
 0xabf   : > { %v3331_v59 = vsub.f32 %v3329_v46, %v3330_v1  ;;  %3542 = vst.msk [vmem:[#allocation5] sm:$0x3] %vm522_vm4, %v3330_v1  ;;  %3336 = vperm.xlu1 %4876, %v3330_v1  }
 0xac1   : > { %v3332_v63 = vmul.f32 1.442695, %v3331_v59 }
 0xac3   : > { %5041 = vpow2.f32 %v3332_v63 }
 0xacd   : > { %v5042_v31 = vpop.eup %5041 }
 0xace   : > { %3530 = vperm.xlu0 %4875, %v5042_v31   ;;  %v3355_v44 = vmul.f32 %v5042_v31, %v3354_v25 }
 0xb3e   : > { %v3337_v34 = vpop.permute.xlu1 %3336 }
 0xb3f   : > { %v3341_v49 = vrot.slane %v3337_v34, %v3340_v23  ;;  %v3345_v36 = vrot.slane %v3337_v34, %v3344_v32 }
 0xb41   : > { %v3348_v40 = vsub.f32 %v3306_v22, %v3341_v49  ;;  %v3349_v41 = vsub.f32 %v3309_v27, %v3345_v36 }
 0xb43   : > { %v3350_v6 = vmul.f32 1.442695, %v3348_v40  ;;  %v3352_v14 = vmul.f32 1.442695, %v3349_v41 }
 0xb45   : > { %5043 = vpow2.f32 %v3350_v6 }
 0xb46   : > { %5045 = vpow2.f32 %v3352_v14 }
 0xb47   : > { %5047 = vtanh.f32 %v3629_v42 }
 0xb4d   : > { %v3531_v54 = vpop.permute.xlu0 %3530 }
 0xb4f   : > { %v5044_v45 = vpop.eup %5043 }
 0xb50   : > { %3359 = vperm.xlu1 %4876, %v5044_v45   ;;  %v5046_v15 = vpop.eup %5045 }
 0xb51   : > { %v5048_v7 = vpop.eup %5047 }
 0xb54   : > { %3362 = vperm.xlu1 %4876, %v5046_v15  }
 0xbcf   : > { %v3360_v62 = vpop.permute.xlu1 %3359 }
 0xbd0   : > { %v3367_v9 = vrot.slane %v3360_v62, %v3316_v26 }
 0xbd2   : > { %4355 = vmatmul.mubr.msk.f32.vlgmr.msra.gmra.mrb[20].mxu1 %vm3382_vm8, %v3367_v9 }
 0xbd3   : > { %4358 = vmatpush3.msra.mxu1 %v3381_v18  ;;  %v3363_v0 = vpop.permute.xlu1 %3362  ;;  %4359 = vmatprep.mubr.msk.f32.mxu1 %vm5078_vm1, %v5079_v2  ;;  %v3527_v2 = vld [vmem:[#allocation7] sm:$0x3] }
 0xbd4   : > { %v3371_v19 = vrot.slane %v3363_v0, %v3316_v26  ;;  %v3533_v29 = vmul.f32 %v3531_v54, %v3527_v2 }
 0xbd6   : > { %4360 = vmatmul.mubr.msk.f32.vlgmr.msra.gmra.mrb[22].mxu1 %vm3382_vm8, %v3371_v19  ;;  %v3372_v20 = vsel %vm3322_vm5, %v3371_v19, %v3367_v9 }
 0xbd7   : > { %v3374_v21 = vsel %vm3325_vm6, %v3372_v20, 0.0 }
 0xbd8   : > { %3375 = vadd.xlane.f32.xlu1 %v3374_v21 }
 0xc65   : > { %v3376_v12 = vpop.xlane.xlu1 %3375 }
 0xc66   : > { %v3377_v56 = vadd.f32 %v3376_v12, %v3355_v44 }
 0xc68   : > { %3379 = vst.msk [vmem:[#allocation6] sm:$0x3] %vm522_vm4, %v3377_v56 }
 0xc6f   : > { %v3547_v35 = vld [vmem:[#allocation6] sm:$0x3] }
 0xc70   : > { %3550 = vperm.xlu0 %4875, %v3547_v35  }
 0xca5   : > { %v3451_v51 = vpop.f32.mrb[20].mxu1 }
 0xca6   : > { %v4356_v28 = vpop.f32.mrb[21].mxu1 }
 0xca9   : > { %v3523_v52 = vpop.f32.mrb[22].mxu1 }
 0xcaa   : > { %v3536_v57 = vrot.slane %v3523_v52, 7  ;;  %v4361_v60 = vpop.f32.mrb[23].mxu1 }
 0xcac   : > { %v3537_v61 = vsel %vm3322_vm5, %v3536_v57, %v3451_v51 }
 0xcad   : > { %v3539_v39 = vadd.f32 %v3537_v61, %v3533_v29 }
 0xcaf   : > { %3541 = vst.msk [vmem:[#allocation7] sm:$0x3] %vm525_vm7, %v3539_v39 }
 0xcb6   : > { %v3546_v8 = vld [vmem:[#allocation7] sm:$0x3] }
 0xcef   : > { %v3551_v4 = vpop.permute.xlu0 %3550 }
 0xcf0   : > { %5049 = vrcp.f32 %v3551_v4 }
 0xcfa   : > { %v5050_v5 = vpop.eup %5049 }
 0xcfb   : > { %v3554_v13 = vmul.f32 %v5050_v5, %v3546_v8 }
 0xcfd   : > { %v3634_v16 = vadd.f32 %v5048_v7, %v3554_v13 }
 0xcff   : > { %3635 = vst.msk [vmem:[%s509_s17] sm:$0x3] %vm525_vm7, %v3634_v16 }
 0xd00 PF: > { %s21_s15 = sadd.s32 1, %s5075_s15   ;;  %s5851_s13 = smov %s5071_s14 }
 0xd01   : > { %p18_p5 = scmp.ge.s32.totalorder %s21_s15, 4   ;;  %s5852_s14 = smov %s5854_s16 }
 0xd03   :  { %20 = sbr.rel (!%p18_p5) target bundleno = 2 (0x2), region = 142 }

// kernel: _lambda_.6
= control target key start
LH: loop header
LB: loop body
LE: loop exit
PB: predicated region body
PF: predicated region fallthrough
CT: control target
= control target key end

     0   :  { %s6024_s0 = inlined_call_operand.vmem [shape: f32[2,8,32], index: 0, kind: input, shape index: {}]   ;;  %s6025_s1 = inlined_call_operand.vmem [shape: f32[2,8,1], index: 1, kind: input, shape index: {}]   ;;  %s6026_s2 = inlined_call_operand.vmem [shape: f32[2,2,16,32], index: 2, kind: input, shape index: {}]   ;;  %s6027_s3 = inlined_call_operand.vmem [shape: f32[2,16,384], index: 3, kind: input, shape index: {}]   ;;  %s6028_s4 = inlined_call_operand.vmem [shape: f32[2,128,384], index: 4, kind: input, shape index: {}]   ;;  %s6029_s5 = inlined_call_operand.vmem [shape: f32[2,1,128], index: 5, kind: input, shape index: {}]   ;;  %s6030_s6 = inlined_call_operand.vmem [shape: f32[2,1,16], index: 6, kind: input, shape index: {}]   ;;  %s6031_s7 = inlined_call_operand.vmem [shape: f32[2,2,32], index: 7, kind: input, shape index: {}]   ;;  %s6032_s8 = inlined_call_operand.vmem [shape: f32[32,32], index: 8, kind: input, shape index: {}]   ;;  %s6033_s9 = inlined_call_operand.vmem [shape: f32[2,2,8,16], index: 9, kind: output, shape index: {0}]   ;;  %s6034_s10 = inlined_call_operand.hbm [shape: f32[2,2,32], index: 10, kind: output, shape index: {1}]  }
   0x1   :  { %6035 = sst [smem:[#allocation11_spill]] %s6025_s1 }
   0x2   :  { %16 = vsyncpa [#allocation9], 0 }
   0x3   :  { %18 = vsyncpa [#allocation9 + $0x1], 0  ;;  %s5247_s13 = smov 0   ;;  %s5249_s14 = smov 0  }
   0x4   :  { %s5251_s15 = smov 0   ;;  %s5253_s16 = smov 0  }
   0x5   :  { %s5255_s17 = smov 0   ;;  %s5257_s18 = smov 0  }
   0x6 LB: > { %s3848_s19 = sadd.s32 4294967295, %s5183_s18   ;;  %s3849_s20 = sadd.s32 4294967294, %s5183_s18   ;;  %s5183_s18 = sphi %s5257_s18, %s24_s18   ;;  %s5179_s17 = sphi %s5255_s17, %s6043_s17   ;;  %s5175_s16 = sphi %s5253_s16, %s6042_s16   ;;  %s5171_s15 = sphi %s5251_s15, %s6041_s15   ;;  %s5167_s14 = sphi %s5249_s14, %s6040_s14   ;;  %s5163_s13 = sphi %s5247_s13, %s6039_s13  }
   0x7   : > { %s36_s21 = sadd.s32 1, %s5179_s17  ;;  %s300_s22 = sadd.s32 1, %s5171_s15 }
   0x8   : > { %p38_p0 = scmp.ge.s32.totalorder %s36_s21, 2  ;;  %p310_p1 = scmp.ne.s32.totalorder %s5171_s15, %s5167_s14 }
   0x9   : > { %p311_p2 = scmp.eq.s32.totalorder %s3848_s19, 1  ;;  %p316_p3 = scmp.ne.s32.totalorder %s5167_s14, %s5163_s13 }
   0xa   : > { %s6045_s21 = smov (%p38_p0, %s36_s21), 0  ;;  %p317_p5 = scmp.eq.s32.totalorder %s3849_s20, 1 }
   0xb   : > { %p5287_p4 = por %p311_p2, %p310_p1  ;;  %s297_s24 = ssub.s32 %s5179_s17, %s6045_s21 }
   0xc   : > { %p3854_p6 = scmp.ge.s32.totalorder %s5183_s18, 1  ;;  %p298_p7 = scmp.eq.s32.totalorder %s297_s24, 0 }
   0xd   : > { %p5294_p8 = por %p317_p5, %p316_p3  ;;  %p395_p9 = scmp.lt.s32.totalorder %s5183_s18, 3 }
   0xe   : > { %s5300_s26 = scalar_select %p298_p7, %s5171_s15, %s300_s22  }
   0xf   : > { %p396_p10 = pnand %p3854_p6, %p395_p9 }
  0x10   : > { %p477_p11 = scmp.lt.s32.totalorder (!%p396_p10), %s5175_s16, 1  ;;  %v5185_v0 = vmov (!%p396_p10), 0.0|0.0   ;;  %s6038_s1 = sld [smem:[#allocation11_spill]] (!%p396_p10)  ;;  %vm535_vm0 = vcmask (!%p396_p10), 261120   ;;  %vm5186_vm1 = vmmov (!%p396_p10), 0   ;;  %v5187_v2 = vmov (!%p396_p10), 0.0  }
  0x11   : > { %399 = sbr.rel (%p396_p10) target bundleno = 3352 (0xd18), region = 56  ;;  %4394 = vmatprep.subr.bf16.mxu0 (!%p396_p10), %v5185_v0  ;;  %4398 = vmatprep.subr.bf16.mxu1 (!%p396_p10), %v5185_v0  ;;  %v5188_v3 = vmov (!%p396_p10), 0   ;;  %vm4396_vm2 = vmpackc.low (!%p396_p10), %vm535_vm0, %vm535_vm0  ;;  %v527_v11 = vld [vmem:[%s6024_s0] sm:$0xff] (!%p396_p10)  ;;  %v528_v12 = vld [vmem:[%s6024_s0 + $0x8] sm:$0xff] (!%p396_p10)  ;;  %vm714_vm3 = vcmask (!%p396_p10), 130048   ;;  %vm522_vm4 = vcmask (!%p396_p10), 1024  }
  0x12   : > { %4076 = vmatprep.mubr.msk.f32.mxu0 (!%p396_p10), %vm5186_vm1, %v5187_v2  ;;  %4083 = vmatprep.mubr.msk.f32.mxu1 (!%p396_p10), %vm5186_vm1, %v5187_v2  ;;  %524 = vst.msk [vmem:[#allocation6] sm:$0x3] (!%p396_p10), %vm522_vm4, %v5187_v2  ;;  %vm3322_vm5 = vcmask (!%p396_p10), 1041409   ;;  %vm3325_vm6 = vcmask (!%p396_p10), 58368   ;;  %vm525_vm7 = vcmask (!%p396_p10), 254976   ;;  %vm3382_vm8 = vcmask (!%p396_p10), 64512  }
  0x13   : > { %4927 = vset.pattern.permute.xlu0 (!%p396_p10), %v5188_v3  ;;  %4928 = vset.pattern.permute.xlu1 (!%p396_p10), %v5188_v3  ;;  %526 = vst.msk [vmem:[#allocation7] sm:$0x3] (!%p396_p10), %vm525_vm7, %v5187_v2 }
  0x16   : > { %v529_v1 = vld [vmem:[%s6038_s1] sm:$0xff] (!%p396_p10)  ;;  %v530_v4 = vld [vmem:[%s6038_s1 + $0x8] sm:$0xff] (!%p396_p10) }
  0x17   : > { %698 = vperm.xlu0 (!%p396_p10), %4927, %v529_v1  }
  0x18   : > { %s5309_s29 = scalar_select %p477_p11, %s5175_s16, 1 }
  0x1a   : > { %s3915_s30 = sshll.u32 %s5309_s29, 5  ;;  %s4865_s11 = smul.u32 384, %s5309_s29 }
  0x1b   : > { %s481_s19 = scalar_lea.vmem %s6026_s2, %s3915_s30  ;;  %703 = vperm.xlu0 %4927, %v530_v4   ;;  %s4864_s12 = smul.u32 48, %s5309_s29 }
  0x1c   : > { %v531_v5 = vld [vmem:[%s481_s19] sm:$0xff]  ;;  %v532_v6 = vld [vmem:[%s481_s19 + $0x8] sm:$0xff]  ;;  %v533_v7 = vld [vmem:[%s481_s19 + $0x10] sm:$0xff]  ;;  %s5341_s1 = scalar_lea.vmem %s6028_s4, %s4865_s11  ;;  %s494_s11 = scalar_lea.vmem %s6029_s5, %s5309_s29 }
  0x1d   : > { %v4395_v8 = vpack.c.bf16 %v532_v6, %v531_v5  ;;  %v534_v9 = vld [vmem:[%s481_s19 + $0x18] sm:$0xff]  ;;  %s486_s22 = scalar_lea.vmem %s6027_s3, %s4864_s12  ;;  %v880_v22 = vld [vmem:[%s5341_s1 + $0x8] sm:$0xff]  ;;  %v883_v23 = vld [vmem:[%s5341_s1 + $0x20] sm:$0xff]  ;;  %s3916_s24 = sshll.u32 %s5309_s29, 4 }
  0x1e   : > { %v4399_v10 = vpack.c.bf16 %v534_v9, %v533_v7  ;;  %v709_v13 = vld [vmem:[%s486_s22 + $0x8] sm:$0xff]  ;;  %v712_v14 = vld [vmem:[%s486_s22 + $0x20] sm:$0xff]  ;;  %v711_v17 = vld [vmem:[%s486_s22 + $0x18] sm:$0xff]  ;;  %v5345_v24 = vpack.c.bf16 %v883_v23, %v880_v22  ;;  %s509_s30 = scalar_lea.vmem %s6033_s9, %s3916_s24  ;;  %s3860_s28 = sshll.u32 %s5309_s29, 1 }
  0x1f   : > { %4397 = vmatpush3.bf16.xpose.msk.msra.mxu0 %vm4396_vm2, %v4395_v8  ;;  %v4402_v15 = vpack.c.bf16 %v712_v14, %v709_v13  ;;  %v708_v16 = vld [vmem:[%s486_s22] sm:$0xff]  ;;  %v710_v19 = vld [vmem:[%s486_s22 + $0x10] sm:$0xff]  ;;  %v713_v20 = vld [vmem:[%s486_s22 + $0x28] sm:$0xff]  ;;  %s497_s22 = scalar_lea.vmem %s6030_s6, %s5309_s29  ;;  %s466_s29 = sand.u32 1, %s5167_s14  }
  0x20   : > { %4401 = vmatpush3.bf16.xpose.msk.msra.mxu1 %vm4396_vm2, %v4399_v10  ;;  %v4404_v18 = vpack.c.bf16 %v711_v17, %v708_v16  ;;  %v4406_v21 = vpack.c.bf16 %v713_v20, %v710_v19  ;;  %v3863_v25 = vld [vmem:[%s494_s11] ss:$0 sm:$0xff]  ;;  %v882_v32 = vld [vmem:[%s5341_s1 + $0x18] sm:$0xff]  ;;  %v889_v34 = vld [vmem:[%s5341_s1 + $0x50] sm:$0xff]  ;;  %s3855_s20 = sshll.u32 %s466_s29, 1 }
  0x21   : > { %4403 = vmatprep.subr.bf16.mxu0 %v4402_v15  ;;  %521 = vst [vmem:[#allocation2] sm:$0x3] %v3863_v25  ;;  %v879_v31 = vld [vmem:[%s5341_s1] sm:$0xff]  ;;  %v886_v33 = vld [vmem:[%s5341_s1 + $0x38] sm:$0xff]  ;;  %v881_v36 = vld [vmem:[%s5341_s1 + $0x10] sm:$0xff]  ;;  %s468_s24 = scalar_lea.vmem [#allocation8], %s3855_s20 }
  0x22   : > { %4407 = vmatprep.subr.bf16.mxu1 %v4406_v21  ;;  %v884_v37 = vld [vmem:[%s5341_s1 + $0x28] sm:$0xff]  ;;  %v5363_v39 = vpack.c.bf16 %v882_v32, %v879_v31  ;;  %v5366_v42 = vpack.c.bf16 %v889_v34, %v886_v33  ;;  %v885_v43 = vld [vmem:[%s5341_s1 + $0x30] sm:$0xff]  ;;  %v895_v47 = vld [vmem:[%s5341_s1 + $0x80] sm:$0xff]  ;;  %s3661_s27 = sshll.u32 %s468_s24, 4  ;;  %s5978_s27 = int_to_ptr.vmem [resolvable:$true] %s3661_s27 }
  0x23   : > { %v888_v44 = vld [vmem:[%s5341_s1 + $0x48] sm:$0xff]  ;;  %v5373_v48 = vpack.c.bf16 %v884_v37, %v881_v36  ;;  %v887_v49 = vld [vmem:[%s5341_s1 + $0x40] sm:$0xff]  ;;  %v890_v50 = vld [vmem:[%s5341_s1 + $0x58] sm:$0xff]  ;;  %s5105_s12 = scalar_lea.vmem %s5978_s27, 32 }
  0x24   : > { %v892_v46 = vld [vmem:[%s5341_s1 + $0x68] sm:$0xff]  ;;  %v5381_v51 = vpack.c.bf16 %v888_v44, %v885_v43  ;;  %v891_v53 = vld [vmem:[%s5341_s1 + $0x60] sm:$0xff]  ;;  %v894_v54 = vld [vmem:[%s5341_s1 + $0x78] sm:$0xff]  ;;  %v5392_v57 = vpack.c.bf16 %v890_v50, %v887_v49  ;;  %p5106_p12 = scmp.ne.s32.totalorder %s5978_s27, %s5105_s12 }
  0x25   : > { %v5385_v52 = vpack.c.bf16 %v895_v47, %v892_v46  ;;  %v898_v55 = vld [vmem:[%s5341_s1 + $0x98] sm:$0xff]  ;;  %v901_v56 = vld [vmem:[%s5341_s1 + $0xb0] sm:$0xff]  ;;  %v896_v59 = vld [vmem:[%s5341_s1 + $0x88] sm:$0xff]  ;;  %v5401_v60 = vpack.c.bf16 %v894_v54, %v891_v53 }
  0x26   : > { %4077 = vmatmul.mubr.msk.f32.vlgmr.msra.gmra.mrb[0].mxu0 %vm535_vm0, %v527_v11  ;;  %v893_v58 = vld [vmem:[%s5341_s1 + $0x70] sm:$0xff]  ;;  %v5405_v61 = vpack.c.bf16 %v901_v56, %v898_v55  ;;  %v900_v63 = vld [vmem:[%s5341_s1 + $0xa8] sm:$0xff]  ;;  %v907_v3 = vld [vmem:[%s5341_s1 + $0xe0] sm:$0xff]  ;;  %p5107_p13 = pnand %p5106_p12, %p5287_p4 }
  0x27   : > { %4084 = vmatmul.mubr.msk.f32.vlgmr.msra.gmra.mrb[0].mxu1 %vm535_vm0, %v528_v12  ;;  %785 = vmatprep.mubr.f32.mxu0 %v5187_v2  ;;  %v897_v62 = vld [vmem:[%s5341_s1 + $0x90] sm:$0xff]  ;;  %v904_v1 = vld [vmem:[%s5341_s1 + $0xc8] sm:$0xff]  ;;  %v5412_v4 = vpack.c.bf16 %v896_v59, %v893_v58  ;;  %v899_v5 = vld [vmem:[%s5341_s1 + $0xa0] sm:$0xff]  ;;  %v5189_v59 = vmov 1966171168  }
  0x28   : > { %4405 = vmatpush1.bf16.msra.mxu0 %v4404_v18  ;;  %4409 = vmatpush3.bf16.msra.mxu1 %v4406_v21  ;;  %v902_v6 = vld [vmem:[%s5341_s1 + $0xb8] sm:$0xff]  ;;  %v5418_v7 = vpack.c.bf16 %v900_v63, %v897_v62  ;;  %v5421_v8 = vpack.c.bf16 %v907_v3, %v904_v1  ;;  %v903_v9 = vld [vmem:[%s5341_s1 + $0xc0] sm:$0xff]  ;;  %v913_v12 = vld [vmem:[%s5341_s1 + $0x110] sm:$0xff]  ;;  %v1074_v62 = vunpack.c.l.s4 %v5189_v59  ;;  %v1076_v63 = vlaneseq  ;;  %p5108_p0 = pneg %p5107_p13 }
  0x29   : > { %4411 = vmatprep.subr.bf16.mxu0 %v5345_v24  ;;  %4442 = vmatprep.subr.bf16.mxu1 %v5185_v0  ;;  %v906_v10 = vld [vmem:[%s5341_s1 + $0xd8] sm:$0xff]  ;;  %v5428_v13 = vpack.c.bf16 %v902_v6, %v899_v5  ;;  %v905_v14 = vld [vmem:[%s5341_s1 + $0xd0] sm:$0xff]  ;;  %v908_v15 = vld [vmem:[%s5341_s1 + $0xe8] sm:$0xff] }
  0x2a   : > { %v910_v11 = vld [vmem:[%s5341_s1 + $0xf8] sm:$0xff]  ;;  %v5434_v16 = vpack.c.bf16 %v906_v10, %v903_v9  ;;  %v909_v18 = vld [vmem:[%s5341_s1 + $0xf0] sm:$0xff]  ;;  %v912_v19 = vld [vmem:[%s5341_s1 + $0x108] sm:$0xff]  ;;  %v5444_v22 = vpack.c.bf16 %v908_v15, %v905_v14  ;;  %v1075_v1 = vunpack.c.0.s8 %v1074_v62  ;;  %v5531_v3 = vshrl.u32 %v1076_v63, 7 }
  0x2b   : > { %v5437_v17 = vpack.c.bf16 %v913_v12, %v910_v11  ;;  %v916_v20 = vld [vmem:[%s5341_s1 + $0x128] sm:$0xff]  ;;  %v919_v21 = vld [vmem:[%s5341_s1 + $0x140] sm:$0xff]  ;;  %v914_v25 = vld [vmem:[%s5341_s1 + $0x118] sm:$0xff] }
  0x2c   : > { %v911_v23 = vld [vmem:[%s5341_s1 + $0x100] sm:$0xff]  ;;  %v922_v31 = vld [vmem:[%s5341_s1 + $0x158] sm:$0xff]  ;;  %v925_v32 = vld [vmem:[%s5341_s1 + $0x170] sm:$0xff]  ;;  %v5534_v5 = vsub.s32 %v1075_v1, %v5531_v3 }
  0x2d   : > { %v5460_v33 = vpack.c.bf16 %v914_v25, %v911_v23  ;;  %v917_v34 = vld [vmem:[%s5341_s1 + $0x130] sm:$0xff]  ;;  %v920_v36 = vld [vmem:[%s5341_s1 + $0x148] sm:$0xff]  ;;  %v923_v44 = vld [vmem:[%s5341_s1 + $0x160] sm:$0xff] }
  0x2e   : > { %v5474_v43 = vpack.c.bf16 %v920_v36, %v917_v34  ;;  %v5488_v49 = vld [vmem:[#allocation2] sm:$0x3] }
  0x96   : > { %v5353_v30 = vpop.permute.xlu0 %698 }
  0x9a   : > { %v5359_v35 = vpop.permute.xlu0 %703 }
  0xf9   : > { %v611_v26 = vpop.f32.mrb[0].mxu0 }
  0xfa   : > { %4929 = vtanh.f32 %v611_v26  ;;  %v690_v27 = vpop.f32.mrb[0].mxu1  ;;  %v4078_v28 = vpop.f32.mrb[1].mxu0  ;;  %v5450_v26 = vpack.c.bf16 %v912_v19, %v909_v18 }
  0xfb   : > { %4931 = vtanh.f32 %v690_v27  ;;  %v4085_v29 = vpop.f32.mrb[1].mxu1  ;;  %v5453_v27 = vpack.c.bf16 %v919_v21, %v916_v20  ;;  %v915_v28 = vld [vmem:[%s5341_s1 + $0x120] sm:$0xff] }
  0xfc   : > { %v918_v29 = vld [vmem:[%s5341_s1 + $0x138] sm:$0xff] }
  0xfd   : > { %v5466_v37 = vpack.c.bf16 %v918_v29, %v915_v28 }
 0x104   : > { %v4930_v38 = vpop.eup %4929 }
 0x105   : > { %v4932_v40 = vpop.eup %4931  ;;  %v706_v41 = vmul.f32 %v4930_v38, %v5353_v30  ;;  %v5469_v38 = vpack.c.bf16 %v925_v32, %v922_v31 }
 0x106   : > { %v707_v45 = vmul.f32 %v4932_v40, %v5359_v35  ;;  %v921_v40 = vld [vmem:[%s5341_s1 + $0x150] sm:$0xff] }
 0x107   : > { %3870 = vmatmul.mubr.msk.f32.vlgmr.msra.gmra.mrb[2].mxu0 %vm714_vm3, %v706_v41  ;;  %4090 = vmatprep.mubr.msk.f32.mxu1 %vm714_vm3, %v706_v41  ;;  %v924_v41 = vld [vmem:[%s5341_s1 + $0x168] sm:$0xff] }
 0x108   : > { %4413 = vmatpush1.bf16.msra.mxu0 %v5363_v39  ;;  %4091 = vmatmul.mubr.msk.f32.vlgmr.msra.gmra.mrb[2].mxu1 %vm714_vm3, %v707_v45  ;;  %v5480_v46 = vpack.c.bf16 %v924_v41, %v921_v40 }
 0x109   : > { %791 = vmatprep.mubr.f32.mxu0 %v5187_v2  ;;  %4415 = vmatprep.subr.bf16.mxu0 %v5366_v42 }
 0x10a   : > { %4444 = vmatpush3.bf16.msra.mxu1 %v5373_v48  ;;  %4125 = vmatprep.mubr.msk.f32.mxu1 %vm5186_vm1, %v5187_v2 }
 0x10b   : > { %3871 = vmatmul.mubr.msk.f32.gmra.mrb[4].mxu0 %vm714_vm3, %v707_v45  ;;  %4445 = vmatprep.subr.bf16.mxu1 %v5185_v0  ;;  %v926_v45 = vld [vmem:[%s5341_s1 + $0x178] sm:$0xff]  ;;  %s501_s1 = scalar_lea.vmem %s6031_s7, %s3860_s28 }
 0x10c   : > { %4417 = vmatpush1.bf16.msra.mxu0 %v5381_v51  ;;  %995 = vmatprep.mubr.f32.mxu0 %v5187_v2  ;;  %v5484_v47 = vpack.c.bf16 %v926_v45, %v923_v44 }
 0x10d   : > { %4419 = vmatprep.subr.bf16.mxu0 %v5385_v52 }
 0x10e   : > { %4447 = vmatpush3.bf16.msra.mxu1 %v5392_v57 }
 0x10f   : > { %4448 = vmatprep.subr.bf16.mxu1 %v5185_v0 }
 0x110   : > { %4421 = vmatpush1.bf16.msra.mxu0 %v5401_v60 }
 0x111   : > { %4423 = vmatprep.subr.bf16.mxu0 %v5405_v61 }
 0x112   : > { %4450 = vmatpush3.bf16.msra.mxu1 %v5412_v4 }
 0x113   : > { %4451 = vmatprep.subr.bf16.mxu1 %v5185_v0 }
 0x114   : > { %4425 = vmatpush1.bf16.msra.mxu0 %v5418_v7 }
 0x115   : > { %4427 = vmatprep.subr.bf16.mxu0 %v5421_v8 }
 0x116   : > { %4453 = vmatpush3.bf16.msra.mxu1 %v5428_v13 }
 0x117   : > { %4454 = vmatprep.subr.bf16.mxu1 %v5185_v0 }
 0x118   : > { %4429 = vmatpush1.bf16.msra.mxu0 %v5434_v16 }
 0x119   : > { %4431 = vmatprep.subr.bf16.mxu0 %v5437_v17 }
 0x11a   : > { %4456 = vmatpush3.bf16.msra.mxu1 %v5444_v22 }
 0x11b   : > { %4457 = vmatprep.subr.bf16.mxu1 %v5185_v0 }
 0x11c   : > { %4433 = vmatpush1.bf16.msra.mxu0 %v5450_v26 }
 0x11d   : > { %4435 = vmatprep.subr.bf16.mxu0 %v5453_v27 }
 0x11e   : > { %4459 = vmatpush3.bf16.msra.mxu1 %v5460_v33 }
 0x11f   : > { %4460 = vmatprep.subr.bf16.mxu1 %v5185_v0 }
 0x120   : > { %4437 = vmatpush1.bf16.msra.mxu0 %v5466_v37 }
 0x121   : > { %4439 = vmatprep.subr.bf16.mxu0 %v5469_v38 }
 0x122   : > { %4462 = vmatpush3.bf16.msra.mxu1 %v5474_v43 }
 0x123   : > { %4463 = vmatprep.subr.bf16.mxu1 %v5185_v0 }
 0x124   : > { %4441 = vmatpush1.bf16.msra.mxu0 %v5480_v46 }
 0x125   : > { %4467 = vmatprep.subr.bf16.mxu0 %v5345_v24 }
 0x126   : > { %4465 = vmatpush3.bf16.msra.mxu1 %v5484_v47 }
 0x127   : > { %996 = vmatmul.mubr.f32.vlgmr.msra.gmra.mrb[6].mxu0 %v5488_v49  ;;  %4498 = vmatprep.subr.bf16.mxu1 %v5185_v0 }
 0x128   : > { %4469 = vmatpush1.bf16.msra.mxu0 %v5363_v39  ;;  %1312 = vmatprep.mubr.f32.mxu0 %v5187_v2 }
 0x129   : > { %4126 = vmatmul.mubr.f32.vlgmr.msra.gmra.mrb[4].mxu1 %v5488_v49  ;;  %4471 = vmatprep.subr.bf16.mxu0 %v5366_v42 }
 0x12a   : > { %4500 = vmatpush3.bf16.msra.mxu1 %v5373_v48  ;;  %4160 = vmatprep.mubr.msk.f32.mxu1 %vm5186_vm1, %v5187_v2 }
 0x12b   : > { %4501 = vmatprep.subr.bf16.mxu1 %v5185_v0 }
 0x12c   : > { %4473 = vmatpush1.bf16.msra.mxu0 %v5381_v51 }
 0x12d   : > { %4475 = vmatprep.subr.bf16.mxu0 %v5385_v52 }
 0x12e   : > { %4503 = vmatpush3.bf16.msra.mxu1 %v5392_v57 }
 0x12f   : > { %4504 = vmatprep.subr.bf16.mxu1 %v5185_v0 }
 0x130   : > { %4477 = vmatpush1.bf16.msra.mxu0 %v5401_v60 }
 0x131   : > { %4479 = vmatprep.subr.bf16.mxu0 %v5405_v61 }
 0x132   : > { %4506 = vmatpush3.bf16.msra.mxu1 %v5412_v4 }
 0x133   : > { %4507 = vmatprep.subr.bf16.mxu1 %v5185_v0 }
 0x134   : > { %4481 = vmatpush1.bf16.msra.mxu0 %v5418_v7 }
 0x135   : > { %4483 = vmatprep.subr.bf16.mxu0 %v5421_v8 }
 0x136   : > { %4509 = vmatpush3.bf16.msra.mxu1 %v5428_v13 }
 0x137   : > { %4510 = vmatprep.subr.bf16.mxu1 %v5185_v0 }
 0x138   : > { %4485 = vmatpush1.bf16.msra.mxu0 %v5434_v16 }
 0x139   : > { %4487 = vmatprep.subr.bf16.mxu0 %v5437_v17 }
 0x13a   : > { %4512 = vmatpush3.bf16.msra.mxu1 %v5444_v22 }
 0x13b   : > { %4513 = vmatprep.subr.bf16.mxu1 %v5185_v0 }
 0x13c   : > { %4489 = vmatpush1.bf16.msra.mxu0 %v5450_v26 }
 0x13d   : > { %4491 = vmatprep.subr.bf16.mxu0 %v5453_v27 }
 0x13e   : > { %4515 = vmatpush3.bf16.msra.mxu1 %v5460_v33 }
 0x13f   : > { %4516 = vmatprep.subr.bf16.mxu1 %v5185_v0 }
 0x140   : > { %4493 = vmatpush1.bf16.msra.mxu0 %v5466_v37 }
 0x141   : > { %4495 = vmatprep.subr.bf16.mxu0 %v5469_v38 }
 0x142   : > { %4518 = vmatpush3.bf16.msra.mxu1 %v5474_v43 }
 0x143   : > { %4519 = vmatprep.subr.bf16.mxu1 %v5185_v0 }
 0x144   : > { %4497 = vmatpush1.bf16.msra.mxu0 %v5480_v46 }
 0x145   : > { %4523 = vmatprep.subr.bf16.mxu0 %v5345_v24 }
 0x146   : > { %4521 = vmatpush3.bf16.msra.mxu1 %v5484_v47 }
 0x147   : > { %4554 = vmatprep.subr.bf16.mxu1 %v5185_v0 }
 0x1da   : > { %v787_v50 = vpop.f32.mrb[2].mxu0 }
 0x1db   : > { %873 = vst [vmem:[#allocation3] sm:$0xff] %v787_v50  ;;  %v789_v53 = vpop.f32.mrb[3].mxu0  ;;  %v4092_v54 = vpop.f32.mrb[2].mxu1 }
 0x1dc   : > { %874 = vst [vmem:[#allocation3 + $0x8] sm:$0xff] %v789_v53  ;;  %878 = vst [vmem:[#allocation3 + $0x28] sm:$0xff] %v4092_v54  ;;  %v864_v55 = vpop.f32.mrb[3].mxu1 }
 0x1dd   : > { %875 = vst [vmem:[#allocation3 + $0x10] sm:$0xff] %v864_v55 }
 0x1de   : > { %v793_v56 = vpop.f32.mrb[4].mxu0 }
 0x1df   : > { %876 = vst [vmem:[#allocation3 + $0x18] sm:$0xff] %v793_v56  ;;  %v795_v58 = vpop.f32.mrb[5].mxu0 }
 0x1e0   : > { %877 = vst [vmem:[#allocation3 + $0x20] sm:$0xff] %v795_v58 }
 0x1e4   : > { %v928_v14 = vld [vmem:[#allocation3] ss:$8 sm:$0x7] }
 0x1e5   : > { %v1113_v29 = vrot.slane %v928_v14, 1 }
 0x1e7   : > { %v930_v23 = vld [vmem:[#allocation3 + $0x18] ss:$8 sm:$0x7] }
 0x1e8   : > { %v1114_v36 = vrot.slane %v930_v23, 1 }
 0x1fa   : > { %v997_v6 = vpop.f32.mrb[6].mxu0 }
 0x1fb   : > { %v1079_v9 = vrot.slane %v997_v6, %v5534_v5  ;;  %v999_v10 = vpop.f32.mrb[7].mxu0 }
 0x1fc   : > { %v1124_v11 = vrot.slane %v999_v10, %v5534_v5  ;;  %v1068_v12 = vpop.f32.mrb[4].mxu1 }
 0x1fd   : > { %v1080_v15 = vcombine.high %v1079_v9, %v1079_v9  ;;  %v1087_v18 = vrot.slane %v1079_v9, %v5534_v5  ;;  %v4127_v19 = vpop.f32.mrb[5].mxu1  ;;  %v1163_v58 = vrot.slane %v1068_v12, %v5534_v5 }
 0x1fe   : > { %v1125_v20 = vcombine.high %v1124_v11, %v1124_v11  ;;  %v1132_v21 = vrot.slane %v1124_v11, %v5534_v5  ;;  %v1183_v19 = vrot.slane %v928_v14, 2 }
 0x1ff   : > { %v1094_v25 = vrot.slane %v1080_v15, %v5534_v5  ;;  %v1097_v28 = vadd.f32 %v1087_v18, %v928_v14  ;;  %v1164_v62 = vcombine.high %v1163_v58, %v1163_v58  ;;  %v1171_v9 = vrot.slane %v1163_v58, %v5534_v5 }
 0x200   : > { %v1139_v31 = vrot.slane %v1125_v20, %v5534_v5  ;;  %v1142_v40 = vadd.f32 %v1132_v21, %v1113_v29  ;;  %v1202_v29 = vrot.slane %v5488_v49, %v5534_v5 }
 0x201   : > { %v1098_v32 = vadd.f32 %v1094_v25, %v930_v23  ;;  %v3874_v34 = vmul.f32 -1.442695, %v1097_v28  ;;  %v1178_v11 = vrot.slane %v1164_v62, %v5534_v5  ;;  %v1184_v25 = vrot.slane %v930_v23, 2 }
 0x202   : > { %v1143_v44 = vadd.f32 %v1139_v31, %v1114_v36  ;;  %v3876_v45 = vmul.f32 -1.442695, %v1142_v40  ;;  %v1203_v31 = vcombine.high %v1202_v29, %v1202_v29 }
 0x203   : > { %4933 = vpow2.f32 %v3874_v34  ;;  %v3875_v41 = vmul.f32 -1.442695, %v1098_v32  ;;  %v1210_v34 = vrot.slane %v1202_v29, %v5534_v5 }
 0x204   : > { %v3877_v50 = vmul.f32 -1.442695, %v1143_v44  ;;  %v1217_v40 = vrot.slane %v1203_v31, %v5534_v5 }
 0x205   : > { %4935 = vpow2.f32 %v3875_v41 }
 0x206   : > { %4937 = vpow2.f32 %v3876_v45 }
 0x207   : > { %4939 = vpow2.f32 %v3877_v50 }
 0x20d   : > { %v4934_v53 = vpop.eup %4933 }
 0x20e   : > { %v1105_v54 = vadd.f32 1.0, %v4934_v53 }
 0x20f   : > { %v4936_v55 = vpop.eup %4935 }
 0x210   : > { %v1106_v56 = vadd.f32 1.0, %v4936_v55  ;;  %4941 = vrcp.f32 %v1105_v54  ;;  %v4938_v59 = vpop.eup %4937 }
 0x211   : > { %v4940_v1 = vpop.eup %4939  ;;  %v1150_v6 = vadd.f32 1.0, %v4938_v59 }
 0x212   : > { %4943 = vrcp.f32 %v1106_v56  ;;  %v1151_v10 = vadd.f32 1.0, %v4940_v1 }
 0x213   : > { %4945 = vrcp.f32 %v1150_v6 }
 0x214   : > { %4947 = vrcp.f32 %v1151_v10 }
 0x21a   : > { %v4942_v15 = vpop.eup %4941 }
 0x21b   : > { %v1181_v18 = vmul.f32 %v4942_v15, %v1171_v9  ;;  %v1227_v15 = vld [vmem:[#allocation3 + $0x1] ss:$8 sm:$0x7] }
 0x21c   : > { %v4944_v20 = vpop.eup %4943  ;;  %v1430_v29 = vrot.slane %v1227_v15, 1 }
 0x21d   : > { %v1182_v21 = vmul.f32 %v4944_v20, %v1178_v11  ;;  %v1187_v28 = vadd.f32 %v1183_v19, %v1181_v18  ;;  %v4946_v32 = vpop.eup %4945 }
 0x21e   : > { %v4948_v36 = vpop.eup %4947  ;;  %v1191_v41 = vsub.f32 1.0, %v4946_v32  ;;  %v1220_v50 = vmul.f32 %v4946_v32, %v1210_v34 }
 0x21f   : > { %v1188_v12 = vadd.f32 %v1184_v25, %v1182_v21  ;;  %4949 = vtanh.f32 %v1187_v28  ;;  %v1192_v44 = vsub.f32 1.0, %v4948_v36  ;;  %v1221_v54 = vmul.f32 %v4948_v36, %v1217_v40  ;;  %v1229_v25 = vld [vmem:[#allocation3 + $0x19] ss:$8 sm:$0x7] }
 0x220   : > { %v1431_v36 = vrot.slane %v1229_v25, 1 }
 0x221   : > { %4951 = vtanh.f32 %v1188_v12 }
 0x229   : > { %v4950_v14 = vpop.eup %4949 }
 0x22a   : > { %v1193_v45 = vmul.f32 %v4950_v14, %v1191_v41 }
 0x22b   : > { %v4952_v23 = vpop.eup %4951 }
 0x22c   : > { %v1194_v53 = vmul.f32 %v4952_v23, %v1192_v44  ;;  %v5549_v55 = vadd.f32 %v1220_v50, %v1193_v45 }
 0x22e   : > { %v5551_v56 = vadd.f32 %v1221_v54, %v1194_v53  ;;  %1224 = vst [vmem:[#allocation4] sm:$0x1] %v5549_v55 }
 0x230   : > { %1225 = vst [vmem:[#allocation4 + $0x8] sm:$0x1] %v5551_v56  ;;  %v1232_v49 = vcombine.low %v5549_v55, %v5551_v56 }
 0x232   : > { %v1239_v58 = vrot.slane %v1232_v49, %v5534_v5 }
 0x234   : > { %v1246_v59 = vrot.slane %v1239_v58, %v5534_v5 }
 0x236   : > { %1313 = vmatmul.mubr.f32.vlgmr.msra.gmra.mrb[8].mxu0 %v1246_v59  ;;  %4161 = vmatmul.mubr.f32.vlgmr.msra.gmra.mrb[6].mxu1 %v1246_v59 }
 0x237   : > { %4525 = vmatpush1.bf16.msra.mxu0 %v5363_v39  ;;  %4556 = vmatpush3.bf16.msra.mxu1 %v5373_v48 }
 0x238   : > { %4527 = vmatprep.subr.bf16.mxu0 %v5366_v42  ;;  %4557 = vmatprep.subr.bf16.mxu1 %v5185_v0 }
 0x239   : > { %1604 = vmatprep.mubr.f32.mxu0 %v5187_v2  ;;  %4195 = vmatprep.mubr.msk.f32.mxu1 %vm5186_vm1, %v5187_v2 }
 0x23b   : > { %4529 = vmatpush1.bf16.msra.mxu0 %v5381_v51  ;;  %4559 = vmatpush3.bf16.msra.mxu1 %v5392_v57 }
 0x23c   : > { %4531 = vmatprep.subr.bf16.mxu0 %v5385_v52  ;;  %4560 = vmatprep.subr.bf16.mxu1 %v5185_v0 }
 0x23f   : > { %4533 = vmatpush1.bf16.msra.mxu0 %v5401_v60  ;;  %4562 = vmatpush3.bf16.msra.mxu1 %v5412_v4 }
 0x240   : > { %4535 = vmatprep.subr.bf16.mxu0 %v5405_v61  ;;  %4563 = vmatprep.subr.bf16.mxu1 %v5185_v0 }
 0x243   : > { %4537 = vmatpush1.bf16.msra.mxu0 %v5418_v7  ;;  %4565 = vmatpush3.bf16.msra.mxu1 %v5428_v13 }
 0x244   : > { %4539 = vmatprep.subr.bf16.mxu0 %v5421_v8  ;;  %4566 = vmatprep.subr.bf16.mxu1 %v5185_v0 }
 0x247   : > { %4541 = vmatpush1.bf16.msra.mxu0 %v5434_v16  ;;  %4568 = vmatpush3.bf16.msra.mxu1 %v5444_v22 }
 0x248   : > { %4543 = vmatprep.subr.bf16.mxu0 %v5437_v17  ;;  %4569 = vmatprep.subr.bf16.mxu1 %v5185_v0 }
 0x24b   : > { %4545 = vmatpush1.bf16.msra.mxu0 %v5450_v26  ;;  %4571 = vmatpush3.bf16.msra.mxu1 %v5460_v33 }
 0x24c   : > { %4547 = vmatprep.subr.bf16.mxu0 %v5453_v27  ;;  %4572 = vmatprep.subr.bf16.mxu1 %v5185_v0 }
 0x24f   : > { %4549 = vmatpush1.bf16.msra.mxu0 %v5466_v37  ;;  %4574 = vmatpush3.bf16.msra.mxu1 %v5474_v43 }
 0x250   : > { %4551 = vmatprep.subr.bf16.mxu0 %v5469_v38  ;;  %4575 = vmatprep.subr.bf16.mxu1 %v5185_v0 }
 0x253   : > { %4553 = vmatpush1.bf16.msra.mxu0 %v5480_v46  ;;  %4577 = vmatpush3.bf16.msra.mxu1 %v5484_v47 }
 0x254   : > { %4579 = vmatprep.subr.bf16.mxu0 %v5345_v24  ;;  %4610 = vmatprep.subr.bf16.mxu1 %v5185_v0 }
 0x309   : > { %v1314_v62 = vpop.f32.mrb[8].mxu0  ;;  %v1385_v1 = vpop.f32.mrb[6].mxu1 }
 0x30a   : > { %v1396_v6 = vrot.slane %v1314_v62, %v5534_v5  ;;  %v1316_v9 = vpop.f32.mrb[9].mxu0  ;;  %v4162_v10 = vpop.f32.mrb[7].mxu1  ;;  %v1480_v49 = vrot.slane %v1385_v1, %v5534_v5 }
 0x30b   : > { %v1441_v11 = vrot.slane %v1316_v9, %v5534_v5 }
 0x30c   : > { %v1397_v18 = vcombine.high %v1396_v6, %v1396_v6  ;;  %v1404_v19 = vrot.slane %v1396_v6, %v5534_v5  ;;  %v1481_v62 = vcombine.high %v1480_v49, %v1480_v49  ;;  %v1488_v9 = vrot.slane %v1480_v49, %v5534_v5 }
 0x30d   : > { %v1442_v20 = vcombine.high %v1441_v11, %v1441_v11  ;;  %v1449_v21 = vrot.slane %v1441_v11, %v5534_v5 }
 0x30e   : > { %v1411_v28 = vrot.slane %v1397_v18, %v5534_v5  ;;  %v1414_v12 = vadd.f32 %v1404_v19, %v1227_v15  ;;  %v1495_v18 = vrot.slane %v1481_v62, %v5534_v5 }
 0x30f   : > { %v1456_v31 = vrot.slane %v1442_v20, %v5534_v5  ;;  %v1459_v40 = vadd.f32 %v1449_v21, %v1430_v29  ;;  %v1500_v20 = vrot.slane %v1227_v15, 2 }
 0x310   : > { %v1415_v32 = vadd.f32 %v1411_v28, %v1229_v25  ;;  %v3878_v34 = vmul.f32 -1.442695, %v1414_v12  ;;  %v1501_v12 = vrot.slane %v1229_v25, 2 }
 0x311   : > { %v1460_v14 = vadd.f32 %v1456_v31, %v1431_v36  ;;  %v3880_v44 = vmul.f32 -1.442695, %v1459_v40 }
 0x312   : > { %4953 = vpow2.f32 %v3878_v34  ;;  %v3879_v41 = vmul.f32 -1.442695, %v1415_v32 }
 0x313   : > { %v3881_v45 = vmul.f32 -1.442695, %v1460_v14 }
 0x314   : > { %4955 = vpow2.f32 %v3879_v41 }
 0x315   : > { %4957 = vpow2.f32 %v3880_v44 }
 0x316   : > { %4959 = vpow2.f32 %v3881_v45 }
 0x31c   : > { %v4954_v50 = vpop.eup %4953 }
 0x31d   : > { %v1422_v23 = vadd.f32 1.0, %v4954_v50 }
 0x31e   : > { %v4956_v53 = vpop.eup %4955 }
 0x31f   : > { %v1423_v54 = vadd.f32 1.0, %v4956_v53  ;;  %4961 = vrcp.f32 %v1422_v23  ;;  %v4958_v58 = vpop.eup %4957 }
 0x320   : > { %v4960_v59 = vpop.eup %4959  ;;  %v1467_v6 = vadd.f32 1.0, %v4958_v58 }
 0x321   : > { %4963 = vrcp.f32 %v1423_v54  ;;  %v1468_v10 = vadd.f32 1.0, %v4960_v59 }
 0x322   : > { %4965 = vrcp.f32 %v1467_v6  ;;  %v1519_v6 = vld [vmem:[#allocation3 + $0x2] ss:$8 sm:$0x7] }
 0x323   : > { %4967 = vrcp.f32 %v1468_v10 }
 0x329   : > { %v4962_v11 = vpop.eup %4961 }
 0x32a   : > { %v1498_v19 = vmul.f32 %v4962_v11, %v1488_v9 }
 0x32b   : > { %v4964_v21 = vpop.eup %4963 }
 0x32c   : > { %v1499_v28 = vmul.f32 %v4964_v21, %v1495_v18  ;;  %v1504_v29 = vadd.f32 %v1500_v20, %v1498_v19  ;;  %v4966_v1 = vpop.eup %4965  ;;  %v1521_v19 = vld [vmem:[#allocation3 + $0x1a] ss:$8 sm:$0x7] }
 0x32d   : > { %v4968_v32 = vpop.eup %4967  ;;  %v1508_v34 = vsub.f32 1.0, %v4966_v1  ;;  %v1512_v14 = vmul.f32 %v4966_v1, %v5549_v55  ;;  %v1723_v1 = vrot.slane %v1521_v19, 1 }
 0x32e   : > { %v1505_v31 = vadd.f32 %v1501_v12, %v1499_v28  ;;  %4969 = vtanh.f32 %v1504_v29  ;;  %v1509_v40 = vsub.f32 1.0, %v4968_v32  ;;  %v1513_v15 = vmul.f32 %v4968_v32, %v5551_v56 }
 0x32f   : > { %v1722_v28 = vrot.slane %v1519_v6, 1 }
 0x330   : > { %4971 = vtanh.f32 %v1505_v31 }
 0x338   : > { %v4970_v36 = vpop.eup %4969 }
 0x339   : > { %v1510_v41 = vmul.f32 %v4970_v36, %v1508_v34 }
 0x33a   : > { %v4972_v44 = vpop.eup %4971 }
 0x33b   : > { %v1511_v45 = vmul.f32 %v4972_v44, %v1509_v40  ;;  %v5605_v50 = vadd.f32 %v1512_v14, %v1510_v41 }
 0x33d   : > { %v5607_v25 = vadd.f32 %v1513_v15, %v1511_v45  ;;  %1516 = vst [vmem:[#allocation4 + $0x1] sm:$0x1] %v5605_v50 }
 0x33f   : > { %1517 = vst [vmem:[#allocation4 + $0x9] sm:$0x1] %v5607_v25  ;;  %v1524_v23 = vcombine.low %v5605_v50, %v5607_v25 }
 0x341   : > { %v1531_v53 = vrot.slane %v1524_v23, %v5534_v5 }
 0x343   : > { %v1538_v54 = vrot.slane %v1531_v53, %v5534_v5 }
 0x345   : > { %1605 = vmatmul.mubr.f32.vlgmr.msra.gmra.mrb[10].mxu0 %v1538_v54  ;;  %4196 = vmatmul.mubr.f32.vlgmr.msra.gmra.mrb[8].mxu1 %v1538_v54 }
 0x346   : > { %4581 = vmatpush1.bf16.msra.mxu0 %v5363_v39  ;;  %4612 = vmatpush3.bf16.msra.mxu1 %v5373_v48 }
 0x347   : > { %4583 = vmatprep.subr.bf16.mxu0 %v5366_v42  ;;  %4613 = vmatprep.subr.bf16.mxu1 %v5185_v0 }
 0x348   : > { %1896 = vmatprep.mubr.f32.mxu0 %v5187_v2  ;;  %4230 = vmatprep.mubr.msk.f32.mxu1 %vm5186_vm1, %v5187_v2 }
 0x34a   : > { %4585 = vmatpush1.bf16.msra.mxu0 %v5381_v51  ;;  %4615 = vmatpush3.bf16.msra.mxu1 %v5392_v57 }
 0x34b   : > { %4587 = vmatprep.subr.bf16.mxu0 %v5385_v52  ;;  %4616 = vmatprep.subr.bf16.mxu1 %v5185_v0 }
 0x34e   : > { %4589 = vmatpush1.bf16.msra.mxu0 %v5401_v60  ;;  %4618 = vmatpush3.bf16.msra.mxu1 %v5412_v4 }
 0x34f   : > { %4591 = vmatprep.subr.bf16.mxu0 %v5405_v61  ;;  %4619 = vmatprep.subr.bf16.mxu1 %v5185_v0 }
 0x352   : > { %4593 = vmatpush1.bf16.msra.mxu0 %v5418_v7  ;;  %4621 = vmatpush3.bf16.msra.mxu1 %v5428_v13 }
 0x353   : > { %4595 = vmatprep.subr.bf16.mxu0 %v5421_v8  ;;  %4622 = vmatprep.subr.bf16.mxu1 %v5185_v0 }
 0x356   : > { %4597 = vmatpush1.bf16.msra.mxu0 %v5434_v16  ;;  %4624 = vmatpush3.bf16.msra.mxu1 %v5444_v22 }
 0x357   : > { %4599 = vmatprep.subr.bf16.mxu0 %v5437_v17  ;;  %4625 = vmatprep.subr.bf16.mxu1 %v5185_v0 }
 0x35a   : > { %4601 = vmatpush1.bf16.msra.mxu0 %v5450_v26  ;;  %4627 = vmatpush3.bf16.msra.mxu1 %v5460_v33 }
 0x35b   : > { %4603 = vmatprep.subr.bf16.mxu0 %v5453_v27  ;;  %4628 = vmatprep.subr.bf16.mxu1 %v5185_v0 }
 0x35e   : > { %4605 = vmatpush1.bf16.msra.mxu0 %v5466_v37  ;;  %4630 = vmatpush3.bf16.msra.mxu1 %v5474_v43 }
 0x35f   : > { %4607 = vmatprep.subr.bf16.mxu0 %v5469_v38  ;;  %4631 = vmatprep.subr.bf16.mxu1 %v5185_v0 }
 0x362   : > { %4609 = vmatpush1.bf16.msra.mxu0 %v5480_v46  ;;  %4633 = vmatpush3.bf16.msra.mxu1 %v5484_v47 }
 0x363   : > { %4635 = vmatprep.subr.bf16.mxu0 %v5345_v24  ;;  %4666 = vmatprep.subr.bf16.mxu1 %v5185_v0 }
 0x418   : > { %v1606_v55 = vpop.f32.mrb[10].mxu0  ;;  %v1677_v56 = vpop.f32.mrb[8].mxu1 }
 0x419   : > { %v1688_v49 = vrot.slane %v1606_v55, %v5534_v5  ;;  %v1608_v58 = vpop.f32.mrb[11].mxu0  ;;  %v4197_v59 = vpop.f32.mrb[9].mxu1  ;;  %v1772_v23 = vrot.slane %v1677_v56, %v5534_v5 }
 0x41a   : > { %v1733_v62 = vrot.slane %v1608_v58, %v5534_v5 }
 0x41b   : > { %v1689_v9 = vcombine.high %v1688_v49, %v1688_v49  ;;  %v1696_v10 = vrot.slane %v1688_v49, %v5534_v5  ;;  %v1773_v55 = vcombine.high %v1772_v23, %v1772_v23  ;;  %v1780_v58 = vrot.slane %v1772_v23, %v5534_v5 }
 0x41c   : > { %v1734_v11 = vcombine.high %v1733_v62, %v1733_v62  ;;  %v1741_v18 = vrot.slane %v1733_v62, %v5534_v5 }
 0x41d   : > { %v1703_v20 = vrot.slane %v1689_v9, %v5534_v5  ;;  %v1706_v21 = vadd.f32 %v1696_v10, %v1519_v6  ;;  %v1787_v9 = vrot.slane %v1773_v55, %v5534_v5 }
 0x41e   : > { %v1748_v12 = vrot.slane %v1734_v11, %v5534_v5  ;;  %v1751_v32 = vadd.f32 %v1741_v18, %v1722_v28  ;;  %v1792_v11 = vrot.slane %v1519_v6, 2 }
 0x41f   : > { %v1707_v29 = vadd.f32 %v1703_v20, %v1521_v19  ;;  %v3882_v31 = vmul.f32 -1.442695, %v1706_v21  ;;  %v1793_v21 = vrot.slane %v1521_v19, 2 }
 0x420   : > { %v1752_v36 = vadd.f32 %v1748_v12, %v1723_v1  ;;  %v3884_v40 = vmul.f32 -1.442695, %v1751_v32 }
 0x421   : > { %4973 = vpow2.f32 %v3882_v31  ;;  %v3883_v34 = vmul.f32 -1.442695, %v1707_v29 }
 0x422   : > { %v3885_v41 = vmul.f32 -1.442695, %v1752_v36 }
 0x423   : > { %4975 = vpow2.f32 %v3883_v34 }
 0x424   : > { %4977 = vpow2.f32 %v3884_v40 }
 0x425   : > { %4979 = vpow2.f32 %v3885_v41 }
 0x42b   : > { %v4974_v14 = vpop.eup %4973 }
 0x42c   : > { %v1714_v44 = vadd.f32 1.0, %v4974_v14 }
 0x42d   : > { %v4976_v45 = vpop.eup %4975 }
 0x42e   : > { %v1715_v15 = vadd.f32 1.0, %v4976_v45  ;;  %4981 = vrcp.f32 %v1714_v44  ;;  %v4978_v53 = vpop.eup %4977 }
 0x42f   : > { %v4980_v54 = vpop.eup %4979  ;;  %v1759_v49 = vadd.f32 1.0, %v4978_v53 }
 0x430   : > { %4983 = vrcp.f32 %v1715_v15  ;;  %v1760_v59 = vadd.f32 1.0, %v4980_v54 }
 0x431   : > { %4985 = vrcp.f32 %v1759_v49  ;;  %v1811_v49 = vld [vmem:[#allocation3 + $0x3] ss:$8 sm:$0x7] }
 0x432   : > { %4987 = vrcp.f32 %v1760_v59 }
 0x438   : > { %v4982_v62 = vpop.eup %4981 }
 0x439   : > { %v1790_v10 = vmul.f32 %v4982_v62, %v1780_v58 }
 0x43a   : > { %v4984_v18 = vpop.eup %4983 }
 0x43b   : > { %v1791_v20 = vmul.f32 %v4984_v18, %v1787_v9  ;;  %v1796_v28 = vadd.f32 %v1792_v11, %v1790_v10  ;;  %v4986_v56 = vpop.eup %4985  ;;  %v1813_v10 = vld [vmem:[#allocation3 + $0x1b] ss:$8 sm:$0x7] }
 0x43c   : > { %v4988_v29 = vpop.eup %4987  ;;  %v1800_v31 = vsub.f32 1.0, %v4986_v56  ;;  %v1804_v36 = vmul.f32 %v4986_v56, %v5605_v50  ;;  %v2015_v56 = vrot.slane %v1813_v10, 1 }
 0x43d   : > { %v1797_v12 = vadd.f32 %v1793_v21, %v1791_v20  ;;  %4989 = vtanh.f32 %v1796_v28  ;;  %v1801_v32 = vsub.f32 1.0, %v4988_v29  ;;  %v1805_v6 = vmul.f32 %v4988_v29, %v5607_v25 }
 0x43e   : > { %v2014_v20 = vrot.slane %v1811_v49, 1 }
 0x43f   : > { %4991 = vtanh.f32 %v1797_v12 }
 0x447   : > { %v4990_v1 = vpop.eup %4989 }
 0x448   : > { %v1802_v34 = vmul.f32 %v4990_v1, %v1800_v31 }
 0x449   : > { %v4992_v40 = vpop.eup %4991 }
 0x44a   : > { %v1803_v41 = vmul.f32 %v4992_v40, %v1801_v32  ;;  %v5661_v14 = vadd.f32 %v1804_v36, %v1802_v34 }
 0x44c   : > { %v5663_v19 = vadd.f32 %v1805_v6, %v1803_v41  ;;  %1808 = vst [vmem:[#allocation4 + $0x2] sm:$0x1] %v5661_v14 }
 0x44e   : > { %1809 = vst [vmem:[#allocation4 + $0xa] sm:$0x1] %v5663_v19  ;;  %v1816_v44 = vcombine.low %v5661_v14, %v5663_v19 }
 0x450   : > { %v1823_v45 = vrot.slane %v1816_v44, %v5534_v5 }
 0x452   : > { %v1830_v15 = vrot.slane %v1823_v45, %v5534_v5 }
 0x454   : > { %1897 = vmatmul.mubr.f32.vlgmr.msra.gmra.mrb[12].mxu0 %v1830_v15  ;;  %4231 = vmatmul.mubr.f32.vlgmr.msra.gmra.mrb[10].mxu1 %v1830_v15 }
 0x455   : > { %4637 = vmatpush1.bf16.msra.mxu0 %v5363_v39  ;;  %4668 = vmatpush3.bf16.msra.mxu1 %v5373_v48 }
 0x456   : > { %4639 = vmatprep.subr.bf16.mxu0 %v5366_v42  ;;  %4669 = vmatprep.subr.bf16.mxu1 %v5185_v0 }
 0x457   : > { %2188 = vmatprep.mubr.f32.mxu0 %v5187_v2  ;;  %4265 = vmatprep.mubr.msk.f32.mxu1 %vm5186_vm1, %v5187_v2 }
 0x459   : > { %4641 = vmatpush1.bf16.msra.mxu0 %v5381_v51  ;;  %4671 = vmatpush3.bf16.msra.mxu1 %v5392_v57 }
 0x45a   : > { %4643 = vmatprep.subr.bf16.mxu0 %v5385_v52  ;;  %4672 = vmatprep.subr.bf16.mxu1 %v5185_v0 }
 0x45d   : > { %4645 = vmatpush1.bf16.msra.mxu0 %v5401_v60  ;;  %4674 = vmatpush3.bf16.msra.mxu1 %v5412_v4 }
 0x45e   : > { %4647 = vmatprep.subr.bf16.mxu0 %v5405_v61  ;;  %4675 = vmatprep.subr.bf16.mxu1 %v5185_v0 }
 0x461   : > { %4649 = vmatpush1.bf16.msra.mxu0 %v5418_v7  ;;  %4677 = vmatpush3.bf16.msra.mxu1 %v5428_v13 }
 0x462   : > { %4651 = vmatprep.subr.bf16.mxu0 %v5421_v8  ;;  %4678 = vmatprep.subr.bf16.mxu1 %v5185_v0 }
 0x465   : > { %4653 = vmatpush1.bf16.msra.mxu0 %v5434_v16  ;;  %4680 = vmatpush3.bf16.msra.mxu1 %v5444_v22 }
 0x466   : > { %4655 = vmatprep.subr.bf16.mxu0 %v5437_v17  ;;  %4681 = vmatprep.subr.bf16.mxu1 %v5185_v0 }
 0x469   : > { %4657 = vmatpush1.bf16.msra.mxu0 %v5450_v26  ;;  %4683 = vmatpush3.bf16.msra.mxu1 %v5460_v33 }
 0x46a   : > { %4659 = vmatprep.subr.bf16.mxu0 %v5453_v27  ;;  %4684 = vmatprep.subr.bf16.mxu1 %v5185_v0 }
 0x46d   : > { %4661 = vmatpush1.bf16.msra.mxu0 %v5466_v37  ;;  %4686 = vmatpush3.bf16.msra.mxu1 %v5474_v43 }
 0x46e   : > { %4663 = vmatprep.subr.bf16.mxu0 %v5469_v38  ;;  %4687 = vmatprep.subr.bf16.mxu1 %v5185_v0 }
 0x471   : > { %4665 = vmatpush1.bf16.msra.mxu0 %v5480_v46  ;;  %4689 = vmatpush3.bf16.msra.mxu1 %v5484_v47 }
 0x472   : > { %4691 = vmatprep.subr.bf16.mxu0 %v5345_v24  ;;  %4722 = vmatprep.subr.bf16.mxu1 %v5185_v0 }
 0x527   : > { %v1898_v50 = vpop.f32.mrb[12].mxu0  ;;  %v1969_v25 = vpop.f32.mrb[10].mxu1 }
 0x528   : > { %v1980_v23 = vrot.slane %v1898_v50, %v5534_v5  ;;  %v1900_v53 = vpop.f32.mrb[13].mxu0  ;;  %v4232_v54 = vpop.f32.mrb[11].mxu1  ;;  %v2064_v44 = vrot.slane %v1969_v25, %v5534_v5 }
 0x529   : > { %v2025_v55 = vrot.slane %v1900_v53, %v5534_v5 }
 0x52a   : > { %v1981_v58 = vcombine.high %v1980_v23, %v1980_v23  ;;  %v1988_v59 = vrot.slane %v1980_v23, %v5534_v5  ;;  %v2065_v50 = vcombine.high %v2064_v44, %v2064_v44  ;;  %v2072_v53 = vrot.slane %v2064_v44, %v5534_v5 }
 0x52b   : > { %v2026_v62 = vcombine.high %v2025_v55, %v2025_v55  ;;  %v2033_v9 = vrot.slane %v2025_v55, %v5534_v5 }
 0x52c   : > { %v1995_v11 = vrot.slane %v1981_v58, %v5534_v5  ;;  %v1998_v18 = vadd.f32 %v1988_v59, %v1811_v49  ;;  %v2079_v58 = vrot.slane %v2065_v50, %v5534_v5 }
 0x52d   : > { %v2040_v21 = vrot.slane %v2026_v62, %v5534_v5  ;;  %v2043_v29 = vadd.f32 %v2033_v9, %v2014_v20  ;;  %v2084_v62 = vrot.slane %v1811_v49, 2 }
 0x52e   : > { %v1999_v28 = vadd.f32 %v1995_v11, %v1813_v10  ;;  %v3886_v12 = vmul.f32 -1.442695, %v1998_v18  ;;  %v2085_v18 = vrot.slane %v1813_v10, 2 }
 0x52f   : > { %v2044_v1 = vadd.f32 %v2040_v21, %v2015_v56  ;;  %v3888_v32 = vmul.f32 -1.442695, %v2043_v29 }
 0x530   : > { %4993 = vpow2.f32 %v3886_v12  ;;  %v3887_v31 = vmul.f32 -1.442695, %v1999_v28 }
 0x531   : > { %v3889_v34 = vmul.f32 -1.442695, %v2044_v1 }
 0x532   : > { %4995 = vpow2.f32 %v3887_v31 }
 0x533   : > { %4997 = vpow2.f32 %v3888_v32 }
 0x534   : > { %4999 = vpow2.f32 %v3889_v34 }
 0x53a   : > { %v4994_v36 = vpop.eup %4993 }
 0x53b   : > { %v2006_v40 = vadd.f32 1.0, %v4994_v36 }
 0x53c   : > { %v4996_v41 = vpop.eup %4995 }
 0x53d   : > { %v2007_v6 = vadd.f32 1.0, %v4996_v41  ;;  %5001 = vrcp.f32 %v2006_v40  ;;  %v4998_v45 = vpop.eup %4997 }
 0x53e   : > { %v5000_v15 = vpop.eup %4999  ;;  %v2051_v23 = vadd.f32 1.0, %v4998_v45 }
 0x53f   : > { %5003 = vrcp.f32 %v2007_v6  ;;  %v2052_v54 = vadd.f32 1.0, %v5000_v15 }
 0x540   : > { %5005 = vrcp.f32 %v2051_v23  ;;  %v2103_v23 = vld [vmem:[#allocation3 + $0x4] ss:$8 sm:$0x7] }
 0x541   : > { %5007 = vrcp.f32 %v2052_v54 }
 0x547   : > { %v5002_v55 = vpop.eup %5001 }
 0x548   : > { %v2082_v59 = vmul.f32 %v5002_v55, %v2072_v53 }
 0x549   : > { %v5004_v9 = vpop.eup %5003 }
 0x54a   : > { %v2083_v11 = vmul.f32 %v5004_v9, %v2079_v58  ;;  %v2088_v20 = vadd.f32 %v2084_v62, %v2082_v59  ;;  %v5006_v25 = vpop.eup %5005  ;;  %v2105_v59 = vld [vmem:[#allocation3 + $0x1c] ss:$8 sm:$0x7] }
 0x54b   : > { %v5008_v28 = vpop.eup %5007  ;;  %v2092_v12 = vsub.f32 1.0, %v5006_v25  ;;  %v2096_v1 = vmul.f32 %v5006_v25, %v5661_v14  ;;  %v2307_v25 = vrot.slane %v2105_v59, 1 }
 0x54c   : > { %v2089_v21 = vadd.f32 %v2085_v18, %v2083_v11  ;;  %5009 = vtanh.f32 %v2088_v20  ;;  %v2093_v29 = vsub.f32 1.0, %v5008_v28  ;;  %v2097_v49 = vmul.f32 %v5008_v28, %v5663_v19 }
 0x54d   : > { %v2306_v11 = vrot.slane %v2103_v23, 1 }
 0x54e   : > { %5011 = vtanh.f32 %v2089_v21 }
 0x556   : > { %v5010_v56 = vpop.eup %5009 }
 0x557   : > { %v2094_v31 = vmul.f32 %v5010_v56, %v2092_v12 }
 0x558   : > { %v5012_v32 = vpop.eup %5011 }
 0x559   : > { %v2095_v34 = vmul.f32 %v5012_v32, %v2093_v29  ;;  %v5717_v36 = vadd.f32 %v2096_v1, %v2094_v31 }
 0x55b   : > { %v5719_v10 = vadd.f32 %v2097_v49, %v2095_v34  ;;  %2100 = vst [vmem:[#allocation4 + $0x3] sm:$0x1] %v5717_v36 }
 0x55d   : > { %2101 = vst [vmem:[#allocation4 + $0xb] sm:$0x1] %v5719_v10  ;;  %v2108_v40 = vcombine.low %v5717_v36, %v5719_v10 }
 0x55f   : > { %v2115_v41 = vrot.slane %v2108_v40, %v5534_v5 }
 0x561   : > { %v2122_v6 = vrot.slane %v2115_v41, %v5534_v5 }
 0x563   : > { %2189 = vmatmul.mubr.f32.vlgmr.msra.gmra.mrb[14].mxu0 %v2122_v6  ;;  %4266 = vmatmul.mubr.f32.vlgmr.msra.gmra.mrb[12].mxu1 %v2122_v6 }
 0x564   : > { %4693 = vmatpush1.bf16.msra.mxu0 %v5363_v39  ;;  %4724 = vmatpush3.bf16.msra.mxu1 %v5373_v48 }
 0x565   : > { %4695 = vmatprep.subr.bf16.mxu0 %v5366_v42  ;;  %4725 = vmatprep.subr.bf16.mxu1 %v5185_v0 }
 0x566   : > { %2480 = vmatprep.mubr.f32.mxu0 %v5187_v2  ;;  %4300 = vmatprep.mubr.msk.f32.mxu1 %vm5186_vm1, %v5187_v2 }
 0x568   : > { %4697 = vmatpush1.bf16.msra.mxu0 %v5381_v51  ;;  %4727 = vmatpush3.bf16.msra.mxu1 %v5392_v57 }
 0x569   : > { %4699 = vmatprep.subr.bf16.mxu0 %v5385_v52  ;;  %4728 = vmatprep.subr.bf16.mxu1 %v5185_v0 }
 0x56c   : > { %4701 = vmatpush1.bf16.msra.mxu0 %v5401_v60  ;;  %4730 = vmatpush3.bf16.msra.mxu1 %v5412_v4 }
 0x56d   : > { %4703 = vmatprep.subr.bf16.mxu0 %v5405_v61  ;;  %4731 = vmatprep.subr.bf16.mxu1 %v5185_v0 }
 0x570   : > { %4705 = vmatpush1.bf16.msra.mxu0 %v5418_v7  ;;  %4733 = vmatpush3.bf16.msra.mxu1 %v5428_v13 }
 0x571   : > { %4707 = vmatprep.subr.bf16.mxu0 %v5421_v8  ;;  %4734 = vmatprep.subr.bf16.mxu1 %v5185_v0 }
 0x574   : > { %4709 = vmatpush1.bf16.msra.mxu0 %v5434_v16  ;;  %4736 = vmatpush3.bf16.msra.mxu1 %v5444_v22 }
 0x575   : > { %4711 = vmatprep.subr.bf16.mxu0 %v5437_v17  ;;  %4737 = vmatprep.subr.bf16.mxu1 %v5185_v0 }
 0x578   : > { %4713 = vmatpush1.bf16.msra.mxu0 %v5450_v26  ;;  %4739 = vmatpush3.bf16.msra.mxu1 %v5460_v33 }
 0x579   : > { %4715 = vmatprep.subr.bf16.mxu0 %v5453_v27  ;;  %4740 = vmatprep.subr.bf16.mxu1 %v5185_v0 }
 0x57c   : > { %4717 = vmatpush1.bf16.msra.mxu0 %v5466_v37  ;;  %4742 = vmatpush3.bf16.msra.mxu1 %v5474_v43 }
 0x57d   : > { %4719 = vmatprep.subr.bf16.mxu0 %v5469_v38  ;;  %4743 = vmatprep.subr.bf16.mxu1 %v5185_v0 }
 0x580   : > { %4721 = vmatpush1.bf16.msra.mxu0 %v5480_v46  ;;  %4745 = vmatpush3.bf16.msra.mxu1 %v5484_v47 }
 0x581   : > { %4747 = vmatprep.subr.bf16.mxu0 %v5345_v24  ;;  %4778 = vmatprep.subr.bf16.mxu1 %v5185_v0 }
 0x636   : > { %v2190_v14 = vpop.f32.mrb[14].mxu0  ;;  %v2261_v19 = vpop.f32.mrb[12].mxu1 }
 0x637   : > { %v2272_v44 = vrot.slane %v2190_v14, %v5534_v5  ;;  %v2192_v45 = vpop.f32.mrb[15].mxu0  ;;  %v4267_v15 = vpop.f32.mrb[13].mxu1  ;;  %v2356_v40 = vrot.slane %v2261_v19, %v5534_v5 }
 0x638   : > { %v2317_v50 = vrot.slane %v2192_v45, %v5534_v5 }
 0x639   : > { %v2273_v53 = vcombine.high %v2272_v44, %v2272_v44  ;;  %v2280_v54 = vrot.slane %v2272_v44, %v5534_v5  ;;  %v2357_v14 = vcombine.high %v2356_v40, %v2356_v40  ;;  %v2364_v45 = vrot.slane %v2356_v40, %v5534_v5 }
 0x63a   : > { %v2318_v55 = vcombine.high %v2317_v50, %v2317_v50  ;;  %v2325_v58 = vrot.slane %v2317_v50, %v5534_v5 }
 0x63b   : > { %v2287_v62 = vrot.slane %v2273_v53, %v5534_v5  ;;  %v2290_v9 = vadd.f32 %v2280_v54, %v2103_v23  ;;  %v2371_v53 = vrot.slane %v2357_v14, %v5534_v5 }
 0x63c   : > { %v2332_v18 = vrot.slane %v2318_v55, %v5534_v5  ;;  %v2335_v28 = vadd.f32 %v2325_v58, %v2306_v11  ;;  %v2376_v55 = vrot.slane %v2103_v23, 2 }
 0x63d   : > { %v2291_v20 = vadd.f32 %v2287_v62, %v2105_v59  ;;  %v3890_v21 = vmul.f32 -1.442695, %v2290_v9  ;;  %v2377_v9 = vrot.slane %v2105_v59, 2 }
 0x63e   : > { %v2336_v56 = vadd.f32 %v2332_v18, %v2307_v25  ;;  %v3892_v29 = vmul.f32 -1.442695, %v2335_v28 }
 0x63f   : > { %5013 = vpow2.f32 %v3890_v21  ;;  %v3891_v12 = vmul.f32 -1.442695, %v2291_v20 }
 0x640   : > { %v3893_v31 = vmul.f32 -1.442695, %v2336_v56 }
 0x641   : > { %5015 = vpow2.f32 %v3891_v12 }
 0x642   : > { %5017 = vpow2.f32 %v3892_v29 }
 0x643   : > { %5019 = vpow2.f32 %v3893_v31 }
 0x649   : > { %v5014_v1 = vpop.eup %5013 }
 0x64a   : > { %v2298_v32 = vadd.f32 1.0, %v5014_v1 }
 0x64b   : > { %v5016_v34 = vpop.eup %5015 }
 0x64c   : > { %v2299_v49 = vadd.f32 1.0, %v5016_v34  ;;  %5021 = vrcp.f32 %v2298_v32  ;;  %v5018_v41 = vpop.eup %5017 }
 0x64d   : > { %v5020_v6 = vpop.eup %5019  ;;  %v2343_v44 = vadd.f32 1.0, %v5018_v41 }
 0x64e   : > { %5023 = vrcp.f32 %v2299_v49  ;;  %v2344_v15 = vadd.f32 1.0, %v5020_v6 }
 0x64f   : > { %5025 = vrcp.f32 %v2343_v44  ;;  %v2395_v44 = vld [vmem:[#allocation3 + $0x5] ss:$8 sm:$0x7] }
 0x650   : > { %5027 = vrcp.f32 %v2344_v15 }
 0x656   : > { %v5022_v50 = vpop.eup %5021 }
 0x657   : > { %v2374_v54 = vmul.f32 %v5022_v50, %v2364_v45 }
 0x658   : > { %v5024_v58 = vpop.eup %5023 }
 0x659   : > { %v2375_v62 = vmul.f32 %v5024_v58, %v2371_v53  ;;  %v2380_v11 = vadd.f32 %v2376_v55, %v2374_v54  ;;  %v5026_v19 = vpop.eup %5025  ;;  %v2397_v54 = vld [vmem:[#allocation3 + $0x1d] ss:$8 sm:$0x7] }
 0x65a   : > { %v5028_v20 = vpop.eup %5027  ;;  %v2384_v21 = vsub.f32 1.0, %v5026_v19  ;;  %v2388_v56 = vmul.f32 %v5026_v19, %v5717_v36 }
 0x65b   : > { %v2381_v18 = vadd.f32 %v2377_v9, %v2375_v62  ;;  %5029 = vtanh.f32 %v2380_v11  ;;  %v2385_v28 = vsub.f32 1.0, %v5028_v20  ;;  %v2389_v23 = vmul.f32 %v5028_v20, %v5719_v10 }
 0x65d   : > { %5031 = vtanh.f32 %v2381_v18  ;;  %v2599_v18 = vrot.slane %v2397_v54, 1 }
 0x665   : > { %v5030_v25 = vpop.eup %5029 }
 0x666   : > { %v2386_v12 = vmul.f32 %v5030_v25, %v2384_v21 }
 0x667   : > { %v5032_v29 = vpop.eup %5031 }
 0x668   : > { %v2387_v31 = vmul.f32 %v5032_v29, %v2385_v28  ;;  %v5773_v1 = vadd.f32 %v2388_v56, %v2386_v12 }
 0x66a   : > { %v5775_v59 = vadd.f32 %v2389_v23, %v2387_v31  ;;  %2392 = vst [vmem:[#allocation4 + $0x4] sm:$0x1] %v5773_v1 }
 0x66c   : > { %2393 = vst [vmem:[#allocation4 + $0xc] sm:$0x1] %v5775_v59  ;;  %v2400_v32 = vcombine.low %v5773_v1, %v5775_v59 }
 0x66e   : > { %v2407_v34 = vrot.slane %v2400_v32, %v5534_v5 }
 0x670   : > { %v2414_v49 = vrot.slane %v2407_v34, %v5534_v5 }
 0x672   : > { %2481 = vmatmul.mubr.f32.vlgmr.msra.gmra.mrb[16].mxu0 %v2414_v49  ;;  %4301 = vmatmul.mubr.f32.vlgmr.msra.gmra.mrb[14].mxu1 %v2414_v49 }
 0x673   : > { %4749 = vmatpush1.bf16.msra.mxu0 %v5363_v39  ;;  %4780 = vmatpush3.bf16.msra.mxu1 %v5373_v48 }
 0x674   : > { %4751 = vmatprep.subr.bf16.mxu0 %v5366_v42  ;;  %4781 = vmatprep.subr.bf16.mxu1 %v5185_v0 }
 0x675   : > { %2772 = vmatprep.mubr.f32.mxu0 %v5187_v2  ;;  %4335 = vmatprep.mubr.msk.f32.mxu1 %vm5186_vm1, %v5187_v2 }
 0x677   : > { %4753 = vmatpush1.bf16.msra.mxu0 %v5381_v51  ;;  %4783 = vmatpush3.bf16.msra.mxu1 %v5392_v57 }
 0x678   : > { %4755 = vmatprep.subr.bf16.mxu0 %v5385_v52  ;;  %4784 = vmatprep.subr.bf16.mxu1 %v5185_v0 }
 0x67b   : > { %4757 = vmatpush1.bf16.msra.mxu0 %v5401_v60  ;;  %4786 = vmatpush3.bf16.msra.mxu1 %v5412_v4 }
 0x67c   : > { %4759 = vmatprep.subr.bf16.mxu0 %v5405_v61  ;;  %4787 = vmatprep.subr.bf16.mxu1 %v5185_v0 }
 0x67f   : > { %4761 = vmatpush1.bf16.msra.mxu0 %v5418_v7  ;;  %4789 = vmatpush3.bf16.msra.mxu1 %v5428_v13 }
 0x680   : > { %4763 = vmatprep.subr.bf16.mxu0 %v5421_v8  ;;  %4790 = vmatprep.subr.bf16.mxu1 %v5185_v0 }
 0x683   : > { %4765 = vmatpush1.bf16.msra.mxu0 %v5434_v16  ;;  %4792 = vmatpush3.bf16.msra.mxu1 %v5444_v22 }
 0x684   : > { %4767 = vmatprep.subr.bf16.mxu0 %v5437_v17  ;;  %4793 = vmatprep.subr.bf16.mxu1 %v5185_v0 }
 0x687   : > { %4769 = vmatpush1.bf16.msra.mxu0 %v5450_v26  ;;  %4795 = vmatpush3.bf16.msra.mxu1 %v5460_v33 }
 0x688   : > { %4771 = vmatprep.subr.bf16.mxu0 %v5453_v27  ;;  %4796 = vmatprep.subr.bf16.mxu1 %v5185_v0 }
 0x68b   : > { %4773 = vmatpush1.bf16.msra.mxu0 %v5466_v37  ;;  %4798 = vmatpush3.bf16.msra.mxu1 %v5474_v43 }
 0x68c   : > { %4775 = vmatprep.subr.bf16.mxu0 %v5469_v38  ;;  %4799 = vmatprep.subr.bf16.mxu1 %v5185_v0 }
 0x68f   : > { %4777 = vmatpush1.bf16.msra.mxu0 %v5480_v46  ;;  %4801 = vmatpush3.bf16.msra.mxu1 %v5484_v47 }
 0x690   : > { %4834 = vmatprep.subr.bf16.mxu1 %v5185_v0  ;;  %4803 = vmatprep.subr.bf16.mxu0 %v5345_v24  ;;  %v2598_v24 = vrot.slane %v2395_v44, 1 }
 0x745   : > { %v2482_v36 = vpop.f32.mrb[16].mxu0  ;;  %v2553_v10 = vpop.f32.mrb[14].mxu1 }
 0x746   : > { %v2564_v40 = vrot.slane %v2482_v36, %v5534_v5  ;;  %v2484_v41 = vpop.f32.mrb[17].mxu0  ;;  %v4302_v6 = vpop.f32.mrb[15].mxu1  ;;  %v2648_v23 = vrot.slane %v2553_v10, %v5534_v5 }
 0x747   : > { %v2609_v14 = vrot.slane %v2484_v41, %v5534_v5 }
 0x748   : > { %v2565_v45 = vcombine.high %v2564_v40, %v2564_v40  ;;  %v2572_v15 = vrot.slane %v2564_v40, %v5534_v5  ;;  %v2649_v49 = vcombine.high %v2648_v23, %v2648_v23  ;;  %v2656_v40 = vrot.slane %v2648_v23, %v5534_v5 }
 0x749   : > { %v2610_v50 = vcombine.high %v2609_v14, %v2609_v14  ;;  %v2617_v53 = vrot.slane %v2609_v14, %v5534_v5 }
 0x74a   : > { %v2579_v55 = vrot.slane %v2565_v45, %v5534_v5  ;;  %v2582_v58 = vadd.f32 %v2572_v15, %v2395_v44  ;;  %v2663_v14 = vrot.slane %v2649_v49, %v5534_v5  ;;  %v2668_v15 = vrot.slane %v2395_v44, 2 }
 0x74b   : > { %v2624_v62 = vrot.slane %v2610_v50, %v5534_v5  ;;  %v2627_v19 = vadd.f32 %v2617_v53, %v2598_v24 }
 0x74c   : > { %v2583_v9 = vadd.f32 %v2579_v55, %v2397_v54  ;;  %v3894_v11 = vmul.f32 -1.442695, %v2582_v58  ;;  %v2669_v55 = vrot.slane %v2397_v54, 2 }
 0x74d   : > { %v2628_v21 = vadd.f32 %v2624_v62, %v2599_v18  ;;  %v3896_v25 = vmul.f32 -1.442695, %v2627_v19 }
 0x74e   : > { %5033 = vpow2.f32 %v3894_v11  ;;  %v3895_v20 = vmul.f32 -1.442695, %v2583_v9 }
 0x74f   : > { %v3897_v28 = vmul.f32 -1.442695, %v2628_v21 }
 0x750   : > { %5035 = vpow2.f32 %v3895_v20 }
 0x751   : > { %5037 = vpow2.f32 %v3896_v25 }
 0x752   : > { %5039 = vpow2.f32 %v3897_v28 }
 0x758   : > { %v5034_v12 = vpop.eup %5033 }
 0x759   : > { %v2590_v56 = vadd.f32 1.0, %v5034_v12 }
 0x75a   : > { %v5036_v29 = vpop.eup %5035 }
 0x75b   : > { %v2591_v31 = vadd.f32 1.0, %v5036_v29  ;;  %5041 = vrcp.f32 %v2590_v56  ;;  %v5038_v32 = vpop.eup %5037 }
 0x75c   : > { %v5040_v34 = vpop.eup %5039  ;;  %v2635_v36 = vadd.f32 1.0, %v5038_v32 }
 0x75d   : > { %5043 = vrcp.f32 %v2591_v31  ;;  %v2636_v41 = vadd.f32 1.0, %v5040_v34 }
 0x75e   : > { %5045 = vrcp.f32 %v2635_v36 }
 0x75f   : > { %5047 = vrcp.f32 %v2636_v41 }
 0x765   : > { %v5042_v6 = vpop.eup %5041 }
 0x766   : > { %v2666_v45 = vmul.f32 %v5042_v6, %v2656_v40 }
 0x767   : > { %v5044_v50 = vpop.eup %5043 }
 0x768   : > { %v2667_v53 = vmul.f32 %v5044_v50, %v2663_v14  ;;  %v2672_v58 = vadd.f32 %v2668_v15, %v2666_v45  ;;  %v5046_v10 = vpop.eup %5045 }
 0x769   : > { %v5048_v62 = vpop.eup %5047  ;;  %v2676_v9 = vsub.f32 1.0, %v5046_v10  ;;  %v2680_v20 = vmul.f32 %v5046_v10, %v5773_v1 }
 0x76a   : > { %v2673_v24 = vadd.f32 %v2669_v55, %v2667_v53  ;;  %5049 = vtanh.f32 %v2672_v58  ;;  %v2677_v18 = vsub.f32 1.0, %v5048_v62  ;;  %v2681_v44 = vmul.f32 %v5048_v62, %v5775_v59 }
 0x76c   : > { %5051 = vtanh.f32 %v2673_v24 }
 0x774   : > { %v5050_v11 = vpop.eup %5049 }
 0x775   : > { %v2678_v19 = vmul.f32 %v5050_v11, %v2676_v9 }
 0x776   : > { %v5052_v21 = vpop.eup %5051 }
 0x777   : > { %v2679_v25 = vmul.f32 %v5052_v21, %v2677_v18  ;;  %v5829_v28 = vadd.f32 %v2680_v20, %v2678_v19 }
 0x779   : > { %v5831_v54 = vadd.f32 %v2681_v44, %v2679_v25  ;;  %2684 = vst [vmem:[#allocation4 + $0x5] sm:$0x1] %v5829_v28 }
 0x77b   : > { %2685 = vst [vmem:[#allocation4 + $0xd] sm:$0x1] %v5831_v54  ;;  %v2692_v12 = vcombine.low %v5829_v28, %v5831_v54 }
 0x77d   : > { %v2699_v56 = vrot.slane %v2692_v12, %v5534_v5 }
 0x77f   : > { %v2706_v29 = vrot.slane %v2699_v56, %v5534_v5 }
 0x781   : > { %2773 = vmatmul.mubr.f32.vlgmr.msra.gmra.mrb[18].mxu0 %v2706_v29  ;;  %4336 = vmatmul.mubr.f32.vlgmr.msra.gmra.mrb[16].mxu1 %v2706_v29 }
 0x782   : > { %4836 = vmatpush3.bf16.msra.mxu1 %v5373_v48  ;;  %4805 = vmatpush1.bf16.msra.mxu0 %v5363_v39 }
 0x783   : > { %4837 = vmatprep.subr.bf16.mxu1 %v5185_v0  ;;  %4807 = vmatprep.subr.bf16.mxu0 %v5366_v42 }
 0x784   : > { %3064 = vmatprep.mubr.f32.mxu0 %v5187_v2  ;;  %4370 = vmatprep.mubr.msk.f32.mxu1 %vm5186_vm1, %v5187_v2 }
 0x786   : > { %4839 = vmatpush3.bf16.msra.mxu1 %v5392_v57  ;;  %4809 = vmatpush1.bf16.msra.mxu0 %v5381_v51 }
 0x787   : > { %4840 = vmatprep.subr.bf16.mxu1 %v5185_v0  ;;  %4811 = vmatprep.subr.bf16.mxu0 %v5385_v52 }
 0x78a   : > { %4842 = vmatpush3.bf16.msra.mxu1 %v5412_v4  ;;  %4813 = vmatpush1.bf16.msra.mxu0 %v5401_v60  ;;  %v2687_v60 = vld [vmem:[#allocation3 + $0x6] ss:$8 sm:$0x7] }
 0x78b   : > { %4843 = vmatprep.subr.bf16.mxu1 %v5185_v0  ;;  %4815 = vmatprep.subr.bf16.mxu0 %v5405_v61  ;;  %v2960_v53 = vrot.slane %v2687_v60, 2 }
 0x78e   : > { %4845 = vmatpush3.bf16.msra.mxu1 %v5428_v13  ;;  %4817 = vmatpush1.bf16.msra.mxu0 %v5418_v7  ;;  %v2689_v13 = vld [vmem:[#allocation3 + $0x1e] ss:$8 sm:$0x7] }
 0x78f   : > { %4846 = vmatprep.subr.bf16.mxu1 %v5185_v0  ;;  %4819 = vmatprep.subr.bf16.mxu0 %v5421_v8  ;;  %v2961_v24 = vrot.slane %v2689_v13, 2 }
 0x792   : > { %4848 = vmatpush3.bf16.msra.mxu1 %v5444_v22  ;;  %4821 = vmatpush1.bf16.msra.mxu0 %v5434_v16  ;;  %v2890_v22 = vrot.slane %v2687_v60, 1 }
 0x793   : > { %4849 = vmatprep.subr.bf16.mxu1 %v5185_v0  ;;  %4823 = vmatprep.subr.bf16.mxu0 %v5437_v17 }
 0x796   : > { %4851 = vmatpush3.bf16.msra.mxu1 %v5460_v33  ;;  %4825 = vmatpush1.bf16.msra.mxu0 %v5450_v26 }
 0x797   : > { %4852 = vmatprep.subr.bf16.mxu1 %v5185_v0  ;;  %4827 = vmatprep.subr.bf16.mxu0 %v5453_v27 }
 0x79a   : > { %4854 = vmatpush3.bf16.msra.mxu1 %v5474_v43  ;;  %4829 = vmatpush1.bf16.msra.mxu0 %v5466_v37  ;;  %v2891_v37 = vrot.slane %v2689_v13, 1 }
 0x79b   : > { %4855 = vmatprep.subr.bf16.mxu1 %v5185_v0  ;;  %4831 = vmatprep.subr.bf16.mxu0 %v5469_v38 }
 0x79e   : > { %4857 = vmatpush3.bf16.msra.mxu1 %v5484_v47  ;;  %4833 = vmatpush1.bf16.msra.mxu0 %v5480_v46 }
 0x79f   : > { %4373 = vmatprep.subr.mxu1 %v5187_v2  ;;  %4858 = vmatprep.subr.bf16.mxu0 %v5185_v0 }
 0x854   : > { %v2774_v39 = vpop.f32.mrb[18].mxu0  ;;  %v2845_v42 = vpop.f32.mrb[16].mxu1 }
 0x855   : > { %v2856_v48 = vrot.slane %v2774_v39, %v5534_v5  ;;  %v2776_v51 = vpop.f32.mrb[19].mxu0  ;;  %v4337_v52 = vpop.f32.mrb[17].mxu1  ;;  %v2940_v34 = vrot.slane %v2845_v42, %v5534_v5 }
 0x856   : > { %v2901_v57 = vrot.slane %v2776_v51, %v5534_v5 }
 0x857   : > { %v2857_v61 = vcombine.high %v2856_v48, %v2856_v48  ;;  %v2864_v4 = vrot.slane %v2856_v48, %v5534_v5  ;;  %v2941_v40 = vcombine.high %v2940_v34, %v2940_v34  ;;  %v2948_v6 = vrot.slane %v2940_v34, %v5534_v5 }
 0x858   : > { %v2902_v7 = vcombine.high %v2901_v57, %v2901_v57  ;;  %v2909_v8 = vrot.slane %v2901_v57, %v5534_v5 }
 0x859   : > { %v2871_v16 = vrot.slane %v2857_v61, %v5534_v5  ;;  %v2874_v17 = vadd.f32 %v2864_v4, %v2687_v60  ;;  %v2955_v15 = vrot.slane %v2941_v40, %v5534_v5 }
 0x85a   : > { %v2916_v26 = vrot.slane %v2902_v7, %v5534_v5  ;;  %v2919_v38 = vadd.f32 %v2909_v8, %v2890_v22  ;;  %v2979_v8 = vld [vmem:[#allocation3 + $0x7] ss:$8 sm:$0x7] }
 0x85b   : > { %v2875_v27 = vadd.f32 %v2871_v16, %v2689_v13  ;;  %v3898_v33 = vmul.f32 -1.442695, %v2874_v17 }
 0x85c   : > { %v2920_v46 = vadd.f32 %v2916_v26, %v2891_v37  ;;  %v3900_v47 = vmul.f32 -1.442695, %v2919_v38  ;;  %v2981_v26 = vld [vmem:[#allocation3 + $0x1f] ss:$8 sm:$0x7]  ;;  %v3182_v37 = vrot.slane %v2979_v8, 1 }
 0x85d   : > { %5053 = vpow2.f32 %v3898_v33  ;;  %v3899_v43 = vmul.f32 -1.442695, %v2875_v27 }
 0x85e   : > { %v3901_v1 = vmul.f32 -1.442695, %v2920_v46 }
 0x85f   : > { %5055 = vpow2.f32 %v3899_v43 }
 0x860   : > { %5057 = vpow2.f32 %v3900_v47  ;;  %v3183_v47 = vrot.slane %v2981_v26, 1 }
 0x861   : > { %5059 = vpow2.f32 %v3901_v1 }
 0x867   : > { %v5054_v59 = vpop.eup %5053 }
 0x868   : > { %v2882_v31 = vadd.f32 1.0, %v5054_v59 }
 0x869   : > { %v5056_v23 = vpop.eup %5055 }
 0x86a   : > { %v2883_v32 = vadd.f32 1.0, %v5056_v23  ;;  %5061 = vrcp.f32 %v2882_v31  ;;  %v5058_v49 = vpop.eup %5057 }
 0x86b   : > { %v5060_v36 = vpop.eup %5059  ;;  %v2927_v41 = vadd.f32 1.0, %v5058_v49 }
 0x86c   : > { %5063 = vrcp.f32 %v2883_v32  ;;  %v2928_v14 = vadd.f32 1.0, %v5060_v36 }
 0x86d   : > { %5065 = vrcp.f32 %v2927_v41 }
 0x86e   : > { %5067 = vrcp.f32 %v2928_v14 }
 0x874   : > { %v5062_v45 = vpop.eup %5061 }
 0x875   : > { %v2958_v50 = vmul.f32 %v5062_v45, %v2948_v6 }
 0x876   : > { %v5064_v55 = vpop.eup %5063 }
 0x877   : > { %v2959_v58 = vmul.f32 %v5064_v55, %v2955_v15  ;;  %v2964_v10 = vadd.f32 %v2960_v53, %v2958_v50  ;;  %v5066_v9 = vpop.eup %5065 }
 0x878   : > { %v5068_v11 = vpop.eup %5067  ;;  %v2968_v18 = vsub.f32 1.0, %v5066_v9  ;;  %v2972_v25 = vmul.f32 %v5066_v9, %v5829_v28  ;;  %v5103_v28 = vld [vmem:[%s6024_s0] sm:$0xff] }
 0x879   : > { %v2965_v62 = vadd.f32 %v2961_v24, %v2959_v58  ;;  %5069 = vtanh.f32 %v2964_v10  ;;  %v2969_v20 = vsub.f32 1.0, %v5068_v11  ;;  %v2973_v56 = vmul.f32 %v5068_v11, %v5831_v54 }
 0x87a   : > { %v3380_v54 = vmul.f32 %v5103_v28, %v5353_v30  ;;  %v3252_v10 = vrot.slane %v2979_v8, 2  ;;  %v3253_v11 = vrot.slane %v2981_v26, 2 }
 0x87b   : > { %5071 = vtanh.f32 %v2965_v62 }
 0x883   : > { %v5070_v19 = vpop.eup %5069 }
 0x884   : > { %v2970_v21 = vmul.f32 %v5070_v19, %v2968_v18 }
 0x885   : > { %v5072_v44 = vpop.eup %5071 }
 0x886   : > { %v2971_v12 = vmul.f32 %v5072_v44, %v2969_v20  ;;  %v5885_v29 = vadd.f32 %v2972_v25, %v2970_v21 }
 0x888   : > { %v5887_v39 = vadd.f32 %v2973_v56, %v2971_v12  ;;  %2976 = vst [vmem:[#allocation4 + $0x6] sm:$0x1] %v5885_v29 }
 0x88a   : > { %2977 = vst [vmem:[#allocation4 + $0xe] sm:$0x1] %v5887_v39  ;;  %v2984_v42 = vcombine.low %v5885_v29, %v5887_v39 }
 0x88c   : > { %v2991_v48 = vrot.slane %v2984_v42, %v5534_v5 }
 0x88e   : > { %v2998_v51 = vrot.slane %v2991_v48, %v5534_v5 }
 0x890   : > { %3065 = vmatmul.mubr.f32.vlgmr.msra.gmra.mrb[20].mxu0 %v2998_v51  ;;  %4371 = vmatmul.mubr.f32.vlgmr.msra.gmra.mrb[18].mxu1 %v2998_v51 }
 0x891   : > { %4374 = vmatpush3.msra.mxu1 %v3380_v54  ;;  %4375 = vmatprep.mubr.msk.f32.mxu1 %vm5186_vm1, %v5187_v2 }
 0x892   : > { %4378 = vmatprep.subr.mxu1 %v5187_v2  ;;  %4391 = vmatprep.mubr.msk.f32.mxu0 %vm5186_vm1, %v5187_v2 }
 0x963   : > { %v3066_v52 = vpop.f32.mrb[20].mxu0  ;;  %v3137_v57 = vpop.f32.mrb[18].mxu1 }
 0x964   : > { %v3148_v60 = vrot.slane %v3066_v52, %v5534_v5  ;;  %v3068_v61 = vpop.f32.mrb[21].mxu0  ;;  %v4372_v4 = vpop.f32.mrb[19].mxu1  ;;  %v3232_v41 = vrot.slane %v3137_v57, %v5534_v5 }
 0x965   : > { %v3193_v7 = vrot.slane %v3068_v61, %v5534_v5  ;;  %v3907_v61 = vld [vmem:[%s497_s22] ss:$0 sm:$0xff]  ;;  %s3912_s22 = sshll.u32 %s5175_s16, 5  ;;  %s5191_s16 = smov [#allocation8]  }
 0x966   : > { %v3149_v13 = vcombine.high %v3148_v60, %v3148_v60  ;;  %v3156_v16 = vrot.slane %v3148_v60, %v5534_v5  ;;  %v3233_v45 = vcombine.high %v3232_v41, %v3232_v41  ;;  %v3240_v50 = vrot.slane %v3232_v41, %v5534_v5  ;;  %s5976_s11 = scalar_lea.hbm %s6034_s10, %s3912_s22  ;;  %s5109_s19 = sshll.u32 %s5191_s16, 4  ;;  %s5110_s19 = int_to_ptr.vmem [resolvable:$false] %s5109_s19 }
 0x967   : > { %v3194_v17 = vcombine.high %v3193_v7, %v3193_v7  ;;  %v3201_v22 = vrot.slane %v3193_v7, %v5534_v5  ;;  %s5111_s20 = scalar_lea.vmem %s5110_s19, 64  ;;  %p5112_p1 = scmp.lt.s32.totalorder %s5978_s27, %s5110_s19 }
 0x968   : > { %v3163_v27 = vrot.slane %v3149_v13, %v5534_v5  ;;  %v3166_v33 = vadd.f32 %v3156_v16, %v2979_v8  ;;  %v3247_v58 = vrot.slane %v3233_v45, %v5534_v5  ;;  %p5113_p2 = scmp.lt.s32.totalorder %s5111_s20, %s5105_s12 }
 0x969   : > { %v3208_v38 = vrot.slane %v3194_v17, %v5534_v5  ;;  %v3211_v1 = vadd.f32 %v3201_v22, %v3182_v37  ;;  %v5190_v17 = vmov -inf  }
 0x96a   : > { %v3167_v43 = vadd.f32 %v3163_v27, %v2981_v26  ;;  %v3902_v46 = vmul.f32 -1.442695, %v3166_v33  ;;  %523 = vst.msk [vmem:[#allocation5] sm:$0x3] %vm522_vm4, %v5190_v17  ;;  %p5114_p3 = por %p5113_p2, %p5112_p1 }
 0x96b   : > { %v3212_v31 = vadd.f32 %v3208_v38, %v3183_v47  ;;  %v3904_v23 = vmul.f32 -1.442695, %v3211_v1 }
 0x96c   : > { %5073 = vpow2.f32 %v3902_v46  ;;  %v3903_v59 = vmul.f32 -1.442695, %v3167_v43  ;;  %p5115_p5 = pnand %p5114_p3, %p5108_p0 }
 0x96d   : > { %v3905_v32 = vmul.f32 -1.442695, %v3212_v31 }
 0x96e   : > { %5075 = vpow2.f32 %v3903_v59 }
 0x96f   : > { %5077 = vpow2.f32 %v3904_v23  ;;  %v3340_v23 = vsub.s32 0, %v5531_v3 }
 0x970   : > { %5079 = vpow2.f32 %v3905_v32  ;;  %v3344_v32 = vsub.s32 1, %v5531_v3 }
 0x971   : > { %v3329_v46 = vld [vmem:[#allocation5] sm:$0x3] }
 0x976   : > { %v5074_v34 = vpop.eup %5073 }
 0x977   : > { %v3174_v49 = vadd.f32 1.0, %v5074_v34 }
 0x978   : > { %v5076_v36 = vpop.eup %5075 }
 0x979   : > { %v3175_v40 = vadd.f32 1.0, %v5076_v36  ;;  %5081 = vrcp.f32 %v3174_v49  ;;  %v5078_v6 = vpop.eup %5077 }
 0x97a   : > { %v5080_v14 = vpop.eup %5079  ;;  %v3219_v15 = vadd.f32 1.0, %v5078_v6 }
 0x97b   : > { %5083 = vrcp.f32 %v3175_v40  ;;  %v3220_v53 = vadd.f32 1.0, %v5080_v14 }
 0x97c   : > { %5085 = vrcp.f32 %v3219_v15 }
 0x97d   : > { %5087 = vrcp.f32 %v3220_v53  ;;  %v3558_v53 = vld [vmem:[%s6032_s8 + $0x10] sm:$0xff] }
 0x983   : > { %v5082_v55 = vpop.eup %5081 }
 0x984   : > { %v3250_v24 = vmul.f32 %v5082_v55, %v3240_v50  ;;  %v3556_v50 = vld [vmem:[%s6032_s8] sm:$0xff] }
 0x985   : > { %v5084_v62 = vpop.eup %5083 }
 0x986   : > { %v3251_v9 = vmul.f32 %v5084_v62, %v3247_v58  ;;  %v3256_v18 = vadd.f32 %v3252_v10, %v3250_v24  ;;  %v5086_v20 = vpop.eup %5085  ;;  %v3559_v58 = vld [vmem:[%s6032_s8 + $0x18] sm:$0xff]  ;;  %v3555_v10 = vld [vmem:[%s501_s1] sm:$0x3]  ;;  %s3645_s1 = scalar_lea.sflag [#allocation9], %s466_s29 }
 0x987   : > { %v5088_v21 = vpop.eup %5087  ;;  %v3260_v25 = vsub.f32 1.0, %v5086_v20  ;;  %v3264_v42 = vmul.f32 %v5086_v20, %v5885_v29  ;;  %v4862_v24 = vpack.c.bf16 %v3559_v58, %v3558_v53 }
 0x988   : > { %v3257_v19 = vadd.f32 %v3253_v11, %v3251_v9  ;;  %5089 = vtanh.f32 %v3256_v18  ;;  %v3261_v12 = vsub.f32 1.0, %v5088_v21  ;;  %v3265_v28 = vmul.f32 %v5088_v21, %v5887_v39  ;;  %v5104_v11 = vld [vmem:[%s6024_s0 + $0x8] sm:$0xff] }
 0x989   : > { %v3381_v18 = vmul.f32 %v5104_v11, %v5359_v35 }
 0x98a   : > { %5091 = vtanh.f32 %v3257_v19 }
 0x992   : > { %v5090_v44 = vpop.eup %5089 }
 0x993   : > { %v3262_v56 = vmul.f32 %v5090_v44, %v3260_v25  ;;  %v3354_v25 = vld [vmem:[#allocation6] sm:$0x3] }
 0x994   : > { %v5092_v48 = vpop.eup %5091 }
 0x995   : > { %v3263_v51 = vmul.f32 %v5092_v48, %v3261_v12  ;;  %v3266_v54 = vadd.f32 %v3264_v42, %v3262_v56 }
 0x997   : > { %v3267_v52 = vadd.f32 %v3265_v28, %v3263_v51  ;;  %3268 = vst [vmem:[#allocation4 + $0x7] sm:$0x1] %v3266_v54  ;;  %v3527_v28 = vld [vmem:[#allocation7] sm:$0x3] }
 0x999   : > { %3269 = vst [vmem:[#allocation4 + $0xf] sm:$0x1] %v3267_v52  ;;  %v3272_v57 = vcombine.low %v3266_v54, %v3267_v52 }
 0x99b   : > { %v3279_v60 = vrot.slane %v3272_v57, %v5534_v5 }
 0x99d   : > { %3906 = vst.sshfl [vmem:[#allocation2] sm:$0x5 pattern:$0x73625140] %v3279_v60 }
 0x99e   : > { %v3289_v29 = vld [vmem:[#allocation4] sm:$0xff] }
 0x99f   : > { %v3291_v39 = vmul.f32 %v3289_v29, %v5353_v30  ;;  %v3313_v30 = vand.u32 127, %v1076_v63 }
 0x9a0   : > { %v3290_v4 = vld [vmem:[#allocation4 + $0x8] sm:$0xff] }
 0x9a1   : > { %v3302_v7 = vmul.f32 %v3907_v61, %v3291_v39  ;;  %3293 = vst.msk [vmem:[%s509_s30] sm:$0xff] %vm714_vm3, %v3291_v39  ;;  %v3292_v5 = vmul.f32 %v3290_v4, %v5359_v35  ;;  %v3316_v26 = vsub.s32 %v3313_v30, %v5531_v3  ;;  %v3557_v3 = vld [vmem:[%s6032_s8 + $0x8] sm:$0xff] }
 0x9a2   : > { %v4859_v55 = vpack.c.bf16 %v3557_v3, %v3556_v50 }
 0x9a3   : > { %v3304_v8 = vsel %vm714_vm3, %v3302_v7, 0.0  ;;  %v3303_v13 = vmul.f32 %v3907_v61, %v3292_v5  ;;  %3294 = vst.msk [vmem:[%s509_s30 + $0x8] sm:$0xff] %vm714_vm3, %v3292_v5 }
 0x9a4   : > { %3305 = vadd.xlane.f32.xlu1 %v3304_v8  ;;  %4860 = vmatpush3.bf16.msra.mxu0 %v4859_v55 }
 0x9a5   : > { %v3307_v16 = vsel %vm714_vm3, %v3303_v13, 0.0  ;;  %4861 = vmatprep.subr.bf16.mxu0 %v5185_v0 }
 0x9a8   : > { %3308 = vadd.xlane.f32.xlu1 %v3307_v16  ;;  %4863 = vmatpush3.bf16.msra.mxu0 %v4862_v24 }
 0x9ab   : > { %4392 = vmatmul.mubr.msk.f32.vlgmr.msra.gmra.mrb[22].mxu0 %vm535_vm0, %v3555_v10 }
 0xa31   : > { %v3306_v22 = vpop.xlane.xlu1 %3305 }
 0xa32   : > { %v3317_v33 = vrot.slane %v3306_v22, %v3316_v26 }
 0xa35   : > { %v3309_v27 = vpop.xlane.xlu1 %3308 }
 0xa36   : > { %v3321_v37 = vrot.slane %v3309_v27, %v3316_v26 }
 0xa38   : > { %v3323_v38 = vsel %vm3322_vm5, %v3321_v37, %v3317_v33 }
 0xa39   : > { %v3326_v43 = vsel %vm3325_vm6, %v3323_v38, -inf }
 0xa3a   : > { %3327 = vmax.xlane.f32.xlu0 %v3326_v43 }
 0xa7e   : > { %v3629_v42 = vpop.f32.mrb[22].mxu0 }
 0xa7f   : > { %v4393_v48 = vpop.f32.mrb[23].mxu0 }
 0xac7   : > { %v3328_v47 = vpop.xlane.xlu0 %3327 }
 0xac8   : > { %v3330_v1 = vmax.f32 %v3329_v46, %v3328_v47 }
 0xaca   : > { %v3331_v59 = vsub.f32 %v3329_v46, %v3330_v1  ;;  %3542 = vst.msk [vmem:[#allocation5] sm:$0x3] %vm522_vm4, %v3330_v1  ;;  %3336 = vperm.xlu1 %4928, %v3330_v1  }
 0xacc   : > { %v3332_v63 = vmul.f32 1.442695, %v3331_v59 }
 0xace   : > { %5093 = vpow2.f32 %v3332_v63 }
 0xad8   : > { %v5094_v31 = vpop.eup %5093 }
 0xad9   : > { %3530 = vperm.xlu0 %4927, %v5094_v31   ;;  %v3355_v44 = vmul.f32 %v5094_v31, %v3354_v25 }
 0xb49   : > { %v3337_v34 = vpop.permute.xlu1 %3336 }
 0xb4a   : > { %v3341_v49 = vrot.slane %v3337_v34, %v3340_v23  ;;  %v3345_v36 = vrot.slane %v3337_v34, %v3344_v32 }
 0xb4c   : > { %v3348_v40 = vsub.f32 %v3306_v22, %v3341_v49  ;;  %v3349_v41 = vsub.f32 %v3309_v27, %v3345_v36 }
 0xb4e   : > { %v3350_v6 = vmul.f32 1.442695, %v3348_v40  ;;  %v3352_v14 = vmul.f32 1.442695, %v3349_v41 }
 0xb50   : > { %5095 = vpow2.f32 %v3350_v6 }
 0xb51   : > { %5097 = vpow2.f32 %v3352_v14 }
 0xb52   : > { %5099 = vtanh.f32 %v3629_v42 }
 0xb58   : > { %v3531_v54 = vpop.permute.xlu0 %3530 }
 0xb59   : > { %v3533_v29 = vmul.f32 %v3531_v54, %v3527_v28 }
 0xb5a   : > { %v5096_v45 = vpop.eup %5095 }
 0xb5b   : > { %3359 = vperm.xlu1 %4928, %v5096_v45   ;;  %v5098_v15 = vpop.eup %5097 }
 0xb5c   : > { %v5100_v7 = vpop.eup %5099 }
 0xb5f   : > { %3362 = vperm.xlu1 %4928, %v5098_v15  }
 0xbda   : > { %v3360_v62 = vpop.permute.xlu1 %3359 }
 0xbdb   : > { %v3367_v9 = vrot.slane %v3360_v62, %v3316_v26 }
 0xbdd   : > { %4376 = vmatmul.mubr.msk.f32.vlgmr.msra.gmra.mrb[20].mxu1 %vm3382_vm8, %v3367_v9 }
 0xbde   : > { %4379 = vmatpush3.msra.mxu1 %v3381_v18  ;;  %v3363_v0 = vpop.permute.xlu1 %3362  ;;  %4380 = vmatprep.mubr.msk.f32.mxu1 %vm5186_vm1, %v5187_v2 }
 0xbdf   : > { %v3371_v19 = vrot.slane %v3363_v0, %v3316_v26 }
 0xbe1   : > { %4381 = vmatmul.mubr.msk.f32.vlgmr.msra.gmra.mrb[22].mxu1 %vm3382_vm8, %v3371_v19  ;;  %v3372_v20 = vsel %vm3322_vm5, %v3371_v19, %v3367_v9 }
 0xbe2   : > { %v3374_v21 = vsel %vm3325_vm6, %v3372_v20, 0.0 }
 0xbe3   : > { %3375 = vadd.xlane.f32.xlu1 %v3374_v21 }
 0xc70   : > { %v3376_v12 = vpop.xlane.xlu1 %3375 }
 0xc71   : > { %v3377_v56 = vadd.f32 %v3376_v12, %v3355_v44 }
 0xc73   : > { %3379 = vst.msk [vmem:[#allocation6] sm:$0x3] %vm522_vm4, %v3377_v56 }
 0xc7a   : > { %v3547_v35 = vld [vmem:[#allocation6] sm:$0x3] }
 0xc7b   : > { %3550 = vperm.xlu0 %4927, %v3547_v35  }
 0xcb0   : > { %v3451_v51 = vpop.f32.mrb[20].mxu1 }
 0xcb1   : > { %v4377_v2 = vpop.f32.mrb[21].mxu1 }
 0xcb4   : > { %v3523_v52 = vpop.f32.mrb[22].mxu1 }
 0xcb5   : > { %v3536_v57 = vrot.slane %v3523_v52, 7  ;;  %v4382_v60 = vpop.f32.mrb[23].mxu1 }
 0xcb7   : > { %v3537_v61 = vsel %vm3322_vm5, %v3536_v57, %v3451_v51 }
 0xcb8   : > { %v3539_v39 = vadd.f32 %v3537_v61, %v3533_v29 }
 0xcba   : > { %3541 = vst.msk [vmem:[#allocation7] sm:$0x3] %vm525_vm7, %v3539_v39 }
 0xcc1   : > { %v3546_v8 = vld [vmem:[#allocation7] sm:$0x3] }
 0xcfa   : > { %v3551_v4 = vpop.permute.xlu0 %3550 }
 0xcfb   : > { %5101 = vrcp.f32 %v3551_v4 }
 0xd05   : > { %v5102_v5 = vpop.eup %5101 }
 0xd06   : > { %v3554_v13 = vmul.f32 %v5102_v5, %v3546_v8 }
 0xd08   : > { %v3634_v16 = vadd.f32 %v5100_v7, %v3554_v13 }
 0xd0a   : > { %3635 = vst.msk [vmem:[%s468_s24] sm:$0x3] %vm525_vm7, %v3634_v16 }
 0xd0b   : > { %5118 = shalt.err (!%p5115_p5)
}
 0xd0c   : > { %s5119_s29 = scalar_lea.hbm %s5976_s11, 32  ;;  %s5123_s28 = scalar_lea.hbm %s6034_s10, 64 }
 0xd0d   : > { %p5120_p6 = scmp.ne.s32.totalorder %s5976_s11, %s5119_s29  ;;  %p5124_p10 = scmp.lt.u32.totalorder %s5976_s11, %s6034_s10 }
 0xd0e   : > { %p5125_p11 = scmp.lt.u32.totalorder %s5123_s28, %s5119_s29  ;;  %p5127_p13 = scmp.lt.u32.totalorder %s5119_s29, %s5976_s11 }
 0xd0f   : > { %p5121_p7 = pnand %p5120_p6, %p5287_p4 }
 0xd10   : > { %p5126_p12 = por %p5125_p11, %p5124_p10 }
 0xd11   : > { %p5122_p9 = pneg %p5121_p7 }
 0xd12   : > { %p5128_p0 = por %p5127_p13, %p5126_p12 }
 0xd14   : > { %p5129_p1 = pnand %p5128_p0, %p5122_p9 }
 0xd16   : > { %5132 = shalt.err (!%p5129_p1)
}
 0xd17   : > { %4866 = dma.vmem_to_hbm [thread:$0]  (%p5287_p4), %s5978_s27, 32, %s5976_s11, %s3645_s1  }
 0xd18 PF: > { %p4872_p2 = scmp.ge.s32.totalorder %s5183_s18, 2  ;;  %s3684_s12 = sand.u32 1, %s5163_s13  }
 0xd19   : > { %s3685_s19 = scalar_lea.sflag [#allocation9], %s3684_s12 }
 0xd1a   : > { %p4869_p3 = pnand %p4872_p2, %p5294_p8 }
 0xd1c   : > { %5158 = dma.done.wait (!%p4869_p3), %s3685_s19, 32  }
 0xd1d   : > { %5160 = vsyncadd (!%p4869_p3), %s3685_s19, 4294967264  ;;  %s24_s18 = sadd.s32 1, %s5183_s18   ;;  %s6039_s13 = smov %s5167_s14 }
 0xd1e   : > { %p21_p5 = scmp.ge.s32.totalorder %s24_s18, 4   ;;  %s6040_s14 = smov %s5171_s15 }
 0xd1f   : > { %s6041_s15 = smov %s5300_s26  ;;  %s6042_s16 = smov %s5179_s17 }
 0xd20   : > { %s6043_s17 = smov %s6045_s21  ;;  %23 = sbr.rel (!%p21_p5) target bundleno = 6 (0x6), region = 147 }
 0xd27   :  { %3690 = vsyncpa [#allocation9], 1 }
 0xd28   :  { %3692 = vsyncpa [#allocation9 + $0x1], 1 }

</bundles_post_ra>
